<compile_context>
chip_gen: v7x
topology: tpu7x:2x2x1
jax: 0.10.0
libtpu: 0.0.40
codegen_flags: <defaults>
</compile_context>

<pallas_src>
import functools
import math

import jax
import jax.numpy as jnp
from jax import lax
from jax.experimental import pallas as pl
from jax.experimental.pallas import tpu as pltpu


CONFIG = dict(
    descriptor_dim=32,
    keypoint_encoder=[16, 32],
    GNN_layers=['self', 'cross'],
    sinkhorn_iterations=10,
    match_threshold=0.2,
    use_layernorm=True,
    bin_value=1.0,
    num_heads=4,          # hardcoded to 4 in AttentionalPropagation
)

_LN_EPS = 1e-6


# ----------------------------------------------------------------------------
# In-kernel building blocks (operate on loaded values / param refs)
# ----------------------------------------------------------------------------
def _layernorm_relu(y, a, b):
    """RA_MMIR LayerNorm: (x - mean) / (unbiased_std + eps) * a + b, then ReLU."""
    c = y.shape[0]
    mean = jnp.mean(y, axis=0, keepdims=True)
    var = jnp.sum((y - mean) ** 2, axis=0, keepdims=True) * (1.0 / (c - 1))
    y = a * ((y - mean) / (jnp.sqrt(var) + _LN_EPS)) + b
    return jnp.maximum(y, 0.0)


def _mlp(layer_refs, x):
    """Sequence of 1x1 convs (channel matmuls); LayerNorm+ReLU on all but the last."""
    y = x
    for lyr in layer_refs:
        y = jnp.dot(lyr['w'][...], y, preferred_element_type=jnp.float32) + lyr['b'][...]
        if 'ln_a' in lyr:
            y = _layernorm_relu(y, lyr['ln_a'][...], lyr['ln_b'][...])
    return y


def _attentional_propagation(p, x, src, n_src_real, num_heads):
    """MultiHeadedAttention(x, src, src) + merge + 2-layer MLP on [x ; message]."""
    d_model, nq = x.shape
    ns = src.shape[1]
    dh = d_model // num_heads
    scale = 1.0 / math.sqrt(dh)

    q = jnp.dot(p['wq'][...], x, preferred_element_type=jnp.float32) + p['bq'][...]
    kv = jnp.dot(p['wkv'][...], src, preferred_element_type=jnp.float32) + p['bkv'][...]
    k = kv[:d_model, :]
    v = kv[d_model:, :]

    # mask out the padded key column (index >= n_src_real)
    key_valid = lax.broadcasted_iota(jnp.int32, (nq, ns), 1) < n_src_real

    merged = jnp.zeros((d_model, nq), jnp.float32)
    for h in range(num_heads):
        sl = slice(h * dh, (h + 1) * dh)
        qh, kh, vh = q[sl, :], k[sl, :], v[sl, :]
        s = lax.dot_general(qh, kh, (((0,), (0,)), ((), ())),
                            preferred_element_type=jnp.float32) * scale       # (nq, ns)
        s = jnp.where(key_valid, s, -1e30)
        s = s - jnp.max(s, axis=1, keepdims=True)
        e = jnp.exp(s)
        prob = e * pl.reciprocal(jnp.sum(e, axis=1, keepdims=True), approx=True)
        oh = lax.dot_general(vh, prob, (((1,), (1,)), ((), ())),
                             preferred_element_type=jnp.float32)              # (dh, nq)
        merged = merged + lax.dot_general(p['wmergeT'][sl, :], oh,
                                          (((0,), (0,)), ((), ())),
                                          preferred_element_type=jnp.float32)
    message = merged + p['bmerge'][...]

    # MLP([x ; message]): first (2D -> 2D) conv is pre-split into x / message halves
    y = (jnp.dot(p['w1x'][...], x, preferred_element_type=jnp.float32)
         + jnp.dot(p['w1m'][...], message, preferred_element_type=jnp.float32)
         + p['b1'][...])
    y = _layernorm_relu(y, p['ln1_a'][...], p['ln1_b'][...])
    return jnp.dot(p['w2'][...], y, preferred_element_type=jnp.float32) + p['b2'][...]


# ----------------------------------------------------------------------------
# Fused forward kernel (one grid step == one batch element)
# ----------------------------------------------------------------------------
def _ra_mmir_kernel(*refs, treedef, n_leaves, n0, n1, num_heads, gnn_names,
                    sink_iters):
    x0_ref, x1_ref, d0_ref, d1_ref = refs[:4]
    param_refs = refs[4:4 + n_leaves]
    out_ref = refs[4 + n_leaves]
    p = jax.tree_util.tree_unflatten(treedef, list(param_refs))

    # keypoint encoder (+ residual into descriptors)
    d0 = d0_ref[...] + _mlp(p['kenc'], x0_ref[...])
    d1 = d1_ref[...] + _mlp(p['kenc'], x1_ref[...])

    # attentional GNN ('self' / 'cross' layers), fully unrolled at trace time
    for lp, name in zip(p['gnn'], gnn_names):
        if name == 'cross':
            src0, src1, ns0, ns1 = d1, d0, n1, n0
        else:
            src0, src1, ns0, ns1 = d0, d1, n0, n1
        delta0 = _attentional_propagation(lp, d0, src0, ns0, num_heads)
        delta1 = _attentional_propagation(lp, d1, src1, ns1, num_heads)
        d0 = d0 + delta0
        d1 = d1 + delta1

    # final projection + descriptor scores  'dn,dm->nm' / sqrt(D)
    fw, fb = p['final']['w'][...], p['final']['b'][...]
    md0 = jnp.dot(fw, d0, preferred_element_type=jnp.float32) + fb
    md1 = jnp.dot(fw, d1, preferred_element_type=jnp.float32) + fb
    s = lax.dot_general(md0, md1, (((0,), (0,)), ((), ())),
                        preferred_element_type=jnp.float32)
    s = s * (1.0 / math.sqrt(md0.shape[0]))

    # couplings: real scores inside, learned bin score on the pad row/column
    n0p, n1p = s.shape
    ri = lax.broadcasted_iota(jnp.int32, (n0p, n1p), 0)
    ci = lax.broadcasted_iota(jnp.int32, (n0p, n1p), 1)
    Z = jnp.where((ri < n0) & (ci < n1), s, p['bin'][...])

    # log-space Sinkhorn, fully unrolled (small static iteration count)
    norm = -math.log(n0 + n1)
    log_mu = jnp.where(lax.broadcasted_iota(jnp.int32, (n0p, 1), 0) < n0,
                       norm, math.log(n1) + norm).astype(jnp.float32)
    log_nu = jnp.where(lax.broadcasted_iota(jnp.int32, (1, n1p), 1) < n1,
                       norm, math.log(n0) + norm).astype(jnp.float32)

    def lse_rows(z):      # logsumexp over the last axis  -> (n0p, 1)
        m = jnp.max(z, axis=1, keepdims=True)
        return m + jnp.log(jnp.sum(jnp.exp(z - m), axis=1, keepdims=True))

    def lse_cols(z):      # logsumexp over the first axis -> (1, n1p)
        m = jnp.max(z, axis=0, keepdims=True)
        return m + jnp.log(jnp.sum(jnp.exp(z - m), axis=0, keepdims=True))

    u = jnp.zeros((n0p, 1), jnp.float32)
    v = jnp.zeros((1, n1p), jnp.float32)
    for _ in range(sink_iters):
        u = log_mu - lse_rows(Z + v)
        v = log_nu - lse_cols(Z + u)

    out_ref[...] = Z + u + v - norm


# ----------------------------------------------------------------------------
# JAX glue: keypoint normalization, weight re-layout, pallas_call, matching
# ----------------------------------------------------------------------------
def normalize_keypoints(kpts, image_shape):
    _, _, height, width = image_shape
    size = jnp.array([[float(width), float(height)]], jnp.float32)   # (1, 2)
    center = size / 2
    scaling = jnp.max(size, axis=1, keepdims=True) * 0.7             # (1, 1)
    return (kpts - center[:, None, :]) / scaling[:, None, :]


def prepare_kernel_params(params, config):
    """Re-layout PyTorch-structured weights into the fused kernel's format."""
    D = config['descriptor_dim']
    H = config['num_heads']
    dh = D // H
    # PyTorch's view(B, dh, H, N) reads output channel c as (d, h) with c = d*H + h.
    # Re-order projection output channels (and merge input channels) so head h
    # occupies contiguous rows [h*dh, (h+1)*dh) inside the kernel.
    perm = jnp.array([d * H + h for h in range(H) for d in range(dh)], jnp.int32)

    def mlp_layers(layers):
        out = []
        for lyr in layers:
            d = dict(w=lyr['conv']['w'], b=lyr['conv']['b'])
            if 'ln_a' in lyr:
                d['ln_a'] = lyr['ln_a']
                d['ln_b'] = lyr['ln_b']
            out.append(d)
        return out

    gnn = []
    for lp in params['gnn']:
        a = lp['attn']
        wq, bq = a['proj0']['w'][perm], a['proj0']['b'][perm]
        wk, bk = a['proj1']['w'][perm], a['proj1']['b'][perm]
        wv, bv = a['proj2']['w'][perm], a['proj2']['b'][perm]
        w1 = lp['mlp'][0]['conv']['w']                  # (2D, 2D)
        gnn.append(dict(
            wq=wq, bq=bq,
            wkv=jnp.concatenate([wk, wv], axis=0),      # (2D, D)
            bkv=jnp.concatenate([bk, bv], axis=0),      # (2D, 1)
            wmergeT=jnp.transpose(a['merge']['w'][:, perm]),   # (D, D) head-major rows
            bmerge=a['merge']['b'],
            w1x=w1[:, :D], w1m=w1[:, D:],
            b1=lp['mlp'][0]['conv']['b'],
            ln1_a=lp['mlp'][0]['ln_a'], ln1_b=lp['mlp'][0]['ln_b'],
            w2=lp['mlp'][1]['conv']['w'], b2=lp['mlp'][1]['conv']['b']))

    return dict(kenc=mlp_layers(params['kenc']),
                gnn=gnn,
                final=dict(w=params['final_proj']['w'], b=params['final_proj']['b']))


def ra_mmir_forward(params, data, config):
    desc0, desc1 = data['descriptors0'], data['descriptors1']
    B, D, N0 = desc0.shape
    N1 = desc1.shape[2]
    N0p, N1p = N0 + 1, N1 + 1

    kpts0 = normalize_keypoints(data['keypoints0'], data['image0_shape'])
    kpts1 = normalize_keypoints(data['keypoints1'], data['image1_shape'])
    x0 = jnp.concatenate([jnp.transpose(kpts0, (0, 2, 1)),
                          data['scores0'][:, None, :]], axis=1)       # (B, 3, N0)
    x1 = jnp.concatenate([jnp.transpose(kpts1, (0, 2, 1)),
                          data['scores1'][:, None, :]], axis=1)       # (B, 3, N1)

    # one extra (masked-out) keypoint column so the kernel produces the
    # (N0+1, N1+1) optimal-transport couplings as a single output block
    pad = ((0, 0), (0, 0), (0, 1))
    x0p, x1p = jnp.pad(x0, pad), jnp.pad(x1, pad)
    d0p, d1p = jnp.pad(desc0, pad), jnp.pad(desc1, pad)

    kparams = prepare_kernel_params(params, config)
    kparams['bin'] = jnp.broadcast_to(params['bin_score'].astype(jnp.float32),
                                      (N0p, N1p))
    leaves, treedef = jax.tree_util.tree_flatten(kparams)

    kern = functools.partial(
        _ra_mmir_kernel,
        treedef=treedef, n_leaves=len(leaves), n0=N0, n1=N1,
        num_heads=config['num_heads'], gnn_names=tuple(config['GNN_layers']),
        sink_iters=config['sinkhorn_iterations'])

    def batch_spec(c, n):
        return pl.BlockSpec((None, c, n), lambda b: (b, 0, 0))

    def const_spec(arr):
        nd = arr.ndim
        return pl.BlockSpec(arr.shape, lambda b, _nd=nd: (0,) * _nd)

    in_specs = ([batch_spec(3, N0p), batch_spec(3, N1p),
                 batch_spec(D, N0p), batch_spec(D, N1p)]
                + [const_spec(l) for l in leaves])

    Z = pl.pallas_call(
        kern,
        out_shape=jax.ShapeDtypeStruct((B, N0p, N1p), jnp.float32),
        grid=(B,),
        in_specs=in_specs,
        out_specs=pl.BlockSpec((None, N0p, N1p), lambda b: (b, 0, 0)),
        compiler_params=pltpu.CompilerParams(
            dimension_semantics=("parallel",)),   # batch across TCs on v7x
    )(x0p, x1p, d0p, d1p, *leaves)

    # --- match extraction (small glue; argmax / gather in plain JAX) ---
    sub = Z[:, :N0, :N1]
    max0 = jnp.max(sub, axis=2)
    max1 = jnp.max(sub, axis=1)
    indices0 = jnp.argmax(sub, axis=2).astype(jnp.int32)
    indices1 = jnp.argmax(sub, axis=1).astype(jnp.int32)
    ar0 = jnp.arange(N0, dtype=jnp.int32)
    ar1 = jnp.arange(N1, dtype=jnp.int32)
    mutual0 = ar0[None] == jnp.take_along_axis(indices1, indices0, axis=1)
    mutual1 = ar1[None] == jnp.take_along_axis(indices0, indices1, axis=1)
    mscores0 = jnp.where(mutual0, jnp.exp(max0), 0.0)
    mscores1 = jnp.where(mutual1,
                         jnp.take_along_axis(mscores0, indices1, axis=1), 0.0)
    valid0 = mutual0 & (mscores0 > config['match_threshold'])
    valid1 = mutual1 & jnp.take_along_axis(valid0, indices1, axis=1)
    indices0 = jnp.where(valid0, indices0, -1)
    indices1 = jnp.where(valid1, indices1, -1)
    return {'matches0': indices0, 'matches1': indices1,
            'matching_scores0': mscores0, 'matching_scores1': mscores1,
            'scores': Z, 'max1': max1}


# ----------------------------------------------------------------------------
# Deterministic parameter init (shapes from the PyTorch module's __init__)
# ----------------------------------------------------------------------------
def _init_conv(key, cin, cout, zero_bias=False):
    kw, kb = jax.random.split(key)
    w = jax.random.normal(kw, (cout, cin), jnp.float32) * (1.0 / math.sqrt(cin))
    if zero_bias:
        b = jnp.zeros((cout, 1), jnp.float32)
    else:
        b = jax.random.normal(kb, (cout, 1), jnp.float32) * 0.01
    return dict(w=w, b=b)


def _init_mlp(key, channels, zero_last_bias=True):
    layers = []
    n = len(channels)
    keys = jax.random.split(key, n - 1)
    for i in range(1, n):
        last = (i == n - 1)
        layer = dict(conv=_init_conv(keys[i - 1], channels[i - 1], channels[i],
                                     zero_bias=(last and zero_last_bias)))
        if not last:
            layer['ln_a'] = jnp.ones((channels[i], 1), jnp.float32)
            layer['ln_b'] = jnp.zeros((channels[i], 1), jnp.float32)
        layers.append(layer)
    return layers


def init_params(key, config):
    D = config['descriptor_dim']
    k_kenc, k_gnn, k_fp = jax.random.split(key, 3)
    kenc = _init_mlp(k_kenc, [3] + list(config['keypoint_encoder']) + [D])
    gnn_layers = []
    gkeys = jax.random.split(k_gnn, len(config['GNN_layers']))
    for gk in gkeys:
        k0, k1, k2, k3, k4 = jax.random.split(gk, 5)
        attn = dict(proj0=_init_conv(k0, D, D), proj1=_init_conv(k1, D, D),
                    proj2=_init_conv(k2, D, D), merge=_init_conv(k3, D, D))
        mlp = _init_mlp(k4, [2 * D, 2 * D, D])
        gnn_layers.append(dict(attn=attn, mlp=mlp))
    final_proj = _init_conv(k_fp, D, D)
    bin_score = jnp.asarray(config.get('bin_value', 1.0), jnp.float32)
    return dict(kenc=kenc, gnn=gnn_layers, final_proj=final_proj,
                bin_score=bin_score)


# ----------------------------------------------------------------------------
if __name__ == "__main__":
    key = jax.random.PRNGKey(0)
    B, N0, N1 = 2, 8, 10
    D = CONFIG['descriptor_dim']
    H, W = 16, 16

    keys = jax.random.split(key, 8)
    params = init_params(keys[0], CONFIG)

    data = {
        'keypoints0': jax.random.uniform(keys[1], (B, N0, 2), jnp.float32, 0.0, W),
        'keypoints1': jax.random.uniform(keys[2], (B, N1, 2), jnp.float32, 0.0, W),
        'scores0': jax.random.uniform(keys[3], (B, N0), jnp.float32),
        'scores1': jax.random.uniform(keys[4], (B, N1), jnp.float32),
        'descriptors0': jax.random.normal(keys[5], (B, D, N0), jnp.float32),
        'descriptors1': jax.random.normal(keys[6], (B, D, N1), jnp.float32),
        'image0_shape': (B, 1, H, W),
        'image1_shape': (B, 1, H, W),
    }

    out = ra_mmir_forward(params, data, CONFIG)
    out = jax.block_until_ready(out)

    assert out['matches0'].shape == (B, N0)
    assert out['matches1'].shape == (B, N1)
    assert out['matching_scores0'].shape == (B, N0)
    assert out['matching_scores1'].shape == (B, N1)
    assert out['scores'].shape == (B, N0 + 1, N1 + 1)
    assert bool(jnp.all(jnp.isfinite(out['scores'])))
    print("KERNEL_OK")
</pallas_src>

<mosaic_0001>
module attributes {stable_mosaic.version = 11 : i64} {
  func.func @_ra_mmir_kernel(%arg0: i32, %arg1: memref<1x3x9xf32, #tpu.memory_space<vmem>>, %arg2: memref<1x3x11xf32, #tpu.memory_space<vmem>>, %arg3: memref<1x32x9xf32, #tpu.memory_space<vmem>>, %arg4: memref<1x32x11xf32, #tpu.memory_space<vmem>>, %arg5: memref<9x11xf32, #tpu.memory_space<vmem>>, %arg6: memref<32x1xf32, #tpu.memory_space<vmem>>, %arg7: memref<32x32xf32, #tpu.memory_space<vmem>>, %arg8: memref<64x1xf32, #tpu.memory_space<vmem>>, %arg9: memref<32x1xf32, #tpu.memory_space<vmem>>, %arg10: memref<64x1xf32, #tpu.memory_space<vmem>>, %arg11: memref<32x1xf32, #tpu.memory_space<vmem>>, %arg12: memref<32x1xf32, #tpu.memory_space<vmem>>, %arg13: memref<64x1xf32, #tpu.memory_space<vmem>>, %arg14: memref<64x1xf32, #tpu.memory_space<vmem>>, %arg15: memref<64x32xf32, #tpu.memory_space<vmem>>, %arg16: memref<64x32xf32, #tpu.memory_space<vmem>>, %arg17: memref<32x64xf32, #tpu.memory_space<vmem>>, %arg18: memref<64x32xf32, #tpu.memory_space<vmem>>, %arg19: memref<32x32xf32, #tpu.memory_space<vmem>>, %arg20: memref<32x32xf32, #tpu.memory_space<vmem>>, %arg21: memref<64x1xf32, #tpu.memory_space<vmem>>, %arg22: memref<32x1xf32, #tpu.memory_space<vmem>>, %arg23: memref<64x1xf32, #tpu.memory_space<vmem>>, %arg24: memref<32x1xf32, #tpu.memory_space<vmem>>, %arg25: memref<32x1xf32, #tpu.memory_space<vmem>>, %arg26: memref<64x1xf32, #tpu.memory_space<vmem>>, %arg27: memref<64x1xf32, #tpu.memory_space<vmem>>, %arg28: memref<64x32xf32, #tpu.memory_space<vmem>>, %arg29: memref<64x32xf32, #tpu.memory_space<vmem>>, %arg30: memref<32x64xf32, #tpu.memory_space<vmem>>, %arg31: memref<64x32xf32, #tpu.memory_space<vmem>>, %arg32: memref<32x32xf32, #tpu.memory_space<vmem>>, %arg33: memref<32x32xf32, #tpu.memory_space<vmem>>, %arg34: memref<16x1xf32, #tpu.memory_space<vmem>>, %arg35: memref<16x1xf32, #tpu.memory_space<vmem>>, %arg36: memref<16x1xf32, #tpu.memory_space<vmem>>, %arg37: memref<16x3xf32, #tpu.memory_space<vmem>>, %arg38: memref<32x1xf32, #tpu.memory_space<vmem>>, %arg39: memref<32x1xf32, #tpu.memory_space<vmem>>, %arg40: memref<32x1xf32, #tpu.memory_space<vmem>>, %arg41: memref<32x16xf32, #tpu.memory_space<vmem>>, %arg42: memref<32x1xf32, #tpu.memory_space<vmem>>, %arg43: memref<32x32xf32, #tpu.memory_space<vmem>>, %arg44: memref<1x9x11xf32, #tpu.memory_space<vmem>>) attributes {dimension_semantics = [#tpu.dimension_semantics<parallel>], iteration_bounds = array<i64: 2>, scalar_prefetch = 0 : i64, scratch_operands = 0 : i64, tpu.core_type = #tpu.core_type<tc>, window_params = [{transform_indices = @transform_0, window_bounds = array<i64: 1, 3, 9>}, {transform_indices = @transform_1, window_bounds = array<i64: 1, 3, 11>}, {transform_indices = @transform_2, window_bounds = array<i64: 1, 32, 9>}, {transform_indices = @transform_3, window_bounds = array<i64: 1, 32, 11>}, {pipeline_mode = #tpu.pipeline_mode<synchronous>, transform_indices = @transform_4, window_bounds = array<i64: 9, 11>}, {pipeline_mode = #tpu.pipeline_mode<synchronous>, transform_indices = @transform_5, window_bounds = array<i64: 32, 1>}, {pipeline_mode = #tpu.pipeline_mode<synchronous>, transform_indices = @transform_6, window_bounds = array<i64: 32, 32>}, {pipeline_mode = #tpu.pipeline_mode<synchronous>, transform_indices = @transform_7, window_bounds = array<i64: 64, 1>}, {pipeline_mode = #tpu.pipeline_mode<synchronous>, transform_indices = @transform_8, window_bounds = array<i64: 32, 1>}, {pipeline_mode = #tpu.pipeline_mode<synchronous>, transform_indices = @transform_9, window_bounds = array<i64: 64, 1>}, {pipeline_mode = #tpu.pipeline_mode<synchronous>, transform_indices = @transform_10, window_bounds = array<i64: 32, 1>}, {pipeline_mode = #tpu.pipeline_mode<synchronous>, transform_indices = @transform_11, window_bounds = array<i64: 32, 1>}, {pipeline_mode = #tpu.pipeline_mode<synchronous>, transform_indices = @transform_12, window_bounds = array<i64: 64, 1>}, {pipeline_mode = #tpu.pipeline_mode<synchronous>, transform_indices = @transform_13, window_bounds = array<i64: 64, 1>}, {pipeline_mode = #tpu.pipeline_mode<synchronous>, transform_indices = @transform_14, window_bounds = array<i64: 64, 32>}, {pipeline_mode = #tpu.pipeline_mode<synchronous>, transform_indices = @transform_15, window_bounds = array<i64: 64, 32>}, {pipeline_mode = #tpu.pipeline_mode<synchronous>, transform_indices = @transform_16, window_bounds = array<i64: 32, 64>}, {pipeline_mode = #tpu.pipeline_mode<synchronous>, transform_indices = @transform_17, window_bounds = array<i64: 64, 32>}, {pipeline_mode = #tpu.pipeline_mode<synchronous>, transform_indices = @transform_18, window_bounds = array<i64: 32, 32>}, {pipeline_mode = #tpu.pipeline_mode<synchronous>, transform_indices = @transform_19, window_bounds = array<i64: 32, 32>}, {pipeline_mode = #tpu.pipeline_mode<synchronous>, transform_indices = @transform_20, window_bounds = array<i64: 64, 1>}, {pipeline_mode = #tpu.pipeline_mode<synchronous>, transform_indices = @transform_21, window_bounds = array<i64: 32, 1>}, {pipeline_mode = #tpu.pipeline_mode<synchronous>, transform_indices = @transform_22, window_bounds = array<i64: 64, 1>}, {pipeline_mode = #tpu.pipeline_mode<synchronous>, transform_indices = @transform_23, window_bounds = array<i64: 32, 1>}, {pipeline_mode = #tpu.pipeline_mode<synchronous>, transform_indices = @transform_24, window_bounds = array<i64: 32, 1>}, {pipeline_mode = #tpu.pipeline_mode<synchronous>, transform_indices = @transform_25, window_bounds = array<i64: 64, 1>}, {pipeline_mode = #tpu.pipeline_mode<synchronous>, transform_indices = @transform_26, window_bounds = array<i64: 64, 1>}, {pipeline_mode = #tpu.pipeline_mode<synchronous>, transform_indices = @transform_27, window_bounds = array<i64: 64, 32>}, {pipeline_mode = #tpu.pipeline_mode<synchronous>, transform_indices = @transform_28, window_bounds = array<i64: 64, 32>}, {pipeline_mode = #tpu.pipeline_mode<synchronous>, transform_indices = @transform_29, window_bounds = array<i64: 32, 64>}, {pipeline_mode = #tpu.pipeline_mode<synchronous>, transform_indices = @transform_30, window_bounds = array<i64: 64, 32>}, {pipeline_mode = #tpu.pipeline_mode<synchronous>, transform_indices = @transform_31, window_bounds = array<i64: 32, 32>}, {pipeline_mode = #tpu.pipeline_mode<synchronous>, transform_indices = @transform_32, window_bounds = array<i64: 32, 32>}, {pipeline_mode = #tpu.pipeline_mode<synchronous>, transform_indices = @transform_33, window_bounds = array<i64: 16, 1>}, {pipeline_mode = #tpu.pipeline_mode<synchronous>, transform_indices = @transform_34, window_bounds = array<i64: 16, 1>}, {pipeline_mode = #tpu.pipeline_mode<synchronous>, transform_indices = @transform_35, window_bounds = array<i64: 16, 1>}, {pipeline_mode = #tpu.pipeline_mode<synchronous>, transform_indices = @transform_36, window_bounds = array<i64: 16, 3>}, {pipeline_mode = #tpu.pipeline_mode<synchronous>, transform_indices = @transform_37, window_bounds = array<i64: 32, 1>}, {pipeline_mode = #tpu.pipeline_mode<synchronous>, transform_indices = @transform_38, window_bounds = array<i64: 32, 1>}, {pipeline_mode = #tpu.pipeline_mode<synchronous>, transform_indices = @transform_39, window_bounds = array<i64: 32, 1>}, {pipeline_mode = #tpu.pipeline_mode<synchronous>, transform_indices = @transform_40, window_bounds = array<i64: 32, 16>}, {pipeline_mode = #tpu.pipeline_mode<synchronous>, transform_indices = @transform_41, window_bounds = array<i64: 32, 1>}, {pipeline_mode = #tpu.pipeline_mode<synchronous>, transform_indices = @transform_42, window_bounds = array<i64: 32, 32>}, {transform_indices = @transform_43, window_bounds = array<i64: 1, 9, 11>}]} {
    %c0 = arith.constant 0 : index
    %c0_0 = arith.constant 0 : index
    %c0_1 = arith.constant 0 : index
    %0 = vector.load %arg3[%c0, %c0_0, %c0_1] : memref<1x32x9xf32, #tpu.memory_space<vmem>>, vector<1x32x9xf32>
    %1 = vector.shape_cast %0 : vector<1x32x9xf32> to vector<32x9xf32>
    %c0_2 = arith.constant 0 : index
    %c0_3 = arith.constant 0 : index
    %c0_4 = arith.constant 0 : index
    %2 = vector.load %arg1[%c0_2, %c0_3, %c0_4] : memref<1x3x9xf32, #tpu.memory_space<vmem>>, vector<1x3x9xf32>
    %3 = vector.shape_cast %2 : vector<1x3x9xf32> to vector<3x9xf32>
    %c0_5 = arith.constant 0 : index
    %c0_6 = arith.constant 0 : index
    %4 = vector.load %arg37[%c0_5, %c0_6] : memref<16x3xf32, #tpu.memory_space<vmem>>, vector<16x3xf32>
    %cst = arith.constant dense<0.000000e+00> : vector<16x9xf32>
    %5 = tpu.matmul %4, %3, %cst {dimension_numbers = #tpu.dot_dimension_numbers<[1], [0], [0], [1], [0, 0, 1, 1], [], []>} : vector<16x3xf32>, vector<3x9xf32>, vector<16x9xf32> -> vector<16x9xf32>
    %c0_7 = arith.constant 0 : index
    %c0_8 = arith.constant 0 : index
    %6 = vector.load %arg34[%c0_7, %c0_8] : memref<16x1xf32, #tpu.memory_space<vmem>>, vector<16x1xf32>
    %7 = vector.broadcast %6 : vector<16x1xf32> to vector<16x9xf32>
    %8 = arith.addf %5, %7 : vector<16x9xf32>
    %c0_9 = arith.constant 0 : index
    %c0_10 = arith.constant 0 : index
    %9 = vector.load %arg35[%c0_9, %c0_10] : memref<16x1xf32, #tpu.memory_space<vmem>>, vector<16x1xf32>
    %c0_11 = arith.constant 0 : index
    %c0_12 = arith.constant 0 : index
    %10 = vector.load %arg36[%c0_11, %c0_12] : memref<16x1xf32, #tpu.memory_space<vmem>>, vector<16x1xf32>
    %cst_13 = arith.constant dense<0.000000e+00> : vector<9xf32>
    %11 = vector.multi_reduction <add>, %8, %cst_13 [0] : vector<16x9xf32> to vector<9xf32>
    %12 = vector.shape_cast %11 : vector<9xf32> to vector<1x9xf32>
    %cst_14 = arith.constant 1.600000e+01 : f32
    %13 = vector.broadcast %cst_14 : f32 to vector<1x9xf32>
    %14 = arith.divf %12, %13 : vector<1x9xf32>
    %15 = vector.broadcast %14 : vector<1x9xf32> to vector<16x9xf32>
    %16 = arith.subf %8, %15 : vector<16x9xf32>
    %17 = arith.mulf %16, %16 : vector<16x9xf32>
    %cst_15 = arith.constant dense<0.000000e+00> : vector<9xf32>
    %18 = vector.multi_reduction <add>, %17, %cst_15 [0] : vector<16x9xf32> to vector<9xf32>
    %19 = vector.shape_cast %18 : vector<9xf32> to vector<1x9xf32>
    %cst_16 = arith.constant 0.0666666701 : f32
    %20 = vector.broadcast %cst_16 : f32 to vector<1x9xf32>
    %21 = arith.mulf %19, %20 : vector<1x9xf32>
    %22 = vector.broadcast %14 : vector<1x9xf32> to vector<16x9xf32>
    %23 = arith.subf %8, %22 : vector<16x9xf32>
    %24 = math.sqrt %21 : vector<1x9xf32>
    %cst_17 = arith.constant 9.99999997E-7 : f32
    %25 = vector.broadcast %cst_17 : f32 to vector<1x9xf32>
    %26 = arith.addf %24, %25 : vector<1x9xf32>
    %27 = vector.broadcast %26 : vector<1x9xf32> to vector<16x9xf32>
    %28 = arith.divf %23, %27 : vector<16x9xf32>
    %29 = vector.broadcast %9 : vector<16x1xf32> to vector<16x9xf32>
    %30 = arith.mulf %29, %28 : vector<16x9xf32>
    %31 = vector.broadcast %10 : vector<16x1xf32> to vector<16x9xf32>
    %32 = arith.addf %30, %31 : vector<16x9xf32>
    %cst_18 = arith.constant 0.000000e+00 : f32
    %33 = vector.broadcast %cst_18 : f32 to vector<16x9xf32>
    %34 = arith.maximumf %32, %33 : vector<16x9xf32>
    %c0_19 = arith.constant 0 : index
    %c0_20 = arith.constant 0 : index
    %35 = vector.load %arg41[%c0_19, %c0_20] : memref<32x16xf32, #tpu.memory_space<vmem>>, vector<32x16xf32>
    %cst_21 = arith.constant dense<0.000000e+00> : vector<32x9xf32>
    %36 = tpu.matmul %35, %34, %cst_21 {dimension_numbers = #tpu.dot_dimension_numbers<[1], [0], [0], [1], [0, 0, 1, 1], [], []>} : vector<32x16xf32>, vector<16x9xf32>, vector<32x9xf32> -> vector<32x9xf32>
    %c0_22 = arith.constant 0 : index
    %c0_23 = arith.constant 0 : index
    %37 = vector.load %arg38[%c0_22, %c0_23] : memref<32x1xf32, #tpu.memory_space<vmem>>, vector<32x1xf32>
    %38 = vector.broadcast %37 : vector<32x1xf32> to vector<32x9xf32>
    %39 = arith.addf %36, %38 : vector<32x9xf32>
    %c0_24 = arith.constant 0 : index
    %c0_25 = arith.constant 0 : index
    %40 = vector.load %arg39[%c0_24, %c0_25] : memref<32x1xf32, #tpu.memory_space<vmem>>, vector<32x1xf32>
    %c0_26 = arith.constant 0 : index
    %c0_27 = arith.constant 0 : index
    %41 = vector.load %arg40[%c0_26, %c0_27] : memref<32x1xf32, #tpu.memory_space<vmem>>, vector<32x1xf32>
    %cst_28 = arith.constant dense<0.000000e+00> : vector<9xf32>
    %42 = vector.multi_reduction <add>, %39, %cst_28 [0] : vector<32x9xf32> to vector<9xf32>
    %43 = vector.shape_cast %42 : vector<9xf32> to vector<1x9xf32>
    %cst_29 = arith.constant 3.200000e+01 : f32
    %44 = vector.broadcast %cst_29 : f32 to vector<1x9xf32>
    %45 = arith.divf %43, %44 : vector<1x9xf32>
    %46 = vector.broadcast %45 : vector<1x9xf32> to vector<32x9xf32>
    %47 = arith.subf %39, %46 : vector<32x9xf32>
    %48 = arith.mulf %47, %47 : vector<32x9xf32>
    %cst_30 = arith.constant dense<0.000000e+00> : vector<9xf32>
    %49 = vector.multi_reduction <add>, %48, %cst_30 [0] : vector<32x9xf32> to vector<9xf32>
    %50 = vector.shape_cast %49 : vector<9xf32> to vector<1x9xf32>
    %cst_31 = arith.constant 0.0322580636 : f32
    %51 = vector.broadcast %cst_31 : f32 to vector<1x9xf32>
    %52 = arith.mulf %50, %51 : vector<1x9xf32>
    %53 = vector.broadcast %45 : vector<1x9xf32> to vector<32x9xf32>
    %54 = arith.subf %39, %53 : vector<32x9xf32>
    %55 = math.sqrt %52 : vector<1x9xf32>
    %cst_32 = arith.constant 9.99999997E-7 : f32
    %56 = vector.broadcast %cst_32 : f32 to vector<1x9xf32>
    %57 = arith.addf %55, %56 : vector<1x9xf32>
    %58 = vector.broadcast %57 : vector<1x9xf32> to vector<32x9xf32>
    %59 = arith.divf %54, %58 : vector<32x9xf32>
    %60 = vector.broadcast %40 : vector<32x1xf32> to vector<32x9xf32>
    %61 = arith.mulf %60, %59 : vector<32x9xf32>
    %62 = vector.broadcast %41 : vector<32x1xf32> to vector<32x9xf32>
    %63 = arith.addf %61, %62 : vector<32x9xf32>
    %cst_33 = arith.constant 0.000000e+00 : f32
    %64 = vector.broadcast %cst_33 : f32 to vector<32x9xf32>
    %65 = arith.maximumf %63, %64 : vector<32x9xf32>
    %c0_34 = arith.constant 0 : index
    %c0_35 = arith.constant 0 : index
    %66 = vector.load %arg43[%c0_34, %c0_35] : memref<32x32xf32, #tpu.memory_space<vmem>>, vector<32x32xf32>
    %cst_36 = arith.constant dense<0.000000e+00> : vector<32x9xf32>
    %67 = tpu.matmul %66, %65, %cst_36 {dimension_numbers = #tpu.dot_dimension_numbers<[1], [0], [0], [1], [0, 0, 1, 1], [], []>} : vector<32x32xf32>, vector<32x9xf32>, vector<32x9xf32> -> vector<32x9xf32>
    %c0_37 = arith.constant 0 : index
    %c0_38 = arith.constant 0 : index
    %68 = vector.load %arg42[%c0_37, %c0_38] : memref<32x1xf32, #tpu.memory_space<vmem>>, vector<32x1xf32>
    %69 = vector.broadcast %68 : vector<32x1xf32> to vector<32x9xf32>
    %70 = arith.addf %67, %69 : vector<32x9xf32>
    %71 = arith.addf %1, %70 : vector<32x9xf32>
    %c0_39 = arith.constant 0 : index
    %c0_40 = arith.constant 0 : index
    %c0_41 = arith.constant 0 : index
    %72 = vector.load %arg4[%c0_39, %c0_40, %c0_41] : memref<1x32x11xf32, #tpu.memory_space<vmem>>, vector<1x32x11xf32>
    %73 = vector.shape_cast %72 : vector<1x32x11xf32> to vector<32x11xf32>
    %c0_42 = arith.constant 0 : index
    %c0_43 = arith.constant 0 : index
    %c0_44 = arith.constant 0 : index
    %74 = vector.load %arg2[%c0_42, %c0_43, %c0_44] : memref<1x3x11xf32, #tpu.memory_space<vmem>>, vector<1x3x11xf32>
    %75 = vector.shape_cast %74 : vector<1x3x11xf32> to vector<3x11xf32>
    %c0_45 = arith.constant 0 : index
    %c0_46 = arith.constant 0 : index
    %76 = vector.load %arg37[%c0_45, %c0_46] : memref<16x3xf32, #tpu.memory_space<vmem>>, vector<16x3xf32>
    %cst_47 = arith.constant dense<0.000000e+00> : vector<16x11xf32>
    %77 = tpu.matmul %76, %75, %cst_47 {dimension_numbers = #tpu.dot_dimension_numbers<[1], [0], [0], [1], [0, 0, 1, 1], [], []>} : vector<16x3xf32>, vector<3x11xf32>, vector<16x11xf32> -> vector<16x11xf32>
    %c0_48 = arith.constant 0 : index
    %c0_49 = arith.constant 0 : index
    %78 = vector.load %arg34[%c0_48, %c0_49] : memref<16x1xf32, #tpu.memory_space<vmem>>, vector<16x1xf32>
    %79 = vector.broadcast %78 : vector<16x1xf32> to vector<16x11xf32>
    %80 = arith.addf %77, %79 : vector<16x11xf32>
    %c0_50 = arith.constant 0 : index
    %c0_51 = arith.constant 0 : index
    %81 = vector.load %arg35[%c0_50, %c0_51] : memref<16x1xf32, #tpu.memory_space<vmem>>, vector<16x1xf32>
    %c0_52 = arith.constant 0 : index
    %c0_53 = arith.constant 0 : index
    %82 = vector.load %arg36[%c0_52, %c0_53] : memref<16x1xf32, #tpu.memory_space<vmem>>, vector<16x1xf32>
    %cst_54 = arith.constant dense<0.000000e+00> : vector<11xf32>
    %83 = vector.multi_reduction <add>, %80, %cst_54 [0] : vector<16x11xf32> to vector<11xf32>
    %84 = vector.shape_cast %83 : vector<11xf32> to vector<1x11xf32>
    %cst_55 = arith.constant 1.600000e+01 : f32
    %85 = vector.broadcast %cst_55 : f32 to vector<1x11xf32>
    %86 = arith.divf %84, %85 : vector<1x11xf32>
    %87 = vector.broadcast %86 : vector<1x11xf32> to vector<16x11xf32>
    %88 = arith.subf %80, %87 : vector<16x11xf32>
    %89 = arith.mulf %88, %88 : vector<16x11xf32>
    %cst_56 = arith.constant dense<0.000000e+00> : vector<11xf32>
    %90 = vector.multi_reduction <add>, %89, %cst_56 [0] : vector<16x11xf32> to vector<11xf32>
    %91 = vector.shape_cast %90 : vector<11xf32> to vector<1x11xf32>
    %cst_57 = arith.constant 0.0666666701 : f32
    %92 = vector.broadcast %cst_57 : f32 to vector<1x11xf32>
    %93 = arith.mulf %91, %92 : vector<1x11xf32>
    %94 = vector.broadcast %86 : vector<1x11xf32> to vector<16x11xf32>
    %95 = arith.subf %80, %94 : vector<16x11xf32>
    %96 = math.sqrt %93 : vector<1x11xf32>
    %cst_58 = arith.constant 9.99999997E-7 : f32
    %97 = vector.broadcast %cst_58 : f32 to vector<1x11xf32>
    %98 = arith.addf %96, %97 : vector<1x11xf32>
    %99 = vector.broadcast %98 : vector<1x11xf32> to vector<16x11xf32>
    %100 = arith.divf %95, %99 : vector<16x11xf32>
    %101 = vector.broadcast %81 : vector<16x1xf32> to vector<16x11xf32>
    %102 = arith.mulf %101, %100 : vector<16x11xf32>
    %103 = vector.broadcast %82 : vector<16x1xf32> to vector<16x11xf32>
    %104 = arith.addf %102, %103 : vector<16x11xf32>
    %cst_59 = arith.constant 0.000000e+00 : f32
    %105 = vector.broadcast %cst_59 : f32 to vector<16x11xf32>
    %106 = arith.maximumf %104, %105 : vector<16x11xf32>
    %c0_60 = arith.constant 0 : index
    %c0_61 = arith.constant 0 : index
    %107 = vector.load %arg41[%c0_60, %c0_61] : memref<32x16xf32, #tpu.memory_space<vmem>>, vector<32x16xf32>
    %cst_62 = arith.constant dense<0.000000e+00> : vector<32x11xf32>
    %108 = tpu.matmul %107, %106, %cst_62 {dimension_numbers = #tpu.dot_dimension_numbers<[1], [0], [0], [1], [0, 0, 1, 1], [], []>} : vector<32x16xf32>, vector<16x11xf32>, vector<32x11xf32> -> vector<32x11xf32>
    %c0_63 = arith.constant 0 : index
    %c0_64 = arith.constant 0 : index
    %109 = vector.load %arg38[%c0_63, %c0_64] : memref<32x1xf32, #tpu.memory_space<vmem>>, vector<32x1xf32>
    %110 = vector.broadcast %109 : vector<32x1xf32> to vector<32x11xf32>
    %111 = arith.addf %108, %110 : vector<32x11xf32>
    %c0_65 = arith.constant 0 : index
    %c0_66 = arith.constant 0 : index
    %112 = vector.load %arg39[%c0_65, %c0_66] : memref<32x1xf32, #tpu.memory_space<vmem>>, vector<32x1xf32>
    %c0_67 = arith.constant 0 : index
    %c0_68 = arith.constant 0 : index
    %113 = vector.load %arg40[%c0_67, %c0_68] : memref<32x1xf32, #tpu.memory_space<vmem>>, vector<32x1xf32>
    %cst_69 = arith.constant dense<0.000000e+00> : vector<11xf32>
    %114 = vector.multi_reduction <add>, %111, %cst_69 [0] : vector<32x11xf32> to vector<11xf32>
    %115 = vector.shape_cast %114 : vector<11xf32> to vector<1x11xf32>
    %cst_70 = arith.constant 3.200000e+01 : f32
    %116 = vector.broadcast %cst_70 : f32 to vector<1x11xf32>
    %117 = arith.divf %115, %116 : vector<1x11xf32>
    %118 = vector.broadcast %117 : vector<1x11xf32> to vector<32x11xf32>
    %119 = arith.subf %111, %118 : vector<32x11xf32>
    %120 = arith.mulf %119, %119 : vector<32x11xf32>
    %cst_71 = arith.constant dense<0.000000e+00> : vector<11xf32>
    %121 = vector.multi_reduction <add>, %120, %cst_71 [0] : vector<32x11xf32> to vector<11xf32>
    %122 = vector.shape_cast %121 : vector<11xf32> to vector<1x11xf32>
    %cst_72 = arith.constant 0.0322580636 : f32
    %123 = vector.broadcast %cst_72 : f32 to vector<1x11xf32>
    %124 = arith.mulf %122, %123 : vector<1x11xf32>
    %125 = vector.broadcast %117 : vector<1x11xf32> to vector<32x11xf32>
    %126 = arith.subf %111, %125 : vector<32x11xf32>
    %127 = math.sqrt %124 : vector<1x11xf32>
    %cst_73 = arith.constant 9.99999997E-7 : f32
    %128 = vector.broadcast %cst_73 : f32 to vector<1x11xf32>
    %129 = arith.addf %127, %128 : vector<1x11xf32>
    %130 = vector.broadcast %129 : vector<1x11xf32> to vector<32x11xf32>
    %131 = arith.divf %126, %130 : vector<32x11xf32>
    %132 = vector.broadcast %112 : vector<32x1xf32> to vector<32x11xf32>
    %133 = arith.mulf %132, %131 : vector<32x11xf32>
    %134 = vector.broadcast %113 : vector<32x1xf32> to vector<32x11xf32>
    %135 = arith.addf %133, %134 : vector<32x11xf32>
    %cst_74 = arith.constant 0.000000e+00 : f32
    %136 = vector.broadcast %cst_74 : f32 to vector<32x11xf32>
    %137 = arith.maximumf %135, %136 : vector<32x11xf32>
    %c0_75 = arith.constant 0 : index
    %c0_76 = arith.constant 0 : index
    %138 = vector.load %arg43[%c0_75, %c0_76] : memref<32x32xf32, #tpu.memory_space<vmem>>, vector<32x32xf32>
    %cst_77 = arith.constant dense<0.000000e+00> : vector<32x11xf32>
    %139 = tpu.matmul %138, %137, %cst_77 {dimension_numbers = #tpu.dot_dimension_numbers<[1], [0], [0], [1], [0, 0, 1, 1], [], []>} : vector<32x32xf32>, vector<32x11xf32>, vector<32x11xf32> -> vector<32x11xf32>
    %c0_78 = arith.constant 0 : index
    %c0_79 = arith.constant 0 : index
    %140 = vector.load %arg42[%c0_78, %c0_79] : memref<32x1xf32, #tpu.memory_space<vmem>>, vector<32x1xf32>
    %141 = vector.broadcast %140 : vector<32x1xf32> to vector<32x11xf32>
    %142 = arith.addf %139, %141 : vector<32x11xf32>
    %143 = arith.addf %73, %142 : vector<32x11xf32>
    %c0_80 = arith.constant 0 : index
    %c0_81 = arith.constant 0 : index
    %144 = vector.load %arg20[%c0_80, %c0_81] : memref<32x32xf32, #tpu.memory_space<vmem>>, vector<32x32xf32>
    %cst_82 = arith.constant dense<0.000000e+00> : vector<32x9xf32>
    %145 = tpu.matmul %144, %71, %cst_82 {dimension_numbers = #tpu.dot_dimension_numbers<[1], [0], [0], [1], [0, 0, 1, 1], [], []>} : vector<32x32xf32>, vector<32x9xf32>, vector<32x9xf32> -> vector<32x9xf32>
    %c0_83 = arith.constant 0 : index
    %c0_84 = arith.constant 0 : index
    %146 = vector.load %arg12[%c0_83, %c0_84] : memref<32x1xf32, #tpu.memory_space<vmem>>, vector<32x1xf32>
    %147 = vector.broadcast %146 : vector<32x1xf32> to vector<32x9xf32>
    %148 = arith.addf %145, %147 : vector<32x9xf32>
    %c0_85 = arith.constant 0 : index
    %c0_86 = arith.constant 0 : index
    %149 = vector.load %arg18[%c0_85, %c0_86] : memref<64x32xf32, #tpu.memory_space<vmem>>, vector<64x32xf32>
    %cst_87 = arith.constant dense<0.000000e+00> : vector<64x9xf32>
    %150 = tpu.matmul %149, %71, %cst_87 {dimension_numbers = #tpu.dot_dimension_numbers<[1], [0], [0], [1], [0, 0, 1, 1], [], []>} : vector<64x32xf32>, vector<32x9xf32>, vector<64x9xf32> -> vector<64x9xf32>
    %c0_88 = arith.constant 0 : index
    %c0_89 = arith.constant 0 : index
    %151 = vector.load %arg10[%c0_88, %c0_89] : memref<64x1xf32, #tpu.memory_space<vmem>>, vector<64x1xf32>
    %152 = vector.broadcast %151 : vector<64x1xf32> to vector<64x9xf32>
    %153 = arith.addf %150, %152 : vector<64x9xf32>
    %154 = vector.extract_strided_slice %153 {offsets = [0, 0], sizes = [32, 9], strides = [1, 1]} : vector<64x9xf32> to vector<32x9xf32>
    %155 = vector.extract_strided_slice %153 {offsets = [32, 0], sizes = [32, 9], strides = [1, 1]} : vector<64x9xf32> to vector<32x9xf32>
    %156 = tpu.iota {dimensions = array<i32: 1>} : vector<9x9xi32>
    %c8_i32 = arith.constant 8 : i32
    %157 = vector.broadcast %c8_i32 : i32 to vector<9x9xi32>
    %158 = arith.cmpi slt, %156, %157 : vector<9x9xi32>
    %cst_90 = arith.constant 0.000000e+00 : f32
    %159 = vector.broadcast %cst_90 : f32 to vector<32x9xf32>
    %160 = vector.extract_strided_slice %148 {offsets = [0, 0], sizes = [8, 9], strides = [1, 1]} : vector<32x9xf32> to vector<8x9xf32>
    %161 = vector.extract_strided_slice %154 {offsets = [0, 0], sizes = [8, 9], strides = [1, 1]} : vector<32x9xf32> to vector<8x9xf32>
    %162 = vector.extract_strided_slice %155 {offsets = [0, 0], sizes = [8, 9], strides = [1, 1]} : vector<32x9xf32> to vector<8x9xf32>
    %cst_91 = arith.constant dense<0.000000e+00> : vector<9x9xf32>
    %163 = tpu.matmul %160, %161, %cst_91 {dimension_numbers = #tpu.dot_dimension_numbers<[0], [0], [1], [1], [0, 1, 1, 1], [], []>} : vector<8x9xf32>, vector<8x9xf32>, vector<9x9xf32> -> vector<9x9xf32>
    %cst_92 = arith.constant 0.353553385 : f32
    %164 = vector.broadcast %cst_92 : f32 to vector<9x9xf32>
    %165 = arith.mulf %163, %164 : vector<9x9xf32>
    %cst_93 = arith.constant -1.000000e+30 : f32
    %166 = vector.broadcast %cst_93 : f32 to vector<9x9xf32>
    %167 = arith.select %158, %165, %166 : vector<9x9xi1>, vector<9x9xf32>
    %cst_94 = arith.constant dense<0xFF800000> : vector<9xf32>
    %168 = vector.multi_reduction <maximumf>, %167, %cst_94 [1] : vector<9x9xf32> to vector<9xf32>
    %169 = vector.shape_cast %168 : vector<9xf32> to vector<9x1xf32>
    %170 = vector.broadcast %169 : vector<9x1xf32> to vector<9x9xf32>
    %171 = arith.subf %167, %170 : vector<9x9xf32>
    %172 = math.exp %171 : vector<9x9xf32>
    %cst_95 = arith.constant dense<0.000000e+00> : vector<9xf32>
    %173 = vector.multi_reduction <add>, %172, %cst_95 [1] : vector<9x9xf32> to vector<9xf32>
    %174 = vector.shape_cast %173 : vector<9xf32> to vector<9x1xf32>
    %175 = tpu.reciprocal %174 {approx = true} : vector<9x1xf32> -> vector<9x1xf32>
    %176 = vector.broadcast %175 : vector<9x1xf32> to vector<9x9xf32>
    %177 = arith.mulf %172, %176 : vector<9x9xf32>
    %cst_96 = arith.constant dense<0.000000e+00> : vector<8x9xf32>
    %178 = tpu.matmul %162, %177, %cst_96 {dimension_numbers = #tpu.dot_dimension_numbers<[1], [1], [0], [0], [0, 0, 1, 0], [], []>} : vector<8x9xf32>, vector<9x9xf32>, vector<8x9xf32> -> vector<8x9xf32>
    %c0_97 = arith.constant 0 : index
    %c0_98 = arith.constant 0 : index
    %179 = vector.load %arg19[%c0_97, %c0_98] : memref<32x32xf32, #tpu.memory_space<vmem>>, vector<8x32xf32>
    %cst_99 = arith.constant dense<0.000000e+00> : vector<32x9xf32>
    %180 = tpu.matmul %179, %178, %cst_99 {dimension_numbers = #tpu.dot_dimension_numbers<[0], [0], [1], [1], [0, 1, 1, 1], [], []>} : vector<8x32xf32>, vector<8x9xf32>, vector<32x9xf32> -> vector<32x9xf32>
    %181 = arith.addf %159, %180 : vector<32x9xf32>
    %182 = vector.extract_strided_slice %148 {offsets = [8, 0], sizes = [8, 9], strides = [1, 1]} : vector<32x9xf32> to vector<8x9xf32>
    %183 = vector.extract_strided_slice %154 {offsets = [8, 0], sizes = [8, 9], strides = [1, 1]} : vector<32x9xf32> to vector<8x9xf32>
    %184 = vector.extract_strided_slice %155 {offsets = [8, 0], sizes = [8, 9], strides = [1, 1]} : vector<32x9xf32> to vector<8x9xf32>
    %cst_100 = arith.constant dense<0.000000e+00> : vector<9x9xf32>
    %185 = tpu.matmul %182, %183, %cst_100 {dimension_numbers = #tpu.dot_dimension_numbers<[0], [0], [1], [1], [0, 1, 1, 1], [], []>} : vector<8x9xf32>, vector<8x9xf32>, vector<9x9xf32> -> vector<9x9xf32>
    %cst_101 = arith.constant 0.353553385 : f32
    %186 = vector.broadcast %cst_101 : f32 to vector<9x9xf32>
    %187 = arith.mulf %185, %186 : vector<9x9xf32>
    %cst_102 = arith.constant -1.000000e+30 : f32
    %188 = vector.broadcast %cst_102 : f32 to vector<9x9xf32>
    %189 = arith.select %158, %187, %188 : vector<9x9xi1>, vector<9x9xf32>
    %cst_103 = arith.constant dense<0xFF800000> : vector<9xf32>
    %190 = vector.multi_reduction <maximumf>, %189, %cst_103 [1] : vector<9x9xf32> to vector<9xf32>
    %191 = vector.shape_cast %190 : vector<9xf32> to vector<9x1xf32>
    %192 = vector.broadcast %191 : vector<9x1xf32> to vector<9x9xf32>
    %193 = arith.subf %189, %192 : vector<9x9xf32>
    %194 = math.exp %193 : vector<9x9xf32>
    %cst_104 = arith.constant dense<0.000000e+00> : vector<9xf32>
    %195 = vector.multi_reduction <add>, %194, %cst_104 [1] : vector<9x9xf32> to vector<9xf32>
    %196 = vector.shape_cast %195 : vector<9xf32> to vector<9x1xf32>
    %197 = tpu.reciprocal %196 {approx = true} : vector<9x1xf32> -> vector<9x1xf32>
    %198 = vector.broadcast %197 : vector<9x1xf32> to vector<9x9xf32>
    %199 = arith.mulf %194, %198 : vector<9x9xf32>
    %cst_105 = arith.constant dense<0.000000e+00> : vector<8x9xf32>
    %200 = tpu.matmul %184, %199, %cst_105 {dimension_numbers = #tpu.dot_dimension_numbers<[1], [1], [0], [0], [0, 0, 1, 0], [], []>} : vector<8x9xf32>, vector<9x9xf32>, vector<8x9xf32> -> vector<8x9xf32>
    %c8 = arith.constant 8 : index
    %c0_106 = arith.constant 0 : index
    %201 = vector.load %arg19[%c8, %c0_106] : memref<32x32xf32, #tpu.memory_space<vmem>>, vector<8x32xf32>
    %cst_107 = arith.constant dense<0.000000e+00> : vector<32x9xf32>
    %202 = tpu.matmul %201, %200, %cst_107 {dimension_numbers = #tpu.dot_dimension_numbers<[0], [0], [1], [1], [0, 1, 1, 1], [], []>} : vector<8x32xf32>, vector<8x9xf32>, vector<32x9xf32> -> vector<32x9xf32>
    %203 = arith.addf %181, %202 : vector<32x9xf32>
    %204 = vector.extract_strided_slice %148 {offsets = [16, 0], sizes = [8, 9], strides = [1, 1]} : vector<32x9xf32> to vector<8x9xf32>
    %205 = vector.extract_strided_slice %154 {offsets = [16, 0], sizes = [8, 9], strides = [1, 1]} : vector<32x9xf32> to vector<8x9xf32>
    %206 = vector.extract_strided_slice %155 {offsets = [16, 0], sizes = [8, 9], strides = [1, 1]} : vector<32x9xf32> to vector<8x9xf32>
    %cst_108 = arith.constant dense<0.000000e+00> : vector<9x9xf32>
    %207 = tpu.matmul %204, %205, %cst_108 {dimension_numbers = #tpu.dot_dimension_numbers<[0], [0], [1], [1], [0, 1, 1, 1], [], []>} : vector<8x9xf32>, vector<8x9xf32>, vector<9x9xf32> -> vector<9x9xf32>
    %cst_109 = arith.constant 0.353553385 : f32
    %208 = vector.broadcast %cst_109 : f32 to vector<9x9xf32>
    %209 = arith.mulf %207, %208 : vector<9x9xf32>
    %cst_110 = arith.constant -1.000000e+30 : f32
    %210 = vector.broadcast %cst_110 : f32 to vector<9x9xf32>
    %211 = arith.select %158, %209, %210 : vector<9x9xi1>, vector<9x9xf32>
    %cst_111 = arith.constant dense<0xFF800000> : vector<9xf32>
    %212 = vector.multi_reduction <maximumf>, %211, %cst_111 [1] : vector<9x9xf32> to vector<9xf32>
    %213 = vector.shape_cast %212 : vector<9xf32> to vector<9x1xf32>
    %214 = vector.broadcast %213 : vector<9x1xf32> to vector<9x9xf32>
    %215 = arith.subf %211, %214 : vector<9x9xf32>
    %216 = math.exp %215 : vector<9x9xf32>
    %cst_112 = arith.constant dense<0.000000e+00> : vector<9xf32>
    %217 = vector.multi_reduction <add>, %216, %cst_112 [1] : vector<9x9xf32> to vector<9xf32>
    %218 = vector.shape_cast %217 : vector<9xf32> to vector<9x1xf32>
    %219 = tpu.reciprocal %218 {approx = true} : vector<9x1xf32> -> vector<9x1xf32>
    %220 = vector.broadcast %219 : vector<9x1xf32> to vector<9x9xf32>
    %221 = arith.mulf %216, %220 : vector<9x9xf32>
    %cst_113 = arith.constant dense<0.000000e+00> : vector<8x9xf32>
    %222 = tpu.matmul %206, %221, %cst_113 {dimension_numbers = #tpu.dot_dimension_numbers<[1], [1], [0], [0], [0, 0, 1, 0], [], []>} : vector<8x9xf32>, vector<9x9xf32>, vector<8x9xf32> -> vector<8x9xf32>
    %c16 = arith.constant 16 : index
    %c0_114 = arith.constant 0 : index
    %223 = vector.load %arg19[%c16, %c0_114] : memref<32x32xf32, #tpu.memory_space<vmem>>, vector<8x32xf32>
    %cst_115 = arith.constant dense<0.000000e+00> : vector<32x9xf32>
    %224 = tpu.matmul %223, %222, %cst_115 {dimension_numbers = #tpu.dot_dimension_numbers<[0], [0], [1], [1], [0, 1, 1, 1], [], []>} : vector<8x32xf32>, vector<8x9xf32>, vector<32x9xf32> -> vector<32x9xf32>
    %225 = arith.addf %203, %224 : vector<32x9xf32>
    %226 = vector.extract_strided_slice %148 {offsets = [24, 0], sizes = [8, 9], strides = [1, 1]} : vector<32x9xf32> to vector<8x9xf32>
    %227 = vector.extract_strided_slice %154 {offsets = [24, 0], sizes = [8, 9], strides = [1, 1]} : vector<32x9xf32> to vector<8x9xf32>
    %228 = vector.extract_strided_slice %155 {offsets = [24, 0], sizes = [8, 9], strides = [1, 1]} : vector<32x9xf32> to vector<8x9xf32>
    %cst_116 = arith.constant dense<0.000000e+00> : vector<9x9xf32>
    %229 = tpu.matmul %226, %227, %cst_116 {dimension_numbers = #tpu.dot_dimension_numbers<[0], [0], [1], [1], [0, 1, 1, 1], [], []>} : vector<8x9xf32>, vector<8x9xf32>, vector<9x9xf32> -> vector<9x9xf32>
    %cst_117 = arith.constant 0.353553385 : f32
    %230 = vector.broadcast %cst_117 : f32 to vector<9x9xf32>
    %231 = arith.mulf %229, %230 : vector<9x9xf32>
    %cst_118 = arith.constant -1.000000e+30 : f32
    %232 = vector.broadcast %cst_118 : f32 to vector<9x9xf32>
    %233 = arith.select %158, %231, %232 : vector<9x9xi1>, vector<9x9xf32>
    %cst_119 = arith.constant dense<0xFF800000> : vector<9xf32>
    %234 = vector.multi_reduction <maximumf>, %233, %cst_119 [1] : vector<9x9xf32> to vector<9xf32>
    %235 = vector.shape_cast %234 : vector<9xf32> to vector<9x1xf32>
    %236 = vector.broadcast %235 : vector<9x1xf32> to vector<9x9xf32>
    %237 = arith.subf %233, %236 : vector<9x9xf32>
    %238 = math.exp %237 : vector<9x9xf32>
    %cst_120 = arith.constant dense<0.000000e+00> : vector<9xf32>
    %239 = vector.multi_reduction <add>, %238, %cst_120 [1] : vector<9x9xf32> to vector<9xf32>
    %240 = vector.shape_cast %239 : vector<9xf32> to vector<9x1xf32>
    %241 = tpu.reciprocal %240 {approx = true} : vector<9x1xf32> -> vector<9x1xf32>
    %242 = vector.broadcast %241 : vector<9x1xf32> to vector<9x9xf32>
    %243 = arith.mulf %238, %242 : vector<9x9xf32>
    %cst_121 = arith.constant dense<0.000000e+00> : vector<8x9xf32>
    %244 = tpu.matmul %228, %243, %cst_121 {dimension_numbers = #tpu.dot_dimension_numbers<[1], [1], [0], [0], [0, 0, 1, 0], [], []>} : vector<8x9xf32>, vector<9x9xf32>, vector<8x9xf32> -> vector<8x9xf32>
    %c24 = arith.constant 24 : index
    %c0_122 = arith.constant 0 : index
    %245 = vector.load %arg19[%c24, %c0_122] : memref<32x32xf32, #tpu.memory_space<vmem>>, vector<8x32xf32>
    %cst_123 = arith.constant dense<0.000000e+00> : vector<32x9xf32>
    %246 = tpu.matmul %245, %244, %cst_123 {dimension_numbers = #tpu.dot_dimension_numbers<[0], [0], [1], [1], [0, 1, 1, 1], [], []>} : vector<8x32xf32>, vector<8x9xf32>, vector<32x9xf32> -> vector<32x9xf32>
    %247 = arith.addf %225, %246 : vector<32x9xf32>
    %c0_124 = arith.constant 0 : index
    %c0_125 = arith.constant 0 : index
    %248 = vector.load %arg11[%c0_124, %c0_125] : memref<32x1xf32, #tpu.memory_space<vmem>>, vector<32x1xf32>
    %249 = vector.broadcast %248 : vector<32x1xf32> to vector<32x9xf32>
    %250 = arith.addf %247, %249 : vector<32x9xf32>
    %c0_126 = arith.constant 0 : index
    %c0_127 = arith.constant 0 : index
    %251 = vector.load %arg16[%c0_126, %c0_127] : memref<64x32xf32, #tpu.memory_space<vmem>>, vector<64x32xf32>
    %cst_128 = arith.constant dense<0.000000e+00> : vector<64x9xf32>
    %252 = tpu.matmul %251, %71, %cst_128 {dimension_numbers = #tpu.dot_dimension_numbers<[1], [0], [0], [1], [0, 0, 1, 1], [], []>} : vector<64x32xf32>, vector<32x9xf32>, vector<64x9xf32> -> vector<64x9xf32>
    %c0_129 = arith.constant 0 : index
    %c0_130 = arith.constant 0 : index
    %253 = vector.load %arg15[%c0_129, %c0_130] : memref<64x32xf32, #tpu.memory_space<vmem>>, vector<64x32xf32>
    %cst_131 = arith.constant dense<0.000000e+00> : vector<64x9xf32>
    %254 = tpu.matmul %253, %250, %cst_131 {dimension_numbers = #tpu.dot_dimension_numbers<[1], [0], [0], [1], [0, 0, 1, 1], [], []>} : vector<64x32xf32>, vector<32x9xf32>, vector<64x9xf32> -> vector<64x9xf32>
    %255 = arith.addf %252, %254 : vector<64x9xf32>
    %c0_132 = arith.constant 0 : index
    %c0_133 = arith.constant 0 : index
    %256 = vector.load %arg8[%c0_132, %c0_133] : memref<64x1xf32, #tpu.memory_space<vmem>>, vector<64x1xf32>
    %257 = vector.broadcast %256 : vector<64x1xf32> to vector<64x9xf32>
    %258 = arith.addf %255, %257 : vector<64x9xf32>
    %c0_134 = arith.constant 0 : index
    %c0_135 = arith.constant 0 : index
    %259 = vector.load %arg13[%c0_134, %c0_135] : memref<64x1xf32, #tpu.memory_space<vmem>>, vector<64x1xf32>
    %c0_136 = arith.constant 0 : index
    %c0_137 = arith.constant 0 : index
    %260 = vector.load %arg14[%c0_136, %c0_137] : memref<64x1xf32, #tpu.memory_space<vmem>>, vector<64x1xf32>
    %cst_138 = arith.constant dense<0.000000e+00> : vector<9xf32>
    %261 = vector.multi_reduction <add>, %258, %cst_138 [0] : vector<64x9xf32> to vector<9xf32>
    %262 = vector.shape_cast %261 : vector<9xf32> to vector<1x9xf32>
    %cst_139 = arith.constant 6.400000e+01 : f32
    %263 = vector.broadcast %cst_139 : f32 to vector<1x9xf32>
    %264 = arith.divf %262, %263 : vector<1x9xf32>
    %265 = vector.broadcast %264 : vector<1x9xf32> to vector<64x9xf32>
    %266 = arith.subf %258, %265 : vector<64x9xf32>
    %267 = arith.mulf %266, %266 : vector<64x9xf32>
    %cst_140 = arith.constant dense<0.000000e+00> : vector<9xf32>
    %268 = vector.multi_reduction <add>, %267, %cst_140 [0] : vector<64x9xf32> to vector<9xf32>
    %269 = vector.shape_cast %268 : vector<9xf32> to vector<1x9xf32>
    %cst_141 = arith.constant 0.0158730168 : f32
    %270 = vector.broadcast %cst_141 : f32 to vector<1x9xf32>
    %271 = arith.mulf %269, %270 : vector<1x9xf32>
    %272 = vector.broadcast %264 : vector<1x9xf32> to vector<64x9xf32>
    %273 = arith.subf %258, %272 : vector<64x9xf32>
    %274 = math.sqrt %271 : vector<1x9xf32>
    %cst_142 = arith.constant 9.99999997E-7 : f32
    %275 = vector.broadcast %cst_142 : f32 to vector<1x9xf32>
    %276 = arith.addf %274, %275 : vector<1x9xf32>
    %277 = vector.broadcast %276 : vector<1x9xf32> to vector<64x9xf32>
    %278 = arith.divf %273, %277 : vector<64x9xf32>
    %279 = vector.broadcast %259 : vector<64x1xf32> to vector<64x9xf32>
    %280 = arith.mulf %279, %278 : vector<64x9xf32>
    %281 = vector.broadcast %260 : vector<64x1xf32> to vector<64x9xf32>
    %282 = arith.addf %280, %281 : vector<64x9xf32>
    %cst_143 = arith.constant 0.000000e+00 : f32
    %283 = vector.broadcast %cst_143 : f32 to vector<64x9xf32>
    %284 = arith.maximumf %282, %283 : vector<64x9xf32>
    %c0_144 = arith.constant 0 : index
    %c0_145 = arith.constant 0 : index
    %285 = vector.load %arg17[%c0_144, %c0_145] : memref<32x64xf32, #tpu.memory_space<vmem>>, vector<32x64xf32>
    %cst_146 = arith.constant dense<0.000000e+00> : vector<32x9xf32>
    %286 = tpu.matmul %285, %284, %cst_146 {dimension_numbers = #tpu.dot_dimension_numbers<[1], [0], [0], [1], [0, 0, 1, 1], [], []>} : vector<32x64xf32>, vector<64x9xf32>, vector<32x9xf32> -> vector<32x9xf32>
    %c0_147 = arith.constant 0 : index
    %c0_148 = arith.constant 0 : index
    %287 = vector.load %arg9[%c0_147, %c0_148] : memref<32x1xf32, #tpu.memory_space<vmem>>, vector<32x1xf32>
    %288 = vector.broadcast %287 : vector<32x1xf32> to vector<32x9xf32>
    %289 = arith.addf %286, %288 : vector<32x9xf32>
    %c0_149 = arith.constant 0 : index
    %c0_150 = arith.constant 0 : index
    %290 = vector.load %arg20[%c0_149, %c0_150] : memref<32x32xf32, #tpu.memory_space<vmem>>, vector<32x32xf32>
    %cst_151 = arith.constant dense<0.000000e+00> : vector<32x11xf32>
    %291 = tpu.matmul %290, %143, %cst_151 {dimension_numbers = #tpu.dot_dimension_numbers<[1], [0], [0], [1], [0, 0, 1, 1], [], []>} : vector<32x32xf32>, vector<32x11xf32>, vector<32x11xf32> -> vector<32x11xf32>
    %c0_152 = arith.constant 0 : index
    %c0_153 = arith.constant 0 : index
    %292 = vector.load %arg12[%c0_152, %c0_153] : memref<32x1xf32, #tpu.memory_space<vmem>>, vector<32x1xf32>
    %293 = vector.broadcast %292 : vector<32x1xf32> to vector<32x11xf32>
    %294 = arith.addf %291, %293 : vector<32x11xf32>
    %c0_154 = arith.constant 0 : index
    %c0_155 = arith.constant 0 : index
    %295 = vector.load %arg18[%c0_154, %c0_155] : memref<64x32xf32, #tpu.memory_space<vmem>>, vector<64x32xf32>
    %cst_156 = arith.constant dense<0.000000e+00> : vector<64x11xf32>
    %296 = tpu.matmul %295, %143, %cst_156 {dimension_numbers = #tpu.dot_dimension_numbers<[1], [0], [0], [1], [0, 0, 1, 1], [], []>} : vector<64x32xf32>, vector<32x11xf32>, vector<64x11xf32> -> vector<64x11xf32>
    %c0_157 = arith.constant 0 : index
    %c0_158 = arith.constant 0 : index
    %297 = vector.load %arg10[%c0_157, %c0_158] : memref<64x1xf32, #tpu.memory_space<vmem>>, vector<64x1xf32>
    %298 = vector.broadcast %297 : vector<64x1xf32> to vector<64x11xf32>
    %299 = arith.addf %296, %298 : vector<64x11xf32>
    %300 = vector.extract_strided_slice %299 {offsets = [0, 0], sizes = [32, 11], strides = [1, 1]} : vector<64x11xf32> to vector<32x11xf32>
    %301 = vector.extract_strided_slice %299 {offsets = [32, 0], sizes = [32, 11], strides = [1, 1]} : vector<64x11xf32> to vector<32x11xf32>
    %302 = tpu.iota {dimensions = array<i32: 1>} : vector<11x11xi32>
    %c10_i32 = arith.constant 10 : i32
    %303 = vector.broadcast %c10_i32 : i32 to vector<11x11xi32>
    %304 = arith.cmpi slt, %302, %303 : vector<11x11xi32>
    %cst_159 = arith.constant 0.000000e+00 : f32
    %305 = vector.broadcast %cst_159 : f32 to vector<32x11xf32>
    %306 = vector.extract_strided_slice %294 {offsets = [0, 0], sizes = [8, 11], strides = [1, 1]} : vector<32x11xf32> to vector<8x11xf32>
    %307 = vector.extract_strided_slice %300 {offsets = [0, 0], sizes = [8, 11], strides = [1, 1]} : vector<32x11xf32> to vector<8x11xf32>
    %308 = vector.extract_strided_slice %301 {offsets = [0, 0], sizes = [8, 11], strides = [1, 1]} : vector<32x11xf32> to vector<8x11xf32>
    %cst_160 = arith.constant dense<0.000000e+00> : vector<11x11xf32>
    %309 = tpu.matmul %306, %307, %cst_160 {dimension_numbers = #tpu.dot_dimension_numbers<[0], [0], [1], [1], [0, 1, 1, 1], [], []>} : vector<8x11xf32>, vector<8x11xf32>, vector<11x11xf32> -> vector<11x11xf32>
    %cst_161 = arith.constant 0.353553385 : f32
    %310 = vector.broadcast %cst_161 : f32 to vector<11x11xf32>
    %311 = arith.mulf %309, %310 : vector<11x11xf32>
    %cst_162 = arith.constant -1.000000e+30 : f32
    %312 = vector.broadcast %cst_162 : f32 to vector<11x11xf32>
    %313 = arith.select %304, %311, %312 : vector<11x11xi1>, vector<11x11xf32>
    %cst_163 = arith.constant dense<0xFF800000> : vector<11xf32>
    %314 = vector.multi_reduction <maximumf>, %313, %cst_163 [1] : vector<11x11xf32> to vector<11xf32>
    %315 = vector.shape_cast %314 : vector<11xf32> to vector<11x1xf32>
    %316 = vector.broadcast %315 : vector<11x1xf32> to vector<11x11xf32>
    %317 = arith.subf %313, %316 : vector<11x11xf32>
    %318 = math.exp %317 : vector<11x11xf32>
    %cst_164 = arith.constant dense<0.000000e+00> : vector<11xf32>
    %319 = vector.multi_reduction <add>, %318, %cst_164 [1] : vector<11x11xf32> to vector<11xf32>
    %320 = vector.shape_cast %319 : vector<11xf32> to vector<11x1xf32>
    %321 = tpu.reciprocal %320 {approx = true} : vector<11x1xf32> -> vector<11x1xf32>
    %322 = vector.broadcast %321 : vector<11x1xf32> to vector<11x11xf32>
    %323 = arith.mulf %318, %322 : vector<11x11xf32>
    %cst_165 = arith.constant dense<0.000000e+00> : vector<8x11xf32>
    %324 = tpu.matmul %308, %323, %cst_165 {dimension_numbers = #tpu.dot_dimension_numbers<[1], [1], [0], [0], [0, 0, 1, 0], [], []>} : vector<8x11xf32>, vector<11x11xf32>, vector<8x11xf32> -> vector<8x11xf32>
    %c0_166 = arith.constant 0 : index
    %c0_167 = arith.constant 0 : index
    %325 = vector.load %arg19[%c0_166, %c0_167] : memref<32x32xf32, #tpu.memory_space<vmem>>, vector<8x32xf32>
    %cst_168 = arith.constant dense<0.000000e+00> : vector<32x11xf32>
    %326 = tpu.matmul %325, %324, %cst_168 {dimension_numbers = #tpu.dot_dimension_numbers<[0], [0], [1], [1], [0, 1, 1, 1], [], []>} : vector<8x32xf32>, vector<8x11xf32>, vector<32x11xf32> -> vector<32x11xf32>
    %327 = arith.addf %305, %326 : vector<32x11xf32>
    %328 = vector.extract_strided_slice %294 {offsets = [8, 0], sizes = [8, 11], strides = [1, 1]} : vector<32x11xf32> to vector<8x11xf32>
    %329 = vector.extract_strided_slice %300 {offsets = [8, 0], sizes = [8, 11], strides = [1, 1]} : vector<32x11xf32> to vector<8x11xf32>
    %330 = vector.extract_strided_slice %301 {offsets = [8, 0], sizes = [8, 11], strides = [1, 1]} : vector<32x11xf32> to vector<8x11xf32>
    %cst_169 = arith.constant dense<0.000000e+00> : vector<11x11xf32>
    %331 = tpu.matmul %328, %329, %cst_169 {dimension_numbers = #tpu.dot_dimension_numbers<[0], [0], [1], [1], [0, 1, 1, 1], [], []>} : vector<8x11xf32>, vector<8x11xf32>, vector<11x11xf32> -> vector<11x11xf32>
    %cst_170 = arith.constant 0.353553385 : f32
    %332 = vector.broadcast %cst_170 : f32 to vector<11x11xf32>
    %333 = arith.mulf %331, %332 : vector<11x11xf32>
    %cst_171 = arith.constant -1.000000e+30 : f32
    %334 = vector.broadcast %cst_171 : f32 to vector<11x11xf32>
    %335 = arith.select %304, %333, %334 : vector<11x11xi1>, vector<11x11xf32>
    %cst_172 = arith.constant dense<0xFF800000> : vector<11xf32>
    %336 = vector.multi_reduction <maximumf>, %335, %cst_172 [1] : vector<11x11xf32> to vector<11xf32>
    %337 = vector.shape_cast %336 : vector<11xf32> to vector<11x1xf32>
    %338 = vector.broadcast %337 : vector<11x1xf32> to vector<11x11xf32>
    %339 = arith.subf %335, %338 : vector<11x11xf32>
    %340 = math.exp %339 : vector<11x11xf32>
    %cst_173 = arith.constant dense<0.000000e+00> : vector<11xf32>
    %341 = vector.multi_reduction <add>, %340, %cst_173 [1] : vector<11x11xf32> to vector<11xf32>
    %342 = vector.shape_cast %341 : vector<11xf32> to vector<11x1xf32>
    %343 = tpu.reciprocal %342 {approx = true} : vector<11x1xf32> -> vector<11x1xf32>
    %344 = vector.broadcast %343 : vector<11x1xf32> to vector<11x11xf32>
    %345 = arith.mulf %340, %344 : vector<11x11xf32>
    %cst_174 = arith.constant dense<0.000000e+00> : vector<8x11xf32>
    %346 = tpu.matmul %330, %345, %cst_174 {dimension_numbers = #tpu.dot_dimension_numbers<[1], [1], [0], [0], [0, 0, 1, 0], [], []>} : vector<8x11xf32>, vector<11x11xf32>, vector<8x11xf32> -> vector<8x11xf32>
    %c8_175 = arith.constant 8 : index
    %c0_176 = arith.constant 0 : index
    %347 = vector.load %arg19[%c8_175, %c0_176] : memref<32x32xf32, #tpu.memory_space<vmem>>, vector<8x32xf32>
    %cst_177 = arith.constant dense<0.000000e+00> : vector<32x11xf32>
    %348 = tpu.matmul %347, %346, %cst_177 {dimension_numbers = #tpu.dot_dimension_numbers<[0], [0], [1], [1], [0, 1, 1, 1], [], []>} : vector<8x32xf32>, vector<8x11xf32>, vector<32x11xf32> -> vector<32x11xf32>
    %349 = arith.addf %327, %348 : vector<32x11xf32>
    %350 = vector.extract_strided_slice %294 {offsets = [16, 0], sizes = [8, 11], strides = [1, 1]} : vector<32x11xf32> to vector<8x11xf32>
    %351 = vector.extract_strided_slice %300 {offsets = [16, 0], sizes = [8, 11], strides = [1, 1]} : vector<32x11xf32> to vector<8x11xf32>
    %352 = vector.extract_strided_slice %301 {offsets = [16, 0], sizes = [8, 11], strides = [1, 1]} : vector<32x11xf32> to vector<8x11xf32>
    %cst_178 = arith.constant dense<0.000000e+00> : vector<11x11xf32>
    %353 = tpu.matmul %350, %351, %cst_178 {dimension_numbers = #tpu.dot_dimension_numbers<[0], [0], [1], [1], [0, 1, 1, 1], [], []>} : vector<8x11xf32>, vector<8x11xf32>, vector<11x11xf32> -> vector<11x11xf32>
    %cst_179 = arith.constant 0.353553385 : f32
    %354 = vector.broadcast %cst_179 : f32 to vector<11x11xf32>
    %355 = arith.mulf %353, %354 : vector<11x11xf32>
    %cst_180 = arith.constant -1.000000e+30 : f32
    %356 = vector.broadcast %cst_180 : f32 to vector<11x11xf32>
    %357 = arith.select %304, %355, %356 : vector<11x11xi1>, vector<11x11xf32>
    %cst_181 = arith.constant dense<0xFF800000> : vector<11xf32>
    %358 = vector.multi_reduction <maximumf>, %357, %cst_181 [1] : vector<11x11xf32> to vector<11xf32>
    %359 = vector.shape_cast %358 : vector<11xf32> to vector<11x1xf32>
    %360 = vector.broadcast %359 : vector<11x1xf32> to vector<11x11xf32>
    %361 = arith.subf %357, %360 : vector<11x11xf32>
    %362 = math.exp %361 : vector<11x11xf32>
    %cst_182 = arith.constant dense<0.000000e+00> : vector<11xf32>
    %363 = vector.multi_reduction <add>, %362, %cst_182 [1] : vector<11x11xf32> to vector<11xf32>
    %364 = vector.shape_cast %363 : vector<11xf32> to vector<11x1xf32>
    %365 = tpu.reciprocal %364 {approx = true} : vector<11x1xf32> -> vector<11x1xf32>
    %366 = vector.broadcast %365 : vector<11x1xf32> to vector<11x11xf32>
    %367 = arith.mulf %362, %366 : vector<11x11xf32>
    %cst_183 = arith.constant dense<0.000000e+00> : vector<8x11xf32>
    %368 = tpu.matmul %352, %367, %cst_183 {dimension_numbers = #tpu.dot_dimension_numbers<[1], [1], [0], [0], [0, 0, 1, 0], [], []>} : vector<8x11xf32>, vector<11x11xf32>, vector<8x11xf32> -> vector<8x11xf32>
    %c16_184 = arith.constant 16 : index
    %c0_185 = arith.constant 0 : index
    %369 = vector.load %arg19[%c16_184, %c0_185] : memref<32x32xf32, #tpu.memory_space<vmem>>, vector<8x32xf32>
    %cst_186 = arith.constant dense<0.000000e+00> : vector<32x11xf32>
    %370 = tpu.matmul %369, %368, %cst_186 {dimension_numbers = #tpu.dot_dimension_numbers<[0], [0], [1], [1], [0, 1, 1, 1], [], []>} : vector<8x32xf32>, vector<8x11xf32>, vector<32x11xf32> -> vector<32x11xf32>
    %371 = arith.addf %349, %370 : vector<32x11xf32>
    %372 = vector.extract_strided_slice %294 {offsets = [24, 0], sizes = [8, 11], strides = [1, 1]} : vector<32x11xf32> to vector<8x11xf32>
    %373 = vector.extract_strided_slice %300 {offsets = [24, 0], sizes = [8, 11], strides = [1, 1]} : vector<32x11xf32> to vector<8x11xf32>
    %374 = vector.extract_strided_slice %301 {offsets = [24, 0], sizes = [8, 11], strides = [1, 1]} : vector<32x11xf32> to vector<8x11xf32>
    %cst_187 = arith.constant dense<0.000000e+00> : vector<11x11xf32>
    %375 = tpu.matmul %372, %373, %cst_187 {dimension_numbers = #tpu.dot_dimension_numbers<[0], [0], [1], [1], [0, 1, 1, 1], [], []>} : vector<8x11xf32>, vector<8x11xf32>, vector<11x11xf32> -> vector<11x11xf32>
    %cst_188 = arith.constant 0.353553385 : f32
    %376 = vector.broadcast %cst_188 : f32 to vector<11x11xf32>
    %377 = arith.mulf %375, %376 : vector<11x11xf32>
    %cst_189 = arith.constant -1.000000e+30 : f32
    %378 = vector.broadcast %cst_189 : f32 to vector<11x11xf32>
    %379 = arith.select %304, %377, %378 : vector<11x11xi1>, vector<11x11xf32>
    %cst_190 = arith.constant dense<0xFF800000> : vector<11xf32>
    %380 = vector.multi_reduction <maximumf>, %379, %cst_190 [1] : vector<11x11xf32> to vector<11xf32>
    %381 = vector.shape_cast %380 : vector<11xf32> to vector<11x1xf32>
    %382 = vector.broadcast %381 : vector<11x1xf32> to vector<11x11xf32>
    %383 = arith.subf %379, %382 : vector<11x11xf32>
    %384 = math.exp %383 : vector<11x11xf32>
    %cst_191 = arith.constant dense<0.000000e+00> : vector<11xf32>
    %385 = vector.multi_reduction <add>, %384, %cst_191 [1] : vector<11x11xf32> to vector<11xf32>
    %386 = vector.shape_cast %385 : vector<11xf32> to vector<11x1xf32>
    %387 = tpu.reciprocal %386 {approx = true} : vector<11x1xf32> -> vector<11x1xf32>
    %388 = vector.broadcast %387 : vector<11x1xf32> to vector<11x11xf32>
    %389 = arith.mulf %384, %388 : vector<11x11xf32>
    %cst_192 = arith.constant dense<0.000000e+00> : vector<8x11xf32>
    %390 = tpu.matmul %374, %389, %cst_192 {dimension_numbers = #tpu.dot_dimension_numbers<[1], [1], [0], [0], [0, 0, 1, 0], [], []>} : vector<8x11xf32>, vector<11x11xf32>, vector<8x11xf32> -> vector<8x11xf32>
    %c24_193 = arith.constant 24 : index
    %c0_194 = arith.constant 0 : index
    %391 = vector.load %arg19[%c24_193, %c0_194] : memref<32x32xf32, #tpu.memory_space<vmem>>, vector<8x32xf32>
    %cst_195 = arith.constant dense<0.000000e+00> : vector<32x11xf32>
    %392 = tpu.matmul %391, %390, %cst_195 {dimension_numbers = #tpu.dot_dimension_numbers<[0], [0], [1], [1], [0, 1, 1, 1], [], []>} : vector<8x32xf32>, vector<8x11xf32>, vector<32x11xf32> -> vector<32x11xf32>
    %393 = arith.addf %371, %392 : vector<32x11xf32>
    %c0_196 = arith.constant 0 : index
    %c0_197 = arith.constant 0 : index
    %394 = vector.load %arg11[%c0_196, %c0_197] : memref<32x1xf32, #tpu.memory_space<vmem>>, vector<32x1xf32>
    %395 = vector.broadcast %394 : vector<32x1xf32> to vector<32x11xf32>
    %396 = arith.addf %393, %395 : vector<32x11xf32>
    %c0_198 = arith.constant 0 : index
    %c0_199 = arith.constant 0 : index
    %397 = vector.load %arg16[%c0_198, %c0_199] : memref<64x32xf32, #tpu.memory_space<vmem>>, vector<64x32xf32>
    %cst_200 = arith.constant dense<0.000000e+00> : vector<64x11xf32>
    %398 = tpu.matmul %397, %143, %cst_200 {dimension_numbers = #tpu.dot_dimension_numbers<[1], [0], [0], [1], [0, 0, 1, 1], [], []>} : vector<64x32xf32>, vector<32x11xf32>, vector<64x11xf32> -> vector<64x11xf32>
    %c0_201 = arith.constant 0 : index
    %c0_202 = arith.constant 0 : index
    %399 = vector.load %arg15[%c0_201, %c0_202] : memref<64x32xf32, #tpu.memory_space<vmem>>, vector<64x32xf32>
    %cst_203 = arith.constant dense<0.000000e+00> : vector<64x11xf32>
    %400 = tpu.matmul %399, %396, %cst_203 {dimension_numbers = #tpu.dot_dimension_numbers<[1], [0], [0], [1], [0, 0, 1, 1], [], []>} : vector<64x32xf32>, vector<32x11xf32>, vector<64x11xf32> -> vector<64x11xf32>
    %401 = arith.addf %398, %400 : vector<64x11xf32>
    %c0_204 = arith.constant 0 : index
    %c0_205 = arith.constant 0 : index
    %402 = vector.load %arg8[%c0_204, %c0_205] : memref<64x1xf32, #tpu.memory_space<vmem>>, vector<64x1xf32>
    %403 = vector.broadcast %402 : vector<64x1xf32> to vector<64x11xf32>
    %404 = arith.addf %401, %403 : vector<64x11xf32>
    %c0_206 = arith.constant 0 : index
    %c0_207 = arith.constant 0 : index
    %405 = vector.load %arg13[%c0_206, %c0_207] : memref<64x1xf32, #tpu.memory_space<vmem>>, vector<64x1xf32>
    %c0_208 = arith.constant 0 : index
    %c0_209 = arith.constant 0 : index
    %406 = vector.load %arg14[%c0_208, %c0_209] : memref<64x1xf32, #tpu.memory_space<vmem>>, vector<64x1xf32>
    %cst_210 = arith.constant dense<0.000000e+00> : vector<11xf32>
    %407 = vector.multi_reduction <add>, %404, %cst_210 [0] : vector<64x11xf32> to vector<11xf32>
    %408 = vector.shape_cast %407 : vector<11xf32> to vector<1x11xf32>
    %cst_211 = arith.constant 6.400000e+01 : f32
    %409 = vector.broadcast %cst_211 : f32 to vector<1x11xf32>
    %410 = arith.divf %408, %409 : vector<1x11xf32>
    %411 = vector.broadcast %410 : vector<1x11xf32> to vector<64x11xf32>
    %412 = arith.subf %404, %411 : vector<64x11xf32>
    %413 = arith.mulf %412, %412 : vector<64x11xf32>
    %cst_212 = arith.constant dense<0.000000e+00> : vector<11xf32>
    %414 = vector.multi_reduction <add>, %413, %cst_212 [0] : vector<64x11xf32> to vector<11xf32>
    %415 = vector.shape_cast %414 : vector<11xf32> to vector<1x11xf32>
    %cst_213 = arith.constant 0.0158730168 : f32
    %416 = vector.broadcast %cst_213 : f32 to vector<1x11xf32>
    %417 = arith.mulf %415, %416 : vector<1x11xf32>
    %418 = vector.broadcast %410 : vector<1x11xf32> to vector<64x11xf32>
    %419 = arith.subf %404, %418 : vector<64x11xf32>
    %420 = math.sqrt %417 : vector<1x11xf32>
    %cst_214 = arith.constant 9.99999997E-7 : f32
    %421 = vector.broadcast %cst_214 : f32 to vector<1x11xf32>
    %422 = arith.addf %420, %421 : vector<1x11xf32>
    %423 = vector.broadcast %422 : vector<1x11xf32> to vector<64x11xf32>
    %424 = arith.divf %419, %423 : vector<64x11xf32>
    %425 = vector.broadcast %405 : vector<64x1xf32> to vector<64x11xf32>
    %426 = arith.mulf %425, %424 : vector<64x11xf32>
    %427 = vector.broadcast %406 : vector<64x1xf32> to vector<64x11xf32>
    %428 = arith.addf %426, %427 : vector<64x11xf32>
    %cst_215 = arith.constant 0.000000e+00 : f32
    %429 = vector.broadcast %cst_215 : f32 to vector<64x11xf32>
    %430 = arith.maximumf %428, %429 : vector<64x11xf32>
    %c0_216 = arith.constant 0 : index
    %c0_217 = arith.constant 0 : index
    %431 = vector.load %arg17[%c0_216, %c0_217] : memref<32x64xf32, #tpu.memory_space<vmem>>, vector<32x64xf32>
    %cst_218 = arith.constant dense<0.000000e+00> : vector<32x11xf32>
    %432 = tpu.matmul %431, %430, %cst_218 {dimension_numbers = #tpu.dot_dimension_numbers<[1], [0], [0], [1], [0, 0, 1, 1], [], []>} : vector<32x64xf32>, vector<64x11xf32>, vector<32x11xf32> -> vector<32x11xf32>
    %c0_219 = arith.constant 0 : index
    %c0_220 = arith.constant 0 : index
    %433 = vector.load %arg9[%c0_219, %c0_220] : memref<32x1xf32, #tpu.memory_space<vmem>>, vector<32x1xf32>
    %434 = vector.broadcast %433 : vector<32x1xf32> to vector<32x11xf32>
    %435 = arith.addf %432, %434 : vector<32x11xf32>
    %436 = arith.addf %71, %289 : vector<32x9xf32>
    %437 = arith.addf %143, %435 : vector<32x11xf32>
    %c0_221 = arith.constant 0 : index
    %c0_222 = arith.constant 0 : index
    %438 = vector.load %arg33[%c0_221, %c0_222] : memref<32x32xf32, #tpu.memory_space<vmem>>, vector<32x32xf32>
    %cst_223 = arith.constant dense<0.000000e+00> : vector<32x9xf32>
    %439 = tpu.matmul %438, %436, %cst_223 {dimension_numbers = #tpu.dot_dimension_numbers<[1], [0], [0], [1], [0, 0, 1, 1], [], []>} : vector<32x32xf32>, vector<32x9xf32>, vector<32x9xf32> -> vector<32x9xf32>
    %c0_224 = arith.constant 0 : index
    %c0_225 = arith.constant 0 : index
    %440 = vector.load %arg25[%c0_224, %c0_225] : memref<32x1xf32, #tpu.memory_space<vmem>>, vector<32x1xf32>
    %441 = vector.broadcast %440 : vector<32x1xf32> to vector<32x9xf32>
    %442 = arith.addf %439, %441 : vector<32x9xf32>
    %c0_226 = arith.constant 0 : index
    %c0_227 = arith.constant 0 : index
    %443 = vector.load %arg31[%c0_226, %c0_227] : memref<64x32xf32, #tpu.memory_space<vmem>>, vector<64x32xf32>
    %cst_228 = arith.constant dense<0.000000e+00> : vector<64x11xf32>
    %444 = tpu.matmul %443, %437, %cst_228 {dimension_numbers = #tpu.dot_dimension_numbers<[1], [0], [0], [1], [0, 0, 1, 1], [], []>} : vector<64x32xf32>, vector<32x11xf32>, vector<64x11xf32> -> vector<64x11xf32>
    %c0_229 = arith.constant 0 : index
    %c0_230 = arith.constant 0 : index
    %445 = vector.load %arg23[%c0_229, %c0_230] : memref<64x1xf32, #tpu.memory_space<vmem>>, vector<64x1xf32>
    %446 = vector.broadcast %445 : vector<64x1xf32> to vector<64x11xf32>
    %447 = arith.addf %444, %446 : vector<64x11xf32>
    %448 = vector.extract_strided_slice %447 {offsets = [0, 0], sizes = [32, 11], strides = [1, 1]} : vector<64x11xf32> to vector<32x11xf32>
    %449 = vector.extract_strided_slice %447 {offsets = [32, 0], sizes = [32, 11], strides = [1, 1]} : vector<64x11xf32> to vector<32x11xf32>
    %450 = tpu.iota {dimensions = array<i32: 1>} : vector<9x11xi32>
    %c10_i32_231 = arith.constant 10 : i32
    %451 = vector.broadcast %c10_i32_231 : i32 to vector<9x11xi32>
    %452 = arith.cmpi slt, %450, %451 : vector<9x11xi32>
    %cst_232 = arith.constant 0.000000e+00 : f32
    %453 = vector.broadcast %cst_232 : f32 to vector<32x9xf32>
    %454 = vector.extract_strided_slice %442 {offsets = [0, 0], sizes = [8, 9], strides = [1, 1]} : vector<32x9xf32> to vector<8x9xf32>
    %455 = vector.extract_strided_slice %448 {offsets = [0, 0], sizes = [8, 11], strides = [1, 1]} : vector<32x11xf32> to vector<8x11xf32>
    %456 = vector.extract_strided_slice %449 {offsets = [0, 0], sizes = [8, 11], strides = [1, 1]} : vector<32x11xf32> to vector<8x11xf32>
    %cst_233 = arith.constant dense<0.000000e+00> : vector<9x11xf32>
    %457 = tpu.matmul %454, %455, %cst_233 {dimension_numbers = #tpu.dot_dimension_numbers<[0], [0], [1], [1], [0, 1, 1, 1], [], []>} : vector<8x9xf32>, vector<8x11xf32>, vector<9x11xf32> -> vector<9x11xf32>
    %cst_234 = arith.constant 0.353553385 : f32
    %458 = vector.broadcast %cst_234 : f32 to vector<9x11xf32>
    %459 = arith.mulf %457, %458 : vector<9x11xf32>
    %cst_235 = arith.constant -1.000000e+30 : f32
    %460 = vector.broadcast %cst_235 : f32 to vector<9x11xf32>
    %461 = arith.select %452, %459, %460 : vector<9x11xi1>, vector<9x11xf32>
    %cst_236 = arith.constant dense<0xFF800000> : vector<9xf32>
    %462 = vector.multi_reduction <maximumf>, %461, %cst_236 [1] : vector<9x11xf32> to vector<9xf32>
    %463 = vector.shape_cast %462 : vector<9xf32> to vector<9x1xf32>
    %464 = vector.broadcast %463 : vector<9x1xf32> to vector<9x11xf32>
    %465 = arith.subf %461, %464 : vector<9x11xf32>
    %466 = math.exp %465 : vector<9x11xf32>
    %cst_237 = arith.constant dense<0.000000e+00> : vector<9xf32>
    %467 = vector.multi_reduction <add>, %466, %cst_237 [1] : vector<9x11xf32> to vector<9xf32>
    %468 = vector.shape_cast %467 : vector<9xf32> to vector<9x1xf32>
    %469 = tpu.reciprocal %468 {approx = true} : vector<9x1xf32> -> vector<9x1xf32>
    %470 = vector.broadcast %469 : vector<9x1xf32> to vector<9x11xf32>
    %471 = arith.mulf %466, %470 : vector<9x11xf32>
    %cst_238 = arith.constant dense<0.000000e+00> : vector<8x9xf32>
    %472 = tpu.matmul %456, %471, %cst_238 {dimension_numbers = #tpu.dot_dimension_numbers<[1], [1], [0], [0], [0, 0, 1, 0], [], []>} : vector<8x11xf32>, vector<9x11xf32>, vector<8x9xf32> -> vector<8x9xf32>
    %c0_239 = arith.constant 0 : index
    %c0_240 = arith.constant 0 : index
    %473 = vector.load %arg32[%c0_239, %c0_240] : memref<32x32xf32, #tpu.memory_space<vmem>>, vector<8x32xf32>
    %cst_241 = arith.constant dense<0.000000e+00> : vector<32x9xf32>
    %474 = tpu.matmul %473, %472, %cst_241 {dimension_numbers = #tpu.dot_dimension_numbers<[0], [0], [1], [1], [0, 1, 1, 1], [], []>} : vector<8x32xf32>, vector<8x9xf32>, vector<32x9xf32> -> vector<32x9xf32>
    %475 = arith.addf %453, %474 : vector<32x9xf32>
    %476 = vector.extract_strided_slice %442 {offsets = [8, 0], sizes = [8, 9], strides = [1, 1]} : vector<32x9xf32> to vector<8x9xf32>
    %477 = vector.extract_strided_slice %448 {offsets = [8, 0], sizes = [8, 11], strides = [1, 1]} : vector<32x11xf32> to vector<8x11xf32>
    %478 = vector.extract_strided_slice %449 {offsets = [8, 0], sizes = [8, 11], strides = [1, 1]} : vector<32x11xf32> to vector<8x11xf32>
    %cst_242 = arith.constant dense<0.000000e+00> : vector<9x11xf32>
    %479 = tpu.matmul %476, %477, %cst_242 {dimension_numbers = #tpu.dot_dimension_numbers<[0], [0], [1], [1], [0, 1, 1, 1], [], []>} : vector<8x9xf32>, vector<8x11xf32>, vector<9x11xf32> -> vector<9x11xf32>
    %cst_243 = arith.constant 0.353553385 : f32
    %480 = vector.broadcast %cst_243 : f32 to vector<9x11xf32>
    %481 = arith.mulf %479, %480 : vector<9x11xf32>
    %cst_244 = arith.constant -1.000000e+30 : f32
    %482 = vector.broadcast %cst_244 : f32 to vector<9x11xf32>
    %483 = arith.select %452, %481, %482 : vector<9x11xi1>, vector<9x11xf32>
    %cst_245 = arith.constant dense<0xFF800000> : vector<9xf32>
    %484 = vector.multi_reduction <maximumf>, %483, %cst_245 [1] : vector<9x11xf32> to vector<9xf32>
    %485 = vector.shape_cast %484 : vector<9xf32> to vector<9x1xf32>
    %486 = vector.broadcast %485 : vector<9x1xf32> to vector<9x11xf32>
    %487 = arith.subf %483, %486 : vector<9x11xf32>
    %488 = math.exp %487 : vector<9x11xf32>
    %cst_246 = arith.constant dense<0.000000e+00> : vector<9xf32>
    %489 = vector.multi_reduction <add>, %488, %cst_246 [1] : vector<9x11xf32> to vector<9xf32>
    %490 = vector.shape_cast %489 : vector<9xf32> to vector<9x1xf32>
    %491 = tpu.reciprocal %490 {approx = true} : vector<9x1xf32> -> vector<9x1xf32>
    %492 = vector.broadcast %491 : vector<9x1xf32> to vector<9x11xf32>
    %493 = arith.mulf %488, %492 : vector<9x11xf32>
    %cst_247 = arith.constant dense<0.000000e+00> : vector<8x9xf32>
    %494 = tpu.matmul %478, %493, %cst_247 {dimension_numbers = #tpu.dot_dimension_numbers<[1], [1], [0], [0], [0, 0, 1, 0], [], []>} : vector<8x11xf32>, vector<9x11xf32>, vector<8x9xf32> -> vector<8x9xf32>
    %c8_248 = arith.constant 8 : index
    %c0_249 = arith.constant 0 : index
    %495 = vector.load %arg32[%c8_248, %c0_249] : memref<32x32xf32, #tpu.memory_space<vmem>>, vector<8x32xf32>
    %cst_250 = arith.constant dense<0.000000e+00> : vector<32x9xf32>
    %496 = tpu.matmul %495, %494, %cst_250 {dimension_numbers = #tpu.dot_dimension_numbers<[0], [0], [1], [1], [0, 1, 1, 1], [], []>} : vector<8x32xf32>, vector<8x9xf32>, vector<32x9xf32> -> vector<32x9xf32>
    %497 = arith.addf %475, %496 : vector<32x9xf32>
    %498 = vector.extract_strided_slice %442 {offsets = [16, 0], sizes = [8, 9], strides = [1, 1]} : vector<32x9xf32> to vector<8x9xf32>
    %499 = vector.extract_strided_slice %448 {offsets = [16, 0], sizes = [8, 11], strides = [1, 1]} : vector<32x11xf32> to vector<8x11xf32>
    %500 = vector.extract_strided_slice %449 {offsets = [16, 0], sizes = [8, 11], strides = [1, 1]} : vector<32x11xf32> to vector<8x11xf32>
    %cst_251 = arith.constant dense<0.000000e+00> : vector<9x11xf32>
    %501 = tpu.matmul %498, %499, %cst_251 {dimension_numbers = #tpu.dot_dimension_numbers<[0], [0], [1], [1], [0, 1, 1, 1], [], []>} : vector<8x9xf32>, vector<8x11xf32>, vector<9x11xf32> -> vector<9x11xf32>
    %cst_252 = arith.constant 0.353553385 : f32
    %502 = vector.broadcast %cst_252 : f32 to vector<9x11xf32>
    %503 = arith.mulf %501, %502 : vector<9x11xf32>
    %cst_253 = arith.constant -1.000000e+30 : f32
    %504 = vector.broadcast %cst_253 : f32 to vector<9x11xf32>
    %505 = arith.select %452, %503, %504 : vector<9x11xi1>, vector<9x11xf32>
    %cst_254 = arith.constant dense<0xFF800000> : vector<9xf32>
    %506 = vector.multi_reduction <maximumf>, %505, %cst_254 [1] : vector<9x11xf32> to vector<9xf32>
    %507 = vector.shape_cast %506 : vector<9xf32> to vector<9x1xf32>
    %508 = vector.broadcast %507 : vector<9x1xf32> to vector<9x11xf32>
    %509 = arith.subf %505, %508 : vector<9x11xf32>
    %510 = math.exp %509 : vector<9x11xf32>
    %cst_255 = arith.constant dense<0.000000e+00> : vector<9xf32>
    %511 = vector.multi_reduction <add>, %510, %cst_255 [1] : vector<9x11xf32> to vector<9xf32>
    %512 = vector.shape_cast %511 : vector<9xf32> to vector<9x1xf32>
    %513 = tpu.reciprocal %512 {approx = true} : vector<9x1xf32> -> vector<9x1xf32>
    %514 = vector.broadcast %513 : vector<9x1xf32> to vector<9x11xf32>
    %515 = arith.mulf %510, %514 : vector<9x11xf32>
    %cst_256 = arith.constant dense<0.000000e+00> : vector<8x9xf32>
    %516 = tpu.matmul %500, %515, %cst_256 {dimension_numbers = #tpu.dot_dimension_numbers<[1], [1], [0], [0], [0, 0, 1, 0], [], []>} : vector<8x11xf32>, vector<9x11xf32>, vector<8x9xf32> -> vector<8x9xf32>
    %c16_257 = arith.constant 16 : index
    %c0_258 = arith.constant 0 : index
    %517 = vector.load %arg32[%c16_257, %c0_258] : memref<32x32xf32, #tpu.memory_space<vmem>>, vector<8x32xf32>
    %cst_259 = arith.constant dense<0.000000e+00> : vector<32x9xf32>
    %518 = tpu.matmul %517, %516, %cst_259 {dimension_numbers = #tpu.dot_dimension_numbers<[0], [0], [1], [1], [0, 1, 1, 1], [], []>} : vector<8x32xf32>, vector<8x9xf32>, vector<32x9xf32> -> vector<32x9xf32>
    %519 = arith.addf %497, %518 : vector<32x9xf32>
    %520 = vector.extract_strided_slice %442 {offsets = [24, 0], sizes = [8, 9], strides = [1, 1]} : vector<32x9xf32> to vector<8x9xf32>
    %521 = vector.extract_strided_slice %448 {offsets = [24, 0], sizes = [8, 11], strides = [1, 1]} : vector<32x11xf32> to vector<8x11xf32>
    %522 = vector.extract_strided_slice %449 {offsets = [24, 0], sizes = [8, 11], strides = [1, 1]} : vector<32x11xf32> to vector<8x11xf32>
    %cst_260 = arith.constant dense<0.000000e+00> : vector<9x11xf32>
    %523 = tpu.matmul %520, %521, %cst_260 {dimension_numbers = #tpu.dot_dimension_numbers<[0], [0], [1], [1], [0, 1, 1, 1], [], []>} : vector<8x9xf32>, vector<8x11xf32>, vector<9x11xf32> -> vector<9x11xf32>
    %cst_261 = arith.constant 0.353553385 : f32
    %524 = vector.broadcast %cst_261 : f32 to vector<9x11xf32>
    %525 = arith.mulf %523, %524 : vector<9x11xf32>
    %cst_262 = arith.constant -1.000000e+30 : f32
    %526 = vector.broadcast %cst_262 : f32 to vector<9x11xf32>
    %527 = arith.select %452, %525, %526 : vector<9x11xi1>, vector<9x11xf32>
    %cst_263 = arith.constant dense<0xFF800000> : vector<9xf32>
    %528 = vector.multi_reduction <maximumf>, %527, %cst_263 [1] : vector<9x11xf32> to vector<9xf32>
    %529 = vector.shape_cast %528 : vector<9xf32> to vector<9x1xf32>
    %530 = vector.broadcast %529 : vector<9x1xf32> to vector<9x11xf32>
    %531 = arith.subf %527, %530 : vector<9x11xf32>
    %532 = math.exp %531 : vector<9x11xf32>
    %cst_264 = arith.constant dense<0.000000e+00> : vector<9xf32>
    %533 = vector.multi_reduction <add>, %532, %cst_264 [1] : vector<9x11xf32> to vector<9xf32>
    %534 = vector.shape_cast %533 : vector<9xf32> to vector<9x1xf32>
    %535 = tpu.reciprocal %534 {approx = true} : vector<9x1xf32> -> vector<9x1xf32>
    %536 = vector.broadcast %535 : vector<9x1xf32> to vector<9x11xf32>
    %537 = arith.mulf %532, %536 : vector<9x11xf32>
    %cst_265 = arith.constant dense<0.000000e+00> : vector<8x9xf32>
    %538 = tpu.matmul %522, %537, %cst_265 {dimension_numbers = #tpu.dot_dimension_numbers<[1], [1], [0], [0], [0, 0, 1, 0], [], []>} : vector<8x11xf32>, vector<9x11xf32>, vector<8x9xf32> -> vector<8x9xf32>
    %c24_266 = arith.constant 24 : index
    %c0_267 = arith.constant 0 : index
    %539 = vector.load %arg32[%c24_266, %c0_267] : memref<32x32xf32, #tpu.memory_space<vmem>>, vector<8x32xf32>
    %cst_268 = arith.constant dense<0.000000e+00> : vector<32x9xf32>
    %540 = tpu.matmul %539, %538, %cst_268 {dimension_numbers = #tpu.dot_dimension_numbers<[0], [0], [1], [1], [0, 1, 1, 1], [], []>} : vector<8x32xf32>, vector<8x9xf32>, vector<32x9xf32> -> vector<32x9xf32>
    %541 = arith.addf %519, %540 : vector<32x9xf32>
    %c0_269 = arith.constant 0 : index
    %c0_270 = arith.constant 0 : index
    %542 = vector.load %arg24[%c0_269, %c0_270] : memref<32x1xf32, #tpu.memory_space<vmem>>, vector<32x1xf32>
    %543 = vector.broadcast %542 : vector<32x1xf32> to vector<32x9xf32>
    %544 = arith.addf %541, %543 : vector<32x9xf32>
    %c0_271 = arith.constant 0 : index
    %c0_272 = arith.constant 0 : index
    %545 = vector.load %arg29[%c0_271, %c0_272] : memref<64x32xf32, #tpu.memory_space<vmem>>, vector<64x32xf32>
    %cst_273 = arith.constant dense<0.000000e+00> : vector<64x9xf32>
    %546 = tpu.matmul %545, %436, %cst_273 {dimension_numbers = #tpu.dot_dimension_numbers<[1], [0], [0], [1], [0, 0, 1, 1], [], []>} : vector<64x32xf32>, vector<32x9xf32>, vector<64x9xf32> -> vector<64x9xf32>
    %c0_274 = arith.constant 0 : index
    %c0_275 = arith.constant 0 : index
    %547 = vector.load %arg28[%c0_274, %c0_275] : memref<64x32xf32, #tpu.memory_space<vmem>>, vector<64x32xf32>
    %cst_276 = arith.constant dense<0.000000e+00> : vector<64x9xf32>
    %548 = tpu.matmul %547, %544, %cst_276 {dimension_numbers = #tpu.dot_dimension_numbers<[1], [0], [0], [1], [0, 0, 1, 1], [], []>} : vector<64x32xf32>, vector<32x9xf32>, vector<64x9xf32> -> vector<64x9xf32>
    %549 = arith.addf %546, %548 : vector<64x9xf32>
    %c0_277 = arith.constant 0 : index
    %c0_278 = arith.constant 0 : index
    %550 = vector.load %arg21[%c0_277, %c0_278] : memref<64x1xf32, #tpu.memory_space<vmem>>, vector<64x1xf32>
    %551 = vector.broadcast %550 : vector<64x1xf32> to vector<64x9xf32>
    %552 = arith.addf %549, %551 : vector<64x9xf32>
    %c0_279 = arith.constant 0 : index
    %c0_280 = arith.constant 0 : index
    %553 = vector.load %arg26[%c0_279, %c0_280] : memref<64x1xf32, #tpu.memory_space<vmem>>, vector<64x1xf32>
    %c0_281 = arith.constant 0 : index
    %c0_282 = arith.constant 0 : index
    %554 = vector.load %arg27[%c0_281, %c0_282] : memref<64x1xf32, #tpu.memory_space<vmem>>, vector<64x1xf32>
    %cst_283 = arith.constant dense<0.000000e+00> : vector<9xf32>
    %555 = vector.multi_reduction <add>, %552, %cst_283 [0] : vector<64x9xf32> to vector<9xf32>
    %556 = vector.shape_cast %555 : vector<9xf32> to vector<1x9xf32>
    %cst_284 = arith.constant 6.400000e+01 : f32
    %557 = vector.broadcast %cst_284 : f32 to vector<1x9xf32>
    %558 = arith.divf %556, %557 : vector<1x9xf32>
    %559 = vector.broadcast %558 : vector<1x9xf32> to vector<64x9xf32>
    %560 = arith.subf %552, %559 : vector<64x9xf32>
    %561 = arith.mulf %560, %560 : vector<64x9xf32>
    %cst_285 = arith.constant dense<0.000000e+00> : vector<9xf32>
    %562 = vector.multi_reduction <add>, %561, %cst_285 [0] : vector<64x9xf32> to vector<9xf32>
    %563 = vector.shape_cast %562 : vector<9xf32> to vector<1x9xf32>
    %cst_286 = arith.constant 0.0158730168 : f32
    %564 = vector.broadcast %cst_286 : f32 to vector<1x9xf32>
    %565 = arith.mulf %563, %564 : vector<1x9xf32>
    %566 = vector.broadcast %558 : vector<1x9xf32> to vector<64x9xf32>
    %567 = arith.subf %552, %566 : vector<64x9xf32>
    %568 = math.sqrt %565 : vector<1x9xf32>
    %cst_287 = arith.constant 9.99999997E-7 : f32
    %569 = vector.broadcast %cst_287 : f32 to vector<1x9xf32>
    %570 = arith.addf %568, %569 : vector<1x9xf32>
    %571 = vector.broadcast %570 : vector<1x9xf32> to vector<64x9xf32>
    %572 = arith.divf %567, %571 : vector<64x9xf32>
    %573 = vector.broadcast %553 : vector<64x1xf32> to vector<64x9xf32>
    %574 = arith.mulf %573, %572 : vector<64x9xf32>
    %575 = vector.broadcast %554 : vector<64x1xf32> to vector<64x9xf32>
    %576 = arith.addf %574, %575 : vector<64x9xf32>
    %cst_288 = arith.constant 0.000000e+00 : f32
    %577 = vector.broadcast %cst_288 : f32 to vector<64x9xf32>
    %578 = arith.maximumf %576, %577 : vector<64x9xf32>
    %c0_289 = arith.constant 0 : index
    %c0_290 = arith.constant 0 : index
    %579 = vector.load %arg30[%c0_289, %c0_290] : memref<32x64xf32, #tpu.memory_space<vmem>>, vector<32x64xf32>
    %cst_291 = arith.constant dense<0.000000e+00> : vector<32x9xf32>
    %580 = tpu.matmul %579, %578, %cst_291 {dimension_numbers = #tpu.dot_dimension_numbers<[1], [0], [0], [1], [0, 0, 1, 1], [], []>} : vector<32x64xf32>, vector<64x9xf32>, vector<32x9xf32> -> vector<32x9xf32>
    %c0_292 = arith.constant 0 : index
    %c0_293 = arith.constant 0 : index
    %581 = vector.load %arg22[%c0_292, %c0_293] : memref<32x1xf32, #tpu.memory_space<vmem>>, vector<32x1xf32>
    %582 = vector.broadcast %581 : vector<32x1xf32> to vector<32x9xf32>
    %583 = arith.addf %580, %582 : vector<32x9xf32>
    %c0_294 = arith.constant 0 : index
    %c0_295 = arith.constant 0 : index
    %584 = vector.load %arg33[%c0_294, %c0_295] : memref<32x32xf32, #tpu.memory_space<vmem>>, vector<32x32xf32>
    %cst_296 = arith.constant dense<0.000000e+00> : vector<32x11xf32>
    %585 = tpu.matmul %584, %437, %cst_296 {dimension_numbers = #tpu.dot_dimension_numbers<[1], [0], [0], [1], [0, 0, 1, 1], [], []>} : vector<32x32xf32>, vector<32x11xf32>, vector<32x11xf32> -> vector<32x11xf32>
    %c0_297 = arith.constant 0 : index
    %c0_298 = arith.constant 0 : index
    %586 = vector.load %arg25[%c0_297, %c0_298] : memref<32x1xf32, #tpu.memory_space<vmem>>, vector<32x1xf32>
    %587 = vector.broadcast %586 : vector<32x1xf32> to vector<32x11xf32>
    %588 = arith.addf %585, %587 : vector<32x11xf32>
    %c0_299 = arith.constant 0 : index
    %c0_300 = arith.constant 0 : index
    %589 = vector.load %arg31[%c0_299, %c0_300] : memref<64x32xf32, #tpu.memory_space<vmem>>, vector<64x32xf32>
    %cst_301 = arith.constant dense<0.000000e+00> : vector<64x9xf32>
    %590 = tpu.matmul %589, %436, %cst_301 {dimension_numbers = #tpu.dot_dimension_numbers<[1], [0], [0], [1], [0, 0, 1, 1], [], []>} : vector<64x32xf32>, vector<32x9xf32>, vector<64x9xf32> -> vector<64x9xf32>
    %c0_302 = arith.constant 0 : index
    %c0_303 = arith.constant 0 : index
    %591 = vector.load %arg23[%c0_302, %c0_303] : memref<64x1xf32, #tpu.memory_space<vmem>>, vector<64x1xf32>
    %592 = vector.broadcast %591 : vector<64x1xf32> to vector<64x9xf32>
    %593 = arith.addf %590, %592 : vector<64x9xf32>
    %594 = vector.extract_strided_slice %593 {offsets = [0, 0], sizes = [32, 9], strides = [1, 1]} : vector<64x9xf32> to vector<32x9xf32>
    %595 = vector.extract_strided_slice %593 {offsets = [32, 0], sizes = [32, 9], strides = [1, 1]} : vector<64x9xf32> to vector<32x9xf32>
    %596 = tpu.iota {dimensions = array<i32: 1>} : vector<11x9xi32>
    %c8_i32_304 = arith.constant 8 : i32
    %597 = vector.broadcast %c8_i32_304 : i32 to vector<11x9xi32>
    %598 = arith.cmpi slt, %596, %597 : vector<11x9xi32>
    %cst_305 = arith.constant 0.000000e+00 : f32
    %599 = vector.broadcast %cst_305 : f32 to vector<32x11xf32>
    %600 = vector.extract_strided_slice %588 {offsets = [0, 0], sizes = [8, 11], strides = [1, 1]} : vector<32x11xf32> to vector<8x11xf32>
    %601 = vector.extract_strided_slice %594 {offsets = [0, 0], sizes = [8, 9], strides = [1, 1]} : vector<32x9xf32> to vector<8x9xf32>
    %602 = vector.extract_strided_slice %595 {offsets = [0, 0], sizes = [8, 9], strides = [1, 1]} : vector<32x9xf32> to vector<8x9xf32>
    %cst_306 = arith.constant dense<0.000000e+00> : vector<11x9xf32>
    %603 = tpu.matmul %600, %601, %cst_306 {dimension_numbers = #tpu.dot_dimension_numbers<[0], [0], [1], [1], [0, 1, 1, 1], [], []>} : vector<8x11xf32>, vector<8x9xf32>, vector<11x9xf32> -> vector<11x9xf32>
    %cst_307 = arith.constant 0.353553385 : f32
    %604 = vector.broadcast %cst_307 : f32 to vector<11x9xf32>
    %605 = arith.mulf %603, %604 : vector<11x9xf32>
    %cst_308 = arith.constant -1.000000e+30 : f32
    %606 = vector.broadcast %cst_308 : f32 to vector<11x9xf32>
    %607 = arith.select %598, %605, %606 : vector<11x9xi1>, vector<11x9xf32>
    %cst_309 = arith.constant dense<0xFF800000> : vector<11xf32>
    %608 = vector.multi_reduction <maximumf>, %607, %cst_309 [1] : vector<11x9xf32> to vector<11xf32>
    %609 = vector.shape_cast %608 : vector<11xf32> to vector<11x1xf32>
    %610 = vector.broadcast %609 : vector<11x1xf32> to vector<11x9xf32>
    %611 = arith.subf %607, %610 : vector<11x9xf32>
    %612 = math.exp %611 : vector<11x9xf32>
    %cst_310 = arith.constant dense<0.000000e+00> : vector<11xf32>
    %613 = vector.multi_reduction <add>, %612, %cst_310 [1] : vector<11x9xf32> to vector<11xf32>
    %614 = vector.shape_cast %613 : vector<11xf32> to vector<11x1xf32>
    %615 = tpu.reciprocal %614 {approx = true} : vector<11x1xf32> -> vector<11x1xf32>
    %616 = vector.broadcast %615 : vector<11x1xf32> to vector<11x9xf32>
    %617 = arith.mulf %612, %616 : vector<11x9xf32>
    %cst_311 = arith.constant dense<0.000000e+00> : vector<8x11xf32>
    %618 = tpu.matmul %602, %617, %cst_311 {dimension_numbers = #tpu.dot_dimension_numbers<[1], [1], [0], [0], [0, 0, 1, 0], [], []>} : vector<8x9xf32>, vector<11x9xf32>, vector<8x11xf32> -> vector<8x11xf32>
    %c0_312 = arith.constant 0 : index
    %c0_313 = arith.constant 0 : index
    %619 = vector.load %arg32[%c0_312, %c0_313] : memref<32x32xf32, #tpu.memory_space<vmem>>, vector<8x32xf32>
    %cst_314 = arith.constant dense<0.000000e+00> : vector<32x11xf32>
    %620 = tpu.matmul %619, %618, %cst_314 {dimension_numbers = #tpu.dot_dimension_numbers<[0], [0], [1], [1], [0, 1, 1, 1], [], []>} : vector<8x32xf32>, vector<8x11xf32>, vector<32x11xf32> -> vector<32x11xf32>
    %621 = arith.addf %599, %620 : vector<32x11xf32>
    %622 = vector.extract_strided_slice %588 {offsets = [8, 0], sizes = [8, 11], strides = [1, 1]} : vector<32x11xf32> to vector<8x11xf32>
    %623 = vector.extract_strided_slice %594 {offsets = [8, 0], sizes = [8, 9], strides = [1, 1]} : vector<32x9xf32> to vector<8x9xf32>
    %624 = vector.extract_strided_slice %595 {offsets = [8, 0], sizes = [8, 9], strides = [1, 1]} : vector<32x9xf32> to vector<8x9xf32>
    %cst_315 = arith.constant dense<0.000000e+00> : vector<11x9xf32>
    %625 = tpu.matmul %622, %623, %cst_315 {dimension_numbers = #tpu.dot_dimension_numbers<[0], [0], [1], [1], [0, 1, 1, 1], [], []>} : vector<8x11xf32>, vector<8x9xf32>, vector<11x9xf32> -> vector<11x9xf32>
    %cst_316 = arith.constant 0.353553385 : f32
    %626 = vector.broadcast %cst_316 : f32 to vector<11x9xf32>
    %627 = arith.mulf %625, %626 : vector<11x9xf32>
    %cst_317 = arith.constant -1.000000e+30 : f32
    %628 = vector.broadcast %cst_317 : f32 to vector<11x9xf32>
    %629 = arith.select %598, %627, %628 : vector<11x9xi1>, vector<11x9xf32>
    %cst_318 = arith.constant dense<0xFF800000> : vector<11xf32>
    %630 = vector.multi_reduction <maximumf>, %629, %cst_318 [1] : vector<11x9xf32> to vector<11xf32>
    %631 = vector.shape_cast %630 : vector<11xf32> to vector<11x1xf32>
    %632 = vector.broadcast %631 : vector<11x1xf32> to vector<11x9xf32>
    %633 = arith.subf %629, %632 : vector<11x9xf32>
    %634 = math.exp %633 : vector<11x9xf32>
    %cst_319 = arith.constant dense<0.000000e+00> : vector<11xf32>
    %635 = vector.multi_reduction <add>, %634, %cst_319 [1] : vector<11x9xf32> to vector<11xf32>
    %636 = vector.shape_cast %635 : vector<11xf32> to vector<11x1xf32>
    %637 = tpu.reciprocal %636 {approx = true} : vector<11x1xf32> -> vector<11x1xf32>
    %638 = vector.broadcast %637 : vector<11x1xf32> to vector<11x9xf32>
    %639 = arith.mulf %634, %638 : vector<11x9xf32>
    %cst_320 = arith.constant dense<0.000000e+00> : vector<8x11xf32>
    %640 = tpu.matmul %624, %639, %cst_320 {dimension_numbers = #tpu.dot_dimension_numbers<[1], [1], [0], [0], [0, 0, 1, 0], [], []>} : vector<8x9xf32>, vector<11x9xf32>, vector<8x11xf32> -> vector<8x11xf32>
    %c8_321 = arith.constant 8 : index
    %c0_322 = arith.constant 0 : index
    %641 = vector.load %arg32[%c8_321, %c0_322] : memref<32x32xf32, #tpu.memory_space<vmem>>, vector<8x32xf32>
    %cst_323 = arith.constant dense<0.000000e+00> : vector<32x11xf32>
    %642 = tpu.matmul %641, %640, %cst_323 {dimension_numbers = #tpu.dot_dimension_numbers<[0], [0], [1], [1], [0, 1, 1, 1], [], []>} : vector<8x32xf32>, vector<8x11xf32>, vector<32x11xf32> -> vector<32x11xf32>
    %643 = arith.addf %621, %642 : vector<32x11xf32>
    %644 = vector.extract_strided_slice %588 {offsets = [16, 0], sizes = [8, 11], strides = [1, 1]} : vector<32x11xf32> to vector<8x11xf32>
    %645 = vector.extract_strided_slice %594 {offsets = [16, 0], sizes = [8, 9], strides = [1, 1]} : vector<32x9xf32> to vector<8x9xf32>
    %646 = vector.extract_strided_slice %595 {offsets = [16, 0], sizes = [8, 9], strides = [1, 1]} : vector<32x9xf32> to vector<8x9xf32>
    %cst_324 = arith.constant dense<0.000000e+00> : vector<11x9xf32>
    %647 = tpu.matmul %644, %645, %cst_324 {dimension_numbers = #tpu.dot_dimension_numbers<[0], [0], [1], [1], [0, 1, 1, 1], [], []>} : vector<8x11xf32>, vector<8x9xf32>, vector<11x9xf32> -> vector<11x9xf32>
    %cst_325 = arith.constant 0.353553385 : f32
    %648 = vector.broadcast %cst_325 : f32 to vector<11x9xf32>
    %649 = arith.mulf %647, %648 : vector<11x9xf32>
    %cst_326 = arith.constant -1.000000e+30 : f32
    %650 = vector.broadcast %cst_326 : f32 to vector<11x9xf32>
    %651 = arith.select %598, %649, %650 : vector<11x9xi1>, vector<11x9xf32>
    %cst_327 = arith.constant dense<0xFF800000> : vector<11xf32>
    %652 = vector.multi_reduction <maximumf>, %651, %cst_327 [1] : vector<11x9xf32> to vector<11xf32>
    %653 = vector.shape_cast %652 : vector<11xf32> to vector<11x1xf32>
    %654 = vector.broadcast %653 : vector<11x1xf32> to vector<11x9xf32>
    %655 = arith.subf %651, %654 : vector<11x9xf32>
    %656 = math.exp %655 : vector<11x9xf32>
    %cst_328 = arith.constant dense<0.000000e+00> : vector<11xf32>
    %657 = vector.multi_reduction <add>, %656, %cst_328 [1] : vector<11x9xf32> to vector<11xf32>
    %658 = vector.shape_cast %657 : vector<11xf32> to vector<11x1xf32>
    %659 = tpu.reciprocal %658 {approx = true} : vector<11x1xf32> -> vector<11x1xf32>
    %660 = vector.broadcast %659 : vector<11x1xf32> to vector<11x9xf32>
    %661 = arith.mulf %656, %660 : vector<11x9xf32>
    %cst_329 = arith.constant dense<0.000000e+00> : vector<8x11xf32>
    %662 = tpu.matmul %646, %661, %cst_329 {dimension_numbers = #tpu.dot_dimension_numbers<[1], [1], [0], [0], [0, 0, 1, 0], [], []>} : vector<8x9xf32>, vector<11x9xf32>, vector<8x11xf32> -> vector<8x11xf32>
    %c16_330 = arith.constant 16 : index
    %c0_331 = arith.constant 0 : index
    %663 = vector.load %arg32[%c16_330, %c0_331] : memref<32x32xf32, #tpu.memory_space<vmem>>, vector<8x32xf32>
    %cst_332 = arith.constant dense<0.000000e+00> : vector<32x11xf32>
    %664 = tpu.matmul %663, %662, %cst_332 {dimension_numbers = #tpu.dot_dimension_numbers<[0], [0], [1], [1], [0, 1, 1, 1], [], []>} : vector<8x32xf32>, vector<8x11xf32>, vector<32x11xf32> -> vector<32x11xf32>
    %665 = arith.addf %643, %664 : vector<32x11xf32>
    %666 = vector.extract_strided_slice %588 {offsets = [24, 0], sizes = [8, 11], strides = [1, 1]} : vector<32x11xf32> to vector<8x11xf32>
    %667 = vector.extract_strided_slice %594 {offsets = [24, 0], sizes = [8, 9], strides = [1, 1]} : vector<32x9xf32> to vector<8x9xf32>
    %668 = vector.extract_strided_slice %595 {offsets = [24, 0], sizes = [8, 9], strides = [1, 1]} : vector<32x9xf32> to vector<8x9xf32>
    %cst_333 = arith.constant dense<0.000000e+00> : vector<11x9xf32>
    %669 = tpu.matmul %666, %667, %cst_333 {dimension_numbers = #tpu.dot_dimension_numbers<[0], [0], [1], [1], [0, 1, 1, 1], [], []>} : vector<8x11xf32>, vector<8x9xf32>, vector<11x9xf32> -> vector<11x9xf32>
    %cst_334 = arith.constant 0.353553385 : f32
    %670 = vector.broadcast %cst_334 : f32 to vector<11x9xf32>
    %671 = arith.mulf %669, %670 : vector<11x9xf32>
    %cst_335 = arith.constant -1.000000e+30 : f32
    %672 = vector.broadcast %cst_335 : f32 to vector<11x9xf32>
    %673 = arith.select %598, %671, %672 : vector<11x9xi1>, vector<11x9xf32>
    %cst_336 = arith.constant dense<0xFF800000> : vector<11xf32>
    %674 = vector.multi_reduction <maximumf>, %673, %cst_336 [1] : vector<11x9xf32> to vector<11xf32>
    %675 = vector.shape_cast %674 : vector<11xf32> to vector<11x1xf32>
    %676 = vector.broadcast %675 : vector<11x1xf32> to vector<11x9xf32>
    %677 = arith.subf %673, %676 : vector<11x9xf32>
    %678 = math.exp %677 : vector<11x9xf32>
    %cst_337 = arith.constant dense<0.000000e+00> : vector<11xf32>
    %679 = vector.multi_reduction <add>, %678, %cst_337 [1] : vector<11x9xf32> to vector<11xf32>
    %680 = vector.shape_cast %679 : vector<11xf32> to vector<11x1xf32>
    %681 = tpu.reciprocal %680 {approx = true} : vector<11x1xf32> -> vector<11x1xf32>
    %682 = vector.broadcast %681 : vector<11x1xf32> to vector<11x9xf32>
    %683 = arith.mulf %678, %682 : vector<11x9xf32>
    %cst_338 = arith.constant dense<0.000000e+00> : vector<8x11xf32>
    %684 = tpu.matmul %668, %683, %cst_338 {dimension_numbers = #tpu.dot_dimension_numbers<[1], [1], [0], [0], [0, 0, 1, 0], [], []>} : vector<8x9xf32>, vector<11x9xf32>, vector<8x11xf32> -> vector<8x11xf32>
    %c24_339 = arith.constant 24 : index
    %c0_340 = arith.constant 0 : index
    %685 = vector.load %arg32[%c24_339, %c0_340] : memref<32x32xf32, #tpu.memory_space<vmem>>, vector<8x32xf32>
    %cst_341 = arith.constant dense<0.000000e+00> : vector<32x11xf32>
    %686 = tpu.matmul %685, %684, %cst_341 {dimension_numbers = #tpu.dot_dimension_numbers<[0], [0], [1], [1], [0, 1, 1, 1], [], []>} : vector<8x32xf32>, vector<8x11xf32>, vector<32x11xf32> -> vector<32x11xf32>
    %687 = arith.addf %665, %686 : vector<32x11xf32>
    %c0_342 = arith.constant 0 : index
    %c0_343 = arith.constant 0 : index
    %688 = vector.load %arg24[%c0_342, %c0_343] : memref<32x1xf32, #tpu.memory_space<vmem>>, vector<32x1xf32>
    %689 = vector.broadcast %688 : vector<32x1xf32> to vector<32x11xf32>
    %690 = arith.addf %687, %689 : vector<32x11xf32>
    %c0_344 = arith.constant 0 : index
    %c0_345 = arith.constant 0 : index
    %691 = vector.load %arg29[%c0_344, %c0_345] : memref<64x32xf32, #tpu.memory_space<vmem>>, vector<64x32xf32>
    %cst_346 = arith.constant dense<0.000000e+00> : vector<64x11xf32>
    %692 = tpu.matmul %691, %437, %cst_346 {dimension_numbers = #tpu.dot_dimension_numbers<[1], [0], [0], [1], [0, 0, 1, 1], [], []>} : vector<64x32xf32>, vector<32x11xf32>, vector<64x11xf32> -> vector<64x11xf32>
    %c0_347 = arith.constant 0 : index
    %c0_348 = arith.constant 0 : index
    %693 = vector.load %arg28[%c0_347, %c0_348] : memref<64x32xf32, #tpu.memory_space<vmem>>, vector<64x32xf32>
    %cst_349 = arith.constant dense<0.000000e+00> : vector<64x11xf32>
    %694 = tpu.matmul %693, %690, %cst_349 {dimension_numbers = #tpu.dot_dimension_numbers<[1], [0], [0], [1], [0, 0, 1, 1], [], []>} : vector<64x32xf32>, vector<32x11xf32>, vector<64x11xf32> -> vector<64x11xf32>
    %695 = arith.addf %692, %694 : vector<64x11xf32>
    %c0_350 = arith.constant 0 : index
    %c0_351 = arith.constant 0 : index
    %696 = vector.load %arg21[%c0_350, %c0_351] : memref<64x1xf32, #tpu.memory_space<vmem>>, vector<64x1xf32>
    %697 = vector.broadcast %696 : vector<64x1xf32> to vector<64x11xf32>
    %698 = arith.addf %695, %697 : vector<64x11xf32>
    %c0_352 = arith.constant 0 : index
    %c0_353 = arith.constant 0 : index
    %699 = vector.load %arg26[%c0_352, %c0_353] : memref<64x1xf32, #tpu.memory_space<vmem>>, vector<64x1xf32>
    %c0_354 = arith.constant 0 : index
    %c0_355 = arith.constant 0 : index
    %700 = vector.load %arg27[%c0_354, %c0_355] : memref<64x1xf32, #tpu.memory_space<vmem>>, vector<64x1xf32>
    %cst_356 = arith.constant dense<0.000000e+00> : vector<11xf32>
    %701 = vector.multi_reduction <add>, %698, %cst_356 [0] : vector<64x11xf32> to vector<11xf32>
    %702 = vector.shape_cast %701 : vector<11xf32> to vector<1x11xf32>
    %cst_357 = arith.constant 6.400000e+01 : f32
    %703 = vector.broadcast %cst_357 : f32 to vector<1x11xf32>
    %704 = arith.divf %702, %703 : vector<1x11xf32>
    %705 = vector.broadcast %704 : vector<1x11xf32> to vector<64x11xf32>
    %706 = arith.subf %698, %705 : vector<64x11xf32>
    %707 = arith.mulf %706, %706 : vector<64x11xf32>
    %cst_358 = arith.constant dense<0.000000e+00> : vector<11xf32>
    %708 = vector.multi_reduction <add>, %707, %cst_358 [0] : vector<64x11xf32> to vector<11xf32>
    %709 = vector.shape_cast %708 : vector<11xf32> to vector<1x11xf32>
    %cst_359 = arith.constant 0.0158730168 : f32
    %710 = vector.broadcast %cst_359 : f32 to vector<1x11xf32>
    %711 = arith.mulf %709, %710 : vector<1x11xf32>
    %712 = vector.broadcast %704 : vector<1x11xf32> to vector<64x11xf32>
    %713 = arith.subf %698, %712 : vector<64x11xf32>
    %714 = math.sqrt %711 : vector<1x11xf32>
    %cst_360 = arith.constant 9.99999997E-7 : f32
    %715 = vector.broadcast %cst_360 : f32 to vector<1x11xf32>
    %716 = arith.addf %714, %715 : vector<1x11xf32>
    %717 = vector.broadcast %716 : vector<1x11xf32> to vector<64x11xf32>
    %718 = arith.divf %713, %717 : vector<64x11xf32>
    %719 = vector.broadcast %699 : vector<64x1xf32> to vector<64x11xf32>
    %720 = arith.mulf %719, %718 : vector<64x11xf32>
    %721 = vector.broadcast %700 : vector<64x1xf32> to vector<64x11xf32>
    %722 = arith.addf %720, %721 : vector<64x11xf32>
    %cst_361 = arith.constant 0.000000e+00 : f32
    %723 = vector.broadcast %cst_361 : f32 to vector<64x11xf32>
    %724 = arith.maximumf %722, %723 : vector<64x11xf32>
    %c0_362 = arith.constant 0 : index
    %c0_363 = arith.constant 0 : index
    %725 = vector.load %arg30[%c0_362, %c0_363] : memref<32x64xf32, #tpu.memory_space<vmem>>, vector<32x64xf32>
    %cst_364 = arith.constant dense<0.000000e+00> : vector<32x11xf32>
    %726 = tpu.matmul %725, %724, %cst_364 {dimension_numbers = #tpu.dot_dimension_numbers<[1], [0], [0], [1], [0, 0, 1, 1], [], []>} : vector<32x64xf32>, vector<64x11xf32>, vector<32x11xf32> -> vector<32x11xf32>
    %c0_365 = arith.constant 0 : index
    %c0_366 = arith.constant 0 : index
    %727 = vector.load %arg22[%c0_365, %c0_366] : memref<32x1xf32, #tpu.memory_space<vmem>>, vector<32x1xf32>
    %728 = vector.broadcast %727 : vector<32x1xf32> to vector<32x11xf32>
    %729 = arith.addf %726, %728 : vector<32x11xf32>
    %730 = arith.addf %436, %583 : vector<32x9xf32>
    %731 = arith.addf %437, %729 : vector<32x11xf32>
    %c0_367 = arith.constant 0 : index
    %c0_368 = arith.constant 0 : index
    %732 = vector.load %arg7[%c0_367, %c0_368] : memref<32x32xf32, #tpu.memory_space<vmem>>, vector<32x32xf32>
    %c0_369 = arith.constant 0 : index
    %c0_370 = arith.constant 0 : index
    %733 = vector.load %arg6[%c0_369, %c0_370] : memref<32x1xf32, #tpu.memory_space<vmem>>, vector<32x1xf32>
    %cst_371 = arith.constant dense<0.000000e+00> : vector<32x9xf32>
    %734 = tpu.matmul %732, %730, %cst_371 {dimension_numbers = #tpu.dot_dimension_numbers<[1], [0], [0], [1], [0, 0, 1, 1], [], []>} : vector<32x32xf32>, vector<32x9xf32>, vector<32x9xf32> -> vector<32x9xf32>
    %735 = vector.broadcast %733 : vector<32x1xf32> to vector<32x9xf32>
    %736 = arith.addf %734, %735 : vector<32x9xf32>
    %cst_372 = arith.constant dense<0.000000e+00> : vector<32x11xf32>
    %737 = tpu.matmul %732, %731, %cst_372 {dimension_numbers = #tpu.dot_dimension_numbers<[1], [0], [0], [1], [0, 0, 1, 1], [], []>} : vector<32x32xf32>, vector<32x11xf32>, vector<32x11xf32> -> vector<32x11xf32>
    %738 = vector.broadcast %733 : vector<32x1xf32> to vector<32x11xf32>
    %739 = arith.addf %737, %738 : vector<32x11xf32>
    %cst_373 = arith.constant dense<0.000000e+00> : vector<9x11xf32>
    %740 = tpu.matmul %736, %739, %cst_373 {dimension_numbers = #tpu.dot_dimension_numbers<[0], [0], [1], [1], [0, 1, 1, 1], [], []>} : vector<32x9xf32>, vector<32x11xf32>, vector<9x11xf32> -> vector<9x11xf32>
    %cst_374 = arith.constant 0.176776692 : f32
    %741 = vector.broadcast %cst_374 : f32 to vector<9x11xf32>
    %742 = arith.mulf %740, %741 : vector<9x11xf32>
    %743 = tpu.iota {dimensions = array<i32: 0>} : vector<9x11xi32>
    %744 = tpu.iota {dimensions = array<i32: 1>} : vector<9x11xi32>
    %c8_i32_375 = arith.constant 8 : i32
    %745 = vector.broadcast %c8_i32_375 : i32 to vector<9x11xi32>
    %746 = arith.cmpi slt, %743, %745 : vector<9x11xi32>
    %c10_i32_376 = arith.constant 10 : i32
    %747 = vector.broadcast %c10_i32_376 : i32 to vector<9x11xi32>
    %748 = arith.cmpi slt, %744, %747 : vector<9x11xi32>
    %749 = arith.andi %746, %748 : vector<9x11xi1>
    %c0_377 = arith.constant 0 : index
    %c0_378 = arith.constant 0 : index
    %750 = vector.load %arg5[%c0_377, %c0_378] : memref<9x11xf32, #tpu.memory_space<vmem>>, vector<9x11xf32>
    %751 = arith.select %749, %742, %750 : vector<9x11xi1>, vector<9x11xf32>
    %752 = tpu.iota {dimensions = array<i32: 0>} : vector<9x1xi32>
    %c8_i32_379 = arith.constant 8 : i32
    %753 = vector.broadcast %c8_i32_379 : i32 to vector<9x1xi32>
    %754 = arith.cmpi slt, %752, %753 : vector<9x1xi32>
    %cst_380 = arith.constant -2.8903718 : f32
    %cst_381 = arith.constant -0.587786674 : f32
    %755 = vector.broadcast %cst_380 : f32 to vector<9x1xf32>
    %756 = vector.broadcast %cst_381 : f32 to vector<9x1xf32>
    %757 = arith.select %754, %755, %756 : vector<9x1xi1>, vector<9x1xf32>
    %758 = tpu.iota {dimensions = array<i32: 1>} : vector<1x11xi32>
    %c10_i32_382 = arith.constant 10 : i32
    %759 = vector.broadcast %c10_i32_382 : i32 to vector<1x11xi32>
    %760 = arith.cmpi slt, %758, %759 : vector<1x11xi32>
    %cst_383 = arith.constant -2.8903718 : f32
    %cst_384 = arith.constant -0.810930192 : f32
    %761 = vector.broadcast %cst_383 : f32 to vector<1x11xf32>
    %762 = vector.broadcast %cst_384 : f32 to vector<1x11xf32>
    %763 = arith.select %760, %761, %762 : vector<1x11xi1>, vector<1x11xf32>
    %cst_385 = arith.constant 0.000000e+00 : f32
    %764 = vector.broadcast %cst_385 : f32 to vector<1x11xf32>
    %765 = vector.broadcast %764 : vector<1x11xf32> to vector<9x11xf32>
    %766 = arith.addf %751, %765 : vector<9x11xf32>
    %cst_386 = arith.constant dense<0xFF800000> : vector<9xf32>
    %767 = vector.multi_reduction <maximumf>, %766, %cst_386 [1] : vector<9x11xf32> to vector<9xf32>
    %768 = vector.shape_cast %767 : vector<9xf32> to vector<9x1xf32>
    %769 = vector.broadcast %768 : vector<9x1xf32> to vector<9x11xf32>
    %770 = arith.subf %766, %769 : vector<9x11xf32>
    %771 = math.exp %770 : vector<9x11xf32>
    %cst_387 = arith.constant dense<0.000000e+00> : vector<9xf32>
    %772 = vector.multi_reduction <add>, %771, %cst_387 [1] : vector<9x11xf32> to vector<9xf32>
    %773 = vector.shape_cast %772 : vector<9xf32> to vector<9x1xf32>
    %774 = math.log %773 : vector<9x1xf32>
    %775 = arith.addf %768, %774 : vector<9x1xf32>
    %776 = arith.subf %757, %775 : vector<9x1xf32>
    %777 = vector.broadcast %776 : vector<9x1xf32> to vector<9x11xf32>
    %778 = arith.addf %751, %777 : vector<9x11xf32>
    %cst_388 = arith.constant dense<0xFF800000> : vector<11xf32>
    %779 = vector.multi_reduction <maximumf>, %778, %cst_388 [0] : vector<9x11xf32> to vector<11xf32>
    %780 = vector.shape_cast %779 : vector<11xf32> to vector<1x11xf32>
    %781 = vector.broadcast %780 : vector<1x11xf32> to vector<9x11xf32>
    %782 = arith.subf %778, %781 : vector<9x11xf32>
    %783 = math.exp %782 : vector<9x11xf32>
    %cst_389 = arith.constant dense<0.000000e+00> : vector<11xf32>
    %784 = vector.multi_reduction <add>, %783, %cst_389 [0] : vector<9x11xf32> to vector<11xf32>
    %785 = vector.shape_cast %784 : vector<11xf32> to vector<1x11xf32>
    %786 = math.log %785 : vector<1x11xf32>
    %787 = arith.addf %780, %786 : vector<1x11xf32>
    %788 = arith.subf %763, %787 : vector<1x11xf32>
    %789 = vector.broadcast %788 : vector<1x11xf32> to vector<9x11xf32>
    %790 = arith.addf %751, %789 : vector<9x11xf32>
    %cst_390 = arith.constant dense<0xFF800000> : vector<9xf32>
    %791 = vector.multi_reduction <maximumf>, %790, %cst_390 [1] : vector<9x11xf32> to vector<9xf32>
    %792 = vector.shape_cast %791 : vector<9xf32> to vector<9x1xf32>
    %793 = vector.broadcast %792 : vector<9x1xf32> to vector<9x11xf32>
    %794 = arith.subf %790, %793 : vector<9x11xf32>
    %795 = math.exp %794 : vector<9x11xf32>
    %cst_391 = arith.constant dense<0.000000e+00> : vector<9xf32>
    %796 = vector.multi_reduction <add>, %795, %cst_391 [1] : vector<9x11xf32> to vector<9xf32>
    %797 = vector.shape_cast %796 : vector<9xf32> to vector<9x1xf32>
    %798 = math.log %797 : vector<9x1xf32>
    %799 = arith.addf %792, %798 : vector<9x1xf32>
    %800 = arith.subf %757, %799 : vector<9x1xf32>
    %801 = vector.broadcast %800 : vector<9x1xf32> to vector<9x11xf32>
    %802 = arith.addf %751, %801 : vector<9x11xf32>
    %cst_392 = arith.constant dense<0xFF800000> : vector<11xf32>
    %803 = vector.multi_reduction <maximumf>, %802, %cst_392 [0] : vector<9x11xf32> to vector<11xf32>
    %804 = vector.shape_cast %803 : vector<11xf32> to vector<1x11xf32>
    %805 = vector.broadcast %804 : vector<1x11xf32> to vector<9x11xf32>
    %806 = arith.subf %802, %805 : vector<9x11xf32>
    %807 = math.exp %806 : vector<9x11xf32>
    %cst_393 = arith.constant dense<0.000000e+00> : vector<11xf32>
    %808 = vector.multi_reduction <add>, %807, %cst_393 [0] : vector<9x11xf32> to vector<11xf32>
    %809 = vector.shape_cast %808 : vector<11xf32> to vector<1x11xf32>
    %810 = math.log %809 : vector<1x11xf32>
    %811 = arith.addf %804, %810 : vector<1x11xf32>
    %812 = arith.subf %763, %811 : vector<1x11xf32>
    %813 = vector.broadcast %812 : vector<1x11xf32> to vector<9x11xf32>
    %814 = arith.addf %751, %813 : vector<9x11xf32>
    %cst_394 = arith.constant dense<0xFF800000> : vector<9xf32>
    %815 = vector.multi_reduction <maximumf>, %814, %cst_394 [1] : vector<9x11xf32> to vector<9xf32>
    %816 = vector.shape_cast %815 : vector<9xf32> to vector<9x1xf32>
    %817 = vector.broadcast %816 : vector<9x1xf32> to vector<9x11xf32>
    %818 = arith.subf %814, %817 : vector<9x11xf32>
    %819 = math.exp %818 : vector<9x11xf32>
    %cst_395 = arith.constant dense<0.000000e+00> : vector<9xf32>
    %820 = vector.multi_reduction <add>, %819, %cst_395 [1] : vector<9x11xf32> to vector<9xf32>
    %821 = vector.shape_cast %820 : vector<9xf32> to vector<9x1xf32>
    %822 = math.log %821 : vector<9x1xf32>
    %823 = arith.addf %816, %822 : vector<9x1xf32>
    %824 = arith.subf %757, %823 : vector<9x1xf32>
    %825 = vector.broadcast %824 : vector<9x1xf32> to vector<9x11xf32>
    %826 = arith.addf %751, %825 : vector<9x11xf32>
    %cst_396 = arith.constant dense<0xFF800000> : vector<11xf32>
    %827 = vector.multi_reduction <maximumf>, %826, %cst_396 [0] : vector<9x11xf32> to vector<11xf32>
    %828 = vector.shape_cast %827 : vector<11xf32> to vector<1x11xf32>
    %829 = vector.broadcast %828 : vector<1x11xf32> to vector<9x11xf32>
    %830 = arith.subf %826, %829 : vector<9x11xf32>
    %831 = math.exp %830 : vector<9x11xf32>
    %cst_397 = arith.constant dense<0.000000e+00> : vector<11xf32>
    %832 = vector.multi_reduction <add>, %831, %cst_397 [0] : vector<9x11xf32> to vector<11xf32>
    %833 = vector.shape_cast %832 : vector<11xf32> to vector<1x11xf32>
    %834 = math.log %833 : vector<1x11xf32>
    %835 = arith.addf %828, %834 : vector<1x11xf32>
    %836 = arith.subf %763, %835 : vector<1x11xf32>
    %837 = vector.broadcast %836 : vector<1x11xf32> to vector<9x11xf32>
    %838 = arith.addf %751, %837 : vector<9x11xf32>
    %cst_398 = arith.constant dense<0xFF800000> : vector<9xf32>
    %839 = vector.multi_reduction <maximumf>, %838, %cst_398 [1] : vector<9x11xf32> to vector<9xf32>
    %840 = vector.shape_cast %839 : vector<9xf32> to vector<9x1xf32>
    %841 = vector.broadcast %840 : vector<9x1xf32> to vector<9x11xf32>
    %842 = arith.subf %838, %841 : vector<9x11xf32>
    %843 = math.exp %842 : vector<9x11xf32>
    %cst_399 = arith.constant dense<0.000000e+00> : vector<9xf32>
    %844 = vector.multi_reduction <add>, %843, %cst_399 [1] : vector<9x11xf32> to vector<9xf32>
    %845 = vector.shape_cast %844 : vector<9xf32> to vector<9x1xf32>
    %846 = math.log %845 : vector<9x1xf32>
    %847 = arith.addf %840, %846 : vector<9x1xf32>
    %848 = arith.subf %757, %847 : vector<9x1xf32>
    %849 = vector.broadcast %848 : vector<9x1xf32> to vector<9x11xf32>
    %850 = arith.addf %751, %849 : vector<9x11xf32>
    %cst_400 = arith.constant dense<0xFF800000> : vector<11xf32>
    %851 = vector.multi_reduction <maximumf>, %850, %cst_400 [0] : vector<9x11xf32> to vector<11xf32>
    %852 = vector.shape_cast %851 : vector<11xf32> to vector<1x11xf32>
    %853 = vector.broadcast %852 : vector<1x11xf32> to vector<9x11xf32>
    %854 = arith.subf %850, %853 : vector<9x11xf32>
    %855 = math.exp %854 : vector<9x11xf32>
    %cst_401 = arith.constant dense<0.000000e+00> : vector<11xf32>
    %856 = vector.multi_reduction <add>, %855, %cst_401 [0] : vector<9x11xf32> to vector<11xf32>
    %857 = vector.shape_cast %856 : vector<11xf32> to vector<1x11xf32>
    %858 = math.log %857 : vector<1x11xf32>
    %859 = arith.addf %852, %858 : vector<1x11xf32>
    %860 = arith.subf %763, %859 : vector<1x11xf32>
    %861 = vector.broadcast %860 : vector<1x11xf32> to vector<9x11xf32>
    %862 = arith.addf %751, %861 : vector<9x11xf32>
    %cst_402 = arith.constant dense<0xFF800000> : vector<9xf32>
    %863 = vector.multi_reduction <maximumf>, %862, %cst_402 [1] : vector<9x11xf32> to vector<9xf32>
    %864 = vector.shape_cast %863 : vector<9xf32> to vector<9x1xf32>
    %865 = vector.broadcast %864 : vector<9x1xf32> to vector<9x11xf32>
    %866 = arith.subf %862, %865 : vector<9x11xf32>
    %867 = math.exp %866 : vector<9x11xf32>
    %cst_403 = arith.constant dense<0.000000e+00> : vector<9xf32>
    %868 = vector.multi_reduction <add>, %867, %cst_403 [1] : vector<9x11xf32> to vector<9xf32>
    %869 = vector.shape_cast %868 : vector<9xf32> to vector<9x1xf32>
    %870 = math.log %869 : vector<9x1xf32>
    %871 = arith.addf %864, %870 : vector<9x1xf32>
    %872 = arith.subf %757, %871 : vector<9x1xf32>
    %873 = vector.broadcast %872 : vector<9x1xf32> to vector<9x11xf32>
    %874 = arith.addf %751, %873 : vector<9x11xf32>
    %cst_404 = arith.constant dense<0xFF800000> : vector<11xf32>
    %875 = vector.multi_reduction <maximumf>, %874, %cst_404 [0] : vector<9x11xf32> to vector<11xf32>
    %876 = vector.shape_cast %875 : vector<11xf32> to vector<1x11xf32>
    %877 = vector.broadcast %876 : vector<1x11xf32> to vector<9x11xf32>
    %878 = arith.subf %874, %877 : vector<9x11xf32>
    %879 = math.exp %878 : vector<9x11xf32>
    %cst_405 = arith.constant dense<0.000000e+00> : vector<11xf32>
    %880 = vector.multi_reduction <add>, %879, %cst_405 [0] : vector<9x11xf32> to vector<11xf32>
    %881 = vector.shape_cast %880 : vector<11xf32> to vector<1x11xf32>
    %882 = math.log %881 : vector<1x11xf32>
    %883 = arith.addf %876, %882 : vector<1x11xf32>
    %884 = arith.subf %763, %883 : vector<1x11xf32>
    %885 = vector.broadcast %884 : vector<1x11xf32> to vector<9x11xf32>
    %886 = arith.addf %751, %885 : vector<9x11xf32>
    %cst_406 = arith.constant dense<0xFF800000> : vector<9xf32>
    %887 = vector.multi_reduction <maximumf>, %886, %cst_406 [1] : vector<9x11xf32> to vector<9xf32>
    %888 = vector.shape_cast %887 : vector<9xf32> to vector<9x1xf32>
    %889 = vector.broadcast %888 : vector<9x1xf32> to vector<9x11xf32>
    %890 = arith.subf %886, %889 : vector<9x11xf32>
    %891 = math.exp %890 : vector<9x11xf32>
    %cst_407 = arith.constant dense<0.000000e+00> : vector<9xf32>
    %892 = vector.multi_reduction <add>, %891, %cst_407 [1] : vector<9x11xf32> to vector<9xf32>
    %893 = vector.shape_cast %892 : vector<9xf32> to vector<9x1xf32>
    %894 = math.log %893 : vector<9x1xf32>
    %895 = arith.addf %888, %894 : vector<9x1xf32>
    %896 = arith.subf %757, %895 : vector<9x1xf32>
    %897 = vector.broadcast %896 : vector<9x1xf32> to vector<9x11xf32>
    %898 = arith.addf %751, %897 : vector<9x11xf32>
    %cst_408 = arith.constant dense<0xFF800000> : vector<11xf32>
    %899 = vector.multi_reduction <maximumf>, %898, %cst_408 [0] : vector<9x11xf32> to vector<11xf32>
    %900 = vector.shape_cast %899 : vector<11xf32> to vector<1x11xf32>
    %901 = vector.broadcast %900 : vector<1x11xf32> to vector<9x11xf32>
    %902 = arith.subf %898, %901 : vector<9x11xf32>
    %903 = math.exp %902 : vector<9x11xf32>
    %cst_409 = arith.constant dense<0.000000e+00> : vector<11xf32>
    %904 = vector.multi_reduction <add>, %903, %cst_409 [0] : vector<9x11xf32> to vector<11xf32>
    %905 = vector.shape_cast %904 : vector<11xf32> to vector<1x11xf32>
    %906 = math.log %905 : vector<1x11xf32>
    %907 = arith.addf %900, %906 : vector<1x11xf32>
    %908 = arith.subf %763, %907 : vector<1x11xf32>
    %909 = vector.broadcast %908 : vector<1x11xf32> to vector<9x11xf32>
    %910 = arith.addf %751, %909 : vector<9x11xf32>
    %cst_410 = arith.constant dense<0xFF800000> : vector<9xf32>
    %911 = vector.multi_reduction <maximumf>, %910, %cst_410 [1] : vector<9x11xf32> to vector<9xf32>
    %912 = vector.shape_cast %911 : vector<9xf32> to vector<9x1xf32>
    %913 = vector.broadcast %912 : vector<9x1xf32> to vector<9x11xf32>
    %914 = arith.subf %910, %913 : vector<9x11xf32>
    %915 = math.exp %914 : vector<9x11xf32>
    %cst_411 = arith.constant dense<0.000000e+00> : vector<9xf32>
    %916 = vector.multi_reduction <add>, %915, %cst_411 [1] : vector<9x11xf32> to vector<9xf32>
    %917 = vector.shape_cast %916 : vector<9xf32> to vector<9x1xf32>
    %918 = math.log %917 : vector<9x1xf32>
    %919 = arith.addf %912, %918 : vector<9x1xf32>
    %920 = arith.subf %757, %919 : vector<9x1xf32>
    %921 = vector.broadcast %920 : vector<9x1xf32> to vector<9x11xf32>
    %922 = arith.addf %751, %921 : vector<9x11xf32>
    %cst_412 = arith.constant dense<0xFF800000> : vector<11xf32>
    %923 = vector.multi_reduction <maximumf>, %922, %cst_412 [0] : vector<9x11xf32> to vector<11xf32>
    %924 = vector.shape_cast %923 : vector<11xf32> to vector<1x11xf32>
    %925 = vector.broadcast %924 : vector<1x11xf32> to vector<9x11xf32>
    %926 = arith.subf %922, %925 : vector<9x11xf32>
    %927 = math.exp %926 : vector<9x11xf32>
    %cst_413 = arith.constant dense<0.000000e+00> : vector<11xf32>
    %928 = vector.multi_reduction <add>, %927, %cst_413 [0] : vector<9x11xf32> to vector<11xf32>
    %929 = vector.shape_cast %928 : vector<11xf32> to vector<1x11xf32>
    %930 = math.log %929 : vector<1x11xf32>
    %931 = arith.addf %924, %930 : vector<1x11xf32>
    %932 = arith.subf %763, %931 : vector<1x11xf32>
    %933 = vector.broadcast %932 : vector<1x11xf32> to vector<9x11xf32>
    %934 = arith.addf %751, %933 : vector<9x11xf32>
    %cst_414 = arith.constant dense<0xFF800000> : vector<9xf32>
    %935 = vector.multi_reduction <maximumf>, %934, %cst_414 [1] : vector<9x11xf32> to vector<9xf32>
    %936 = vector.shape_cast %935 : vector<9xf32> to vector<9x1xf32>
    %937 = vector.broadcast %936 : vector<9x1xf32> to vector<9x11xf32>
    %938 = arith.subf %934, %937 : vector<9x11xf32>
    %939 = math.exp %938 : vector<9x11xf32>
    %cst_415 = arith.constant dense<0.000000e+00> : vector<9xf32>
    %940 = vector.multi_reduction <add>, %939, %cst_415 [1] : vector<9x11xf32> to vector<9xf32>
    %941 = vector.shape_cast %940 : vector<9xf32> to vector<9x1xf32>
    %942 = math.log %941 : vector<9x1xf32>
    %943 = arith.addf %936, %942 : vector<9x1xf32>
    %944 = arith.subf %757, %943 : vector<9x1xf32>
    %945 = vector.broadcast %944 : vector<9x1xf32> to vector<9x11xf32>
    %946 = arith.addf %751, %945 : vector<9x11xf32>
    %cst_416 = arith.constant dense<0xFF800000> : vector<11xf32>
    %947 = vector.multi_reduction <maximumf>, %946, %cst_416 [0] : vector<9x11xf32> to vector<11xf32>
    %948 = vector.shape_cast %947 : vector<11xf32> to vector<1x11xf32>
    %949 = vector.broadcast %948 : vector<1x11xf32> to vector<9x11xf32>
    %950 = arith.subf %946, %949 : vector<9x11xf32>
    %951 = math.exp %950 : vector<9x11xf32>
    %cst_417 = arith.constant dense<0.000000e+00> : vector<11xf32>
    %952 = vector.multi_reduction <add>, %951, %cst_417 [0] : vector<9x11xf32> to vector<11xf32>
    %953 = vector.shape_cast %952 : vector<11xf32> to vector<1x11xf32>
    %954 = math.log %953 : vector<1x11xf32>
    %955 = arith.addf %948, %954 : vector<1x11xf32>
    %956 = arith.subf %763, %955 : vector<1x11xf32>
    %957 = vector.broadcast %956 : vector<1x11xf32> to vector<9x11xf32>
    %958 = arith.addf %751, %957 : vector<9x11xf32>
    %cst_418 = arith.constant dense<0xFF800000> : vector<9xf32>
    %959 = vector.multi_reduction <maximumf>, %958, %cst_418 [1] : vector<9x11xf32> to vector<9xf32>
    %960 = vector.shape_cast %959 : vector<9xf32> to vector<9x1xf32>
    %961 = vector.broadcast %960 : vector<9x1xf32> to vector<9x11xf32>
    %962 = arith.subf %958, %961 : vector<9x11xf32>
    %963 = math.exp %962 : vector<9x11xf32>
    %cst_419 = arith.constant dense<0.000000e+00> : vector<9xf32>
    %964 = vector.multi_reduction <add>, %963, %cst_419 [1] : vector<9x11xf32> to vector<9xf32>
    %965 = vector.shape_cast %964 : vector<9xf32> to vector<9x1xf32>
    %966 = math.log %965 : vector<9x1xf32>
    %967 = arith.addf %960, %966 : vector<9x1xf32>
    %968 = arith.subf %757, %967 : vector<9x1xf32>
    %969 = vector.broadcast %968 : vector<9x1xf32> to vector<9x11xf32>
    %970 = arith.addf %751, %969 : vector<9x11xf32>
    %cst_420 = arith.constant dense<0xFF800000> : vector<11xf32>
    %971 = vector.multi_reduction <maximumf>, %970, %cst_420 [0] : vector<9x11xf32> to vector<11xf32>
    %972 = vector.shape_cast %971 : vector<11xf32> to vector<1x11xf32>
    %973 = vector.broadcast %972 : vector<1x11xf32> to vector<9x11xf32>
    %974 = arith.subf %970, %973 : vector<9x11xf32>
    %975 = math.exp %974 : vector<9x11xf32>
    %cst_421 = arith.constant dense<0.000000e+00> : vector<11xf32>
    %976 = vector.multi_reduction <add>, %975, %cst_421 [0] : vector<9x11xf32> to vector<11xf32>
    %977 = vector.shape_cast %976 : vector<11xf32> to vector<1x11xf32>
    %978 = math.log %977 : vector<1x11xf32>
    %979 = arith.addf %972, %978 : vector<1x11xf32>
    %980 = arith.subf %763, %979 : vector<1x11xf32>
    %981 = vector.broadcast %980 : vector<1x11xf32> to vector<9x11xf32>
    %982 = arith.addf %751, %981 : vector<9x11xf32>
    %cst_422 = arith.constant dense<0xFF800000> : vector<9xf32>
    %983 = vector.multi_reduction <maximumf>, %982, %cst_422 [1] : vector<9x11xf32> to vector<9xf32>
    %984 = vector.shape_cast %983 : vector<9xf32> to vector<9x1xf32>
    %985 = vector.broadcast %984 : vector<9x1xf32> to vector<9x11xf32>
    %986 = arith.subf %982, %985 : vector<9x11xf32>
    %987 = math.exp %986 : vector<9x11xf32>
    %cst_423 = arith.constant dense<0.000000e+00> : vector<9xf32>
    %988 = vector.multi_reduction <add>, %987, %cst_423 [1] : vector<9x11xf32> to vector<9xf32>
    %989 = vector.shape_cast %988 : vector<9xf32> to vector<9x1xf32>
    %990 = math.log %989 : vector<9x1xf32>
    %991 = arith.addf %984, %990 : vector<9x1xf32>
    %992 = arith.subf %757, %991 : vector<9x1xf32>
    %993 = vector.broadcast %992 : vector<9x1xf32> to vector<9x11xf32>
    %994 = arith.addf %751, %993 : vector<9x11xf32>
    %cst_424 = arith.constant dense<0xFF800000> : vector<11xf32>
    %995 = vector.multi_reduction <maximumf>, %994, %cst_424 [0] : vector<9x11xf32> to vector<11xf32>
    %996 = vector.shape_cast %995 : vector<11xf32> to vector<1x11xf32>
    %997 = vector.broadcast %996 : vector<1x11xf32> to vector<9x11xf32>
    %998 = arith.subf %994, %997 : vector<9x11xf32>
    %999 = math.exp %998 : vector<9x11xf32>
    %cst_425 = arith.constant dense<0.000000e+00> : vector<11xf32>
    %1000 = vector.multi_reduction <add>, %999, %cst_425 [0] : vector<9x11xf32> to vector<11xf32>
    %1001 = vector.shape_cast %1000 : vector<11xf32> to vector<1x11xf32>
    %1002 = math.log %1001 : vector<1x11xf32>
    %1003 = arith.addf %996, %1002 : vector<1x11xf32>
    %1004 = arith.subf %763, %1003 : vector<1x11xf32>
    %1005 = vector.broadcast %992 : vector<9x1xf32> to vector<9x11xf32>
    %1006 = arith.addf %751, %1005 : vector<9x11xf32>
    %1007 = vector.broadcast %1004 : vector<1x11xf32> to vector<9x11xf32>
    %1008 = arith.addf %1006, %1007 : vector<9x11xf32>
    %cst_426 = arith.constant -2.8903718 : f32
    %1009 = vector.broadcast %cst_426 : f32 to vector<9x11xf32>
    %1010 = arith.subf %1008, %1009 : vector<9x11xf32>
    %c0_427 = arith.constant 0 : index
    %c0_428 = arith.constant 0 : index
    %c0_429 = arith.constant 0 : index
    %1011 = vector.load %arg44[%c0_427, %c0_428, %c0_429] : memref<1x9x11xf32, #tpu.memory_space<vmem>>, vector<1x9x11xf32>
    %1012 = vector.shape_cast %1011 : vector<1x9x11xf32> to vector<9x11xf32>
    %1013 = vector.shape_cast %1010 : vector<9x11xf32> to vector<1x9x11xf32>
    tpu.vector_store %arg44[%c0_427, %c0_428, %c0_429], %1013 {strides = array<i32>} : memref<1x9x11xf32, #tpu.memory_space<vmem>>, vector<1x9x11xf32>,
    return
  }
  func.func @transform_0(%arg0: i32) -> (i32, i32, i32) {
    %c0_i32 = arith.constant 0 : i32
    %c0_i32_0 = arith.constant 0 : i32
    %c0_i32_1 = arith.constant 0 : i32
    return %arg0, %c0_i32, %c0_i32_0 : i32, i32, i32
  }
  func.func @transform_1(%arg0: i32) -> (i32, i32, i32) {
    %c0_i32 = arith.constant 0 : i32
    %c0_i32_0 = arith.constant 0 : i32
    %c0_i32_1 = arith.constant 0 : i32
    return %arg0, %c0_i32, %c0_i32_0 : i32, i32, i32
  }
  func.func @transform_2(%arg0: i32) -> (i32, i32, i32) {
    %c0_i32 = arith.constant 0 : i32
    %c0_i32_0 = arith.constant 0 : i32
    %c0_i32_1 = arith.constant 0 : i32
    return %arg0, %c0_i32, %c0_i32_0 : i32, i32, i32
  }
  func.func @transform_3(%arg0: i32) -> (i32, i32, i32) {
    %c0_i32 = arith.constant 0 : i32
    %c0_i32_0 = arith.constant 0 : i32
    %c0_i32_1 = arith.constant 0 : i32
    return %arg0, %c0_i32, %c0_i32_0 : i32, i32, i32
  }
  func.func @transform_4(%arg0: i32) -> (i32, i32) {
    %c0_i32 = arith.constant 0 : i32
    %c0_i32_0 = arith.constant 0 : i32
    %c0_i32_1 = arith.constant 0 : i32
    return %c0_i32, %c0_i32_0 : i32, i32
  }
  func.func @transform_5(%arg0: i32) -> (i32, i32) {
    %c0_i32 = arith.constant 0 : i32
    %c0_i32_0 = arith.constant 0 : i32
    %c0_i32_1 = arith.constant 0 : i32
    return %c0_i32, %c0_i32_0 : i32, i32
  }
  func.func @transform_6(%arg0: i32) -> (i32, i32) {
    %c0_i32 = arith.constant 0 : i32
    %c0_i32_0 = arith.constant 0 : i32
    %c0_i32_1 = arith.constant 0 : i32
    return %c0_i32, %c0_i32_0 : i32, i32
  }
  func.func @transform_7(%arg0: i32) -> (i32, i32) {
    %c0_i32 = arith.constant 0 : i32
    %c0_i32_0 = arith.constant 0 : i32
    %c0_i32_1 = arith.constant 0 : i32
    return %c0_i32, %c0_i32_0 : i32, i32
  }
  func.func @transform_8(%arg0: i32) -> (i32, i32) {
    %c0_i32 = arith.constant 0 : i32
    %c0_i32_0 = arith.constant 0 : i32
    %c0_i32_1 = arith.constant 0 : i32
    return %c0_i32, %c0_i32_0 : i32, i32
  }
  func.func @transform_9(%arg0: i32) -> (i32, i32) {
    %c0_i32 = arith.constant 0 : i32
    %c0_i32_0 = arith.constant 0 : i32
    %c0_i32_1 = arith.constant 0 : i32
    return %c0_i32, %c0_i32_0 : i32, i32
  }
  func.func @transform_10(%arg0: i32) -> (i32, i32) {
    %c0_i32 = arith.constant 0 : i32
    %c0_i32_0 = arith.constant 0 : i32
    %c0_i32_1 = arith.constant 0 : i32
    return %c0_i32, %c0_i32_0 : i32, i32
  }
  func.func @transform_11(%arg0: i32) -> (i32, i32) {
    %c0_i32 = arith.constant 0 : i32
    %c0_i32_0 = arith.constant 0 : i32
    %c0_i32_1 = arith.constant 0 : i32
    return %c0_i32, %c0_i32_0 : i32, i32
  }
  func.func @transform_12(%arg0: i32) -> (i32, i32) {
    %c0_i32 = arith.constant 0 : i32
    %c0_i32_0 = arith.constant 0 : i32
    %c0_i32_1 = arith.constant 0 : i32
    return %c0_i32, %c0_i32_0 : i32, i32
  }
  func.func @transform_13(%arg0: i32) -> (i32, i32) {
    %c0_i32 = arith.constant 0 : i32
    %c0_i32_0 = arith.constant 0 : i32
    %c0_i32_1 = arith.constant 0 : i32
    return %c0_i32, %c0_i32_0 : i32, i32
  }
  func.func @transform_14(%arg0: i32) -> (i32, i32) {
    %c0_i32 = arith.constant 0 : i32
    %c0_i32_0 = arith.constant 0 : i32
    %c0_i32_1 = arith.constant 0 : i32
    return %c0_i32, %c0_i32_0 : i32, i32
  }
  func.func @transform_15(%arg0: i32) -> (i32, i32) {
    %c0_i32 = arith.constant 0 : i32
    %c0_i32_0 = arith.constant 0 : i32
    %c0_i32_1 = arith.constant 0 : i32
    return %c0_i32, %c0_i32_0 : i32, i32
  }
  func.func @transform_16(%arg0: i32) -> (i32, i32) {
    %c0_i32 = arith.constant 0 : i32
    %c0_i32_0 = arith.constant 0 : i32
    %c0_i32_1 = arith.constant 0 : i32
    return %c0_i32, %c0_i32_0 : i32, i32
  }
  func.func @transform_17(%arg0: i32) -> (i32, i32) {
    %c0_i32 = arith.constant 0 : i32
    %c0_i32_0 = arith.constant 0 : i32
    %c0_i32_1 = arith.constant 0 : i32
    return %c0_i32, %c0_i32_0 : i32, i32
  }
  func.func @transform_18(%arg0: i32) -> (i32, i32) {
    %c0_i32 = arith.constant 0 : i32
    %c0_i32_0 = arith.constant 0 : i32
    %c0_i32_1 = arith.constant 0 : i32
    return %c0_i32, %c0_i32_0 : i32, i32
  }
  func.func @transform_19(%arg0: i32) -> (i32, i32) {
    %c0_i32 = arith.constant 0 : i32
    %c0_i32_0 = arith.constant 0 : i32
    %c0_i32_1 = arith.constant 0 : i32
    return %c0_i32, %c0_i32_0 : i32, i32
  }
  func.func @transform_20(%arg0: i32) -> (i32, i32) {
    %c0_i32 = arith.constant 0 : i32
    %c0_i32_0 = arith.constant 0 : i32
    %c0_i32_1 = arith.constant 0 : i32
    return %c0_i32, %c0_i32_0 : i32, i32
  }
  func.func @transform_21(%arg0: i32) -> (i32, i32) {
    %c0_i32 = arith.constant 0 : i32
    %c0_i32_0 = arith.constant 0 : i32
    %c0_i32_1 = arith.constant 0 : i32
    return %c0_i32, %c0_i32_0 : i32, i32
  }
  func.func @transform_22(%arg0: i32) -> (i32, i32) {
    %c0_i32 = arith.constant 0 : i32
    %c0_i32_0 = arith.constant 0 : i32
    %c0_i32_1 = arith.constant 0 : i32
    return %c0_i32, %c0_i32_0 : i32, i32
  }
  func.func @transform_23(%arg0: i32) -> (i32, i32) {
    %c0_i32 = arith.constant 0 : i32
    %c0_i32_0 = arith.constant 0 : i32
    %c0_i32_1 = arith.constant 0 : i32
    return %c0_i32, %c0_i32_0 : i32, i32
  }
  func.func @transform_24(%arg0: i32) -> (i32, i32) {
    %c0_i32 = arith.constant 0 : i32
    %c0_i32_0 = arith.constant 0 : i32
    %c0_i32_1 = arith.constant 0 : i32
    return %c0_i32, %c0_i32_0 : i32, i32
  }
  func.func @transform_25(%arg0: i32) -> (i32, i32) {
    %c0_i32 = arith.constant 0 : i32
    %c0_i32_0 = arith.constant 0 : i32
    %c0_i32_1 = arith.constant 0 : i32
    return %c0_i32, %c0_i32_0 : i32, i32
  }
  func.func @transform_26(%arg0: i32) -> (i32, i32) {
    %c0_i32 = arith.constant 0 : i32
    %c0_i32_0 = arith.constant 0 : i32
    %c0_i32_1 = arith.constant 0 : i32
    return %c0_i32, %c0_i32_0 : i32, i32
  }
  func.func @transform_27(%arg0: i32) -> (i32, i32) {
    %c0_i32 = arith.constant 0 : i32
    %c0_i32_0 = arith.constant 0 : i32
    %c0_i32_1 = arith.constant 0 : i32
    return %c0_i32, %c0_i32_0 : i32, i32
  }
  func.func @transform_28(%arg0: i32) -> (i32, i32) {
    %c0_i32 = arith.constant 0 : i32
    %c0_i32_0 = arith.constant 0 : i32
    %c0_i32_1 = arith.constant 0 : i32
    return %c0_i32, %c0_i32_0 : i32, i32
  }
  func.func @transform_29(%arg0: i32) -> (i32, i32) {
    %c0_i32 = arith.constant 0 : i32
    %c0_i32_0 = arith.constant 0 : i32
    %c0_i32_1 = arith.constant 0 : i32
    return %c0_i32, %c0_i32_0 : i32, i32
  }
  func.func @transform_30(%arg0: i32) -> (i32, i32) {
    %c0_i32 = arith.constant 0 : i32
    %c0_i32_0 = arith.constant 0 : i32
    %c0_i32_1 = arith.constant 0 : i32
    return %c0_i32, %c0_i32_0 : i32, i32
  }
  func.func @transform_31(%arg0: i32) -> (i32, i32) {
    %c0_i32 = arith.constant 0 : i32
    %c0_i32_0 = arith.constant 0 : i32
    %c0_i32_1 = arith.constant 0 : i32
    return %c0_i32, %c0_i32_0 : i32, i32
  }
  func.func @transform_32(%arg0: i32) -> (i32, i32) {
    %c0_i32 = arith.constant 0 : i32
    %c0_i32_0 = arith.constant 0 : i32
    %c0_i32_1 = arith.constant 0 : i32
    return %c0_i32, %c0_i32_0 : i32, i32
  }
  func.func @transform_33(%arg0: i32) -> (i32, i32) {
    %c0_i32 = arith.constant 0 : i32
    %c0_i32_0 = arith.constant 0 : i32
    %c0_i32_1 = arith.constant 0 : i32
    return %c0_i32, %c0_i32_0 : i32, i32
  }
  func.func @transform_34(%arg0: i32) -> (i32, i32) {
    %c0_i32 = arith.constant 0 : i32
    %c0_i32_0 = arith.constant 0 : i32
    %c0_i32_1 = arith.constant 0 : i32
    return %c0_i32, %c0_i32_0 : i32, i32
  }
  func.func @transform_35(%arg0: i32) -> (i32, i32) {
    %c0_i32 = arith.constant 0 : i32
    %c0_i32_0 = arith.constant 0 : i32
    %c0_i32_1 = arith.constant 0 : i32
    return %c0_i32, %c0_i32_0 : i32, i32
  }
  func.func @transform_36(%arg0: i32) -> (i32, i32) {
    %c0_i32 = arith.constant 0 : i32
    %c0_i32_0 = arith.constant 0 : i32
    %c0_i32_1 = arith.constant 0 : i32
    return %c0_i32, %c0_i32_0 : i32, i32
  }
  func.func @transform_37(%arg0: i32) -> (i32, i32) {
    %c0_i32 = arith.constant 0 : i32
    %c0_i32_0 = arith.constant 0 : i32
    %c0_i32_1 = arith.constant 0 : i32
    return %c0_i32, %c0_i32_0 : i32, i32
  }
  func.func @transform_38(%arg0: i32) -> (i32, i32) {
    %c0_i32 = arith.constant 0 : i32
    %c0_i32_0 = arith.constant 0 : i32
    %c0_i32_1 = arith.constant 0 : i32
    return %c0_i32, %c0_i32_0 : i32, i32
  }
  func.func @transform_39(%arg0: i32) -> (i32, i32) {
    %c0_i32 = arith.constant 0 : i32
    %c0_i32_0 = arith.constant 0 : i32
    %c0_i32_1 = arith.constant 0 : i32
    return %c0_i32, %c0_i32_0 : i32, i32
  }
  func.func @transform_40(%arg0: i32) -> (i32, i32) {
    %c0_i32 = arith.constant 0 : i32
    %c0_i32_0 = arith.constant 0 : i32
    %c0_i32_1 = arith.constant 0 : i32
    return %c0_i32, %c0_i32_0 : i32, i32
  }
  func.func @transform_41(%arg0: i32) -> (i32, i32) {
    %c0_i32 = arith.constant 0 : i32
    %c0_i32_0 = arith.constant 0 : i32
    %c0_i32_1 = arith.constant 0 : i32
    return %c0_i32, %c0_i32_0 : i32, i32
  }
  func.func @transform_42(%arg0: i32) -> (i32, i32) {
    %c0_i32 = arith.constant 0 : i32
    %c0_i32_0 = arith.constant 0 : i32
    %c0_i32_1 = arith.constant 0 : i32
    return %c0_i32, %c0_i32_0 : i32, i32
  }
  func.func @transform_43(%arg0: i32) -> (i32, i32, i32) {
    %c0_i32 = arith.constant 0 : i32
    %c0_i32_0 = arith.constant 0 : i32
    %c0_i32_1 = arith.constant 0 : i32
    return %arg0, %c0_i32, %c0_i32_0 : i32, i32, i32
  }
}

</mosaic_0001>

<bundles_post_ra>
// kernel: tpu_custom_call.1
= control target key start
LH: loop header
LB: loop body
LE: loop exit
PB: predicated region body
PF: predicated region fallthrough
CT: control target
= control target key end

     0   :  { %s14089_s6 = smov 1   ;;  %s14090_s10 = smov 2   ;;  %s16560_s0 = inlined_call_operand.smem [shape: u32[44], index: -1, kind: input, shape index: {}] }
   0x1   :  { %s14145_s5 = sld [smem:[%s16560_s0]]   ;;  %s14091_s14 = smov 3  }
   0x2   :  { %s14150_s9 = sld [smem:[%s16560_s0 + %s14089_s6]]   ;;  %s14092_s18 = smov 4  }
   0x3   :  { %s14155_s13 = sld [smem:[%s16560_s0 + %s14090_s10]]   ;;  %s14093_s22 = smov 5  }
   0x4   :  { %s14160_s17 = sld [smem:[%s16560_s0 + %s14091_s14]]   ;;  %s14094_s26 = smov 6  }
   0x5   :  { %s14165_s21 = sld [smem:[%s16560_s0 + %s14092_s18]]   ;;  %s14095_s30 = smov 7  }
   0x6   :  { %s14170_s25 = sld [smem:[%s16560_s0 + %s14093_s22]]   ;;  %s14096_s4 = smov 8  }
   0x7   :  { %16709 = sst [smem:[#allocation2_spill]] %s14145_s5  ;;  %s14097_s10 = smov 9  }
   0x8   :  { %s14175_s29 = sld [smem:[%s16560_s0 + %s14094_s26]]   ;;  %s14098_s15 = smov 10  }
   0x9   :  { %s14180_s3 = sld [smem:[%s16560_s0 + %s14095_s30]]   ;;  %s14099_s20 = smov 11  }
   0xa   :  { %16710 = sst [smem:[#allocation3_spill]] %s14160_s17  ;;  %s14100_s26 = smov 12  }
   0xb   :  { %16711 = sst [smem:[#allocation4_spill]] %s14165_s21  ;;  %s14101_s1 = smov 13  }
   0xc   :  { %16712 = sst [smem:[#allocation5_spill]] %s14170_s25  ;;  %s14102_s7 = smov 14  }
   0xd   :  { %s14185_s8 = sld [smem:[%s16560_s0 + %s14096_s4]]   ;;  %s14104_s22 = smov 16  }
   0xe   :  { %16713 = sst [smem:[#allocation6_spill]] %s14175_s29  ;;  %s14105_s28 = smov 17  }
   0xf   :  { %16714 = sst [smem:[#allocation7_spill]] %s14180_s3 }
  0x10   :  { %s14190_s14 = sld [smem:[%s16560_s0 + %s14097_s10]]  }
  0x11   :  { %s14195_s19 = sld [smem:[%s16560_s0 + %s14098_s15]]   ;;  %s14103_s15 = smov 15  }
  0x12   :  { %s14200_s24 = sld [smem:[%s16560_s0 + %s14099_s20]]  }
  0x13   :  { %16715 = sst [smem:[#allocation8_spill]] %s14185_s8 }
  0x14   :  { %s14205_s30 = sld [smem:[%s16560_s0 + %s14100_s26]]  }
  0x15   :  { %s14210_s6 = sld [smem:[%s16560_s0 + %s14101_s1]]  }
  0x16   :  { %s14215_s12 = sld [smem:[%s16560_s0 + %s14102_s7]]   ;;  %s14106_s7 = smov 18  }
  0x17   :  { %16716 = sst [smem:[#allocation9_spill]] %s14195_s19 }
  0x18   :  { %s14220_s20 = sld [smem:[%s16560_s0 + %s14103_s15]]   ;;  %s14107_s15 = smov 19  }
  0x19   :  { %s14225_s27 = sld [smem:[%s16560_s0 + %s14104_s22]]   ;;  %s14108_s22 = smov 20  }
  0x1a   :  { %16717 = sst [smem:[#allocation10_spill]] %s14205_s30 }
  0x1b   :  { %16718 = sst [smem:[#allocation11_spill]] %s14210_s6 }
  0x1c   :  { %16719 = sst [smem:[#allocation12_spill]] %s14215_s12 }
  0x1d   :  { %s14230_s4 = sld [smem:[%s16560_s0 + %s14105_s28]]   ;;  %s14109_s28 = smov 21  }
  0x1e   :  { %16720 = sst [smem:[#allocation13_spill]] %s14220_s20 }
  0x1f   :  { %16721 = sst [smem:[#allocation14_spill]] %s14225_s27 }
  0x20   :  { %s14235_s21 = sld [smem:[%s16560_s0 + %s14106_s7]]   ;;  %s14110_s7 = smov 22  }
  0x21   :  { %s14240_s29 = sld [smem:[%s16560_s0 + %s14107_s15]]   ;;  %s14111_s15 = smov 23  }
  0x22   :  { %s14245_s25 = sld [smem:[%s16560_s0 + %s14108_s22]]   ;;  %s14112_s22 = smov 24  }
  0x23   :  { %16722 = sst [smem:[#allocation15_spill]] %s14230_s4 }
  0x24   :  { %s14250_s8 = sld [smem:[%s16560_s0 + %s14109_s28]]   ;;  %s14113_s28 = smov 25  }
  0x25   :  { %s14255_s27 = sld [smem:[%s16560_s0 + %s14110_s7]]   ;;  %s14114_s7 = smov 26  }
  0x26   :  { %16723 = sst [smem:[#allocation16_spill]] %s14235_s21 }
  0x27   :  { %s14260_s20 = sld [smem:[%s16560_s0 + %s14111_s15]]   ;;  %s14115_s15 = smov 27  }
  0x28   :  { %16724 = sst [smem:[#allocation17_spill]] %s14245_s25 }
  0x29   :  { %s14265_s25 = sld [smem:[%s16560_s0 + %s14112_s22]]   ;;  %s14116_s22 = smov 28  }
  0x2a   :  { %16725 = sst [smem:[#allocation18_spill]] %s14250_s8 }
  0x2b   :  { %16726 = sst [smem:[#allocation19_spill]] %s14255_s27 }
  0x2c   :  { %s14270_s8 = sld [smem:[%s16560_s0 + %s14113_s28]]   ;;  %s14117_s28 = smov 29  }
  0x2d   :  { %16727 = sst [smem:[#allocation20_spill]] %s14260_s20 }
  0x2e   :  { %s14275_s27 = sld [smem:[%s16560_s0 + %s14114_s7]]   ;;  %s14118_s7 = smov 30  }
  0x2f   :  { %16728 = sst [smem:[#allocation21_spill]] %s14265_s25 }
  0x30   :  { %s14280_s20 = sld [smem:[%s16560_s0 + %s14115_s15]]   ;;  %s14119_s15 = smov 31  }
  0x31   :  { %s14285_s25 = sld [smem:[%s16560_s0 + %s14116_s22]]   ;;  %s14120_s22 = smov 32  }
  0x32   :  { %16729 = sst [smem:[#allocation22_spill]] %s14270_s8 }
  0x33   :  { %s14290_s8 = sld [smem:[%s16560_s0 + %s14117_s28]]   ;;  %s14121_s28 = smov 33  }
  0x34   :  { %16730 = sst [smem:[#allocation23_spill]] %s14275_s27 }
  0x35   :  { %s14295_s27 = sld [smem:[%s16560_s0 + %s14118_s7]]   ;;  %s14122_s7 = smov 34  }
  0x36   :  { %16731 = sst [smem:[#allocation24_spill]] %s14280_s20 }
  0x37   :  { %16732 = sst [smem:[#allocation25_spill]] %s14285_s25 }
  0x38   :  { %s14300_s20 = sld [smem:[%s16560_s0 + %s14119_s15]]   ;;  %s14123_s15 = smov 35  }
  0x39   :  { %16733 = sst [smem:[#allocation26_spill]] %s14290_s8 }
  0x3a   :  { %s14305_s25 = sld [smem:[%s16560_s0 + %s14120_s22]]   ;;  %s14124_s22 = smov 36  }
  0x3b   :  { %16734 = sst [smem:[#allocation27_spill]] %s14295_s27 }
  0x3c   :  { %s14310_s8 = sld [smem:[%s16560_s0 + %s14121_s28]]   ;;  %s14125_s28 = smov 37  }
  0x3d   :  { %s14315_s27 = sld [smem:[%s16560_s0 + %s14122_s7]]   ;;  %s14126_s7 = smov 38  }
  0x3e   :  { %16735 = sst [smem:[#allocation28_spill]] %s14300_s20 }
  0x3f   :  { %s14320_s20 = sld [smem:[%s16560_s0 + %s14123_s15]]   ;;  %s14127_s15 = smov 39  }
  0x40   :  { %16736 = sst [smem:[#allocation29_spill]] %s14305_s25 }
  0x41   :  { %s14325_s25 = sld [smem:[%s16560_s0 + %s14124_s22]]   ;;  %s14128_s22 = smov 40  }
  0x42   :  { %s14330_s17 = sld [smem:[%s16560_s0 + %s14125_s28]]   ;;  %s14129_s28 = smov 41  }
  0x43   :  { %s14335_s12 = sld [smem:[%s16560_s0 + %s14126_s7]]   ;;  %s14130_s7 = smov 42  }
  0x44   :  { %s14340_s6 = sld [smem:[%s16560_s0 + %s14127_s15]]   ;;  %s14131_s15 = smov 43  }
  0x45   :  { %s14345_s30 = sld [smem:[%s16560_s0 + %s14128_s22]]   ;;  %s14362_s22 = smov 0  }
  0x46   :  { %s14350_s3 = sld [smem:[%s16560_s0 + %s14129_s28]]  }
  0x47   :  { %s14355_s19 = sld [smem:[%s16560_s0 + %s14130_s7]]  }
  0x48   :  { %s14360_s21 = sld [smem:[%s16560_s0 + %s14131_s15]]  }
  0x4a   :  { %16737 = sst [smem:[#allocation30_spill]] %s14340_s6 }
  0x4c   :  { %16738 = sst [smem:[#allocation31_spill]] %s14350_s3 }
  0x4d LB: > { %s16739_s6 = sld [smem:[#allocation30_spill]]  ;;  %s16740_s4 = sld [smem:[#allocation15_spill]]  ;;  %s14087_s22 = sphi %s14362_s22, %s97_s22  }
  0x4e   : > { %s16741_s3 = sld [smem:[#allocation31_spill]]  ;;  %s11749_s23 = sadd.s32 4294967295, %s14087_s22  }
  0x4f   : > { %p11753_p0 = scmp.ge.s32.totalorder %s14087_s22, 1  ;;  %p1209_p1 = scmp.lt.s32.totalorder %s14087_s22, 3 }
  0x51   : > { %p1210_p2 = pnand %p11753_p0, %p1209_p1 }
  0x53   : > { %1213 = sbr.rel (%p1210_p2) target bundleno = 17962 (0x462a), region = 192 }
  0x5a   : > { %p1326_p3 = scmp.lt.s32.totalorder %s11749_s23, 1  ;;  %s16742_s5 = sld [smem:[#allocation2_spill]]  ;;  %v14371_v0 = vld [vmem:[%s14325_s25] sm:$0xff]  ;;  %vm1368_vm0 = vcmask 23552   ;;  %v14132_v1 = vmov 0   ;;  %v1357_v3 = vld [vmem:[%s14310_s8 + $0x8] sm:$0xff] }
  0x5b   : > { %12531 = vmatprep.mubr.msk.f32.mxu0 %vm1368_vm0, %v14371_v0  ;;  %13770 = vset.pattern.permute.xlu0 %v14132_v1  ;;  %v1356_v2 = vld [vmem:[%s14310_s8] sm:$0xff]  ;;  %vm1375_vm1 = vcmask 1042432   ;;  %v14385_v6 = vld [vmem:[%s14325_s25 + $0x8] sm:$0xff]  ;;  %v1527_v11 = vld [vmem:[%s14330_s17 + $0x10] sm:$0xff]  ;;  %vm1549_vm2 = vcmask 130048   ;;  %vm1458_vm3 = vcmask 72704  }
  0x5c   : > { %s16990_s23 = smov (!%p1326_p3, %s11749_s23), 1  ;;  %1360 = vperm.xlu0 %13770, %v1356_v2   ;;  %13771 = vset.pattern.permute.xlu1 %v14132_v1  ;;  %v1454_v4 = vld [vmem:[%s14315_s27] sm:$0xff]  ;;  %v1455_v8 = vld [vmem:[%s14315_s27 + $0x8] sm:$0xff]  ;;  %v1528_v14 = vld [vmem:[%s14330_s17 + $0x18] sm:$0xff]  ;;  %vm1785_vm6 = vcmask 261120   ;;  %vm1970_vm7 = vcmask 89088  }
  0x5d   : > { %s11754_s0 = sshll.u32 %s16990_s23, 2  ;;  %1497 = vperm.xlu1 %13771, %v1454_v4   ;;  %v1456_v7 = vld [vmem:[%s14320_s20] sm:$0xff]  ;;  %v1457_v10 = vld [vmem:[%s14320_s20 + $0x8] sm:$0xff]  ;;  %v1649_v17 = vld [vmem:[%s14335_s12 + $0x10] sm:$0xff]  ;;  %s12070_s1 = sshll.u32 %s16990_s23, 5  ;;  %vm2592_vm14 = vcmask 64512  }
  0x5e   : > { %v1525_v9 = vld [vmem:[%s14330_s17] sm:$0xff]  ;;  %v1526_v12 = vld [vmem:[%s14330_s17 + $0x8] sm:$0xff]  ;;  %v1653_v19 = vld [vmem:[%s16739_s6 + $0x10] sm:$0xff]  ;;  %s1333_s28 = scalar_lea.vmem %s14150_s9, %s11754_s0  ;;  %s1338_s2 = scalar_lea.vmem %s14155_s13, %s12070_s1 }
  0x5f   : > { %v1647_v13 = vld [vmem:[%s14335_s12] sm:$0xff]  ;;  %v1648_v16 = vld [vmem:[%s14335_s12 + $0x8] sm:$0xff]  ;;  %v1650_v20 = vld [vmem:[%s14335_s12 + $0x18] sm:$0xff]  ;;  %s16750_s7 = sld [smem:[#allocation16_spill]]  ;;  %s16751_s10 = sld [smem:[#allocation9_spill]] }
  0x60   : > { %s1329_s26 = scalar_lea.vmem %s16742_s5, %s11754_s0  ;;  %1365 = vperm.xlu0 %13770, %v1357_v3   ;;  %v1651_v15 = vld [vmem:[%s16739_s6] sm:$0xff]  ;;  %v1652_v18 = vld [vmem:[%s16739_s6 + $0x8] sm:$0xff]  ;;  %v1654_v22 = vld [vmem:[%s16739_s6 + $0x18] sm:$0xff]  ;;  %s16752_s11 = sld [smem:[#allocation7_spill]] }
  0x61   : > { %v1353_v5 = vld [vmem:[%s1329_s26] sm:$0x7]  ;;  %1502 = vperm.xlu1 %13771, %v1455_v8   ;;  %v1763_v23 = vld [vmem:[%s16741_s3 + $0x10] sm:$0xff]  ;;  %v1762_v24 = vld [vmem:[%s16741_s3 + $0x8] sm:$0xff]  ;;  %s16753_s15 = sld [smem:[#allocation10_spill]]  ;;  %s16754_s16 = sld [smem:[#allocation11_spill]] }
  0x62   : > { %12529 = vmatprep.subr.msk.mxu0 %vm1375_vm1, %v1353_v5  ;;  %v1761_v21 = vld [vmem:[%s16741_s3] sm:$0xff]  ;;  %v1764_v26 = vld [vmem:[%s16741_s3 + $0x18] sm:$0xff]  ;;  %v2252_v28 = vld [vmem:[%s14200_s24 + $0x8] sm:$0xff]  ;;  %s16760_s18 = sld [smem:[#allocation12_spill]]  ;;  %s16766_s0 = sld [smem:[#allocation3_spill]] }
  0x63   : > { %12530 = vmatpush3.msk.msra.mxu0 %vm1375_vm1, %v1353_v5  ;;  %v2251_v25 = vld [vmem:[%s14200_s24] sm:$0xff]  ;;  %v2381_v29 = vld [vmem:[%s14190_s14 + $0x8] sm:$0xff]  ;;  %s16880_s3 = sld [smem:[#allocation20_spill]]  ;;  %s16882_s5 = sld [smem:[#allocation22_spill]] }
  0x64   : > { %12532 = vmatmul.mubr.msk.f32.vlgmr.msra.gmra.mrb[0].mxu0 %vm1368_vm0, %v14385_v6  ;;  %1509 = vperm.xlu0 %13770, %v1456_v7   ;;  %v2380_v27 = vld [vmem:[%s14190_s14] sm:$0xff]  ;;  %s16883_s6 = sld [smem:[#allocation23_spill]] }
  0x65   : > { %1514 = vperm.xlu1 %13771, %v1457_v10   ;;  %v14415_v30 = vld [vmem:[%s14345_s30] sm:$0xff] }
  0x66   : > { %12538 = vmatprep.mubr.msk.f32.mxu1 %vm1549_vm2, %v14415_v30 }
  0x68   : > { %1531 = vperm.xlu0 %13770, %v1525_v9   ;;  %s1343_s26 = scalar_lea.vmem %s16766_s0, %s12070_s1  ;;  %s16789_s1 = sld [smem:[#allocation14_spill]] }
  0x69   : > { %1536 = vperm.xlu1 %13771, %v1526_v12   ;;  %s16819_s0 = sld [smem:[#allocation8_spill]] }
  0x6c   : > { %1541 = vperm.xlu0 %13770, %v1527_v11  }
  0x6d   : > { %1546 = vperm.xlu1 %13771, %v1528_v14  }
  0x70   : > { %1707 = vperm.xlu0 %13770, %v1647_v13  }
  0x71   : > { %1712 = vperm.xlu1 %13771, %v1648_v16  }
  0x74   : > { %1731 = vperm.xlu0 %13770, %v1651_v15  }
  0x75   : > { %1736 = vperm.xlu1 %13771, %v1652_v18  }
  0x78   : > { %1717 = vperm.xlu0 %13770, %v1649_v17  }
  0x79   : > { %1722 = vperm.xlu1 %13771, %v1650_v20   ;;  %v14445_v20 = vld [vmem:[%s14345_s30 + $0x8] sm:$0xff] }
  0x7c   : > { %1741 = vperm.xlu0 %13770, %v1653_v19   ;;  %v1891_v19 = vld [vmem:[%s1333_s28] sm:$0x7]  ;;  %s16776_s28 = sld [smem:[#allocation13_spill]] }
  0x7d   : > { %1746 = vperm.xlu1 %13771, %v1654_v22   ;;  %v14456_v22 = vld [vmem:[%s14345_s30 + $0x18] sm:$0xff] }
  0x80   : > { %1767 = vperm.xlu0 %13770, %v1761_v21   ;;  %v14448_v21 = vld [vmem:[%s14345_s30 + $0x10] sm:$0xff] }
  0x81   : > { %1772 = vperm.xlu1 %13771, %v1762_v24  }
  0x84   : > { %1777 = vperm.xlu0 %13770, %v1763_v23   ;;  %v14468_v23 = vld [vmem:[%s14355_s19] sm:$0xff] }
  0x85   : > { %1782 = vperm.xlu1 %13771, %v1764_v26   ;;  %12552 = vmatprep.mubr.msk.f32.mxu0 %vm1785_vm6, %v14468_v23 }
  0x88   : > { %2257 = vperm.xlu0 %13770, %v2251_v25  }
  0x89   : > { %2262 = vperm.xlu1 %13771, %v2252_v28  }
  0x8c   : > { %2390 = vperm.xlu0 %13770, %v2380_v27  }
  0x8d   : > { %2395 = vperm.xlu1 %13771, %v2381_v29  }
  0xdb   : > { %v14419_v31 = vpop.permute.xlu0 %1360 }
  0xdc   : > { %v14429_v4 = vpop.permute.xlu1 %1497 }
  0xdf   : > { %v14421_v32 = vpop.permute.xlu0 %1365 }
  0xe0   : > { %v14431_v5 = vpop.permute.xlu1 %1502 }
  0xe3   : > { %v14435_v12 = vpop.permute.xlu0 %1509 }
  0xe4   : > { %v14437_v13 = vpop.permute.xlu1 %1514 }
  0xe7   : > { %v14472_v24 = vpop.permute.xlu0 %1531 }
  0xe8   : > { %v14474_v25 = vpop.permute.xlu1 %1536 }
  0xeb   : > { %v14479_v29 = vpop.permute.xlu0 %1541 }
 0x137   : > { %v12533_v33 = vpop.f32.mrb[0].mxu0 }
 0x138   : > { %v1451_v34 = vadd.f32 %v12533_v33, %v14421_v32  ;;  %v1445_v35 = vpop.f32.mrb[1].mxu0 }
 0x139   : > { %v1446_v36 = vadd.f32 %v1445_v35, %v14419_v31 }
 0x13a   : > { %v1460_v37 = vsel %vm1458_vm3, %v1451_v34, 0.0 }
 0x13b   : > { %v1459_v38 = vsel %vm1458_vm3, %v1446_v36, 0.0 }
 0x13c   : > { %v1461_v39 = vadd.f32 %v1460_v37, %v1459_v38 }
 0x13e   : > { %v1462_v40 = vrot.slane %v1461_v39, 4 }
 0x140   : > { %v1463_v41 = vadd.f32 %v1462_v40, %v1461_v39 }
 0x142   : > { %v1464_v42 = vrot.slane %v1463_v41, 2 }
 0x144   : > { %v1465_v43 = vadd.f32 %v1464_v42, %v1463_v41 }
 0x146   : > { %v1466_v44 = vrot.slane %v1465_v43, 1 }
 0x148   : > { %v1467_v45 = vadd.f32 %v1466_v44, %v1465_v43 }
 0x14a   : > { %v1469_v46 = vmul.f32 0.0625, %v1467_v45 }
 0x14c   : > { %v1470_v47 = vsub.f32 %v1446_v36, %v1469_v46  ;;  %v1471_v48 = vsub.f32 %v1451_v34, %v1469_v46  ;;  %v14482_v34 = vpop.permute.xlu1 %1546 }
 0x14e   : > { %v1472_v49 = vmul.f32 %v1470_v47, %v1470_v47  ;;  %v1473_v50 = vmul.f32 %v1471_v48, %v1471_v48 }
 0x150   : > { %v1474_v51 = vsel %vm1458_vm3, %v1472_v49, 0.0  ;;  %v1475_v52 = vsel %vm1458_vm3, %v1473_v50, 0.0 }
 0x151   : > { %v1476_v53 = vadd.f32 %v1475_v52, %v1474_v51 }
 0x153   : > { %v1477_v54 = vrot.slane %v1476_v53, 4 }
 0x155   : > { %v1478_v55 = vadd.f32 %v1477_v54, %v1476_v53 }
 0x157   : > { %v1479_v56 = vrot.slane %v1478_v55, 2 }
 0x159   : > { %v1480_v57 = vadd.f32 %v1479_v56, %v1478_v55 }
 0x15b   : > { %v1481_v58 = vrot.slane %v1480_v57, 1 }
 0x15d   : > { %v1482_v59 = vadd.f32 %v1481_v58, %v1480_v57 }
 0x15f   : > { %v1483_v60 = vmul.f32 0.06666667, %v1482_v59 }
 0x161   : > { %13772 = vrsqrt.f32 %v1483_v60  ;;  %vm1486_vm4 = vcmp.eq.f32.partialorder %v1483_v60, inf  ;;  %v1489_v63 = vand.u32 2147483648, %v1483_v60  ;;  %vm1488_vm5 = vcmp.eq.f32.partialorder %v1483_v60, 0.0 }
 0x16b   : > { %v13773_v61 = vpop.eup %13772 }
 0x16c   : > { %v1485_v62 = vmul.f32 %v13773_v61, %v1483_v60 }
 0x16e   : > { %v1487_v1 = vsel %vm1486_vm4, %v1483_v60, %v1485_v62  ;;  %vm4546_vm4 = vcmask 523264  }
 0x16f   : > { %v1490_v2 = vsel %vm1488_vm5, %v1489_v63, %v1487_v1 }
 0x170   : > { %v1491_v3 = vadd.f32 1e-06, %v1490_v2 }
 0x172   : > { %13774 = vrcp.f32 %v1491_v3 }
 0x17c   : > { %v13775_v7 = vpop.eup %13774 }
 0x17d   : > { %v1493_v8 = vmul.f32 %v13775_v7, %v1470_v47  ;;  %v1494_v9 = vmul.f32 %v13775_v7, %v1471_v48 }
 0x17f   : > { %v1505_v10 = vmul.f32 %v14429_v4, %v1493_v8  ;;  %v1506_v11 = vmul.f32 %v14431_v5, %v1494_v9 }
 0x181   : > { %v1518_v14 = vadd.f32 %v14437_v13, %v1506_v11  ;;  %v1517_v15 = vadd.f32 %v14435_v12, %v1505_v10 }
 0x183   : > { %v1520_v16 = vmax.f32 %v1518_v14, 0.0  ;;  %v1519_v17 = vmax.f32 %v1517_v15, 0.0 }
 0x185   : > { %v13330_v18 = vpack.c.bf16 %v1520_v16, %v1519_v17 }
 0x187   : > { %13331 = vmatprep.subr.bf16.mxu1 %v13330_v18 }
 0x188   : > { %13333 = vmatpush3.bf16.msra.mxu1 %v13330_v18 }
 0x189   : > { %12558 = vmatprep.subr.msk.mxu1 %vm1375_vm1, %v1891_v19 }
 0x18b   : > { %12539 = vmatmul.mubr.msk.f32.vlgmr.msra.gmra.mrb[0].mxu1 %vm1549_vm2, %v14445_v20 }
 0x18c   : > { %12541 = vmatprep.mubr.msk.f32.mxu1 %vm1549_vm2, %v14448_v21  ;;  %12559 = vmatpush3.msk.msra.mxu1 %vm1375_vm1, %v1891_v19  ;;  %vm14134_vm1 = vmmov 0  }
 0x18f   : > { %12542 = vmatmul.mubr.msk.f32.gmra.mrb[2].mxu1 %vm1549_vm2, %v14456_v22 }
 0x190   : > { %12560 = vmatprep.mubr.msk.f32.mxu1 %vm1368_vm0, %v14371_v0 }
 0x193   : > { %12561 = vmatmul.mubr.msk.f32.vlgmr.msra.gmra.mrb[4].mxu1 %vm1368_vm0, %v14385_v6  ;;  %vm2681_vm0 = vcmask 65536  }
 0x194   : > { %12567 = vmatprep.mubr.msk.f32.mxu1 %vm1549_vm2, %v14415_v30 }
 0x25e   : > { %v12540_v26 = vpop.f32.mrb[0].mxu1 }
 0x25f   : > { %v1634_v27 = vadd.f32 %v12540_v26, %v14474_v25  ;;  %v1628_v0 = vpop.f32.mrb[1].mxu1 }
 0x260   : > { %v1629_v28 = vadd.f32 %v1628_v0, %v14472_v24 }
 0x261   : > { %v1656_v6 = vsel %vm1458_vm3, %v1634_v27, 0.0 }
 0x262   : > { %v1655_v30 = vsel %vm1458_vm3, %v1629_v28, 0.0  ;;  %v12543_v33 = vpop.f32.mrb[2].mxu1 }
 0x263   : > { %v1657_v35 = vadd.f32 %v1656_v6, %v1655_v30  ;;  %v1638_v36 = vpop.f32.mrb[3].mxu1  ;;  %v1644_v37 = vadd.f32 %v12543_v33, %v14482_v34 }
 0x264   : > { %v1639_v38 = vadd.f32 %v1638_v36, %v14479_v29 }
 0x265   : > { %v1660_v44 = vsel %vm1458_vm3, %v1644_v37, 0.0 }
 0x266   : > { %v1658_v39 = vsel %vm1458_vm3, %v1639_v38, 0.0  ;;  %v12562_v40 = vpop.f32.mrb[4].mxu1 }
 0x267   : > { %v1659_v41 = vadd.f32 %v1658_v39, %v1657_v35  ;;  %v1967_v42 = vadd.f32 %v12562_v40, %v14421_v32  ;;  %v1961_v43 = vpop.f32.mrb[5].mxu1 }
 0x268   : > { %v1962_v45 = vadd.f32 %v1961_v43, %v14419_v31 }
 0x269   : > { %v1661_v46 = vadd.f32 %v1660_v44, %v1659_v41  ;;  %v1972_v47 = vsel %vm1970_vm7, %v1967_v42, 0.0 }
 0x26a   : > { %v1971_v48 = vsel %vm1970_vm7, %v1962_v45, 0.0 }
 0x26b   : > { %v1662_v49 = vrot.slane %v1661_v46, 4  ;;  %v1973_v50 = vadd.f32 %v1972_v47, %v1971_v48 }
 0x26d   : > { %v1663_v51 = vadd.f32 %v1662_v49, %v1661_v46  ;;  %v1974_v52 = vrot.slane %v1973_v50, 4 }
 0x26f   : > { %v1664_v53 = vrot.slane %v1663_v51, 2  ;;  %v1975_v54 = vadd.f32 %v1974_v52, %v1973_v50 }
 0x271   : > { %v1665_v55 = vadd.f32 %v1664_v53, %v1663_v51  ;;  %v1976_v56 = vrot.slane %v1975_v54, 2 }
 0x273   : > { %v1666_v57 = vrot.slane %v1665_v55, 1  ;;  %v1977_v32 = vadd.f32 %v1976_v56, %v1975_v54  ;;  %v14516_v56 = vpop.permute.xlu1 %1712 }
 0x275   : > { %v1667_v58 = vadd.f32 %v1666_v57, %v1665_v55  ;;  %v1978_v59 = vrot.slane %v1977_v32, 1  ;;  %v14514_v55 = vpop.permute.xlu0 %1707 }
 0x277   : > { %v1669_v60 = vmul.f32 0.03125, %v1667_v58  ;;  %v1979_v61 = vadd.f32 %v1978_v59, %v1977_v32 }
 0x279   : > { %v14492_v31 = vsub.f32 %v1629_v28, %v1669_v60  ;;  %v14494_v62 = vsub.f32 %v1634_v27, %v1669_v60  ;;  %v14496_v63 = vsub.f32 %v1639_v38, %v1669_v60  ;;  %v14498_v1 = vsub.f32 %v1644_v37, %v1669_v60 }
 0x27a   : > { %v1980_v2 = vmul.f32 0.0625, %v1979_v61  ;;  %v14518_v61 = vpop.permute.xlu0 %1731 }
 0x27b   : > { %v1674_v3 = vmul.f32 %v14492_v31, %v14492_v31  ;;  %v1675_v7 = vmul.f32 %v14494_v62, %v14494_v62  ;;  %v1676_v8 = vmul.f32 %v14496_v63, %v14496_v63  ;;  %v1677_v11 = vmul.f32 %v14498_v1, %v14498_v1 }
 0x27c   : > { %v1981_v9 = vsub.f32 %v1962_v45, %v1980_v2  ;;  %v1982_v10 = vsub.f32 %v1967_v42, %v1980_v2  ;;  %v14520_v2 = vpop.permute.xlu1 %1736 }
 0x27d   : > { %v1678_v14 = vsel %vm1458_vm3, %v1674_v3, 0.0  ;;  %v1679_v15 = vsel %vm1458_vm3, %v1675_v7, 0.0  ;;  %v1681_v19 = vsel %vm1458_vm3, %v1676_v8, 0.0  ;;  %v1683_v28 = vsel %vm1458_vm3, %v1677_v11, 0.0 }
 0x27e   : > { %v1680_v16 = vadd.f32 %v1679_v15, %v1678_v14  ;;  %v1983_v17 = vmul.f32 %v1981_v9, %v1981_v9  ;;  %v1984_v18 = vmul.f32 %v1982_v10, %v1982_v10  ;;  %v14522_v3 = vpop.permute.xlu0 %1717 }
 0x280   : > { %v1682_v26 = vadd.f32 %v1681_v19, %v1680_v16  ;;  %v1985_v27 = vsel %vm1970_vm7, %v1983_v17, 0.0  ;;  %v1986_v0 = vsel %vm1970_vm7, %v1984_v18, 0.0  ;;  %v14524_v7 = vpop.permute.xlu1 %1722 }
 0x281   : > { %v1987_v6 = vadd.f32 %v1986_v0, %v1985_v27 }
 0x282   : > { %v1684_v30 = vadd.f32 %v1683_v28, %v1682_v26 }
 0x283   : > { %v1988_v33 = vrot.slane %v1987_v6, 4 }
 0x284   : > { %v1685_v35 = vrot.slane %v1684_v30, 4 }
 0x285   : > { %v1989_v36 = vadd.f32 %v1988_v33, %v1987_v6 }
 0x286   : > { %v1686_v37 = vadd.f32 %v1685_v35, %v1684_v30 }
 0x287   : > { %v1990_v38 = vrot.slane %v1989_v36, 2 }
 0x288   : > { %v1687_v39 = vrot.slane %v1686_v37, 2 }
 0x289   : > { %v1991_v40 = vadd.f32 %v1990_v38, %v1989_v36 }
 0x28a   : > { %v1688_v41 = vadd.f32 %v1687_v39, %v1686_v37 }
 0x28b   : > { %v1992_v42 = vrot.slane %v1991_v40, 1 }
 0x28c   : > { %v1689_v43 = vrot.slane %v1688_v41, 1 }
 0x28d   : > { %v1993_v44 = vadd.f32 %v1992_v42, %v1991_v40  ;;  %v14554_v42 = vld [vmem:[%s14355_s19 + $0x10] sm:$0xff] }
 0x28e   : > { %v1690_v45 = vadd.f32 %v1689_v43, %v1688_v41  ;;  %v14551_v41 = vld [vmem:[%s14355_s19 + $0x8] sm:$0xff] }
 0x28f   : > { %v1994_v46 = vmul.f32 0.06666667, %v1993_v44 }
 0x290   : > { %v1691_v47 = vmul.f32 0.032258064, %v1690_v45 }
 0x291   : > { %13776 = vrsqrt.f32 %v1994_v46  ;;  %vm1997_vm8 = vcmp.eq.f32.partialorder %v1994_v46, inf  ;;  %v2000_v52 = vand.u32 2147483648, %v1994_v46  ;;  %vm1999_vm10 = vcmp.eq.f32.partialorder %v1994_v46, 0.0 }
 0x292   : > { %13778 = vrsqrt.f32 %v1691_v47  ;;  %vm1694_vm9 = vcmp.eq.f32.partialorder %v1691_v47, inf  ;;  %v1697_v53 = vand.u32 2147483648, %v1691_v47  ;;  %vm1696_vm11 = vcmp.eq.f32.partialorder %v1691_v47, 0.0 }
 0x29b   : > { %v13777_v48 = vpop.eup %13776 }
 0x29c   : > { %v13779_v49 = vpop.eup %13778  ;;  %v1996_v50 = vmul.f32 %v13777_v48, %v1994_v46 }
 0x29d   : > { %v1693_v51 = vmul.f32 %v13779_v49, %v1691_v47 }
 0x29e   : > { %v1998_v54 = vsel %vm1997_vm8, %v1994_v46, %v1996_v50 }
 0x29f   : > { %v1695_v57 = vsel %vm1694_vm9, %v1691_v47, %v1693_v51  ;;  %v2001_v32 = vsel %vm1999_vm10, %v2000_v52, %v1998_v54  ;;  %v1350_v52 = vld [vmem:[%s1338_s2 + $0x8] sm:$0xff]  ;;  %vm4955_vm10 = vcmask 83968  }
 0x2a0   : > { %v1698_v58 = vsel %vm1696_vm11, %v1697_v53, %v1695_v57  ;;  %v2002_v59 = vadd.f32 1e-06, %v2001_v32  ;;  %v1349_v57 = vld [vmem:[%s1338_s2] sm:$0xff]  ;;  %vm15293_vm11 = vmpackc.low %vm1970_vm7, %vm1970_vm7 }
 0x2a1   : > { %v1699_v60 = vadd.f32 1e-06, %v1698_v58 }
 0x2a2   : > { %13780 = vrcp.f32 %v2002_v59 }
 0x2a3   : > { %13782 = vrcp.f32 %v1699_v60 }
 0x2ac   : > { %v13781_v8 = vpop.eup %13780 }
 0x2ad   : > { %v13783_v11 = vpop.eup %13782  ;;  %v2004_v14 = vmul.f32 %v13781_v8, %v1981_v9  ;;  %v2005_v15 = vmul.f32 %v13781_v8, %v1982_v10  ;;  %v14536_v10 = vpop.permute.xlu0 %1741 }
 0x2ae   : > { %v1703_v16 = vmul.f32 %v13783_v11, %v14496_v63  ;;  %v1701_v17 = vmul.f32 %v13783_v11, %v14492_v31  ;;  %v1702_v18 = vmul.f32 %v13783_v11, %v14494_v62  ;;  %v1704_v19 = vmul.f32 %v13783_v11, %v14498_v1  ;;  %v14538_v63 = vpop.permute.xlu1 %1746 }
 0x2af   : > { %v2006_v26 = vmul.f32 %v2004_v14, %v14429_v4  ;;  %v2007_v27 = vmul.f32 %v2005_v15, %v14431_v5  ;;  %v1352_v15 = vld [vmem:[%s1338_s2 + $0x18] sm:$0xff] }
 0x2b0   : > { %v1727_v0 = vmul.f32 %v14522_v3, %v1703_v16  ;;  %v1725_v28 = vmul.f32 %v14514_v55, %v1701_v17  ;;  %v1726_v6 = vmul.f32 %v14516_v56, %v1702_v18  ;;  %v1728_v9 = vmul.f32 %v14524_v7, %v1704_v19  ;;  %v1351_v18 = vld [vmem:[%s1338_s2 + $0x10] sm:$0xff]  ;;  %s16814_s2 = sld [smem:[#allocation19_spill]] }
 0x2b1   : > { %v2008_v31 = vadd.f32 %v2006_v26, %v14435_v12  ;;  %v2009_v62 = vadd.f32 %v2007_v27, %v14437_v13  ;;  %v14580_v48 = vpop.permute.xlu0 %1767 }
 0x2b2   : > { %v1749_v4 = vadd.f32 %v14518_v61, %v1725_v28  ;;  %v1750_v5 = vadd.f32 %v14520_v2, %v1726_v6  ;;  %v1751_v1 = vadd.f32 %v14536_v10, %v1727_v0  ;;  %v1752_v30 = vadd.f32 %v14538_v63, %v1728_v9  ;;  %v14577_v46 = vpop.permute.xlu1 %1772 }
 0x2b3   : > { %v2010_v33 = vmax.f32 %v2008_v31, 0.0  ;;  %v2011_v35 = vmax.f32 %v2009_v62, 0.0 }
 0x2b4   : > { %v1753_v36 = vmax.f32 %v1749_v4, 0.0  ;;  %v1754_v37 = vmax.f32 %v1750_v5, 0.0  ;;  %v1755_v38 = vmax.f32 %v1751_v1, 0.0  ;;  %v1756_v39 = vmax.f32 %v1752_v30, 0.0  ;;  %v2248_v5 = vld [vmem:[%s14240_s29 + $0x8] sm:$0xff] }
 0x2b5   : > { %v13342_v40 = vpack.c.bf16 %v2011_v35, %v2010_v33 }
 0x2b6   : > { %v13334_v12 = vpack.c.bf16 %v1754_v37, %v1753_v36  ;;  %v13338_v13 = vpack.c.bf16 %v1756_v39, %v1755_v38  ;;  %v14590_v8 = vpop.permute.xlu1 %1782 }
 0x2b7   : > { %13343 = vmatprep.subr.bf16.mxu1 %v13342_v40 }
 0x2b8   : > { %13345 = vmatpush3.bf16.msra.mxu1 %v13342_v40  ;;  %13335 = vmatprep.subr.bf16.mxu0 %v13334_v12 }
 0x2b9   : > { %13337 = vmatpush3.bf16.msra.mxu0 %v13334_v12 }
 0x2ba   : > { %13339 = vmatprep.subr.bf16.mxu0 %v13338_v13 }
 0x2bb   : > { %12568 = vmatmul.mubr.msk.f32.vlgmr.msra.gmra.mrb[6].mxu1 %vm1549_vm2, %v14445_v20  ;;  %v14563_v20 = vld [vmem:[%s14355_s19 + $0x18] sm:$0xff] }
 0x2bc   : > { %12570 = vmatprep.mubr.msk.f32.mxu1 %vm1549_vm2, %v14448_v21  ;;  %v2247_v21 = vld [vmem:[%s14240_s29] sm:$0xff] }
 0x2bd   : > { %13341 = vmatpush3.bf16.msra.mxu0 %v13338_v13 }
 0x2bf   : > { %12571 = vmatmul.mubr.msk.f32.gmra.mrb[8].mxu1 %vm1549_vm2, %v14456_v22  ;;  %vm14758_vm2 = vmpackc.low %vm1458_vm3, %vm1458_vm3 }
 0x2c0   : > { %12553 = vmatmul.mubr.msk.f32.vlgmr.msra.gmra.mrb[2].mxu0 %vm1785_vm6, %v14551_v41  ;;  %12595 = vmatprep.mubr.msk.f32.mxu1 %vm1785_vm6, %v2247_v21 }
 0x2c1   : > { %12555 = vmatprep.mubr.msk.f32.mxu0 %vm1785_vm6, %v14554_v42 }
 0x2c4   : > { %12556 = vmatmul.mubr.msk.f32.gmra.mrb[4].mxu0 %vm1785_vm6, %v14563_v20 }
 0x2c5   : > { %12581 = vmatprep.mubr.msk.f32.mxu0 %vm1785_vm6, %v14468_v23 }
 0x38e   : > { %v12569_v43 = vpop.f32.mrb[6].mxu1 }
 0x38f   : > { %v2084_v22 = vadd.f32 %v12569_v43, %v14474_v25  ;;  %v2078_v44 = vpop.f32.mrb[7].mxu1 }
 0x390   : > { %v2079_v45 = vadd.f32 %v2078_v44, %v14472_v24 }
 0x391   : > { %v2098_v47 = vsel %vm1970_vm7, %v2084_v22, 0.0 }
 0x392   : > { %v2097_v23 = vsel %vm1970_vm7, %v2079_v45, 0.0  ;;  %v12572_v49 = vpop.f32.mrb[8].mxu1 }
 0x393   : > { %v2099_v50 = vadd.f32 %v2098_v47, %v2097_v23  ;;  %v2088_v51 = vpop.f32.mrb[9].mxu1  ;;  %v12554_v53 = vpop.f32.mrb[2].mxu0  ;;  %v2094_v25 = vadd.f32 %v12572_v49, %v14482_v34 }
 0x394   : > { %v2089_v54 = vadd.f32 %v2088_v51, %v14479_v29  ;;  %v1870_v24 = vadd.f32 %v12554_v53, %v14577_v46  ;;  %v1864_v32 = vpop.f32.mrb[3].mxu0  ;;  %v14594_v34 = vpop.permute.xlu0 %1777 }
 0x395   : > { %v1865_v58 = vadd.f32 %v1864_v32, %v14580_v48  ;;  %v2102_v29 = vsel %vm1970_vm7, %v2094_v25, 0.0 }
 0x396   : > { %v2100_v59 = vsel %vm1970_vm7, %v2089_v54, 0.0  ;;  %v14588_v60 = vadd.f32 %v1870_v24, %v1350_v52 }
 0x397   : > { %v2101_v11 = vadd.f32 %v2100_v59, %v2099_v50  ;;  %v14592_v14 = vadd.f32 %v1865_v58, %v1349_v57  ;;  %v12557_v16 = vpop.f32.mrb[4].mxu0 }
 0x398   : > { %16743 = vst [vmem:[#allocation32_spill] sm:$0xff] %v14588_v60  ;;  %v1880_v17 = vadd.f32 %v12557_v16, %v14590_v8  ;;  %v1874_v19 = vpop.f32.mrb[5].mxu0 }
 0x399   : > { %16744 = vst [vmem:[#allocation33_spill] sm:$0xff] %v14592_v14  ;;  %v2103_v26 = vadd.f32 %v2102_v29, %v2101_v11  ;;  %v14600_v27 = vpack.c.bf16 %v14588_v60, %v14592_v14  ;;  %v1875_v0 = vadd.f32 %v1874_v19, %v14594_v34 }
 0x39a   : > { %v14603_v28 = vadd.f32 %v1880_v17, %v1352_v15 }
 0x39b   : > { %v2104_v6 = vrot.slane %v2103_v26, 4  ;;  %v14605_v9 = vadd.f32 %v1875_v0, %v1351_v18  ;;  %13355 = vmatprep.subr.bf16.mxu1 %v14600_v27 }
 0x39c   : > { %16745 = vst [vmem:[#allocation34_spill] sm:$0xff] %v14603_v28  ;;  %13357 = vmatpush3.bf16.msra.mxu1 %v14600_v27 }
 0x39d   : > { %16746 = vst [vmem:[#allocation35_spill] sm:$0xff] %v14605_v9  ;;  %v2105_v31 = vadd.f32 %v2104_v6, %v2103_v26  ;;  %v14611_v62 = vpack.c.bf16 %v14603_v28, %v14605_v9  ;;  %v1887_v28 = vld [vmem:[%s1343_s26] sm:$0xff] }
 0x39f   : > { %v2106_v4 = vrot.slane %v2105_v31, 2  ;;  %13359 = vmatprep.subr.bf16.mxu1 %v14611_v62 }
 0x3a0   : > { %13361 = vmatpush3.bf16.msra.mxu1 %v14611_v62 }
 0x3a1   : > { %v2107_v1 = vadd.f32 %v2106_v4, %v2105_v31 }
 0x3a3   : > { %v2108_v30 = vrot.slane %v2107_v1, 1  ;;  %12596 = vmatmul.mubr.msk.f32.vlgmr.msra.gmra.mrb[10].mxu1 %vm1785_vm6, %v2248_v5 }
 0x3a5   : > { %v2109_v33 = vadd.f32 %v2108_v30, %v2107_v1 }
 0x3a7   : > { %v2110_v35 = vmul.f32 0.03125, %v2109_v33 }
 0x3a9   : > { %v2111_v36 = vsub.f32 %v2079_v45, %v2110_v35  ;;  %v2112_v37 = vsub.f32 %v2084_v22, %v2110_v35  ;;  %v2113_v38 = vsub.f32 %v2089_v54, %v2110_v35  ;;  %v2114_v39 = vsub.f32 %v2094_v25, %v2110_v35 }
 0x3ab   : > { %v2115_v40 = vmul.f32 %v2111_v36, %v2111_v36  ;;  %v2116_v12 = vmul.f32 %v2112_v37, %v2112_v37  ;;  %v2117_v13 = vmul.f32 %v2113_v38, %v2113_v38  ;;  %v2118_v21 = vmul.f32 %v2114_v39, %v2114_v39 }
 0x3ad   : > { %v2119_v43 = vsel %vm1970_vm7, %v2115_v40, 0.0  ;;  %v2120_v44 = vsel %vm1970_vm7, %v2116_v12, 0.0  ;;  %v2122_v23 = vsel %vm1970_vm7, %v2117_v13, 0.0  ;;  %v2124_v50 = vsel %vm1970_vm7, %v2118_v21, 0.0  ;;  %v14675_v13 = vld [vmem:[%s16740_s4 + $0x28] sm:$0xff]  ;;  %v14680_v21 = vld [vmem:[%s16740_s4 + $0x30] sm:$0xff] }
 0x3ae   : > { %v2121_v47 = vadd.f32 %v2120_v44, %v2119_v43  ;;  %v14685_v43 = vld [vmem:[%s16740_s4 + $0x38] sm:$0xff] }
 0x3b0   : > { %v2123_v49 = vadd.f32 %v2122_v23, %v2121_v47 }
 0x3b2   : > { %v2125_v51 = vadd.f32 %v2124_v50, %v2123_v49 }
 0x3b4   : > { %v2126_v52 = vrot.slane %v2125_v51, 4 }
 0x3b6   : > { %v2127_v45 = vadd.f32 %v2126_v52, %v2125_v51 }
 0x3b8   : > { %v2128_v22 = vrot.slane %v2127_v45, 2 }
 0x3ba   : > { %v2129_v53 = vadd.f32 %v2128_v22, %v2127_v45 }
 0x3bc   : > { %v2130_v25 = vrot.slane %v2129_v53, 1 }
 0x3be   : > { %v2131_v54 = vadd.f32 %v2130_v25, %v2129_v53 }
 0x3c0   : > { %v2132_v24 = vmul.f32 0.032258064, %v2131_v54 }
 0x3c2   : > { %13784 = vrsqrt.f32 %v2132_v24  ;;  %vm2135_vm12 = vcmp.eq.f32.partialorder %v2132_v24, inf  ;;  %v2138_v58 = vand.u32 2147483648, %v2132_v24  ;;  %vm2137_vm13 = vcmp.eq.f32.partialorder %v2132_v24, 0.0 }
 0x3cc   : > { %v13785_v57 = vpop.eup %13784 }
 0x3cd   : > { %v2134_v32 = vmul.f32 %v13785_v57, %v2132_v24 }
 0x3cf   : > { %v2136_v59 = vsel %vm2135_vm12, %v2132_v24, %v2134_v32 }
 0x3d0   : > { %v2139_v11 = vsel %vm2137_vm13, %v2138_v58, %v2136_v59 }
 0x3d1   : > { %v2140_v15 = vadd.f32 1e-06, %v2139_v11 }
 0x3d3   : > { %13786 = vrcp.f32 %v2140_v15 }
 0x3dd   : > { %v13787_v16 = vpop.eup %13786 }
 0x3de   : > { %v2144_v29 = vmul.f32 %v13787_v16, %v2113_v38  ;;  %v2142_v17 = vmul.f32 %v13787_v16, %v2111_v36  ;;  %v2143_v18 = vmul.f32 %v13787_v16, %v2112_v37  ;;  %v2145_v19 = vmul.f32 %v13787_v16, %v2114_v39  ;;  %v14670_v38 = vpop.permute.xlu0 %2257 }
 0x3e0   : > { %v2148_v26 = vmul.f32 %v2144_v29, %v14522_v3  ;;  %v2146_v0 = vmul.f32 %v2142_v17, %v14514_v55  ;;  %v2147_v6 = vmul.f32 %v2143_v18, %v14516_v56  ;;  %v2149_v31 = vmul.f32 %v2145_v19, %v14524_v7  ;;  %v14637_v56 = vld [vmem:[%s16740_s4] sm:$0xff]  ;;  %v14653_v7 = vld [vmem:[%s16740_s4 + $0x18] sm:$0xff] }
 0x3e1   : > { %v2557_v18 = vlaneseq }
 0x3e2   : > { %v2150_v4 = vadd.f32 %v2146_v0, %v14518_v61  ;;  %v2151_v5 = vadd.f32 %v2147_v6, %v14520_v2  ;;  %v2152_v1 = vadd.f32 %v2148_v26, %v14536_v10  ;;  %v2153_v30 = vadd.f32 %v2149_v31, %v14538_v63  ;;  %v14645_v61 = vld [vmem:[%s16740_s4 + $0x8] sm:$0xff]  ;;  %v14650_v2 = vld [vmem:[%s16740_s4 + $0x10] sm:$0xff]  ;;  %v2250_v63 = vld [vmem:[%s14240_s29 + $0x18] sm:$0xff]  ;;  %v14699_v52 = vpop.permute.xlu0 %2390 }
 0x3e3   : > { %v2249_v10 = vld [vmem:[%s14240_s29 + $0x10] sm:$0xff]  ;;  %v14723_v19 = vand.u32 127, %v2557_v18 }
 0x3e4   : > { %v2154_v33 = vmax.f32 %v2150_v4, 0.0  ;;  %v2155_v35 = vmax.f32 %v2151_v5, 0.0  ;;  %v2156_v36 = vmax.f32 %v2152_v1, 0.0  ;;  %v2157_v37 = vmax.f32 %v2153_v30, 0.0  ;;  %12598 = vmatprep.mubr.msk.f32.mxu1 %vm1785_vm6, %v2249_v10 }
 0x3e5   : > { %12599 = vmatmul.mubr.msk.f32.gmra.mrb[12].mxu1 %vm1785_vm6, %v2250_v63  ;;  %vm2559_vm15 = vcmp.lt.s32.totalorder %v14723_v19, 8  ;;  %vm4834_vm9 = vcmp.lt.s32.totalorder %v14723_v19, 10 }
 0x3e6   : > { %v13346_v3 = vpack.c.bf16 %v2155_v35, %v2154_v33  ;;  %v13350_v55 = vpack.c.bf16 %v2157_v37, %v2156_v36 }
 0x3e8   : > { %13347 = vmatprep.subr.bf16.mxu0 %v13346_v3 }
 0x3e9   : > { %13349 = vmatpush3.bf16.msra.mxu0 %v13346_v3 }
 0x3ea   : > { %13351 = vmatprep.subr.bf16.mxu0 %v13350_v55 }
 0x3ed   : > { %13353 = vmatpush3.bf16.msra.mxu0 %v13350_v55 }
 0x3ee   : > { %13363 = vmatprep.subr.bf16.mxu0 %v14600_v27 }
 0x3f0   : > { %12582 = vmatmul.mubr.msk.f32.vlgmr.msra.gmra.mrb[6].mxu0 %vm1785_vm6, %v14551_v41  ;;  %v14661_v41 = vld [vmem:[%s16740_s4 + $0x20] sm:$0xff]  ;;  %s16881_s4 = sld [smem:[#allocation17_spill]] }
 0x3f1   : > { %13365 = vmatpush3.bf16.msra.mxu0 %v14600_v27  ;;  %12584 = vmatprep.mubr.msk.f32.mxu0 %vm1785_vm6, %v14554_v42  ;;  %v14668_v42 = vpop.permute.xlu1 %2262 }
 0x3f2   : > { %13367 = vmatprep.subr.bf16.mxu0 %v14611_v62 }
 0x3f4   : > { %12585 = vmatmul.mubr.msk.f32.gmra.mrb[8].mxu0 %vm1785_vm6, %v14563_v20 }
 0x3f5   : > { %13369 = vmatpush3.bf16.msra.mxu0 %v14611_v62  ;;  %12609 = vmatprep.mubr.msk.f32.mxu0 %vm1785_vm6, %v14637_v56  ;;  %v14697_v50 = vpop.permute.xlu1 %2395 }
 0x3f8   : > { %12610 = vmatmul.mubr.msk.f32.vlgmr.msra.gmra.mrb[10].mxu0 %vm1785_vm6, %v14645_v61 }
 0x3f9   : > { %12612 = vmatprep.mubr.msk.f32.mxu0 %vm1785_vm6, %v14650_v2 }
 0x3fc   : > { %12613 = vmatmul.mubr.msk.f32.gmra.mrb[12].mxu0 %vm1785_vm6, %v14653_v7 }
 0x3fd   : > { %12615 = vmatprep.mubr.msk.f32.mxu0 %vm1785_vm6, %v14661_v41 }
 0x400   : > { %12616 = vmatmul.mubr.msk.f32.gmra.mrb[14].mxu0 %vm1785_vm6, %v14675_v13 }
 0x401   : > { %12618 = vmatprep.mubr.msk.f32.mxu0 %vm1785_vm6, %v14680_v21 }
 0x404   : > { %12619 = vmatmul.mubr.msk.f32.gmra.mrb[16].mxu0 %vm1785_vm6, %v14685_v43 }
 0x476   : > { %v12597_v20 = vpop.f32.mrb[10].mxu1 }
 0x477   : > { %v2359_v39 = vadd.f32 %v12597_v20, %v14668_v42  ;;  %v2353_v40 = vpop.f32.mrb[11].mxu1  ;;  %v2253_v20 = vld [vmem:[%s14200_s24 + $0x10] sm:$0xff] }
 0x478   : > { %v2354_v12 = vadd.f32 %v2353_v40, %v14670_v38 }
 0x479   : > { %2781 = vxpose.xlu1.b32.start.end [1/1] (short) (narrow) %v2359_v39, 16  ;;  %v2385_v39 = vld [vmem:[%s14190_s14 + $0x28] sm:$0xff] }
 0x47a   : > { %2560 = vxpose.xlu0.b32.start.end [1/1] (short) (narrow) %v2354_v12, 16 }
 0x4b8   : > { %v14709_v58 = vpop.f32.mrb[12].mxu1 }
 0x4b9   : > { %v14713_v11 = vpop.f32.mrb[13].mxu1 }
 0x4c3   : > { %v14689_v44 = vpop.f32.mrb[6].mxu0 }
 0x4c4   : > { %v14691_v47 = vpop.f32.mrb[7].mxu0 }
 0x4c7   : > { %v14693_v23 = vpop.f32.mrb[8].mxu0 }
 0x4c8   : > { %v14695_v49 = vpop.f32.mrb[9].mxu0 }
 0x4cb   : > { %v12611_v51 = vpop.f32.mrb[10].mxu0 }
 0x4cc   : > { %v2524_v45 = vadd.f32 %v12611_v51, %v14697_v50  ;;  %v2518_v22 = vpop.f32.mrb[11].mxu0 }
 0x4cd   : > { %v2519_v53 = vadd.f32 %v2518_v22, %v14699_v52 }
 0x4ce   : > { %12633 = vmatprep.subr.mxu0 %v2524_v45 }
 0x4cf   : > { %12621 = vmatprep.subr.mxu1 %v2519_v53  ;;  %12634 = vmatpush3.msra.mxu0 %v2524_v45  ;;  %v14707_v32 = vpop.f32.mrb[12].mxu0 }
 0x4d0   : > { %12622 = vmatpush3.msra.mxu1 %v2519_v53  ;;  %v14711_v59 = vpop.f32.mrb[13].mxu0 }
 0x4d3   : > { %v14715_v15 = vpop.f32.mrb[14].mxu0 }
 0x4d4   : > { %v14717_v16 = vpop.f32.mrb[15].mxu0 }
 0x4d7   : > { %v14719_v29 = vpop.f32.mrb[16].mxu0 }
 0x4d8   : > { %v14721_v17 = vpop.f32.mrb[17].mxu0 }
 0x4f9   : > { %v2797_v25 = vpop.trf.xlu1 }
 0x4fa   : > { %v2576_v54 = vpop.trf.xlu0  ;;  %12635 = vmatprep.mubr.msk.f32.mxu0 %vm2592_vm14, %v2797_v25 }
 0x4fb   : > { %12623 = vmatprep.mubr.msk.f32.mxu1 %vm2592_vm14, %v2576_v54 }
 0x4fd   : > { %v2798_v24 = vpop.trf.xlu1 }
 0x4fe   : > { %v2577_v57 = vpop.trf.xlu0  ;;  %12636 = vmatmul.mubr.msk.f32.vlgmr.msra.gmra.mrb[18].mxu0 %vm2592_vm14, %v2798_v24 }
 0x4ff   : > { %12624 = vmatmul.mubr.msk.f32.vlgmr.msra.gmra.mrb[14].mxu1 %vm2592_vm14, %v2577_v57 }
 0x5d1   : > { %v12637_v26 = vpop.f32.mrb[18].mxu0 }
 0x5d2   : > { %v12625_v0 = vpop.f32.mrb[14].mxu1  ;;  %v2885_v6 = vpop.f32.mrb[19].mxu0  ;;  %v2895_v3 = vmul.f32 0.35355338, %v12637_v26 }
 0x5d3   : > { %v2675_v31 = vmul.f32 0.35355338, %v12625_v0  ;;  %v2665_v4 = vpop.f32.mrb[15].mxu1  ;;  %v2894_v5 = vmul.f32 0.35355338, %v2885_v6 }
 0x5d4   : > { %v2674_v1 = vmul.f32 0.35355338, %v2665_v4  ;;  %v2897_v10 = vsel %vm2559_vm15, %v2895_v3, -1e+30  ;;  %v16586_v3 = vmov 0.0  }
 0x5d5   : > { %v2677_v30 = vsel %vm2559_vm15, %v2675_v31, -1e+30  ;;  %v2896_v36 = vsel %vm2559_vm15, %v2894_v5, -1e+30  ;;  %v2901_v63 = vsel %vm2681_vm0, %v2897_v10, -inf  ;;  %12630 = vmatprep.mubr.msk.f32.mxu1 %vm14134_vm1, %v16586_v3 }
 0x5d6   : > { %v2682_v33 = vsel %vm2681_vm0, %v2677_v30, -inf  ;;  %v2676_v35 = vsel %vm2559_vm15, %v2674_v1, -1e+30  ;;  %v2898_v55 = vsel %vm1458_vm3, %v2896_v36, -inf }
 0x5d7   : > { %2683 = vmax.xlane.f32.xlu1 %v2682_v33  ;;  %v2678_v37 = vsel %vm1458_vm3, %v2676_v35, -inf  ;;  %v2382_v33 = vld [vmem:[%s14190_s14 + $0x10] sm:$0xff] }
 0x5d8   : > { %2679 = vmax.xlane.f32.xlu0 %v2678_v37  ;;  %v16588_v37 = vmov 0.0|0.0  }
 0x5d9   : > { %13370 = vmatprep.subr.bf16.mxu1 %v16588_v37 }
 0x5dc   : > { %2899 = vmax.xlane.f32.xlu0 %v2898_v55 }
 0x5e0   : > { %2902 = vmax.xlane.f32.xlu0 %v2901_v63  ;;  %v2254_v63 = vld [vmem:[%s14200_s24 + $0x18] sm:$0xff] }
 0x5e8   : > { %2267 = vperm.xlu1 %13771, %v2253_v20  }
 0x5ec   : > { %2415 = vperm.xlu1 %13771, %v2385_v39  }
 0x664   : > { %v2684_v45 = vpop.xlane.xlu1 %2683 }
 0x665   : > { %v2680_v40 = vpop.xlane.xlu0 %2679  ;;  %v2686_v53 = vsub.f32 %v2677_v30, %v2684_v45 }
 0x666   : > { %v2685_v12 = vsub.f32 %v2676_v35, %v2680_v40 }
 0x667   : > { %v2689_v24 = vmul.f32 1.442695, %v2686_v53 }
 0x668   : > { %v2687_v51 = vmul.f32 1.442695, %v2685_v12  ;;  %v14749_v55 = vpop.permute.xlu1 %2267 }
 0x669   : > { %v2900_v22 = vpop.xlane.xlu0 %2899 }
 0x66a   : > { %13788 = vpow2.f32 %v2687_v51  ;;  %v2904_v57 = vsub.f32 %v2896_v36, %v2900_v22  ;;  %v2384_v36 = vld [vmem:[%s14190_s14 + $0x20] sm:$0xff] }
 0x66c   : > { %v2906_v0 = vmul.f32 1.442695, %v2904_v57  ;;  %v14754_v20 = vpop.permute.xlu1 %2415 }
 0x66d   : > { %v2903_v25 = vpop.xlane.xlu0 %2902 }
 0x66e   : > { %v2905_v54 = vsub.f32 %v2897_v10, %v2903_v25  ;;  %v2364_v10 = vadd.f32 %v14713_v11, %v14749_v55  ;;  %v16747_v11 = vmov 0 }
 0x66f   : > { %v16748_v11 = vsel %vm14758_vm2, 4294967295, %v16747_v11 }
 0x670   : > { %v2908_v18 = vmul.f32 1.442695, %v2905_v54  ;;  %16749 = vst [vmem:[#allocation36_spill] sm:$0xff] %v16748_v11 }
 0x672   : > { %13790 = vpow2.f32 %v2908_v18 }
 0x673   : > { %13792 = vpow2.f32 %v2689_v24 }
 0x674   : > { %v13789_v26 = vpop.eup %13788  ;;  %13794 = vpow2.f32 %v2906_v0 }
 0x675   : > { %v2691_v6 = vsel %vm1458_vm3, %v13789_v26, 0.0 }
 0x676   : > { %2692 = vadd.xlane.f32.xlu1 %v2691_v6 }
 0x67c   : > { %v13791_v31 = vpop.eup %13790 }
 0x67d   : > { %v2913_v4 = vsel %vm2681_vm0, %v13791_v31, 0.0  ;;  %v13793_v5 = vpop.eup %13792 }
 0x67e   : > { %2914 = vadd.xlane.f32.xlu0 %v2913_v4  ;;  %v2694_v1 = vsel %vm2681_vm0, %v13793_v5, 0.0  ;;  %v13795_v30 = vpop.eup %13794 }
 0x67f   : > { %v2910_v35 = vsel %vm1458_vm3, %v13795_v30, 0.0 }
 0x682   : > { %2695 = vadd.xlane.f32.xlu0 %v2694_v1 }
 0x686   : > { %2911 = vadd.xlane.f32.xlu0 %v2910_v35  ;;  %v2780_v35 = vld [vmem:[%s16750_s7] sm:$0xff] }
 0x687   : > { %2400 = vperm.xlu1 %13771, %v2382_v33   ;;  %v2387_v33 = vld [vmem:[%s14190_s14 + $0x38] sm:$0xff] }
 0x69c   : > { %2410 = vperm.xlu0 %13770, %v2384_v36   ;;  %v3963_v36 = vld [vmem:[%s16751_s10 + $0x8] sm:$0xff] }
 0x6b0   : > { %3258 = vxpose.xlu1.b32.start.end [1/1] (short) (narrow) %v2364_v10, 16  ;;  %v3964_v10 = vld [vmem:[%s16751_s10 + $0x10] sm:$0xff] }
 0x6d2   : > { %2272 = vperm.xlu1 %13771, %v2254_v63   ;;  %v3965_v63 = vld [vmem:[%s16751_s10 + $0x18] sm:$0xff] }
 0x703   : > { %v2693_v39 = vpop.xlane.xlu1 %2692 }
 0x704   : > { %13796 = vrcp.f32 %v2693_v39  ;;  %v4264_v39 = vld [vmem:[%s16752_s11] sm:$0xff] }
 0x707   : > { %v14767_v6 = vpop.permute.xlu1 %2400 }
 0x708   : > { %v2529_v1 = vadd.f32 %v14711_v59, %v14767_v6 }
 0x70b   : > { %v2915_v40 = vpop.xlane.xlu0 %2914 }
 0x70e   : > { %v13797_v45 = vpop.eup %13796 }
 0x70f   : > { %v2696_v12 = vpop.xlane.xlu0 %2695  ;;  %v2699_v53 = vmul.f32 %v13797_v45, %v13789_v26  ;;  %v4328_v45 = vld [vmem:[%s16754_s16] sm:$0xff] }
 0x710   : > { %13798 = vrcp.f32 %v2696_v12  ;;  %v4270_v12 = vld [vmem:[%s16752_s11 + $0x30] sm:$0xff] }
 0x713   : > { %v2912_v51 = vpop.xlane.xlu0 %2911 }
 0x714   : > { %13800 = vrcp.f32 %v2912_v51  ;;  %v4320_v51 = vld [vmem:[%s16753_s15] sm:$0xff] }
 0x715   : > { %13802 = vrcp.f32 %v2915_v40  ;;  %v4268_v40 = vld [vmem:[%s16752_s11 + $0x20] sm:$0xff] }
 0x71a   : > { %v13799_v22 = vpop.eup %13798 }
 0x71b   : > { %v2700_v25 = vmul.f32 %v13799_v22, %v13793_v5  ;;  %v14765_v0 = vpop.permute.xlu0 %2410  ;;  %v4322_v22 = vld [vmem:[%s16753_s15 + $0x10] sm:$0xff] }
 0x71c   : > { %v2539_v4 = vadd.f32 %v14717_v16, %v14765_v0 }
 0x71d   : > { %v13371_v54 = vpack.c.bf16 %v2700_v25, %v2699_v53  ;;  %v4330_v53 = vld [vmem:[%s16754_s16 + $0x10] sm:$0xff]  ;;  %v4324_v25 = vld [vmem:[%s16753_s15 + $0x20] sm:$0xff] }
 0x71e   : > { %v13801_v24 = vpop.eup %13800 }
 0x71f   : > { %13373 = vmatpush3.bf16.xpose.msk.msra.mxu1 %vm14758_vm2, %v13371_v54  ;;  %v13803_v57 = vpop.eup %13802  ;;  %v2918_v18 = vmul.f32 %v13801_v24, %v13795_v30  ;;  %v4332_v54 = vld [vmem:[%s16754_s16 + $0x20] sm:$0xff] }
 0x720   : > { %13374 = vmatprep.subr.bf16.mxu1 %v16588_v37  ;;  %v2919_v26 = vmul.f32 %v13803_v57, %v13791_v31  ;;  %v2544_v31 = vadd.f32 %v14715_v15, %v14754_v20 }
 0x722   : > { %v13375_v5 = vpack.c.bf16 %v2919_v26, %v2918_v18  ;;  %v4326_v18 = vld [vmem:[%s16753_s15 + $0x30] sm:$0xff] }
 0x723   : > { %v4334_v26 = vld [vmem:[%s16754_s16 + $0x30] sm:$0xff] }
 0x726   : > { %12631 = vmatmul.mubr.msk.f32.vlgmr.msra.gmra.mrb[16].mxu1 %vm1458_vm3, %v2539_v4 }
 0x727   : > { %13377 = vmatpush3.bf16.xpose.msk.msra.mxu1 %vm14758_vm2, %v13375_v5  ;;  %12642 = vmatprep.mubr.msk.f32.mxu1 %vm14134_vm1, %v16586_v3 }
 0x728   : > { %12661 = vmatprep.subr.mxu1 %v2529_v1 }
 0x72e   : > { %12643 = vmatmul.mubr.msk.f32.vlgmr.msra.gmra.mrb[18].mxu1 %vm1458_vm3, %v2544_v31 }
 0x72f   : > { %12662 = vmatpush3.msra.mxu1 %v2529_v1 }
 0x730   : > { %v3274_v59 = vpop.trf.xlu1  ;;  %13378 = vmatprep.subr.bf16.mxu1 %v16588_v37 }
 0x731   : > { %12663 = vmatprep.mubr.msk.f32.mxu1 %vm2592_vm14, %v3274_v59 }
 0x734   : > { %v3275_v16 = vpop.trf.xlu1 }
 0x735   : > { %12664 = vmatmul.mubr.msk.f32.vlgmr.msra.gmra.mrb[20].mxu1 %vm2592_vm14, %v3275_v16 }
 0x736   : > { %12670 = vmatprep.mubr.msk.f32.mxu1 %vm14134_vm1, %v16586_v3 }
 0x751   : > { %v14786_v15 = vpop.permute.xlu1 %2272 }
 0x752   : > { %v2369_v30 = vadd.f32 %v14709_v58, %v14786_v15  ;;  %v4266_v58 = vld [vmem:[%s16752_s11 + $0x10] sm:$0xff] }
 0x754   : > { %3610 = vxpose.xlu1.b32.start.end [1/1] (short) (narrow) %v2369_v30, 16 }
 0x776   : > { %2425 = vperm.xlu1 %13771, %v2387_v33  }
 0x79f   : > { %3129 = vxpose.xlu1.b32.start.end [1/1] (short) (narrow) %v2780_v35, 32 }
 0x7c9   : > { %3973 = vperm.xlu1 %13771, %v3963_v36  }
 0x7cd   : > { %3978 = vperm.xlu1 %13771, %v3964_v10   ;;  %v2386_v10 = vld [vmem:[%s14190_s14 + $0x30] sm:$0xff] }
 0x7d1   : > { %3983 = vperm.xlu1 %13771, %v3965_v63  }
 0x7d5   : > { %4274 = vperm.xlu1 %13771, %v4264_v39  }
 0x7d9   : > { %4284 = vperm.xlu1 %13771, %v4266_v58  }
 0x7dd   : > { %4294 = vperm.xlu1 %13771, %v4268_v40  }
 0x7e1   : > { %4304 = vperm.xlu1 %13771, %v4270_v12  }
 0x7e5   : > { %4416 = vperm.xlu1 %13771, %v4320_v51  }
 0x7e9   : > { %4464 = vperm.xlu1 %13771, %v4328_v45  }
 0x7ed   : > { %4426 = vperm.xlu1 %13771, %v4322_v22  }
 0x7f1   : > { %4474 = vperm.xlu1 %13771, %v4330_v53  }
 0x7f5   : > { %4436 = vperm.xlu1 %13771, %v4324_v25  }
 0x7f9   : > { %4484 = vperm.xlu1 %13771, %v4332_v54   ;;  %v14805_v24 = vpop.f32.mrb[16].mxu1  ;;  %v2383_v54 = vld [vmem:[%s14190_s14 + $0x18] sm:$0xff] }
 0x7fa   : > { %v12632_v57 = vpop.f32.mrb[17].mxu1 }
 0x7fd   : > { %4446 = vperm.xlu1 %13771, %v4326_v18  }
 0x801   : > { %4494 = vperm.xlu1 %13771, %v4334_v26   ;;  %v2995_v4 = vpop.f32.mrb[18].mxu1 }
 0x802   : > { %v12644_v5 = vpop.f32.mrb[19].mxu1  ;;  %12645 = vmatprep.subr.mxu0 %v2995_v4 }
 0x803   : > { %12646 = vmatpush3.msra.mxu0 %v2995_v4 }
 0x804   : > { %12653 = vmatprep.subr.mxu0 %v14805_v24 }
 0x808   : > { %v12665_v1 = vpop.f32.mrb[20].mxu1 }
 0x809   : > { %v3362_v31 = vpop.f32.mrb[21].mxu1  ;;  %v3372_v59 = vmul.f32 0.35355338, %v12665_v1 }
 0x80a   : > { %v3371_v16 = vmul.f32 0.35355338, %v3362_v31 }
 0x80b   : > { %v3374_v35 = vsel %vm2559_vm15, %v3372_v59, -1e+30 }
 0x80c   : > { %v3373_v30 = vsel %vm2559_vm15, %v3371_v16, -1e+30  ;;  %v3378_v36 = vsel %vm2681_vm0, %v3374_v35, -inf }
 0x80d   : > { %v3375_v33 = vsel %vm1458_vm3, %v3373_v30, -inf }
 0x80e   : > { %3376 = vmax.xlane.f32.xlu0 %v3375_v33  ;;  %v3626_v33 = vpop.trf.xlu1 }
 0x812   : > { %3379 = vmax.xlane.f32.xlu0 %v3378_v36  ;;  %v3627_v36 = vpop.trf.xlu1 }
 0x828   : > { %2420 = vperm.xlu0 %13770, %v2386_v10  }
 0x89b   : > { %v3377_v63 = vpop.xlane.xlu0 %3376 }
 0x89c   : > { %v3381_v39 = vsub.f32 %v3373_v30, %v3377_v63 }
 0x89e   : > { %v3383_v12 = vmul.f32 1.442695, %v3381_v39 }
 0x89f   : > { %v3380_v58 = vpop.xlane.xlu0 %3379 }
 0x8a0   : > { %v3382_v40 = vsub.f32 %v3374_v35, %v3380_v58 }
 0x8a2   : > { %v3385_v51 = vmul.f32 1.442695, %v3382_v40 }
 0x8a4   : > { %13804 = vpow2.f32 %v3385_v51 }
 0x8a5   : > { %13806 = vpow2.f32 %v3383_v12 }
 0x8a7   : > { %v14820_v57 = vpop.permute.xlu0 %2420 }
 0x8a8   : > { %16755 = vst [vmem:[#allocation37_spill] sm:$0xff] %v14820_v57  ;;  %v2549_v35 = vadd.f32 %v14721_v17, %v14820_v57 }
 0x8ae   : > { %v13805_v45 = vpop.eup %13804 }
 0x8af   : > { %v3390_v22 = vsel %vm2681_vm0, %v13805_v45, 0.0  ;;  %v13807_v53 = vpop.eup %13806 }
 0x8b0   : > { %3391 = vadd.xlane.f32.xlu0 %v3390_v22  ;;  %v3387_v25 = vsel %vm1458_vm3, %v13807_v53, 0.0 }
 0x8b4   : > { %3388 = vadd.xlane.f32.xlu0 %v3387_v25 }
 0x8ca   : > { %2405 = vperm.xlu0 %13770, %v2383_v54  }
 0x93d   : > { %v3392_v18 = vpop.xlane.xlu0 %3391 }
 0x93e   : > { %13808 = vrcp.f32 %v3392_v18 }
 0x941   : > { %v3389_v26 = vpop.xlane.xlu0 %3388 }
 0x942   : > { %13810 = vrcp.f32 %v3389_v26 }
 0x948   : > { %v13809_v4 = vpop.eup %13808 }
 0x949   : > { %v3396_v1 = vmul.f32 %v13809_v4, %v13805_v45  ;;  %v14822_v59 = vpop.permute.xlu0 %2405 }
 0x94a   : > { %v2534_v30 = vadd.f32 %v14707_v32, %v14822_v59 }
 0x94c   : > { %v13811_v5 = vpop.eup %13810 }
 0x94d   : > { %v3395_v31 = vmul.f32 %v13811_v5, %v13807_v53 }
 0x94f   : > { %v13379_v16 = vpack.c.bf16 %v3396_v1, %v3395_v31 }
 0x951   : > { %13381 = vmatpush3.bf16.xpose.msk.msra.mxu1 %vm14758_vm2, %v13379_v16  ;;  %v2999_v16 = vld [vmem:[%s16750_s7 + $0x8] sm:$0xff] }
 0x952   : > { %12681 = vmatprep.subr.mxu1 %v2534_v30 }
 0x958   : > { %12671 = vmatmul.mubr.msk.f32.vlgmr.msra.gmra.mrb[22].mxu1 %vm1458_vm3, %v2549_v35  ;;  %v3962_v35 = vld [vmem:[%s16751_s10] sm:$0xff] }
 0x959   : > { %12682 = vmatpush3.msra.mxu1 %v2534_v30  ;;  %12683 = vmatprep.mubr.msk.f32.mxu1 %vm2592_vm14, %v3626_v33  ;;  %v3476_v30 = vld [vmem:[%s16750_s7 + $0x10] sm:$0xff]  ;;  %v3828_v33 = vld [vmem:[%s16750_s7 + $0x18] sm:$0xff] }
 0x95c   : > { %12684 = vmatmul.mubr.msk.f32.vlgmr.msra.gmra.mrb[24].mxu1 %vm2592_vm14, %v3627_v36  ;;  %v4265_v36 = vld [vmem:[%s16752_s11 + $0x8] sm:$0xff] }
 0xa2b   : > { %v14833_v10 = vpop.f32.mrb[22].mxu1 }
 0xa2c   : > { %v12672_v63 = vpop.f32.mrb[23].mxu1 }
 0xa2d   : > { %v4267_v63 = vld [vmem:[%s16752_s11 + $0x18] sm:$0xff] }
 0xa2f   : > { %v12685_v32 = vpop.f32.mrb[24].mxu1 }
 0xa30   : > { %v3714_v39 = vpop.f32.mrb[25].mxu1  ;;  %v3724_v58 = vmul.f32 0.35355338, %v12685_v32  ;;  %v4269_v32 = vld [vmem:[%s16752_s11 + $0x28] sm:$0xff] }
 0xa31   : > { %v3723_v40 = vmul.f32 0.35355338, %v3714_v39  ;;  %v4271_v39 = vld [vmem:[%s16752_s11 + $0x38] sm:$0xff] }
 0xa32   : > { %v3726_v51 = vsel %vm2559_vm15, %v3724_v58, -1e+30  ;;  %v4321_v58 = vld [vmem:[%s16753_s15 + $0x8] sm:$0xff] }
 0xa33   : > { %v3725_v12 = vsel %vm2559_vm15, %v3723_v40, -1e+30  ;;  %v3730_v45 = vsel %vm2681_vm0, %v3726_v51, -inf  ;;  %v4329_v40 = vld [vmem:[%s16754_s16 + $0x8] sm:$0xff] }
 0xa34   : > { %v3727_v17 = vsel %vm1458_vm3, %v3725_v12, -inf }
 0xa35   : > { %3728 = vmax.xlane.f32.xlu0 %v3727_v17  ;;  %v4331_v17 = vld [vmem:[%s16754_s16 + $0x18] sm:$0xff] }
 0xa39   : > { %3731 = vmax.xlane.f32.xlu0 %v3730_v45  ;;  %v4333_v45 = vld [vmem:[%s16754_s16 + $0x28] sm:$0xff] }
 0xac2   : > { %v3729_v22 = vpop.xlane.xlu0 %3728 }
 0xac3   : > { %v3733_v53 = vsub.f32 %v3725_v12, %v3729_v22  ;;  %v4323_v12 = vld [vmem:[%s16753_s15 + $0x18] sm:$0xff] }
 0xac5   : > { %v3735_v18 = vmul.f32 1.442695, %v3733_v53  ;;  %v4327_v53 = vld [vmem:[%s16753_s15 + $0x38] sm:$0xff] }
 0xac6   : > { %v3732_v25 = vpop.xlane.xlu0 %3731 }
 0xac7   : > { %v3734_v54 = vsub.f32 %v3726_v51, %v3732_v25  ;;  %v4325_v51 = vld [vmem:[%s16753_s15 + $0x28] sm:$0xff] }
 0xac9   : > { %v3737_v26 = vmul.f32 1.442695, %v3734_v54  ;;  %v4335_v54 = vld [vmem:[%s16754_s16 + $0x38] sm:$0xff] }
 0xacb   : > { %13812 = vpow2.f32 %v3737_v26 }
 0xacc   : > { %13814 = vpow2.f32 %v3735_v18  ;;  %v14865_v18 = vpop.permute.xlu1 %2425 }
 0xacd   : > { %16756 = vst [vmem:[#allocation38_spill] sm:$0xff] %v14865_v18 }
 0xad5   : > { %v14841_v4 = vpop.eup %13812 }
 0xad6   : > { %v3742_v5 = vsel %vm2681_vm0, %v14841_v4, 0.0  ;;  %v14845_v1 = vpop.eup %13814  ;;  %vm6902_vm0 = vcmask 81920  }
 0xad7   : > { %3743 = vadd.xlane.f32.xlu0 %v3742_v5  ;;  %v3739_v31 = vsel %vm1458_vm3, %v14845_v1, 0.0  ;;  %v14871_v5 = vpop.trf.xlu1 }
 0xadb   : > { %3740 = vadd.xlane.f32.xlu0 %v3739_v31 }
 0xb08   : > { %3000 = vxpose.xlu0.b32.start.end [1/1] (short) (narrow) %v2999_v16, 32  ;;  %v14879_v16 = vpop.trf.xlu1 }
 0xb15   : > { %3477 = vxpose.xlu0.b32.start.end [1/1] (short) (narrow) %v3476_v30, 32 }
 0xb22   : > { %3829 = vxpose.xlu0.b32.start.end [1/1] (short) (narrow) %v3828_v33, 32 }
 0xb57   : > { %3968 = vperm.xlu0 %13770, %v3962_v35   ;;  %v14889_v35 = vpop.trf.xlu1 }
 0xb5b   : > { %4279 = vperm.xlu0 %13770, %v4265_v36  }
 0xb5f   : > { %4289 = vperm.xlu0 %13770, %v4267_v63  }
 0xb63   : > { %4299 = vperm.xlu0 %13770, %v4269_v32   ;;  %v14901_v32 = vpop.trf.xlu1 }
 0xb64   : > { %v3744_v22 = vpop.xlane.xlu0 %3743 }
 0xb67   : > { %4309 = vperm.xlu0 %13770, %v4271_v39  }
 0xb68   : > { %v3741_v25 = vpop.xlane.xlu0 %3740 }
 0xb69   : > { %13816 = vrcp.f32 %v3741_v25  ;;  %v14945_v25 = vld [vmem:[%s16760_s18] sm:$0xff] }
 0xb6a   : > { %13818 = vrcp.f32 %v3744_v22  ;;  %16765 = vst [vmem:[#allocation46_spill] sm:$0xff] %v14945_v25  ;;  %12709 = vmatprep.mubr.msk.f32.mxu1 %vm1785_vm6, %v14945_v25 }
 0xb6b   : > { %4421 = vperm.xlu0 %13770, %v4321_v58  }
 0xb6f   : > { %4469 = vperm.xlu0 %13770, %v4329_v40  }
 0xb73   : > { %4431 = vperm.xlu0 %13770, %v4323_v12   ;;  %v13817_v36 = vpop.eup %13816 }
 0xb74   : > { %v13819_v63 = vpop.eup %13818  ;;  %v3747_v39 = vmul.f32 %v13817_v36, %v14845_v1 }
 0xb75   : > { %v3748_v40 = vmul.f32 %v13819_v63, %v14841_v4  ;;  %v2554_v4 = vadd.f32 %v14719_v29, %v14865_v18 }
 0xb77   : > { %4479 = vperm.xlu0 %13770, %v4331_v17   ;;  %v13383_v12 = vpack.c.bf16 %v3748_v40, %v3747_v39 }
 0xb7b   : > { %4441 = vperm.xlu0 %13770, %v4325_v51  }
 0xb7f   : > { %4489 = vperm.xlu0 %13770, %v4333_v45  }
 0xb83   : > { %4451 = vperm.xlu0 %13770, %v4327_v53  }
 0xb87   : > { %4499 = vperm.xlu0 %13770, %v4335_v54   ;;  %v14949_v54 = vpop.permute.xlu1 %3973 }
 0xb88   : > { %v14867_v26 = vpop.trf.xlu0  ;;  %16767 = vst [vmem:[#allocation47_spill] sm:$0xff] %v14949_v54 }
 0xb89   : > { %12647 = vmatprep.mubr.msk.f32.mxu0 %vm2592_vm14, %v14867_v26 }
 0xb8b   : > { %v14951_v36 = vpop.permute.xlu1 %3978 }
 0xb8c   : > { %v14873_v31 = vpop.trf.xlu0  ;;  %16768 = vst [vmem:[#allocation48_spill] sm:$0xff] %v14951_v36 }
 0xb8d   : > { %12648 = vmatmul.mubr.msk.f32.vlgmr.msra.gmra.mrb[20].mxu0 %vm2592_vm14, %v14873_v31 }
 0xb8e   : > { %12654 = vmatpush3.msra.mxu0 %v14805_v24 }
 0xb8f   : > { %12673 = vmatprep.subr.mxu0 %v14833_v10 }
 0xb90   : > { %v14881_v30 = vpop.trf.xlu0 }
 0xb91   : > { %12650 = vmatprep.mubr.msk.f32.mxu0 %vm2592_vm14, %v14881_v30 }
 0xb94   : > { %v14885_v33 = vpop.trf.xlu0 }
 0xb95   : > { %12651 = vmatmul.mubr.msk.f32.gmra.mrb[22].mxu0 %vm2592_vm14, %v14885_v33 }
 0xb96   : > { %12655 = vmatprep.mubr.msk.f32.mxu0 %vm2592_vm14, %v14871_v5 }
 0xb98   : > { %v14893_v24 = vpop.trf.xlu0 }
 0xb99   : > { %12656 = vmatmul.mubr.msk.f32.vlgmr.msra.gmra.mrb[20].mxu0 %vm2592_vm14, %v14879_v16 }
 0xb9a   : > { %12674 = vmatpush3.msra.mxu0 %v14833_v10  ;;  %12658 = vmatprep.mubr.msk.f32.mxu0 %vm2592_vm14, %v14889_v35 }
 0xb9b   : > { %13382 = vmatprep.subr.bf16.mxu0 %v16588_v37 }
 0xb9c   : > { %v14904_v58 = vpop.trf.xlu0 }
 0xb9d   : > { %16757 = vst [vmem:[#allocation39_spill] sm:$0xff] %v14904_v58  ;;  %12659 = vmatmul.mubr.msk.f32.gmra.mrb[22].mxu0 %vm2592_vm14, %v14901_v32 }
 0xb9e   : > { %12675 = vmatprep.mubr.msk.f32.mxu0 %vm2592_vm14, %v14893_v24 }
 0xba0   : > { %v14911_v10 = vpop.trf.xlu0 }
 0xba1   : > { %16758 = vst [vmem:[#allocation40_spill] sm:$0xff] %v14911_v10  ;;  %12676 = vmatmul.mubr.msk.f32.vlgmr.msra.gmra.mrb[20].mxu0 %vm2592_vm14, %v14904_v58 }
 0xba2   : > { %13385 = vmatpush3.bf16.xpose.msk.msra.mxu0 %vm14758_vm2, %v13383_v12  ;;  %12678 = vmatprep.mubr.msk.f32.mxu0 %vm2592_vm14, %v14911_v10 }
 0xba4   : > { %v14919_v1 = vpop.trf.xlu0 }
 0xba5   : > { %16759 = vst [vmem:[#allocation41_spill] sm:$0xff] %v14919_v1  ;;  %12679 = vmatmul.mubr.msk.f32.gmra.mrb[22].mxu0 %vm2592_vm14, %v14919_v1 }
 0xba6   : > { %12690 = vmatprep.mubr.msk.f32.mxu0 %vm14134_vm1, %v16586_v3 }
 0xba8   : > { %v14928_v17 = vpop.trf.xlu0 }
 0xba9   : > { %12691 = vmatmul.mubr.msk.f32.vlgmr.msra.gmra.mrb[24].mxu0 %vm1458_vm3, %v2554_v4  ;;  %16761 = vst [vmem:[#allocation42_spill] sm:$0xff] %v14928_v17 }
 0xbaa   : > { %12695 = vmatprep.mubr.msk.f32.mxu0 %vm2592_vm14, %v14928_v17 }
 0xbac   : > { %v14932_v51 = vpop.trf.xlu0 }
 0xbad   : > { %16762 = vst [vmem:[#allocation43_spill] sm:$0xff] %v14932_v51 }
 0xbb0   : > { %v14934_v45 = vpop.trf.xlu0 }
 0xbb1   : > { %16763 = vst [vmem:[#allocation44_spill] sm:$0xff] %v14934_v45 }
 0xbb4   : > { %v14940_v29 = vpop.trf.xlu0 }
 0xbb5   : > { %16764 = vst [vmem:[#allocation45_spill] sm:$0xff] %v14940_v29 }
 0xbd6   : > { %v14953_v39 = vpop.permute.xlu0 %3968 }
 0xbd7   : > { %16769 = vst [vmem:[#allocation49_spill] sm:$0xff] %v14953_v39 }
 0xc7c   : > { %v3824_v22 = vpop.f32.mrb[24].mxu0 }
 0xc7d   : > { %v12692_v53 = vpop.f32.mrb[25].mxu0  ;;  %12693 = vmatprep.subr.mxu0 %v3824_v22 }
 0xc7e   : > { %12694 = vmatpush3.msra.mxu0 %v3824_v22  ;;  %v14957_v22 = vpop.permute.xlu1 %3983 }
 0xc7f   : > { %12696 = vmatmul.mubr.msk.f32.vlgmr.msra.gmra.mrb[20].mxu0 %vm2592_vm14, %v14932_v51  ;;  %16770 = vst [vmem:[#allocation50_spill] sm:$0xff] %v14957_v22 }
 0xc80   : > { %12698 = vmatprep.mubr.msk.f32.mxu0 %vm2592_vm14, %v14934_v45 }
 0xc83   : > { %12699 = vmatmul.mubr.msk.f32.gmra.mrb[22].mxu0 %vm2592_vm14, %v14940_v29 }
 0xd52   : > { %v12697_v63 = vpop.f32.mrb[20].mxu0 }
 0xd53   : > { %v3987_v40 = vadd.f32 %v12697_v63, %v14949_v54  ;;  %v3939_v12 = vpop.f32.mrb[21].mxu0 }
 0xd54   : > { %v3986_v4 = vadd.f32 %v14953_v39, %v3939_v12  ;;  %v2230_v12 = vadd.f32 %v14689_v44, %v14577_v46  ;;  %v14985_v46 = vld [vmem:[%s16760_s18 + $0x18] sm:$0xff]  ;;  %v15005_v44 = vld [vmem:[%s16760_s18 + $0x30] sm:$0xff] }
 0xd55   : > { %16775 = vst [vmem:[#allocation55_spill] sm:$0xff] %v14985_v46  ;;  %16779 = vst [vmem:[#allocation58_spill] sm:$0xff] %v15005_v44 }
 0xd56   : > { %v13386_v53 = vpack.c.bf16 %v3987_v40, %v3986_v4  ;;  %v12700_v3 = vpop.f32.mrb[22].mxu0  ;;  %v2225_v40 = vadd.f32 %v14691_v47, %v14580_v48  ;;  %v1888_v4 = vld [vmem:[%s1343_s26 + $0x8] sm:$0xff]  ;;  %v14989_v48 = vld [vmem:[%s16760_s18 + $0x20] sm:$0xff]  ;;  %v2240_v47 = vadd.f32 %v14693_v23, %v14590_v8  ;;  %v15033_v23 = vld [vmem:[%s16776_s28 + $0x10] sm:$0xff] }
 0xd57   : > { %v3989_v37 = vadd.f32 %v12700_v3, %v14957_v22  ;;  %v3949_v11 = vpop.f32.mrb[23].mxu0  ;;  %v14969_v3 = vld [vmem:[%s16760_s18 + $0x8] sm:$0xff]  ;;  %16777 = vst [vmem:[#allocation56_spill] sm:$0xff] %v14989_v48  ;;  %16785 = vst [vmem:[#allocation64_spill] sm:$0xff] %v15033_v23 }
 0xd58   : > { %v3988_v9 = vadd.f32 %v14951_v36, %v3949_v11  ;;  %13387 = vmatprep.subr.bf16.mxu1 %v13386_v53  ;;  %16771 = vst [vmem:[#allocation51_spill] sm:$0xff] %v14969_v3  ;;  %v14973_v11 = vld [vmem:[%s16760_s18 + $0x10] sm:$0xff] }
 0xd59   : > { %13389 = vmatpush3.bf16.msra.mxu1 %v13386_v53  ;;  %16772 = vst [vmem:[#allocation52_spill] sm:$0xff] %v14973_v11  ;;  %v2235_v53 = vadd.f32 %v14695_v49, %v14594_v34  ;;  %v15030_v34 = vld [vmem:[%s16776_s28 + $0x8] sm:$0xff] }
 0xd5a   : > { %v13390_v63 = vpack.c.bf16 %v3989_v37, %v3988_v9  ;;  %v14975_v9 = vadd.f32 %v2230_v12, %v1888_v4  ;;  %v14977_v37 = vadd.f32 %v2225_v40, %v1887_v28  ;;  %v15016_v12 = vld [vmem:[%s16760_s18 + $0x38] sm:$0xff]  ;;  %v15019_v40 = vld [vmem:[%s16776_s28] sm:$0xff]  ;;  %16784 = vst [vmem:[#allocation63_spill] sm:$0xff] %v15030_v34 }
 0xd5b   : > { %16780 = vst [vmem:[#allocation59_spill] sm:$0xff] %v15016_v12  ;;  %16781 = vst [vmem:[#allocation60_spill] sm:$0xff] %v15019_v40 }
 0xd5c   : > { %13391 = vmatprep.subr.bf16.mxu1 %v13390_v63  ;;  %16773 = vst [vmem:[#allocation53_spill] sm:$0xff] %v14975_v9  ;;  %16774 = vst [vmem:[#allocation54_spill] sm:$0xff] %v14977_v37  ;;  %v14993_v28 = vpack.c.bf16 %v14975_v9, %v14977_v37 }
 0xd5d   : > { %13393 = vmatpush3.bf16.msra.mxu1 %v13390_v63  ;;  %v1889_v63 = vld [vmem:[%s1343_s26 + $0x10] sm:$0xff] }
 0xd5e   : > { %13395 = vmatprep.subr.bf16.mxu1 %v14600_v27  ;;  %v15023_v8 = vadd.f32 %v2235_v53, %v1889_v63  ;;  %v15049_v53 = vld [vmem:[%s16776_s28 + $0x20] sm:$0xff]  ;;  %v15060_v63 = vld [vmem:[%s16776_s28 + $0x30] sm:$0xff] }
 0xd5f   : > { %16787 = vst [vmem:[#allocation66_spill] sm:$0xff] %v15049_v53  ;;  %16790 = vst [vmem:[#allocation68_spill] sm:$0xff] %v15060_v63 }
 0xd60   : > { %12710 = vmatmul.mubr.msk.f32.vlgmr.msra.gmra.mrb[26].mxu1 %vm1785_vm6, %v14969_v3  ;;  %16783 = vst [vmem:[#allocation62_spill] sm:$0xff] %v15023_v8 }
 0xd61   : > { %13397 = vmatpush3.bf16.msra.mxu1 %v14600_v27  ;;  %12712 = vmatprep.mubr.msk.f32.mxu1 %vm1785_vm6, %v14973_v11  ;;  %v15001_v27 = vld [vmem:[%s16760_s18 + $0x28] sm:$0xff] }
 0xd62   : > { %13399 = vmatprep.subr.bf16.mxu1 %v14611_v62  ;;  %16778 = vst [vmem:[#allocation57_spill] sm:$0xff] %v15001_v27 }
 0xd64   : > { %12713 = vmatmul.mubr.msk.f32.gmra.mrb[28].mxu1 %vm1785_vm6, %v14985_v46 }
 0xd65   : > { %13401 = vmatpush3.bf16.msra.mxu1 %v14611_v62  ;;  %12715 = vmatprep.mubr.msk.f32.mxu1 %vm1785_vm6, %v14989_v48  ;;  %v1890_v62 = vld [vmem:[%s1343_s26 + $0x18] sm:$0xff]  ;;  %s16820_s26 = sld [smem:[#allocation21_spill]] }
 0xd66   : > { %13427 = vmatprep.subr.bf16.mxu1 %v14993_v28  ;;  %v15021_v4 = vadd.f32 %v2240_v47, %v1890_v62  ;;  %v15045_v47 = vld [vmem:[%s16776_s28 + $0x18] sm:$0xff]  ;;  %v15057_v62 = vld [vmem:[%s16776_s28 + $0x28] sm:$0xff] }
 0xd67   : > { %16786 = vst [vmem:[#allocation65_spill] sm:$0xff] %v15045_v47  ;;  %16788 = vst [vmem:[#allocation67_spill] sm:$0xff] %v15057_v62 }
 0xd68   : > { %12716 = vmatmul.mubr.msk.f32.gmra.mrb[30].mxu1 %vm1785_vm6, %v15001_v27  ;;  %16782 = vst [vmem:[#allocation61_spill] sm:$0xff] %v15021_v4  ;;  %v15037_v49 = vpack.c.bf16 %v15021_v4, %v15023_v8  ;;  %v16791_v8 = vmov 0.0|0.0   ;;  %v15068_v4 = vld [vmem:[%s16776_s28 + $0x38] sm:$0xff] }
 0xd69   : > { %12718 = vmatprep.mubr.msk.f32.mxu1 %vm1785_vm6, %v15005_v44  ;;  %16792 = vst [vmem:[#allocation69_spill] sm:$0xff] %v15068_v4 }
 0xd6c   : > { %12719 = vmatmul.mubr.msk.f32.gmra.mrb[32].mxu1 %vm1785_vm6, %v15016_v12 }
 0xd6d   : > { %12729 = vmatprep.mubr.msk.f32.mxu1 %vm1785_vm6, %v15019_v40 }
 0xd70   : > { %12730 = vmatmul.mubr.msk.f32.vlgmr.msra.gmra.mrb[26].mxu1 %vm1785_vm6, %v15030_v34 }
 0xd71   : > { %13429 = vmatpush3.bf16.msra.mxu1 %v14993_v28  ;;  %12732 = vmatprep.mubr.msk.f32.mxu1 %vm1785_vm6, %v15033_v23 }
 0xd72   : > { %13431 = vmatprep.subr.bf16.mxu1 %v15037_v49 }
 0xd74   : > { %12733 = vmatmul.mubr.msk.f32.gmra.mrb[28].mxu1 %vm1785_vm6, %v15045_v47 }
 0xd75   : > { %13433 = vmatpush3.bf16.msra.mxu1 %v15037_v49  ;;  %12735 = vmatprep.mubr.msk.f32.mxu1 %vm1785_vm6, %v15049_v53 }
 0xd76   : > { %13438 = vmatprep.subr.bf16.mxu1 %v16791_v8 }
 0xd78   : > { %12736 = vmatmul.mubr.msk.f32.gmra.mrb[30].mxu1 %vm1785_vm6, %v15057_v62 }
 0xd79   : > { %12738 = vmatprep.mubr.msk.f32.mxu1 %vm1785_vm6, %v15060_v63 }
 0xd7c   : > { %12739 = vmatmul.mubr.msk.f32.gmra.mrb[32].mxu1 %vm1785_vm6, %v15068_v4 }
 0xd7d   : > { %12785 = vmatprep.mubr.msk.f32.mxu1 %vm1785_vm6, %v14637_v56  ;;  %v16793_v56 = vmov 0.0  }
 0xd80   : > { %12786 = vmatmul.mubr.msk.f32.vlgmr.msra.gmra.mrb[34].mxu1 %vm1785_vm6, %v14645_v61  ;;  %v15091_v61 = vld [vmem:[%s16789_s1] sm:$0xff] }
 0xd81   : > { %12788 = vmatprep.mubr.msk.f32.mxu1 %vm1785_vm6, %v14650_v2  ;;  %16794 = vst [vmem:[#allocation70_spill] sm:$0xff] %v15091_v61  ;;  %12757 = vmatprep.mubr.msk.f32.mxu0 %vm4546_vm4, %v15091_v61  ;;  %v15095_v2 = vpop.permute.xlu1 %4274 }
 0xd82   : > { %16795 = vst [vmem:[#allocation71_spill] sm:$0xff] %v15095_v2 }
 0xd84   : > { %12789 = vmatmul.mubr.msk.f32.gmra.mrb[36].mxu1 %vm1785_vm6, %v14653_v7  ;;  %v15097_v7 = vpop.permute.xlu0 %4279 }
 0xd85   : > { %12791 = vmatprep.mubr.msk.f32.mxu1 %vm1785_vm6, %v14661_v41  ;;  %16796 = vst [vmem:[#allocation72_spill] sm:$0xff] %v15097_v7  ;;  %v15099_v41 = vpop.permute.xlu1 %4284 }
 0xd86   : > { %16797 = vst [vmem:[#allocation73_spill] sm:$0xff] %v15099_v41 }
 0xd88   : > { %12792 = vmatmul.mubr.msk.f32.gmra.mrb[38].mxu1 %vm1785_vm6, %v14675_v13 }
 0xd89   : > { %12794 = vmatprep.mubr.msk.f32.mxu1 %vm1785_vm6, %v14680_v21  ;;  %v15101_v21 = vpop.permute.xlu0 %4289  ;;  %v15107_v53 = vpop.permute.xlu1 %4294 }
 0xd8a   : > { %16798 = vst [vmem:[#allocation74_spill] sm:$0xff] %v15101_v21  ;;  %16799 = vst [vmem:[#allocation75_spill] sm:$0xff] %v15107_v53 }
 0xd8c   : > { %12795 = vmatmul.mubr.msk.f32.gmra.mrb[40].mxu1 %vm1785_vm6, %v14685_v43 }
 0xd8d   : > { %12818 = vmatprep.mubr.msk.f32.mxu1 %vm14134_vm1, %v16793_v56  ;;  %v15111_v34 = vpop.permute.xlu0 %4299  ;;  %v15117_v44 = vpop.permute.xlu1 %4304 }
 0xd8e   : > { %16800 = vst [vmem:[#allocation76_spill] sm:$0xff] %v15111_v34  ;;  %16801 = vst [vmem:[#allocation77_spill] sm:$0xff] %v15117_v44 }
 0xe43   : > { %v12731_v13 = vpop.f32.mrb[26].mxu1 }
 0xe44   : > { %v4313_v43 = vadd.f32 %v12731_v13, %v15097_v7  ;;  %v4225_v37 = vpop.f32.mrb[27].mxu1 }
 0xe45   : > { %v4312_v9 = vadd.f32 %v15095_v2, %v4225_v37 }
 0xe46   : > { %v4337_v14 = vsel %vm1458_vm3, %v4313_v43, 0.0 }
 0xe47   : > { %v4336_v60 = vsel %vm1458_vm3, %v4312_v9, 0.0  ;;  %v12734_v4 = vpop.f32.mrb[28].mxu1 }
 0xe48   : > { %v4338_v63 = vadd.f32 %v4337_v14, %v4336_v60  ;;  %v4235_v62 = vpop.f32.mrb[29].mxu1  ;;  %v4315_v47 = vadd.f32 %v12734_v4, %v15101_v21 }
 0xe49   : > { %v4314_v23 = vadd.f32 %v15099_v41, %v4235_v62  ;;  %v15120_v62 = vpop.permute.xlu0 %4309 }
 0xe4a   : > { %v4341_v2 = vsel %vm1458_vm3, %v4315_v47, 0.0  ;;  %16802 = vst [vmem:[#allocation78_spill] sm:$0xff] %v15120_v62 }
 0xe4b   : > { %v4339_v13 = vsel %vm1458_vm3, %v4314_v23, 0.0  ;;  %v12737_v7 = vpop.f32.mrb[30].mxu1 }
 0xe4c   : > { %v4340_v40 = vadd.f32 %v4339_v13, %v4338_v63  ;;  %v4245_v37 = vpop.f32.mrb[31].mxu1  ;;  %v4317_v12 = vadd.f32 %v12737_v7, %v15111_v34 }
 0xe4d   : > { %v4316_v60 = vadd.f32 %v15107_v53, %v4245_v37 }
 0xe4e   : > { %v4342_v14 = vadd.f32 %v4341_v2, %v4340_v40  ;;  %v4345_v48 = vsel %vm1458_vm3, %v4317_v12, 0.0 }
 0xe4f   : > { %v4343_v4 = vsel %vm1458_vm3, %v4316_v60, 0.0  ;;  %v12740_v21 = vpop.f32.mrb[32].mxu1 }
 0xe50   : > { %v4344_v41 = vadd.f32 %v4343_v4, %v4342_v14  ;;  %v4255_v27 = vpop.f32.mrb[33].mxu1  ;;  %v4319_v63 = vadd.f32 %v12740_v21, %v15120_v62 }
 0xe51   : > { %v4318_v13 = vadd.f32 %v15117_v44, %v4255_v27 }
 0xe52   : > { %v4346_v46 = vadd.f32 %v4345_v48, %v4344_v41  ;;  %v4349_v53 = vsel %vm1458_vm3, %v4319_v63, 0.0 }
 0xe53   : > { %v4347_v7 = vsel %vm1458_vm3, %v4318_v13, 0.0  ;;  %v15126_v37 = vpop.f32.mrb[34].mxu1 }
 0xe54   : > { %v4348_v40 = vadd.f32 %v4347_v7, %v4346_v46  ;;  %v15128_v2 = vpop.f32.mrb[35].mxu1 }
 0xe56   : > { %v4350_v34 = vadd.f32 %v4349_v53, %v4348_v40 }
 0xe57   : > { %v15131_v11 = vpop.f32.mrb[36].mxu1 }
 0xe58   : > { %v4351_v14 = vrot.slane %v4350_v34, 4  ;;  %v15133_v4 = vpop.f32.mrb[37].mxu1 }
 0xe5a   : > { %v4352_v3 = vadd.f32 %v4351_v14, %v4350_v34 }
 0xe5b   : > { %v15135_v21 = vpop.f32.mrb[38].mxu1 }
 0xe5c   : > { %v4353_v27 = vrot.slane %v4352_v3, 2  ;;  %v15137_v48 = vpop.f32.mrb[39].mxu1 }
 0xe5e   : > { %v4354_v41 = vadd.f32 %v4353_v27, %v4352_v3 }
 0xe5f   : > { %v15139_v44 = vpop.f32.mrb[40].mxu1 }
 0xe60   : > { %16803 = vst [vmem:[#allocation79_spill] sm:$0xff] %v15139_v44  ;;  %v4355_v46 = vrot.slane %v4354_v41, 1  ;;  %v15141_v7 = vpop.f32.mrb[41].mxu1 }
 0xe61   : > { %16804 = vst [vmem:[#allocation80_spill] sm:$0xff] %v15141_v7 }
 0xe62   : > { %v4356_v62 = vadd.f32 %v4355_v46, %v4354_v41 }
 0xe64   : > { %v4358_v36 = vmul.f32 0.015625, %v4356_v62 }
 0xe66   : > { %v15143_v53 = vsub.f32 %v4312_v9, %v4358_v36  ;;  %v15145_v40 = vsub.f32 %v4313_v43, %v4358_v36  ;;  %v15147_v22 = vsub.f32 %v4314_v23, %v4358_v36  ;;  %v15149_v34 = vsub.f32 %v4315_v47, %v4358_v36 }
 0xe67   : > { %v15151_v14 = vsub.f32 %v4316_v60, %v4358_v36  ;;  %v15153_v39 = vsub.f32 %v4317_v12, %v4358_v36  ;;  %v4365_v3 = vsub.f32 %v4318_v13, %v4358_v36  ;;  %v15155_v27 = vsub.f32 %v4319_v63, %v4358_v36 }
 0xe68   : > { %v4367_v54 = vmul.f32 %v15143_v53, %v15143_v53  ;;  %v4368_v9 = vmul.f32 %v15145_v40, %v15145_v40  ;;  %v4369_v43 = vmul.f32 %v15147_v22, %v15147_v22  ;;  %v4370_v23 = vmul.f32 %v15149_v34, %v15149_v34 }
 0xe69   : > { %v4371_v36 = vmul.f32 %v15151_v14, %v15151_v14  ;;  %v4372_v13 = vmul.f32 %v15153_v39, %v15153_v39  ;;  %v4373_v61 = vmul.f32 %v4365_v3, %v4365_v3 }
 0xe6a   : > { %v4375_v47 = vsel %vm1458_vm3, %v4367_v54, 0.0  ;;  %v4376_v12 = vsel %vm1458_vm3, %v4368_v9, 0.0  ;;  %v4378_v62 = vsel %vm1458_vm3, %v4369_v43, 0.0  ;;  %v4380_v41 = vsel %vm1458_vm3, %v4370_v23, 0.0  ;;  %v15179_v23 = vpop.permute.xlu1 %4416 }
 0xe6b   : > { %v4377_v60 = vadd.f32 %v4376_v12, %v4375_v47  ;;  %v4382_v29 = vsel %vm1458_vm3, %v4371_v36, 0.0  ;;  %v4374_v54 = vmul.f32 %v15155_v27, %v15155_v27  ;;  %v4384_v9 = vsel %vm1458_vm3, %v4372_v13, 0.0 }
 0xe6c   : > { %v4386_v12 = vsel %vm1458_vm3, %v4373_v61, 0.0 }
 0xe6d   : > { %v4379_v63 = vadd.f32 %v4378_v62, %v4377_v60  ;;  %v4388_v60 = vsel %vm1458_vm3, %v4374_v54, 0.0 }
 0xe6f   : > { %v4381_v46 = vadd.f32 %v4380_v41, %v4379_v63  ;;  %v15181_v63 = vpop.permute.xlu0 %4421 }
 0xe71   : > { %v4383_v45 = vadd.f32 %v4382_v29, %v4381_v46  ;;  %v15183_v46 = vpop.permute.xlu1 %4464 }
 0xe73   : > { %v4385_v47 = vadd.f32 %v4384_v9, %v4383_v45  ;;  %v15185_v44 = vpop.permute.xlu0 %4469 }
 0xe75   : > { %v4387_v43 = vadd.f32 %v4386_v12, %v4385_v47  ;;  %v15187_v61 = vpop.permute.xlu1 %4426 }
 0xe77   : > { %v4389_v62 = vadd.f32 %v4388_v60, %v4387_v43  ;;  %v15189_v54 = vpop.permute.xlu0 %4431 }
 0xe79   : > { %v4390_v51 = vrot.slane %v4389_v62, 4  ;;  %v15191_v9 = vpop.permute.xlu1 %4474 }
 0xe7a   : > { %16805 = vst [vmem:[#allocation81_spill] sm:$0xff] %v15191_v9 }
 0xe7b   : > { %v4391_v25 = vadd.f32 %v4390_v51, %v4389_v62  ;;  %v15193_v51 = vpop.permute.xlu0 %4479 }
 0xe7d   : > { %v4392_v36 = vrot.slane %v4391_v25, 2  ;;  %v15195_v43 = vpop.permute.xlu1 %4436 }
 0xe7e   : > { %16806 = vst [vmem:[#allocation82_spill] sm:$0xff] %v15195_v43 }
 0xe7f   : > { %v4393_v29 = vadd.f32 %v4392_v36, %v4391_v25  ;;  %v15197_v62 = vpop.permute.xlu0 %4441 }
 0xe80   : > { %16807 = vst [vmem:[#allocation83_spill] sm:$0xff] %v15197_v62 }
 0xe81   : > { %v4394_v41 = vrot.slane %v4393_v29, 1 }
 0xe83   : > { %v4395_v45 = vadd.f32 %v4394_v41, %v4393_v29  ;;  %v15199_v41 = vpop.permute.xlu1 %4484 }
 0xe85   : > { %v4396_v13 = vmul.f32 0.015873017, %v4395_v45  ;;  %v15201_v45 = vpop.permute.xlu0 %4489 }
 0xe87   : > { %13820 = vrsqrt.f32 %v4396_v13  ;;  %vm4399_vm5 = vcmp.eq.f32.partialorder %v4396_v13, inf  ;;  %v4402_v25 = vand.u32 2147483648, %v4396_v13  ;;  %vm4401_vm8 = vcmp.eq.f32.partialorder %v4396_v13, 0.0  ;;  %v15203_v18 = vpop.permute.xlu1 %4446 }
 0xe89   : > { %v15205_v17 = vpop.permute.xlu0 %4451 }
 0xe8a   : > { %16808 = vst [vmem:[#allocation84_spill] sm:$0xff] %v15205_v17 }
 0xe8b   : > { %v15218_v57 = vpop.permute.xlu1 %4494 }
 0xe8c   : > { %16809 = vst [vmem:[#allocation85_spill] sm:$0xff] %v15218_v57 }
 0xe91   : > { %v13821_v47 = vpop.eup %13820 }
 0xe92   : > { %v4398_v12 = vmul.f32 %v13821_v47, %v4396_v13 }
 0xe94   : > { %v4400_v60 = vsel %vm4399_vm5, %v4396_v13, %v4398_v12 }
 0xe95   : > { %v4403_v36 = vsel %vm4401_vm8, %v4402_v25, %v4400_v60 }
 0xe96   : > { %v4404_v29 = vadd.f32 1e-06, %v4403_v36 }
 0xe98   : > { %13822 = vrcp.f32 %v4404_v29 }
 0xea2   : > { %v13823_v47 = vpop.eup %13822 }
 0xea3   : > { %v4412_v1 = vmul.f32 %v13823_v47, %v4365_v3  ;;  %v4406_v10 = vmul.f32 %v13823_v47, %v15143_v53  ;;  %v4407_v12 = vmul.f32 %v13823_v47, %v15145_v40  ;;  %v4408_v13 = vmul.f32 %v13823_v47, %v15147_v22 }
 0xea4   : > { %v4409_v25 = vmul.f32 %v13823_v47, %v15149_v34  ;;  %v4410_v60 = vmul.f32 %v13823_v47, %v15151_v14  ;;  %v4411_v36 = vmul.f32 %v13823_v47, %v15153_v39  ;;  %v4413_v29 = vmul.f32 %v13823_v47, %v15155_v27  ;;  %v15224_v14 = vpop.permute.xlu0 %4499 }
 0xea5   : > { %v4460_v58 = vmul.f32 %v15203_v18, %v4412_v1  ;;  %v4454_v7 = vmul.f32 %v15179_v23, %v4406_v10  ;;  %v4455_v3 = vmul.f32 %v15181_v63, %v4407_v12  ;;  %v4456_v53 = vmul.f32 %v15187_v61, %v4408_v13 }
 0xea6   : > { %v4457_v22 = vmul.f32 %v15189_v54, %v4409_v25  ;;  %v4458_v40 = vmul.f32 %v15195_v43, %v4410_v60  ;;  %v4459_v34 = vmul.f32 %v15197_v62, %v4411_v36  ;;  %v4461_v39 = vmul.f32 %v15205_v17, %v4413_v29 }
 0xea7   : > { %v4502_v1 = vadd.f32 %v15183_v46, %v4454_v7  ;;  %v4503_v10 = vadd.f32 %v15185_v44, %v4455_v3  ;;  %v4504_v27 = vadd.f32 %v15191_v9, %v4456_v53  ;;  %v4508_v47 = vadd.f32 %v15218_v57, %v4460_v58 }
 0xea8   : > { %v4505_v12 = vadd.f32 %v15193_v51, %v4457_v22  ;;  %v4506_v13 = vadd.f32 %v15199_v41, %v4458_v40  ;;  %v4507_v25 = vadd.f32 %v15201_v45, %v4459_v34  ;;  %v4509_v60 = vadd.f32 %v15224_v14, %v4461_v39  ;;  %v15235_v40 = vld [vmem:[%s16789_s1 + $0x8] sm:$0xff]  ;;  %v15239_v34 = vld [vmem:[%s16789_s1 + $0x10] sm:$0xff]  ;;  %v14075_v39 = vld [vmem:[%s14240_s29 + $0x18] sm:$0xff] }
 0xea9   : > { %v4510_v36 = vmax.f32 %v4502_v1, 0.0  ;;  %v4511_v29 = vmax.f32 %v4503_v10, 0.0  ;;  %v4512_v17 = vmax.f32 %v4504_v27, 0.0  ;;  %v4516_v62 = vmax.f32 %v4508_v47, 0.0 }
 0xeaa   : > { %v4513_v43 = vmax.f32 %v4505_v12, 0.0  ;;  %v4514_v7 = vmax.f32 %v4506_v13, 0.0  ;;  %v4515_v3 = vmax.f32 %v4507_v25, 0.0  ;;  %v4517_v53 = vmax.f32 %v4509_v60, 0.0 }
 0xeab   : > { %v13402_v9 = vpack.c.bf16 %v4511_v29, %v4510_v36 }
 0xeac   : > { %v13406_v58 = vpack.c.bf16 %v4513_v43, %v4512_v17  ;;  %v13410_v57 = vpack.c.bf16 %v4515_v3, %v4514_v7  ;;  %v13414_v22 = vpack.c.bf16 %v4517_v53, %v4516_v62  ;;  %v4796_v17 = vadd.f32 %v15128_v2, %v14699_v52  ;;  %v14073_v43 = vld [vmem:[%s14240_s29 + $0x8] sm:$0xff]  ;;  %v14074_v62 = vld [vmem:[%s14240_s29 + $0x10] sm:$0xff] }
 0xead   : > { %13403 = vmatprep.subr.bf16.mxu0 %v13402_v9 }
 0xeae   : > { %13405 = vmatpush3.bf16.msra.mxu0 %v13402_v9  ;;  %v14072_v9 = vld [vmem:[%s14240_s29] sm:$0xff] }
 0xeaf   : > { %13407 = vmatprep.subr.bf16.mxu0 %v13406_v58 }
 0xeb2   : > { %13409 = vmatpush3.bf16.msra.mxu0 %v13406_v58 }
 0xeb3   : > { %13411 = vmatprep.subr.bf16.mxu0 %v13410_v57 }
 0xeb6   : > { %13413 = vmatpush3.bf16.msra.mxu0 %v13410_v57  ;;  %v15247_v57 = vld [vmem:[%s16789_s1 + $0x18] sm:$0xff]  ;;  %s16869_s1 = sld [smem:[#allocation27_spill]] }
 0xeb7   : > { %13415 = vmatprep.subr.bf16.mxu0 %v13414_v22 }
 0xeba   : > { %13417 = vmatpush3.bf16.msra.mxu0 %v13414_v22 }
 0xebb   : > { %13419 = vmatprep.subr.bf16.mxu0 %v14993_v28 }
 0xebd   : > { %12758 = vmatmul.mubr.msk.f32.vlgmr.msra.gmra.mrb[26].mxu0 %vm4546_vm4, %v15235_v40 }
 0xebe   : > { %13421 = vmatpush3.bf16.msra.mxu0 %v14993_v28  ;;  %12760 = vmatprep.mubr.msk.f32.mxu0 %vm4546_vm4, %v15239_v34 }
 0xebf   : > { %13423 = vmatprep.subr.bf16.mxu0 %v15037_v49 }
 0xec1   : > { %12761 = vmatmul.mubr.msk.f32.gmra.mrb[28].mxu0 %vm4546_vm4, %v15247_v57 }
 0xec2   : > { %13425 = vmatpush3.bf16.msra.mxu0 %v15037_v49  ;;  %12771 = vmatprep.mubr.msk.f32.mxu0 %vm1785_vm6, %v14072_v9 }
 0xec3   : > { %12797 = vmatprep.subr.mxu0 %v4796_v17 }
 0xec5   : > { %12772 = vmatmul.mubr.msk.f32.vlgmr.msra.gmra.mrb[30].mxu0 %vm1785_vm6, %v14073_v43 }
 0xec6   : > { %12798 = vmatpush3.msra.mxu0 %v4796_v17  ;;  %12774 = vmatprep.mubr.msk.f32.mxu0 %vm1785_vm6, %v14074_v62 }
 0xec7   : > { %13434 = vmatprep.subr.bf16.mxu0 %v16791_v8 }
 0xec9   : > { %12775 = vmatmul.mubr.msk.f32.gmra.mrb[32].mxu0 %vm1785_vm6, %v14075_v39 }
 0xf90   : > { %v15264_v52 = vpop.f32.mrb[26].mxu0 }
 0xf91   : > { %v15266_v2 = vpop.f32.mrb[27].mxu0 }
 0xf94   : > { %v15268_v1 = vpop.f32.mrb[28].mxu0 }
 0xf95   : > { %v15270_v10 = vpop.f32.mrb[29].mxu0 }
 0xf98   : > { %v12773_v27 = vpop.f32.mrb[30].mxu0 }
 0xf99   : > { %v4710_v47 = vpop.f32.mrb[31].mxu0 }
 0xf9a   : > { %v4711_v12 = vadd.f32 %v4710_v47, %v14670_v38 }
 0xf9c   : > { %v15273_v13 = vpop.f32.mrb[32].mxu0  ;;  %4835 = vxpose.xlu1.b32.start.end [1/1] (short) (narrow) %v4711_v12, 16 }
 0xf9d   : > { %v15275_v25 = vpop.f32.mrb[33].mxu0 }
0x101c   : > { %v4851_v60 = vpop.trf.xlu1 }
0x101d   : > { %12799 = vmatprep.mubr.msk.f32.mxu0 %vm2592_vm14, %v4851_v60 }
0x1020   : > { %v4852_v36 = vpop.trf.xlu1 }
0x1021   : > { %12800 = vmatmul.mubr.msk.f32.vlgmr.msra.gmra.mrb[34].mxu0 %vm2592_vm14, %v4852_v36 }
0x1022   : > { %12806 = vmatprep.mubr.msk.f32.mxu0 %vm14134_vm1, %v16793_v56 }
0x10f4   : > { %v12801_v29 = vpop.f32.mrb[34].mxu0 }
0x10f5   : > { %v4939_v7 = vpop.f32.mrb[35].mxu0  ;;  %v4949_v3 = vmul.f32 0.35355338, %v12801_v29 }
0x10f6   : > { %v4948_v38 = vmul.f32 0.35355338, %v4939_v7 }
0x10f7   : > { %v4951_v22 = vsel %vm4834_vm9, %v4949_v3, -1e+30  ;;  %v4716_v3 = vadd.f32 %v12773_v27, %v14668_v42  ;;  %v4816_v42 = vadd.f32 %v15137_v48, %v14765_v0 }
0x10f8   : > { %v4950_v53 = vsel %vm4834_vm9, %v4948_v38, -1e+30  ;;  %v4956_v17 = vsel %vm4955_vm10, %v4951_v22, -inf }
0x10f9   : > { %v4952_v58 = vsel %vm1970_vm7, %v4950_v53, -inf }
0x10fa   : > { %4953 = vmax.xlane.f32.xlu0 %v4952_v58 }
0x10fe   : > { %4957 = vmax.xlane.f32.xlu0 %v4956_v17 }
0x1187   : > { %v4954_v9 = vpop.xlane.xlu0 %4953 }
0x1188   : > { %v4959_v43 = vsub.f32 %v4950_v53, %v4954_v9 }
0x118a   : > { %v4961_v62 = vmul.f32 1.442695, %v4959_v43 }
0x118b   : > { %v4958_v39 = vpop.xlane.xlu0 %4957 }
0x118c   : > { %13824 = vpow2.f32 %v4961_v62  ;;  %v4960_v47 = vsub.f32 %v4951_v22, %v4958_v39  ;;  %v4801_v39 = vadd.f32 %v15126_v37, %v14697_v50 }
0x118e   : > { %v4963_v12 = vmul.f32 1.442695, %v4960_v47 }
0x1190   : > { %13826 = vpow2.f32 %v4963_v12 }
0x1196   : > { %v13825_v60 = vpop.eup %13824 }
0x1197   : > { %v4965_v36 = vsel %vm1970_vm7, %v13825_v60, 0.0 }
0x1198   : > { %4966 = vadd.xlane.f32.xlu0 %v4965_v36 }
0x119a   : > { %v13827_v29 = vpop.eup %13826 }
0x119b   : > { %v4968_v7 = vsel %vm4955_vm10, %v13827_v29, 0.0 }
0x119c   : > { %4969 = vadd.xlane.f32.xlu1 %v4968_v7 }
0x11c5   : > { %5054 = vxpose.xlu0.b32.start.end [1/1] (short) (narrow) %v4716_v3, 16 }
0x1225   : > { %v4967_v38 = vpop.xlane.xlu0 %4966 }
0x1226   : > { %13828 = vrcp.f32 %v4967_v38 }
0x1229   : > { %v4970_v53 = vpop.xlane.xlu1 %4969 }
0x122a   : > { %13830 = vrcp.f32 %v4970_v53 }
0x1230   : > { %v13829_v58 = vpop.eup %13828 }
0x1231   : > { %v4973_v22 = vmul.f32 %v13829_v58, %v13825_v60 }
0x1234   : > { %v13831_v17 = vpop.eup %13830 }
0x1235   : > { %v4974_v9 = vmul.f32 %v13831_v17, %v13827_v29 }
0x1237   : > { %v13435_v62 = vpack.c.bf16 %v4974_v9, %v4973_v22 }
0x1239   : > { %13437 = vmatpush3.bf16.xpose.msk.msra.mxu0 %vm15293_vm11, %v13435_v62 }
0x123a   : > { %12809 = vmatprep.subr.mxu0 %v4801_v39 }
0x1240   : > { %12807 = vmatmul.mubr.msk.f32.vlgmr.msra.gmra.mrb[36].mxu0 %vm1970_vm7, %v4816_v42 }
0x1241   : > { %12810 = vmatpush3.msra.mxu0 %v4801_v39 }
0x1245   : > { %v5070_v27 = vpop.trf.xlu0 }
0x1246   : > { %12811 = vmatprep.mubr.msk.f32.mxu0 %vm2592_vm14, %v5070_v27  ;;  %v4721_v27 = vadd.f32 %v15275_v25, %v14749_v55  ;;  %v4821_v55 = vadd.f32 %v15135_v21, %v14754_v20 }
0x1249   : > { %v5071_v47 = vpop.trf.xlu0 }
0x124a   : > { %12812 = vmatmul.mubr.msk.f32.vlgmr.msra.gmra.mrb[38].mxu0 %vm2592_vm14, %v5071_v47 }
0x124b   : > { %12823 = vmatprep.mubr.msk.f32.mxu0 %vm2592_vm14, %v14867_v26 }
0x1313   : > { %v5050_v50 = vpop.f32.mrb[36].mxu0 }
0x1314   : > { %v12808_v37 = vpop.f32.mrb[37].mxu0 }
0x131d   : > { %v12813_v12 = vpop.f32.mrb[38].mxu0 }
0x131e   : > { %v5168_v60 = vmul.f32 0.35355338, %v12813_v12  ;;  %v5158_v36 = vpop.f32.mrb[39].mxu0 }
0x131f   : > { %v5167_v29 = vmul.f32 0.35355338, %v5158_v36 }
0x1320   : > { %v5170_v0 = vsel %vm4834_vm9, %v5168_v60, -1e+30 }
0x1321   : > { %v5174_v48 = vsel %vm4955_vm10, %v5170_v0, -inf  ;;  %v5169_v7 = vsel %vm4834_vm9, %v5167_v29, -1e+30 }
0x1322   : > { %5175 = vmax.xlane.f32.xlu0 %v5174_v48  ;;  %v5171_v3 = vsel %vm1970_vm7, %v5169_v7, -inf  ;;  %v4806_v48 = vadd.f32 %v15133_v4, %v14767_v6 }
0x1323   : > { %5172 = vmax.xlane.f32.xlu1 %v5171_v3 }
0x13af   : > { %v5176_v38 = vpop.xlane.xlu0 %5175 }
0x13b0   : > { %v5178_v26 = vsub.f32 %v5170_v0, %v5176_v38  ;;  %v5173_v53 = vpop.xlane.xlu1 %5172 }
0x13b1   : > { %v5177_v58 = vsub.f32 %v5169_v7, %v5173_v53 }
0x13b2   : > { %v5181_v17 = vmul.f32 1.442695, %v5178_v26 }
0x13b3   : > { %v5179_v22 = vmul.f32 1.442695, %v5177_v58 }
0x13b5   : > { %13832 = vpow2.f32 %v5179_v22 }
0x13b6   : > { %13834 = vpow2.f32 %v5181_v17 }
0x13bf   : > { %v13833_v9 = vpop.eup %13832 }
0x13c0   : > { %v5183_v62 = vsel %vm1970_vm7, %v13833_v9, 0.0  ;;  %v13835_v39 = vpop.eup %13834 }
0x13c1   : > { %5184 = vadd.xlane.f32.xlu1 %v5183_v62  ;;  %v5186_v42 = vsel %vm4955_vm10, %v13835_v39, 0.0 }
0x13c5   : > { %5187 = vadd.xlane.f32.xlu1 %v5186_v42 }
0x13f8   : > { %5442 = vxpose.xlu1.b32.start.end [1/1] (short) (narrow) %v4721_v27, 16 }
0x144e   : > { %v5185_v47 = vpop.xlane.xlu1 %5184 }
0x144f   : > { %13836 = vrcp.f32 %v5185_v47 }
0x1452   : > { %v5188_v37 = vpop.xlane.xlu1 %5187 }
0x1453   : > { %13838 = vrcp.f32 %v5188_v37 }
0x1459   : > { %v13837_v12 = vpop.eup %13836 }
0x145a   : > { %v5191_v36 = vmul.f32 %v13837_v12, %v13833_v9  ;;  %v4726_v9 = vadd.f32 %v15273_v13, %v14786_v15 }
0x145d   : > { %v13839_v60 = vpop.eup %13838 }
0x145e   : > { %v5192_v29 = vmul.f32 %v13839_v60, %v13835_v39  ;;  %v4811_v60 = vadd.f32 %v15131_v11, %v14822_v59 }
0x1460   : > { %v13439_v0 = vpack.c.bf16 %v5192_v29, %v5191_v36  ;;  %v16812_v36 = vld [vmem:[#allocation37_spill] sm:$0xff]  ;;  %v16813_v29 = vld [vmem:[#allocation80_spill] sm:$0xff] }
0x1461   : > { %v4826_v15 = vadd.f32 %v16813_v29, %v16812_v36 }
0x1462   : > { %13441 = vmatpush3.bf16.xpose.msk.msra.mxu1 %vm15293_vm11, %v13439_v0 }
0x1463   : > { %12837 = vmatprep.subr.mxu1 %v4806_v48 }
0x1469   : > { %12819 = vmatmul.mubr.msk.f32.vlgmr.msra.gmra.mrb[42].mxu1 %vm1970_vm7, %v4821_v55  ;;  %v16816_v55 = vld [vmem:[#allocation40_spill] sm:$0xff] }
0x146a   : > { %12838 = vmatpush3.msra.mxu1 %v4806_v48  ;;  %v16815_v48 = vld [vmem:[#allocation39_spill] sm:$0xff] }
0x146b   : > { %13442 = vmatprep.subr.bf16.mxu1 %v16791_v8 }
0x1478   : > { %v5458_v25 = vpop.trf.xlu1 }
0x1479   : > { %12839 = vmatprep.mubr.msk.f32.mxu1 %vm2592_vm14, %v5458_v25  ;;  %v16817_v25 = vld [vmem:[#allocation41_spill] sm:$0xff] }
0x147c   : > { %v5459_v7 = vpop.trf.xlu1 }
0x147d   : > { %12840 = vmatmul.mubr.msk.f32.vlgmr.msra.gmra.mrb[44].mxu1 %vm2592_vm14, %v5459_v7  ;;  %v16818_v7 = vld [vmem:[#allocation42_spill] sm:$0xff] }
0x147e   : > { %12846 = vmatprep.mubr.msk.f32.mxu1 %vm14134_vm1, %v16793_v56 }
0x153c   : > { %v5268_v6 = vpop.f32.mrb[42].mxu1 }
0x153d   : > { %v12820_v4 = vpop.f32.mrb[43].mxu1  ;;  %12821 = vmatprep.subr.mxu0 %v5268_v6 }
0x153e   : > { %12822 = vmatpush3.msra.mxu0 %v5268_v6 }
0x153f   : > { %12824 = vmatmul.mubr.msk.f32.vlgmr.msra.gmra.mrb[40].mxu0 %vm2592_vm14, %v14873_v31  ;;  %12829 = vmatprep.subr.mxu0 %v5050_v50 }
0x1540   : > { %12826 = vmatprep.mubr.msk.f32.mxu0 %vm2592_vm14, %v14881_v30  ;;  %12830 = vmatpush3.msra.mxu0 %v5050_v50 }
0x1543   : > { %12827 = vmatmul.mubr.msk.f32.gmra.mrb[42].mxu0 %vm2592_vm14, %v14885_v33 }
0x1544   : > { %12831 = vmatprep.mubr.msk.f32.mxu0 %vm2592_vm14, %v14871_v5 }
0x1547   : > { %12832 = vmatmul.mubr.msk.f32.vlgmr.msra.gmra.mrb[40].mxu0 %vm2592_vm14, %v14879_v16 }
0x1548   : > { %12834 = vmatprep.mubr.msk.f32.mxu0 %vm2592_vm14, %v14889_v35 }
0x154b   : > { %12835 = vmatmul.mubr.msk.f32.gmra.mrb[42].mxu0 %vm2592_vm14, %v14901_v32 }
0x154c   : > { %12851 = vmatprep.mubr.msk.f32.mxu0 %vm2592_vm14, %v14893_v24 }
0x1550   : > { %v12841_v20 = vpop.f32.mrb[44].mxu1 }
0x1551   : > { %v5546_v31 = vpop.f32.mrb[45].mxu1  ;;  %v5556_v30 = vmul.f32 0.35355338, %v12841_v20 }
0x1552   : > { %v5555_v21 = vmul.f32 0.35355338, %v5546_v31 }
0x1553   : > { %v5558_v16 = vsel %vm4834_vm9, %v5556_v30, -1e+30 }
0x1554   : > { %v5557_v33 = vsel %vm4834_vm9, %v5555_v21, -1e+30  ;;  %v5562_v35 = vsel %vm4955_vm10, %v5558_v16, -inf }
0x1555   : > { %v5559_v5 = vsel %vm1970_vm7, %v5557_v33, -inf }
0x1556   : > { %5560 = vmax.xlane.f32.xlu0 %v5559_v5 }
0x155a   : > { %5563 = vmax.xlane.f32.xlu0 %v5562_v35 }
0x15e3   : > { %v5561_v32 = vpop.xlane.xlu0 %5560 }
0x15e4   : > { %v5565_v50 = vsub.f32 %v5557_v33, %v5561_v32 }
0x15e6   : > { %v5567_v3 = vmul.f32 1.442695, %v5565_v50 }
0x15e7   : > { %v5564_v24 = vpop.xlane.xlu0 %5563 }
0x15e8   : > { %13840 = vpow2.f32 %v5567_v3  ;;  %v5566_v38 = vsub.f32 %v5558_v16, %v5564_v24  ;;  %v6606_v16 = vld [vmem:[%s16814_s2 + $0x8] sm:$0xff] }
0x15ea   : > { %v5569_v26 = vmul.f32 1.442695, %v5566_v38 }
0x15ec   : > { %13842 = vpow2.f32 %v5569_v26 }
0x15f2   : > { %v13841_v53 = vpop.eup %13840 }
0x15f3   : > { %v5571_v58 = vsel %vm1970_vm7, %v13841_v53, 0.0 }
0x15f4   : > { %5572 = vadd.xlane.f32.xlu0 %v5571_v58 }
0x15f6   : > { %v13843_v17 = vpop.eup %13842 }
0x15f7   : > { %v5574_v22 = vsel %vm4955_vm10, %v13843_v17, 0.0 }
0x15f8   : > { %5575 = vadd.xlane.f32.xlu1 %v5574_v22  ;;  %v4522_v22 = vld [vmem:[%s16819_s0] sm:$0xff] }
0x1621   : > { %5749 = vxpose.xlu0.b32.start.end [1/1] (short) (narrow) %v4726_v9, 16  ;;  %v4523_v9 = vld [vmem:[%s16819_s0 + $0x8] sm:$0xff] }
0x1681   : > { %v5573_v62 = vpop.xlane.xlu0 %5572 }
0x1682   : > { %13844 = vrcp.f32 %v5573_v62  ;;  %v4524_v62 = vld [vmem:[%s16819_s0 + $0x10] sm:$0xff] }
0x1685   : > { %v5576_v39 = vpop.xlane.xlu1 %5575 }
0x1686   : > { %13846 = vrcp.f32 %v5576_v39  ;;  %v4525_v39 = vld [vmem:[%s16819_s0 + $0x18] sm:$0xff]  ;;  %s16862_s0 = sld [smem:[#allocation29_spill]] }
0x168c   : > { %v13845_v42 = vpop.eup %13844 }
0x168d   : > { %v5579_v47 = vmul.f32 %v13845_v42, %v13841_v53  ;;  %v6476_v42 = vld [vmem:[%s16820_s26] sm:$0xff] }
0x1690   : > { %v13847_v27 = vpop.eup %13846 }
0x1691   : > { %v5580_v37 = vmul.f32 %v13847_v27, %v13843_v17  ;;  %v6477_v27 = vld [vmem:[%s16820_s26 + $0x8] sm:$0xff] }
0x1693   : > { %v13443_v12 = vpack.c.bf16 %v5580_v37, %v5579_v47  ;;  %v6605_v47 = vld [vmem:[%s16814_s2] sm:$0xff] }
0x1695   : > { %13445 = vmatpush3.bf16.xpose.msk.msra.mxu1 %vm15293_vm11, %v13443_v12 }
0x1696   : > { %12857 = vmatprep.subr.mxu1 %v4811_v60 }
0x169c   : > { %12847 = vmatmul.mubr.msk.f32.vlgmr.msra.gmra.mrb[46].mxu1 %vm1970_vm7, %v4826_v15 }
0x169d   : > { %12858 = vmatpush3.msra.mxu1 %v4811_v60 }
0x169e   : > { %13446 = vmatprep.subr.bf16.mxu1 %v16791_v8 }
0x16a1   : > { %v5765_v13 = vpop.trf.xlu0 }
0x16a2   : > { %12859 = vmatprep.mubr.msk.f32.mxu1 %vm2592_vm14, %v5765_v13 }
0x16a5   : > { %v5766_v0 = vpop.trf.xlu0 }
0x16a6   : > { %12860 = vmatmul.mubr.msk.f32.vlgmr.msra.gmra.mrb[48].mxu1 %vm2592_vm14, %v5766_v0  ;;  %v16821_v0 = vld [vmem:[#allocation38_spill] sm:$0xff] }
0x16a7   : > { %12866 = vmatprep.mubr.msk.f32.mxu1 %vm14134_vm1, %v16793_v56 }
0x176f   : > { %v5656_v59 = vpop.f32.mrb[46].mxu1 }
0x1770   : > { %v12848_v11 = vpop.f32.mrb[47].mxu1  ;;  %12849 = vmatprep.subr.mxu0 %v5656_v59 }
0x1771   : > { %12850 = vmatpush3.msra.mxu0 %v5656_v59  ;;  %v16822_v59 = vld [vmem:[#allocation79_spill] sm:$0xff] }
0x1772   : > { %12852 = vmatmul.mubr.msk.f32.vlgmr.msra.gmra.mrb[40].mxu0 %vm2592_vm14, %v16815_v48  ;;  %v4831_v11 = vadd.f32 %v16822_v59, %v16821_v0  ;;  %v16823_v48 = vld [vmem:[#allocation46_spill] sm:$0xff]  ;;  %v16848_v59 = vld [vmem:[#allocation71_spill] sm:$0xff] }
0x1773   : > { %12854 = vmatprep.mubr.msk.f32.mxu0 %vm2592_vm14, %v16816_v55 }
0x1776   : > { %12855 = vmatmul.mubr.msk.f32.gmra.mrb[42].mxu0 %vm2592_vm14, %v16817_v25 }
0x1777   : > { %12871 = vmatprep.mubr.msk.f32.mxu0 %vm2592_vm14, %v16818_v7  ;;  %v16824_v7 = vld [vmem:[#allocation43_spill] sm:$0xff] }
0x1779   : > { %v12861_v6 = vpop.f32.mrb[48].mxu1 }
0x177a   : > { %v5863_v4 = vmul.f32 0.35355338, %v12861_v6  ;;  %v5853_v20 = vpop.f32.mrb[49].mxu1  ;;  %v16825_v6 = vld [vmem:[#allocation44_spill] sm:$0xff] }
0x177b   : > { %v5862_v31 = vmul.f32 0.35355338, %v5853_v20  ;;  %v16827_v20 = vld [vmem:[#allocation70_spill] sm:$0xff] }
0x177c   : > { %v5865_v30 = vsel %vm4834_vm9, %v5863_v4, -1e+30  ;;  %v16826_v4 = vld [vmem:[#allocation45_spill] sm:$0xff] }
0x177d   : > { %v5864_v21 = vsel %vm4834_vm9, %v5862_v31, -1e+30  ;;  %v5869_v33 = vsel %vm4955_vm10, %v5865_v30, -inf }
0x177e   : > { %5870 = vmax.xlane.f32.xlu0 %v5869_v33  ;;  %v5866_v5 = vsel %vm1970_vm7, %v5864_v21, -inf }
0x177f   : > { %5867 = vmax.xlane.f32.xlu1 %v5866_v5  ;;  %v16829_v5 = vld [vmem:[#allocation49_spill] sm:$0xff] }
0x1794   : > { %6620 = vperm.xlu0 %13770, %v6606_v16  }
0x180b   : > { %v5871_v35 = vpop.xlane.xlu0 %5870 }
0x180c   : > { %v5873_v32 = vsub.f32 %v5865_v30, %v5871_v35  ;;  %v5868_v50 = vpop.xlane.xlu1 %5867  ;;  %v16828_v30 = vld [vmem:[#allocation47_spill] sm:$0xff] }
0x180d   : > { %v5872_v3 = vsub.f32 %v5864_v21, %v5868_v50  ;;  %v16830_v50 = vld [vmem:[#allocation50_spill] sm:$0xff] }
0x180e   : > { %v5876_v24 = vmul.f32 1.442695, %v5873_v32 }
0x180f   : > { %v5874_v38 = vmul.f32 1.442695, %v5872_v3 }
0x1811   : > { %13848 = vpow2.f32 %v5874_v38  ;;  %v16831_v38 = vld [vmem:[#allocation48_spill] sm:$0xff] }
0x1812   : > { %13850 = vpow2.f32 %v5876_v24 }
0x181b   : > { %v13849_v26 = vpop.eup %13848 }
0x181c   : > { %v5878_v53 = vsel %vm1970_vm7, %v13849_v26, 0.0  ;;  %v13851_v58 = vpop.eup %13850 }
0x181d   : > { %5879 = vadd.xlane.f32.xlu1 %v5878_v53  ;;  %v5881_v17 = vsel %vm4955_vm10, %v13851_v58, 0.0  ;;  %vm9173_vm10 = vcmask 67584  }
0x1821   : > { %5882 = vadd.xlane.f32.xlu1 %v5881_v17  ;;  %v16833_v17 = vld [vmem:[#allocation52_spill] sm:$0xff] }
0x1832   : > { %4528 = vperm.xlu1 %13771, %v4522_v22   ;;  %v16834_v22 = vld [vmem:[#allocation55_spill] sm:$0xff] }
0x1836   : > { %4533 = vperm.xlu1 %13771, %v4523_v9   ;;  %v16835_v9 = vld [vmem:[#allocation56_spill] sm:$0xff] }
0x183a   : > { %4538 = vperm.xlu1 %13771, %v4524_v62   ;;  %v16836_v62 = vld [vmem:[#allocation57_spill] sm:$0xff] }
0x183e   : > { %4543 = vperm.xlu1 %13771, %v4525_v39   ;;  %v16837_v39 = vld [vmem:[#allocation58_spill] sm:$0xff] }
0x1842   : > { %6482 = vperm.xlu1 %13771, %v6476_v42   ;;  %v16839_v42 = vld [vmem:[#allocation60_spill] sm:$0xff] }
0x1846   : > { %6487 = vperm.xlu1 %13771, %v6477_v27   ;;  %v16840_v27 = vld [vmem:[#allocation63_spill] sm:$0xff] }
0x184a   : > { %6615 = vperm.xlu1 %13771, %v6605_v47   ;;  %v16841_v47 = vld [vmem:[#allocation64_spill] sm:$0xff] }
0x18aa   : > { %v5880_v37 = vpop.xlane.xlu1 %5879 }
0x18ab   : > { %13852 = vrcp.f32 %v5880_v37  ;;  %v16843_v37 = vld [vmem:[#allocation66_spill] sm:$0xff] }
0x18ae   : > { %v5883_v12 = vpop.xlane.xlu1 %5882 }
0x18af   : > { %13854 = vrcp.f32 %v5883_v12  ;;  %v16844_v12 = vld [vmem:[#allocation67_spill] sm:$0xff] }
0x18b5   : > { %v13853_v60 = vpop.eup %13852 }
0x18b6   : > { %v5886_v29 = vmul.f32 %v13853_v60, %v13849_v26  ;;  %v16845_v60 = vld [vmem:[#allocation68_spill] sm:$0xff] }
0x18b9   : > { %v13855_v36 = vpop.eup %13854 }
0x18ba   : > { %v5887_v15 = vmul.f32 %v13855_v36, %v13851_v58  ;;  %v16832_v58 = vld [vmem:[#allocation51_spill] sm:$0xff]  ;;  %v16846_v36 = vld [vmem:[#allocation69_spill] sm:$0xff] }
0x18bc   : > { %v13447_v13 = vpack.c.bf16 %v5887_v15, %v5886_v29  ;;  %v16847_v15 = vld [vmem:[#allocation72_spill] sm:$0xff] }
0x18be   : > { %13449 = vmatpush3.bf16.xpose.msk.msra.mxu1 %vm15293_vm11, %v13447_v13 }
0x18c5   : > { %12867 = vmatmul.mubr.msk.f32.vlgmr.msra.gmra.mrb[50].mxu1 %vm1970_vm7, %v4831_v11 }
0x18c6   : > { %12885 = vmatprep.mubr.msk.f32.mxu1 %vm1785_vm6, %v16823_v48 }
0x1998   : > { %v5963_v55 = vpop.f32.mrb[50].mxu1 }
0x1999   : > { %v12868_v25 = vpop.f32.mrb[51].mxu1  ;;  %12869 = vmatprep.subr.mxu0 %v5963_v55 }
0x199a   : > { %12870 = vmatpush3.msra.mxu0 %v5963_v55 }
0x199b   : > { %12872 = vmatmul.mubr.msk.f32.vlgmr.msra.gmra.mrb[40].mxu0 %vm2592_vm14, %v16824_v7 }
0x199c   : > { %12874 = vmatprep.mubr.msk.f32.mxu0 %vm2592_vm14, %v16825_v6 }
0x199f   : > { %12875 = vmatmul.mubr.msk.f32.gmra.mrb[42].mxu0 %vm2592_vm14, %v16826_v4  ;;  %v16849_v4 = vld [vmem:[#allocation74_spill] sm:$0xff] }
0x19a0   : > { %12933 = vmatprep.mubr.msk.f32.mxu0 %vm4546_vm4, %v16827_v20 }
0x1a6e   : > { %v12873_v31 = vpop.f32.mrb[40].mxu0 }
0x1a6f   : > { %v6057_v21 = vadd.f32 %v12873_v31, %v16828_v30  ;;  %v6033_v33 = vpop.f32.mrb[41].mxu0  ;;  %v16850_v31 = vld [vmem:[#allocation73_spill] sm:$0xff] }
0x1a70   : > { %v6056_v16 = vadd.f32 %v6033_v33, %v16829_v5 }
0x1a72   : > { %v13450_v35 = vpack.c.bf16 %v6057_v21, %v6056_v16  ;;  %v12876_v32 = vpop.f32.mrb[42].mxu0 }
0x1a73   : > { %v6059_v3 = vadd.f32 %v12876_v32, %v16830_v50  ;;  %v6043_v24 = vpop.f32.mrb[43].mxu0  ;;  %v16851_v32 = vld [vmem:[#allocation76_spill] sm:$0xff] }
0x1a74   : > { %v6058_v26 = vadd.f32 %v6043_v24, %v16831_v38  ;;  %13451 = vmatprep.subr.bf16.mxu1 %v13450_v35 }
0x1a75   : > { %13453 = vmatpush3.bf16.msra.mxu1 %v13450_v35 }
0x1a76   : > { %v13454_v53 = vpack.c.bf16 %v6059_v3, %v6058_v26  ;;  %v16852_v3 = vld [vmem:[#allocation75_spill] sm:$0xff] }
0x1a78   : > { %13455 = vmatprep.subr.bf16.mxu1 %v13454_v53 }
0x1a79   : > { %13457 = vmatpush3.bf16.msra.mxu1 %v13454_v53 }
0x1a7a   : > { %13459 = vmatprep.subr.bf16.mxu1 %v14993_v28 }
0x1a7c   : > { %12886 = vmatmul.mubr.msk.f32.vlgmr.msra.gmra.mrb[52].mxu1 %vm1785_vm6, %v16832_v58 }
0x1a7d   : > { %13461 = vmatpush3.bf16.msra.mxu1 %v14993_v28  ;;  %12888 = vmatprep.mubr.msk.f32.mxu1 %vm1785_vm6, %v16833_v17  ;;  %v16838_v28 = vld [vmem:[#allocation59_spill] sm:$0xff] }
0x1a7e   : > { %13463 = vmatprep.subr.bf16.mxu1 %v15037_v49 }
0x1a80   : > { %12889 = vmatmul.mubr.msk.f32.gmra.mrb[54].mxu1 %vm1785_vm6, %v16834_v22 }
0x1a81   : > { %13465 = vmatpush3.bf16.msra.mxu1 %v15037_v49  ;;  %12891 = vmatprep.mubr.msk.f32.mxu1 %vm1785_vm6, %v16835_v9  ;;  %v16842_v49 = vld [vmem:[#allocation65_spill] sm:$0xff]  ;;  %v16853_v9 = vld [vmem:[#allocation78_spill] sm:$0xff] }
0x1a84   : > { %12892 = vmatmul.mubr.msk.f32.gmra.mrb[56].mxu1 %vm1785_vm6, %v16836_v62 }
0x1a85   : > { %12894 = vmatprep.mubr.msk.f32.mxu1 %vm1785_vm6, %v16837_v39  ;;  %v16854_v39 = vld [vmem:[#allocation77_spill] sm:$0xff] }
0x1a88   : > { %12895 = vmatmul.mubr.msk.f32.gmra.mrb[58].mxu1 %vm1785_vm6, %v16838_v28 }
0x1a89   : > { %12905 = vmatprep.mubr.msk.f32.mxu1 %vm1785_vm6, %v16839_v42 }
0x1a8c   : > { %12906 = vmatmul.mubr.msk.f32.vlgmr.msra.gmra.mrb[52].mxu1 %vm1785_vm6, %v16840_v27 }
0x1a8d   : > { %12908 = vmatprep.mubr.msk.f32.mxu1 %vm1785_vm6, %v16841_v47 }
0x1a90   : > { %12909 = vmatmul.mubr.msk.f32.gmra.mrb[54].mxu1 %vm1785_vm6, %v16842_v49 }
0x1a91   : > { %12911 = vmatprep.mubr.msk.f32.mxu1 %vm1785_vm6, %v16843_v37 }
0x1a94   : > { %12912 = vmatmul.mubr.msk.f32.gmra.mrb[56].mxu1 %vm1785_vm6, %v16844_v12 }
0x1a95   : > { %12914 = vmatprep.mubr.msk.f32.mxu1 %vm1785_vm6, %v16845_v60 }
0x1a98   : > { %12915 = vmatmul.mubr.msk.f32.gmra.mrb[58].mxu1 %vm1785_vm6, %v16846_v36 }
0x1b5f   : > { %v12907_v29 = vpop.f32.mrb[52].mxu1 }
0x1b60   : > { %v6271_v13 = vadd.f32 %v12907_v29, %v16847_v15  ;;  %v6231_v0 = vpop.f32.mrb[53].mxu1 }
0x1b61   : > { %v6270_v11 = vadd.f32 %v6231_v0, %v16848_v59 }
0x1b62   : > { %v6279_v48 = vsel %vm1970_vm7, %v6271_v13, 0.0 }
0x1b63   : > { %v6278_v55 = vsel %vm1970_vm7, %v6270_v11, 0.0  ;;  %v12910_v25 = vpop.f32.mrb[54].mxu1 }
0x1b64   : > { %v6280_v7 = vadd.f32 %v6279_v48, %v6278_v55  ;;  %v6241_v6 = vpop.f32.mrb[55].mxu1  ;;  %v6273_v20 = vadd.f32 %v12910_v25, %v16849_v4 }
0x1b65   : > { %v6272_v30 = vadd.f32 %v6241_v6, %v16850_v31 }
0x1b66   : > { %v6283_v35 = vsel %vm1970_vm7, %v6273_v20, 0.0 }
0x1b67   : > { %v6281_v21 = vsel %vm1970_vm7, %v6272_v30, 0.0  ;;  %v12913_v33 = vpop.f32.mrb[56].mxu1 }
0x1b68   : > { %v6282_v5 = vadd.f32 %v6281_v21, %v6280_v7  ;;  %v6251_v16 = vpop.f32.mrb[57].mxu1  ;;  %v6275_v50 = vadd.f32 %v12913_v33, %v16851_v32 }
0x1b69   : > { %v6274_v24 = vadd.f32 %v6251_v16, %v16852_v3 }
0x1b6a   : > { %v6284_v38 = vadd.f32 %v6283_v35, %v6282_v5  ;;  %v6287_v22 = vsel %vm1970_vm7, %v6275_v50, 0.0 }
0x1b6b   : > { %v6285_v26 = vsel %vm1970_vm7, %v6274_v24, 0.0  ;;  %v12916_v53 = vpop.f32.mrb[58].mxu1 }
0x1b6c   : > { %v6286_v58 = vadd.f32 %v6285_v26, %v6284_v38  ;;  %v6261_v17 = vpop.f32.mrb[59].mxu1  ;;  %v6277_v62 = vadd.f32 %v12916_v53, %v16853_v9 }
0x1b6d   : > { %v6276_v28 = vadd.f32 %v6261_v17, %v16854_v39 }
0x1b6e   : > { %v6288_v42 = vadd.f32 %v6287_v22, %v6286_v58  ;;  %v6291_v49 = vsel %vm1970_vm7, %v6277_v62, 0.0 }
0x1b6f   : > { %v6289_v27 = vsel %vm1970_vm7, %v6276_v28, 0.0 }
0x1b70   : > { %v6290_v47 = vadd.f32 %v6289_v27, %v6288_v42 }
0x1b72   : > { %v6292_v37 = vadd.f32 %v6291_v49, %v6290_v47 }
0x1b74   : > { %v6293_v12 = vrot.slane %v6292_v37, 4 }
0x1b76   : > { %v6294_v60 = vadd.f32 %v6293_v12, %v6292_v37 }
0x1b78   : > { %v6295_v36 = vrot.slane %v6294_v60, 2 }
0x1b7a   : > { %v6296_v29 = vadd.f32 %v6295_v36, %v6294_v60 }
0x1b7c   : > { %v6297_v15 = vrot.slane %v6296_v29, 1 }
0x1b7e   : > { %v6298_v0 = vadd.f32 %v6297_v15, %v6296_v29 }
0x1b80   : > { %v6299_v59 = vmul.f32 0.015625, %v6298_v0 }
0x1b82   : > { %v6300_v48 = vsub.f32 %v6270_v11, %v6299_v59  ;;  %v6301_v55 = vsub.f32 %v6271_v13, %v6299_v59  ;;  %v6302_v25 = vsub.f32 %v6272_v30, %v6299_v59  ;;  %v6303_v7 = vsub.f32 %v6273_v20, %v6299_v59 }
0x1b83   : > { %v6304_v6 = vsub.f32 %v6274_v24, %v6299_v59  ;;  %v6305_v4 = vsub.f32 %v6275_v50, %v6299_v59  ;;  %v6306_v31 = vsub.f32 %v6276_v28, %v6299_v59  ;;  %v6307_v21 = vsub.f32 %v6277_v62, %v6299_v59 }
0x1b84   : > { %v6308_v33 = vmul.f32 %v6300_v48, %v6300_v48  ;;  %v6309_v5 = vmul.f32 %v6301_v55, %v6301_v55  ;;  %v6310_v16 = vmul.f32 %v6302_v25, %v6302_v25  ;;  %v6311_v35 = vmul.f32 %v6303_v7, %v6303_v7 }
0x1b85   : > { %v6312_v26 = vmul.f32 %v6304_v6, %v6304_v6  ;;  %v6313_v13 = vmul.f32 %v6305_v4, %v6305_v4  ;;  %v6314_v50 = vmul.f32 %v6306_v31, %v6306_v31  ;;  %v6315_v17 = vmul.f32 %v6307_v21, %v6307_v21 }
0x1b86   : > { %v6316_v32 = vsel %vm1970_vm7, %v6308_v33, 0.0  ;;  %v6317_v3 = vsel %vm1970_vm7, %v6309_v5, 0.0  ;;  %v6319_v53 = vsel %vm1970_vm7, %v6310_v16, 0.0  ;;  %v6321_v20 = vsel %vm1970_vm7, %v6311_v35, 0.0  ;;  %v15469_v16 = vpop.permute.xlu1 %4528 }
0x1b87   : > { %v6318_v38 = vadd.f32 %v6317_v3, %v6316_v32  ;;  %v6323_v24 = vsel %vm1970_vm7, %v6312_v26, 0.0  ;;  %v6325_v22 = vsel %vm1970_vm7, %v6313_v13, 0.0  ;;  %v6327_v62 = vsel %vm1970_vm7, %v6314_v50, 0.0 }
0x1b88   : > { %v6329_v28 = vsel %vm1970_vm7, %v6315_v17, 0.0 }
0x1b89   : > { %v6320_v11 = vadd.f32 %v6319_v53, %v6318_v38 }
0x1b8a   : > { %v15475_v17 = vpop.permute.xlu1 %4533 }
0x1b8b   : > { %v6322_v30 = vadd.f32 %v6321_v20, %v6320_v11 }
0x1b8d   : > { %v6324_v58 = vadd.f32 %v6323_v24, %v6322_v30 }
0x1b8f   : > { %v6326_v9 = vadd.f32 %v6325_v22, %v6324_v58 }
0x1b91   : > { %v6328_v39 = vadd.f32 %v6327_v62, %v6326_v9  ;;  %v16859_v9 = vld [vmem:[#allocation85_spill] sm:$0xff] }
0x1b93   : > { %v6330_v42 = vadd.f32 %v6329_v28, %v6328_v39 }
0x1b95   : > { %v6331_v27 = vrot.slane %v6330_v42, 4 }
0x1b97   : > { %v6332_v47 = vadd.f32 %v6331_v27, %v6330_v42 }
0x1b99   : > { %v6333_v49 = vrot.slane %v6332_v47, 2 }
0x1b9b   : > { %v6334_v37 = vadd.f32 %v6333_v49, %v6332_v47 }
0x1b9d   : > { %v6335_v12 = vrot.slane %v6334_v37, 1 }
0x1b9f   : > { %v6336_v60 = vadd.f32 %v6335_v12, %v6334_v37 }
0x1ba1   : > { %v6337_v36 = vmul.f32 0.015873017, %v6336_v60  ;;  %v4539_v60 = vpop.permute.xlu1 %4538 }
0x1ba3   : > { %13856 = vrsqrt.f32 %v6337_v36  ;;  %vm6340_vm12 = vcmp.eq.f32.partialorder %v6337_v36, inf  ;;  %v6343_v0 = vand.u32 2147483648, %v6337_v36  ;;  %vm6342_vm13 = vcmp.eq.f32.partialorder %v6337_v36, 0.0 }
0x1bad   : > { %v13857_v29 = vpop.eup %13856 }
0x1bae   : > { %v6339_v15 = vmul.f32 %v13857_v29, %v6337_v36 }
0x1bb0   : > { %v6341_v59 = vsel %vm6340_vm12, %v6337_v36, %v6339_v15 }
0x1bb1   : > { %v6344_v33 = vsel %vm6342_vm13, %v6343_v0, %v6341_v59 }
0x1bb2   : > { %v6345_v5 = vadd.f32 1e-06, %v6344_v33  ;;  %v16863_v33 = vld [vmem:[#allocation33_spill] sm:$0xff] }
0x1bb4   : > { %13858 = vrcp.f32 %v6345_v5 }
0x1bbe   : > { %v13859_v35 = vpop.eup %13858 }
0x1bbf   : > { %v6353_v32 = vmul.f32 %v13859_v35, %v6306_v31  ;;  %v6347_v3 = vmul.f32 %v13859_v35, %v6300_v48  ;;  %v6348_v38 = vmul.f32 %v13859_v35, %v6301_v55  ;;  %v6349_v26 = vmul.f32 %v13859_v35, %v6302_v25  ;;  %v16855_v31 = vld [vmem:[#allocation82_spill] sm:$0xff]  ;;  %v16856_v55 = vld [vmem:[#allocation83_spill] sm:$0xff] }
0x1bc0   : > { %v6350_v53 = vmul.f32 %v13859_v35, %v6303_v7  ;;  %v6351_v11 = vmul.f32 %v13859_v35, %v6304_v6  ;;  %v6352_v13 = vmul.f32 %v13859_v35, %v6305_v4  ;;  %v6354_v20 = vmul.f32 %v13859_v35, %v6307_v21  ;;  %v16857_v7 = vld [vmem:[#allocation84_spill] sm:$0xff]  ;;  %v16858_v21 = vld [vmem:[#allocation81_spill] sm:$0xff] }
0x1bc1   : > { %v6361_v30 = vmul.f32 %v6353_v32, %v15203_v18  ;;  %v6355_v50 = vmul.f32 %v6347_v3, %v15179_v23  ;;  %v6356_v24 = vmul.f32 %v6348_v38, %v15181_v63  ;;  %v6357_v58 = vmul.f32 %v6349_v26, %v15187_v61  ;;  %v16867_v3 = vld [vmem:[#allocation35_spill] sm:$0xff]  ;;  %v6472_v38 = vld [vmem:[%s16862_s0] sm:$0xff] }
0x1bc2   : > { %v6358_v22 = vmul.f32 %v6350_v53, %v15189_v54  ;;  %v6359_v48 = vmul.f32 %v6351_v11, %v16855_v31  ;;  %v6360_v25 = vmul.f32 %v6352_v13, %v16856_v55  ;;  %v6362_v6 = vmul.f32 %v6354_v20, %v16857_v7  ;;  %v6473_v26 = vld [vmem:[%s16862_s0 + $0x8] sm:$0xff]  ;;  %v6474_v53 = vld [vmem:[%s16862_s0 + $0x10] sm:$0xff]  ;;  %v16874_v7 = vld [vmem:[#allocation61_spill] sm:$0xff] }
0x1bc3   : > { %v6363_v4 = vadd.f32 %v6355_v50, %v15183_v46  ;;  %v6364_v18 = vadd.f32 %v6356_v24, %v15185_v44  ;;  %v6365_v23 = vadd.f32 %v6357_v58, %v16858_v21  ;;  %v6369_v63 = vadd.f32 %v6361_v30, %v16859_v9  ;;  %v16870_v50 = vld [vmem:[#allocation53_spill] sm:$0xff]  ;;  %v16872_v58 = vld [vmem:[#allocation54_spill] sm:$0xff] }
0x1bc4   : > { %v6366_v61 = vadd.f32 %v6358_v22, %v15193_v51  ;;  %v6367_v62 = vadd.f32 %v6359_v48, %v15199_v41  ;;  %v6368_v54 = vadd.f32 %v6360_v25, %v15201_v45  ;;  %v6370_v39 = vadd.f32 %v6362_v6, %v15224_v14  ;;  %v4544_v41 = vpop.permute.xlu1 %4543  ;;  %v16860_v14 = vld [vmem:[#allocation32_spill] sm:$0xff] }
0x1bc5   : > { %v6371_v28 = vmax.f32 %v6363_v4, 0.0  ;;  %v6372_v42 = vmax.f32 %v6364_v18, 0.0  ;;  %v6373_v27 = vmax.f32 %v6365_v23, 0.0  ;;  %v6377_v47 = vmax.f32 %v6369_v63, 0.0  ;;  %v16876_v4 = vld [vmem:[#allocation62_spill] sm:$0xff] }
0x1bc6   : > { %v6374_v49 = vmax.f32 %v6366_v61, 0.0  ;;  %v6375_v46 = vmax.f32 %v6367_v62, 0.0  ;;  %v6376_v37 = vmax.f32 %v6368_v54, 0.0  ;;  %v6378_v44 = vmax.f32 %v6370_v39, 0.0  ;;  %v15571_v62 = vld [vmem:[%s16869_s1 + $0x8] sm:$0xff]  ;;  %v15574_v54 = vld [vmem:[%s16869_s1 + $0x10] sm:$0xff] }
0x1bc7   : > { %v13466_v12 = vpack.c.bf16 %v6372_v42, %v6371_v28  ;;  %v4631_v51 = vadd.f32 %v15264_v52, %v15475_v17  ;;  %v4626_v45 = vadd.f32 %v15266_v2, %v15469_v16  ;;  %v4641_v59 = vadd.f32 %v15268_v1, %v4544_v41  ;;  %v16865_v2 = vld [vmem:[#allocation34_spill] sm:$0xff]  ;;  %v15581_v39 = vld [vmem:[%s16869_s1 + $0x18] sm:$0xff] }
0x1bc8   : > { %v13470_v36 = vpack.c.bf16 %v6374_v49, %v6373_v27  ;;  %v13474_v29 = vpack.c.bf16 %v6376_v37, %v6375_v46  ;;  %v13478_v15 = vpack.c.bf16 %v6378_v44, %v6377_v47  ;;  %v4636_v35 = vadd.f32 %v15270_v10, %v4539_v60  ;;  %v15539_v20 = vpop.permute.xlu1 %6482  ;;  %v15590_v27 = vld [vmem:[%s16869_s1 + $0x20] sm:$0xff]  ;;  %v15595_v47 = vld [vmem:[%s16869_s1 + $0x28] sm:$0xff]  ;;  %v15600_v49 = vld [vmem:[%s16869_s1 + $0x30] sm:$0xff]  ;;  %v15609_v37 = vpop.permute.xlu0 %6620 }
0x1bc9   : > { %13467 = vmatprep.subr.bf16.mxu0 %v13466_v12  ;;  %v15494_v0 = vadd.f32 %v4631_v51, %v16860_v14  ;;  %v15498_v5 = vadd.f32 %v4626_v45, %v16863_v33  ;;  %v15506_v32 = vadd.f32 %v4641_v59, %v16865_v2  ;;  %v15605_v46 = vld [vmem:[%s16869_s1 + $0x38] sm:$0xff] }
0x1bca   : > { %13469 = vmatpush3.bf16.msra.mxu0 %v13466_v12  ;;  %v15509_v1 = vadd.f32 %v4636_v35, %v16867_v3 }
0x1bcb   : > { %13471 = vmatprep.subr.bf16.mxu0 %v13470_v36  ;;  %16861 = vst [vmem:[#allocation37_spill] sm:$0xff] %v15494_v0  ;;  %16864 = vst [vmem:[#allocation80_spill] sm:$0xff] %v15498_v5  ;;  %v15503_v52 = vpack.c.bf16 %v15494_v0, %v15498_v5 }
0x1bcc   : > { %16866 = vst [vmem:[#allocation39_spill] sm:$0xff] %v15506_v32  ;;  %16868 = vst [vmem:[#allocation40_spill] sm:$0xff] %v15509_v1  ;;  %v15514_v10 = vpack.c.bf16 %v15506_v32, %v15509_v1 }
0x1bce   : > { %13473 = vmatpush3.bf16.msra.mxu0 %v13470_v36 }
0x1bcf   : > { %13475 = vmatprep.subr.bf16.mxu0 %v13474_v29 }
0x1bd2   : > { %13477 = vmatpush3.bf16.msra.mxu0 %v13474_v29 }
0x1bd3   : > { %13479 = vmatprep.subr.bf16.mxu0 %v13478_v15 }
0x1bd6   : > { %13481 = vmatpush3.bf16.msra.mxu0 %v13478_v15 }
0x1bd7   : > { %13483 = vmatprep.subr.bf16.mxu0 %v15503_v52 }
0x1bd9   : > { %12934 = vmatmul.mubr.msk.f32.vlgmr.msra.gmra.mrb[44].mxu0 %vm4546_vm4, %v15235_v40  ;;  %v6475_v40 = vld [vmem:[%s16862_s0 + $0x18] sm:$0xff] }
0x1bda   : > { %13485 = vmatpush3.bf16.msra.mxu0 %v15503_v52  ;;  %12936 = vmatprep.mubr.msk.f32.mxu0 %vm4546_vm4, %v15239_v34  ;;  %v15534_v34 = vld [vmem:[%s16869_s1] sm:$0xff]  ;;  %s16879_s1 = sld [smem:[#allocation28_spill]] }
0x1bdb   : > { %13487 = vmatprep.subr.bf16.mxu0 %v15514_v10 }
0x1bdd   : > { %12937 = vmatmul.mubr.msk.f32.gmra.mrb[46].mxu0 %vm4546_vm4, %v15247_v57 }
0x1bde   : > { %13489 = vmatpush3.bf16.msra.mxu0 %v15514_v10  ;;  %12947 = vmatprep.mubr.msk.f32.mxu0 %vm1785_vm6, %v6472_v38 }
0x1be1   : > { %12948 = vmatmul.mubr.msk.f32.vlgmr.msra.gmra.mrb[48].mxu0 %vm1785_vm6, %v6473_v26 }
0x1be2   : > { %12950 = vmatprep.mubr.msk.f32.mxu0 %vm1785_vm6, %v6474_v53 }
0x1be5   : > { %12951 = vmatmul.mubr.msk.f32.gmra.mrb[50].mxu0 %vm1785_vm6, %v6475_v40 }
0x1be6   : > { %12961 = vmatprep.mubr.msk.f32.mxu0 %vm1785_vm6, %v15534_v34 }
0x1cac   : > { %v12935_v11 = vpop.f32.mrb[44].mxu0 }
0x1cad   : > { %v6451_v57 = vadd.f32 %v12935_v11, %v15475_v17  ;;  %v6445_v13 = vpop.f32.mrb[45].mxu0 }
0x1cae   : > { %v6446_v30 = vadd.f32 %v6445_v13, %v15469_v16  ;;  %v15555_v16 = vpop.permute.xlu1 %6487 }
0x1caf   : > { %v15543_v24 = vadd.f32 %v6451_v57, %v16870_v50 }
0x1cb0   : > { %v15546_v22 = vadd.f32 %v6446_v30, %v16872_v58  ;;  %v12938_v31 = vpop.f32.mrb[46].mxu0 }
0x1cb1   : > { %16871 = vst [vmem:[#allocation41_spill] sm:$0xff] %v15543_v24  ;;  %v6461_v48 = vadd.f32 %v12938_v31, %v4544_v41  ;;  %v6455_v55 = vpop.f32.mrb[47].mxu0 }
0x1cb2   : > { %16873 = vst [vmem:[#allocation42_spill] sm:$0xff] %v15546_v22  ;;  %v15550_v25 = vpack.c.bf16 %v15543_v24, %v15546_v22  ;;  %v6456_v17 = vadd.f32 %v6455_v55, %v4539_v60  ;;  %v15611_v44 = vpop.permute.xlu1 %6615 }
0x1cb3   : > { %v15553_v6 = vadd.f32 %v6461_v48, %v16874_v7 }
0x1cb4   : > { %v15558_v18 = vadd.f32 %v6456_v17, %v16876_v4  ;;  %v12949_v21 = vpop.f32.mrb[48].mxu0  ;;  %13491 = vmatprep.subr.bf16.mxu0 %v15550_v25 }
0x1cb5   : > { %16875 = vst [vmem:[#allocation38_spill] sm:$0xff] %v15553_v6  ;;  %v6584_v23 = vadd.f32 %v12949_v21, %v15555_v16  ;;  %v6578_v9 = vpop.f32.mrb[49].mxu0  ;;  %13493 = vmatpush3.bf16.msra.mxu0 %v15550_v25  ;;  %v6478_v21 = vld [vmem:[%s16820_s26 + $0x10] sm:$0xff] }
0x1cb6   : > { %16877 = vst [vmem:[#allocation79_spill] sm:$0xff] %v15558_v18  ;;  %v15565_v63 = vpack.c.bf16 %v15553_v6, %v15558_v18  ;;  %v6579_v61 = vadd.f32 %v6578_v9, %v15539_v20 }
0x1cb7   : > { %7002 = vxpose.xlu0.b32.start.end [1/1] (short) (narrow) %v6584_v23, 16  ;;  %v6610_v23 = vld [vmem:[%s16814_s2 + $0x28] sm:$0xff] }
0x1cb8   : > { %13495 = vmatprep.subr.bf16.mxu0 %v15565_v63  ;;  %6782 = vxpose.xlu1.b32.start.end [1/1] (short) (narrow) %v6579_v61, 16  ;;  %v15585_v28 = vpop.f32.mrb[50].mxu0 }
0x1cb9   : > { %13497 = vmatpush3.bf16.msra.mxu0 %v15565_v63  ;;  %v15587_v42 = vpop.f32.mrb[51].mxu0 }
0x1cbc   : > { %12962 = vmatmul.mubr.msk.f32.vlgmr.msra.gmra.mrb[52].mxu0 %vm1785_vm6, %v15571_v62 }
0x1cbd   : > { %12964 = vmatprep.mubr.msk.f32.mxu0 %vm1785_vm6, %v15574_v54 }
0x1cc0   : > { %12965 = vmatmul.mubr.msk.f32.gmra.mrb[54].mxu0 %vm1785_vm6, %v15581_v39 }
0x1cc1   : > { %12967 = vmatprep.mubr.msk.f32.mxu0 %vm1785_vm6, %v15590_v27 }
0x1cc4   : > { %12968 = vmatmul.mubr.msk.f32.gmra.mrb[56].mxu0 %vm1785_vm6, %v15595_v47 }
0x1cc5   : > { %12970 = vmatprep.mubr.msk.f32.mxu0 %vm1785_vm6, %v15600_v49 }
0x1cc8   : > { %12971 = vmatmul.mubr.msk.f32.gmra.mrb[58].mxu0 %vm1785_vm6, %v15605_v46 }
0x1d37   : > { %v7018_v12 = vpop.trf.xlu0 }
0x1d38   : > { %v6798_v60 = vpop.trf.xlu1  ;;  %12987 = vmatprep.mubr.msk.f32.mxu0 %vm2592_vm14, %v7018_v12 }
0x1d39   : > { %12975 = vmatprep.mubr.msk.f32.mxu1 %vm2592_vm14, %v6798_v60 }
0x1d3b   : > { %v7019_v41 = vpop.trf.xlu0 }
0x1d3c   : > { %v6799_v45 = vpop.trf.xlu1 }
0x1d8f   : > { %v12963_v36 = vpop.f32.mrb[52].mxu0 }
0x1d90   : > { %v6749_v29 = vadd.f32 %v12963_v36, %v15609_v37  ;;  %v6743_v15 = vpop.f32.mrb[53].mxu0 }
0x1d91   : > { %v6744_v51 = vadd.f32 %v6743_v15, %v15611_v44 }
0x1d92   : > { %12985 = vmatprep.subr.mxu0 %v6749_v29 }
0x1d93   : > { %12973 = vmatprep.subr.mxu1 %v6744_v51  ;;  %12986 = vmatpush3.msra.mxu0 %v6749_v29  ;;  %v15617_v14 = vpop.f32.mrb[54].mxu0 }
0x1d94   : > { %12974 = vmatpush3.msra.mxu1 %v6744_v51  ;;  %12988 = vmatmul.mubr.msk.f32.vlgmr.msra.gmra.mrb[60].mxu0 %vm2592_vm14, %v7019_v41  ;;  %v15620_v59 = vpop.f32.mrb[55].mxu0 }
0x1d95   : > { %12976 = vmatmul.mubr.msk.f32.vlgmr.msra.gmra.mrb[60].mxu1 %vm2592_vm14, %v6799_v45  ;;  %13498 = vmatprep.subr.bf16.mxu1 %v16791_v8 }
0x1d96   : > { %12982 = vmatprep.mubr.msk.f32.mxu1 %vm14134_vm1, %v16793_v56 }
0x1d97   : > { %v15626_v33 = vpop.f32.mrb[56].mxu0 }
0x1d98   : > { %v15628_v35 = vpop.f32.mrb[57].mxu0 }
0x1d9b   : > { %v15630_v2 = vpop.f32.mrb[58].mxu0 }
0x1d9c   : > { %v15632_v3 = vpop.f32.mrb[59].mxu0 }
0x1e67   : > { %v12989_v38 = vpop.f32.mrb[60].mxu0 }
0x1e68   : > { %v12977_v26 = vpop.f32.mrb[60].mxu1  ;;  %v7106_v53 = vpop.f32.mrb[61].mxu0  ;;  %v7116_v55 = vmul.f32 0.35355338, %v12989_v38 }
0x1e69   : > { %v6896_v40 = vmul.f32 0.35355338, %v12977_v26  ;;  %v6886_v11 = vpop.f32.mrb[61].mxu1  ;;  %v7115_v57 = vmul.f32 0.35355338, %v7106_v53 }
0x1e6a   : > { %v6895_v13 = vmul.f32 0.35355338, %v6886_v11  ;;  %v7118_v7 = vsel %vm4834_vm9, %v7116_v55, -1e+30  ;;  %v6607_v55 = vld [vmem:[%s16814_s2 + $0x10] sm:$0xff] }
0x1e6b   : > { %v6898_v30 = vsel %vm4834_vm9, %v6896_v40, -1e+30  ;;  %v7117_v58 = vsel %vm4834_vm9, %v7115_v57, -1e+30  ;;  %v7122_v4 = vsel %vm6902_vm0, %v7118_v7, -inf }
0x1e6c   : > { %v6897_v50 = vsel %vm4834_vm9, %v6895_v13, -1e+30  ;;  %v6903_v31 = vsel %vm6902_vm0, %v6898_v30, -inf  ;;  %v7119_v17 = vsel %vm1970_vm7, %v7117_v58, -inf }
0x1e6d   : > { %6904 = vmax.xlane.f32.xlu0 %v6903_v31  ;;  %v6899_v48 = vsel %vm1970_vm7, %v6897_v50, -inf }
0x1e6e   : > { %6900 = vmax.xlane.f32.xlu1 %v6899_v48  ;;  %v6609_v48 = vld [vmem:[%s16814_s2 + $0x20] sm:$0xff] }
0x1e72   : > { %7120 = vmax.xlane.f32.xlu1 %v7119_v17 }
0x1e76   : > { %7123 = vmax.xlane.f32.xlu1 %v7122_v4 }
0x1e83   : > { %6492 = vperm.xlu0 %13770, %v6478_v21  }
0x1e87   : > { %6640 = vperm.xlu0 %13770, %v6610_v23  }
0x1efa   : > { %v6905_v61 = vpop.xlane.xlu0 %6904 }
0x1efb   : > { %v6901_v9 = vpop.xlane.xlu1 %6900  ;;  %v6907_v60 = vsub.f32 %v6898_v30, %v6905_v61 }
0x1efc   : > { %v6906_v26 = vsub.f32 %v6897_v50, %v6901_v9 }
0x1efd   : > { %v6910_v41 = vmul.f32 1.442695, %v6907_v60 }
0x1efe   : > { %v6908_v40 = vmul.f32 1.442695, %v6906_v26 }
0x1eff   : > { %v7121_v12 = vpop.xlane.xlu1 %7120 }
0x1f00   : > { %v7125_v45 = vsub.f32 %v7117_v58, %v7121_v12 }
0x1f02   : > { %v15648_v36 = vpop.permute.xlu0 %6492  ;;  %v7127_v53 = vmul.f32 1.442695, %v7125_v45 }
0x1f03   : > { %v6589_v29 = vadd.f32 %v15587_v42, %v15648_v36  ;;  %v7124_v15 = vpop.xlane.xlu1 %7123 }
0x1f04   : > { %v7126_v51 = vsub.f32 %v7118_v7, %v7124_v15 }
0x1f05   : > { %7479 = vxpose.xlu0.b32.start.end [1/1] (short) (narrow) %v6589_v29, 16 }
0x1f06   : > { %v7129_v38 = vmul.f32 1.442695, %v7126_v51 }
0x1f08   : > { %13860 = vpow2.f32 %v7129_v38 }
0x1f09   : > { %13862 = vpow2.f32 %v6910_v41 }
0x1f0a   : > { %13864 = vpow2.f32 %v7127_v53  ;;  %v15667_v53 = vpop.permute.xlu0 %6640 }
0x1f0b   : > { %13866 = vpow2.f32 %v6908_v40 }
0x1f12   : > { %v13861_v11 = vpop.eup %13860 }
0x1f13   : > { %v7134_v57 = vsel %vm6902_vm0, %v13861_v11, 0.0  ;;  %v13863_v13 = vpop.eup %13862 }
0x1f14   : > { %7135 = vadd.xlane.f32.xlu1 %v7134_v57  ;;  %v6915_v42 = vsel %vm6902_vm0, %v13863_v13, 0.0  ;;  %v13865_v30 = vpop.eup %13864 }
0x1f15   : > { %v7131_v58 = vsel %vm1970_vm7, %v13865_v30, 0.0  ;;  %v13867_v31 = vpop.eup %13866 }
0x1f16   : > { %v6912_v50 = vsel %vm1970_vm7, %v13867_v31, 0.0 }
0x1f18   : > { %6916 = vadd.xlane.f32.xlu1 %v6915_v42 }
0x1f1c   : > { %7132 = vadd.xlane.f32.xlu1 %v7131_v58 }
0x1f20   : > { %6913 = vadd.xlane.f32.xlu1 %v6912_v50 }
0x1f31   : > { %6635 = vperm.xlu1 %13771, %v6609_v48  }
0x1f35   : > { %6625 = vperm.xlu1 %13771, %v6607_v55  }
0x1fa1   : > { %v7136_v17 = vpop.xlane.xlu1 %7135 }
0x1fa5   : > { %v6917_v7 = vpop.xlane.xlu1 %6916 }
0x1fa6   : > { %13868 = vrcp.f32 %v6917_v7 }
0x1fa9   : > { %v7133_v4 = vpop.xlane.xlu1 %7132 }
0x1fad   : > { %v6914_v21 = vpop.xlane.xlu1 %6913 }
0x1fae   : > { %13870 = vrcp.f32 %v6914_v21  ;;  %v6479_v21 = vld [vmem:[%s16820_s26 + $0x18] sm:$0xff] }
0x1faf   : > { %13872 = vrcp.f32 %v7133_v4 }
0x1fb0   : > { %13874 = vrcp.f32 %v7136_v17  ;;  %v13869_v23 = vpop.eup %13868 }
0x1fb1   : > { %v6921_v61 = vmul.f32 %v13869_v23, %v13863_v13  ;;  %v15658_v60 = vpop.permute.xlu1 %6635  ;;  %v6769_v13 = vadd.f32 %v15626_v33, %v15667_v53 }
0x1fb2   : > { %v6764_v26 = vadd.f32 %v15628_v35, %v15658_v60 }
0x1fb5   : > { %v15663_v38 = vpop.permute.xlu1 %6625 }
0x1fb6   : > { %v6754_v57 = vadd.f32 %v15620_v59, %v15663_v38 }
0x1fb8   : > { %v13871_v9 = vpop.eup %13870 }
0x1fb9   : > { %v6920_v12 = vmul.f32 %v13871_v9, %v13867_v31  ;;  %v13873_v15 = vpop.eup %13872 }
0x1fba   : > { %v13875_v51 = vpop.eup %13874  ;;  %v7139_v41 = vmul.f32 %v13873_v15, %v13865_v30 }
0x1fbb   : > { %v13499_v29 = vpack.c.bf16 %v6921_v61, %v6920_v12  ;;  %v7140_v45 = vmul.f32 %v13875_v51, %v13861_v11  ;;  %v7495_v11 = vpop.trf.xlu0 }
0x1fbd   : > { %13501 = vmatpush3.bf16.xpose.msk.msra.mxu1 %vm15293_vm11, %v13499_v29  ;;  %v13503_v40 = vpack.c.bf16 %v7140_v45, %v7139_v41 }
0x1fbe   : > { %13502 = vmatprep.subr.bf16.mxu1 %v16791_v8 }
0x1fbf   : > { %v7496_v35 = vpop.trf.xlu0 }
0x1fc4   : > { %12983 = vmatmul.mubr.msk.f32.vlgmr.msra.gmra.mrb[62].mxu1 %vm1970_vm7, %v6764_v26 }
0x1fc5   : > { %13505 = vmatpush3.bf16.xpose.msk.msra.mxu1 %vm15293_vm11, %v13503_v40  ;;  %12994 = vmatprep.mubr.msk.f32.mxu1 %vm14134_vm1, %v16793_v56  ;;  %v6608_v40 = vld [vmem:[%s16814_s2 + $0x18] sm:$0xff] }
0x1fc6   : > { %13013 = vmatprep.subr.mxu1 %v6754_v57 }
0x1fcc   : > { %12995 = vmatmul.mubr.msk.f32.vlgmr.msra.gmra.mrb[64].mxu1 %vm1970_vm7, %v6769_v13 }
0x1fcd   : > { %13014 = vmatpush3.msra.mxu1 %v6754_v57  ;;  %13015 = vmatprep.mubr.msk.f32.mxu1 %vm2592_vm14, %v7495_v11  ;;  %v6611_v57 = vld [vmem:[%s16814_s2 + $0x30] sm:$0xff] }
0x1fce   : > { %13506 = vmatprep.subr.bf16.mxu1 %v16791_v8 }
0x1fd0   : > { %13016 = vmatmul.mubr.msk.f32.vlgmr.msra.gmra.mrb[66].mxu1 %vm2592_vm14, %v7496_v35 }
0x1fd1   : > { %13022 = vmatprep.mubr.msk.f32.mxu1 %vm14134_vm1, %v16793_v56 }
0x2097   : > { %v15684_v59 = vpop.f32.mrb[62].mxu1 }
0x2098   : > { %v12984_v42 = vpop.f32.mrb[63].mxu1 }
0x209f   : > { %v7216_v30 = vpop.f32.mrb[64].mxu1 }
0x20a0   : > { %v12996_v58 = vpop.f32.mrb[65].mxu1  ;;  %12997 = vmatprep.subr.mxu0 %v7216_v30 }
0x20a1   : > { %12998 = vmatpush3.msra.mxu0 %v7216_v30 }
0x20a2   : > { %13005 = vmatprep.subr.mxu0 %v15684_v59 }
0x20a3   : > { %v13017_v33 = vpop.f32.mrb[66].mxu1 }
0x20a4   : > { %v7593_v31 = vmul.f32 0.35355338, %v13017_v33  ;;  %v7583_v50 = vpop.f32.mrb[67].mxu1 }
0x20a5   : > { %v7592_v48 = vmul.f32 0.35355338, %v7583_v50 }
0x20a6   : > { %v7595_v55 = vsel %vm4834_vm9, %v7593_v31, -1e+30 }
0x20a7   : > { %v7594_v17 = vsel %vm4834_vm9, %v7592_v48, -1e+30  ;;  %v7599_v7 = vsel %vm6902_vm0, %v7595_v55, -inf }
0x20a8   : > { %7600 = vmax.xlane.f32.xlu0 %v7599_v7  ;;  %v7596_v4 = vsel %vm1970_vm7, %v7594_v17, -inf }
0x20a9   : > { %7597 = vmax.xlane.f32.xlu1 %v7596_v4 }
0x20ba   : > { %6497 = vperm.xlu1 %13771, %v6479_v21  }
0x2135   : > { %v7601_v23 = vpop.xlane.xlu0 %7600 }
0x2136   : > { %v7603_v9 = vsub.f32 %v7595_v55, %v7601_v23  ;;  %v7598_v61 = vpop.xlane.xlu1 %7597 }
0x2137   : > { %v7602_v12 = vsub.f32 %v7594_v17, %v7598_v61 }
0x2138   : > { %v7606_v29 = vmul.f32 1.442695, %v7603_v9 }
0x2139   : > { %v7604_v15 = vmul.f32 1.442695, %v7602_v12 }
0x213a   : > { %13876 = vpow2.f32 %v7606_v29  ;;  %v15698_v11 = vpop.permute.xlu1 %6497 }
0x213b   : > { %13878 = vpow2.f32 %v7604_v15  ;;  %v6594_v13 = vadd.f32 %v15585_v28, %v15698_v11 }
0x2144   : > { %v13877_v51 = vpop.eup %13876 }
0x2145   : > { %v13879_v41 = vpop.eup %13878  ;;  %v7611_v45 = vsel %vm6902_vm0, %v13877_v51, 0.0 }
0x2146   : > { %7612 = vadd.xlane.f32.xlu0 %v7611_v45  ;;  %v7608_v26 = vsel %vm1970_vm7, %v13879_v41, 0.0  ;;  %v7220_v45 = vld [vmem:[%s16879_s1 + $0x8] sm:$0xff] }
0x2147   : > { %7609 = vadd.xlane.f32.xlu1 %v7608_v26  ;;  %v6612_v26 = vld [vmem:[%s16814_s2 + $0x38] sm:$0xff]  ;;  %s16900_s2 = sld [smem:[#allocation25_spill]] }
0x214d   : > { %v15909_v6 = vld [vmem:[%s16900_s2 + $0x10] sm:$0xff]  ;;  %v15917_v22 = vld [vmem:[%s16900_s2 + $0x18] sm:$0xff]  ;;  %v15921_v24 = vld [vmem:[%s16900_s2 + $0x20] sm:$0xff] }
0x214e   : > { %16908 = vst [vmem:[#allocation69_spill] sm:$0xff] %v15909_v6  ;;  %16909 = vst [vmem:[#allocation72_spill] sm:$0xff] %v15917_v22 }
0x214f   : > { %16910 = vst [vmem:[#allocation71_spill] sm:$0xff] %v15921_v24 }
0x2158   : > { %6630 = vperm.xlu1 %13771, %v6608_v40   ;;  %v8183_v40 = vld [vmem:[%s16880_s3] sm:$0xff] }
0x215c   : > { %6645 = vperm.xlu0 %13770, %v6611_v57   ;;  %v8186_v57 = vld [vmem:[%s16880_s3 + $0x18] sm:$0xff] }
0x217a   : > { %7831 = vxpose.xlu0.b32.start.end [1/1] (short) (narrow) %v6594_v13, 16  ;;  %v8486_v13 = vld [vmem:[%s16881_s4 + $0x8] sm:$0xff] }
0x21d3   : > { %v7613_v35 = vpop.xlane.xlu0 %7612 }
0x21d4   : > { %13880 = vrcp.f32 %v7613_v35  ;;  %v7610_v42 = vpop.xlane.xlu1 %7609  ;;  %v8488_v35 = vld [vmem:[%s16881_s4 + $0x18] sm:$0xff] }
0x21d5   : > { %13882 = vrcp.f32 %v7610_v42  ;;  %v8490_v42 = vld [vmem:[%s16881_s4 + $0x28] sm:$0xff] }
0x21d8   : > { %v15702_v50 = vpop.permute.xlu1 %6630 }
0x21d9   : > { %v6759_v55 = vadd.f32 %v15617_v14, %v15702_v50 }
0x21db   : > { %v15708_v28 = vpop.permute.xlu0 %6645 }
0x21dc   : > { %16878 = vst [vmem:[#allocation46_spill] sm:$0xff] %v15708_v28  ;;  %v6774_v17 = vadd.f32 %v15632_v3, %v15708_v28 }
0x21de   : > { %v13881_v30 = vpop.eup %13880 }
0x21df   : > { %v13883_v58 = vpop.eup %13882  ;;  %v7617_v33 = vmul.f32 %v13881_v30, %v13877_v51  ;;  %v8492_v30 = vld [vmem:[%s16881_s4 + $0x38] sm:$0xff] }
0x21e0   : > { %v7616_v31 = vmul.f32 %v13883_v58, %v13879_v41  ;;  %v7001_v41 = vld [vmem:[%s16879_s1] sm:$0xff]  ;;  %v8542_v58 = vld [vmem:[%s16882_s5 + $0x8] sm:$0xff] }
0x21e2   : > { %v13507_v48 = vpack.c.bf16 %v7617_v33, %v7616_v31  ;;  %v8550_v33 = vld [vmem:[%s16883_s6 + $0x8] sm:$0xff]  ;;  %v8544_v31 = vld [vmem:[%s16882_s5 + $0x18] sm:$0xff] }
0x21e4   : > { %13509 = vmatpush3.bf16.xpose.msk.msra.mxu1 %vm15293_vm11, %v13507_v48  ;;  %v8552_v48 = vld [vmem:[%s16883_s6 + $0x18] sm:$0xff] }
0x21e5   : > { %13033 = vmatprep.subr.mxu1 %v6759_v55 }
0x21eb   : > { %13023 = vmatmul.mubr.msk.f32.vlgmr.msra.gmra.mrb[68].mxu1 %vm1970_vm7, %v6774_v17  ;;  %v8554_v17 = vld [vmem:[%s16883_s6 + $0x28] sm:$0xff] }
0x21ec   : > { %13034 = vmatpush3.msra.mxu1 %v6759_v55  ;;  %v8546_v55 = vld [vmem:[%s16882_s5 + $0x28] sm:$0xff] }
0x21fa   : > { %v7847_v7 = vpop.trf.xlu0 }
0x21fb   : > { %13035 = vmatprep.mubr.msk.f32.mxu1 %vm2592_vm14, %v7847_v7 }
0x21fe   : > { %v7848_v4 = vpop.trf.xlu0 }
0x21ff   : > { %13036 = vmatmul.mubr.msk.f32.vlgmr.msra.gmra.mrb[70].mxu1 %vm2592_vm14, %v7848_v4 }
0x22be   : > { %v15715_v14 = vpop.f32.mrb[68].mxu1 }
0x22bf   : > { %v13024_v21 = vpop.f32.mrb[69].mxu1 }
0x22d2   : > { %v13037_v23 = vpop.f32.mrb[70].mxu1 }
0x22d3   : > { %v7945_v9 = vmul.f32 0.35355338, %v13037_v23  ;;  %v7935_v61 = vpop.f32.mrb[71].mxu1 }
0x22d4   : > { %v7944_v3 = vmul.f32 0.35355338, %v7935_v61 }
0x22d5   : > { %v7947_v12 = vsel %vm4834_vm9, %v7945_v9, -1e+30  ;;  %v8548_v9 = vld [vmem:[%s16882_s5 + $0x38] sm:$0xff] }
0x22d6   : > { %v7946_v29 = vsel %vm4834_vm9, %v7944_v3, -1e+30  ;;  %v7951_v15 = vsel %vm6902_vm0, %v7947_v12, -inf }
0x22d7   : > { %7952 = vmax.xlane.f32.xlu0 %v7951_v15  ;;  %v7948_v51 = vsel %vm1970_vm7, %v7946_v29, -inf  ;;  %v8556_v15 = vld [vmem:[%s16883_s6 + $0x38] sm:$0xff] }
0x22d8   : > { %7949 = vmax.xlane.f32.xlu1 %v7948_v51 }
0x2304   : > { %7350 = vxpose.xlu0.b32.start.end [1/1] (short) (narrow) %v7001_v41, 32 }
0x230b   : > { %7221 = vxpose.xlu1.b32.start.end [1/1] (short) (narrow) %v7220_v45, 32 }
0x2335   : > { %6650 = vperm.xlu1 %13771, %v6612_v26  }
0x2339   : > { %8189 = vperm.xlu0 %13770, %v8183_v40  }
0x233d   : > { %8204 = vperm.xlu0 %13770, %v8186_v57  }
0x2341   : > { %8500 = vperm.xlu0 %13770, %v8486_v13  }
0x2345   : > { %8510 = vperm.xlu0 %13770, %v8488_v35  }
0x2349   : > { %8520 = vperm.xlu0 %13770, %v8490_v42  }
0x234d   : > { %8530 = vperm.xlu0 %13770, %v8492_v30   ;;  %v7697_v30 = vld [vmem:[%s16879_s1 + $0x10] sm:$0xff] }
0x2351   : > { %8641 = vperm.xlu0 %13770, %v8542_v58   ;;  %v8049_v58 = vld [vmem:[%s16879_s1 + $0x18] sm:$0xff]  ;;  %s16888_s1 = sld [smem:[#allocation24_spill]] }
0x2355   : > { %8689 = vperm.xlu0 %13770, %v8550_v33   ;;  %v8184_v33 = vld [vmem:[%s16880_s3 + $0x8] sm:$0xff] }
0x2359   : > { %8651 = vperm.xlu0 %13770, %v8544_v31   ;;  %v8485_v31 = vld [vmem:[%s16881_s4] sm:$0xff] }
0x235d   : > { %8699 = vperm.xlu0 %13770, %v8552_v48   ;;  %v8487_v48 = vld [vmem:[%s16881_s4 + $0x10] sm:$0xff] }
0x2361   : > { %8661 = vperm.xlu0 %13770, %v8546_v55   ;;  %v8489_v55 = vld [vmem:[%s16881_s4 + $0x20] sm:$0xff] }
0x2364   : > { %v7953_v7 = vpop.xlane.xlu0 %7952 }
0x2365   : > { %v7955_v4 = vsub.f32 %v7947_v12, %v7953_v7  ;;  %8709 = vperm.xlu0 %13770, %v8554_v17   ;;  %v7950_v21 = vpop.xlane.xlu1 %7949  ;;  %v8491_v17 = vld [vmem:[%s16881_s4 + $0x30] sm:$0xff]  ;;  %v8541_v7 = vld [vmem:[%s16882_s5] sm:$0xff] }
0x2366   : > { %v7954_v23 = vsub.f32 %v7946_v29, %v7950_v21  ;;  %v8543_v21 = vld [vmem:[%s16882_s5 + $0x10] sm:$0xff] }
0x2367   : > { %v7958_v61 = vmul.f32 1.442695, %v7955_v4  ;;  %v8549_v4 = vld [vmem:[%s16883_s6] sm:$0xff] }
0x2368   : > { %v7956_v3 = vmul.f32 1.442695, %v7954_v23  ;;  %v8551_v23 = vld [vmem:[%s16883_s6 + $0x10] sm:$0xff] }
0x2369   : > { %13884 = vpow2.f32 %v7958_v61  ;;  %8671 = vperm.xlu0 %13770, %v8548_v9   ;;  %v8545_v9 = vld [vmem:[%s16882_s5 + $0x20] sm:$0xff] }
0x236a   : > { %13886 = vpow2.f32 %v7956_v3  ;;  %v8553_v61 = vld [vmem:[%s16883_s6 + $0x20] sm:$0xff]  ;;  %v8547_v3 = vld [vmem:[%s16882_s5 + $0x30] sm:$0xff] }
0x236d   : > { %8719 = vperm.xlu0 %13770, %v8556_v15  }
0x2373   : > { %v15740_v51 = vpop.eup %13884 }
0x2374   : > { %v7963_v41 = vsel %vm6902_vm0, %v15740_v51, 0.0  ;;  %v15744_v45 = vpop.eup %13886 }
0x2375   : > { %7964 = vadd.xlane.f32.xlu1 %v7963_v41  ;;  %v7960_v12 = vsel %vm1970_vm7, %v15744_v45, 0.0  ;;  %v8555_v41 = vld [vmem:[%s16883_s6 + $0x30] sm:$0xff] }
0x2379   : > { %7961 = vadd.xlane.f32.xlu1 %v7960_v12 }
0x2384   : > { %v15754_v40 = vpop.trf.xlu0 }
0x2388   : > { %v15764_v13 = vpop.trf.xlu0 }
0x238b   : > { %v15748_v29 = vpop.trf.xlu1 }
0x238c   : > { %12999 = vmatprep.mubr.msk.f32.mxu0 %vm2592_vm14, %v15748_v29 }
0x238f   : > { %v15752_v26 = vpop.trf.xlu1 }
0x2390   : > { %13000 = vmatmul.mubr.msk.f32.vlgmr.msra.gmra.mrb[62].mxu0 %vm2592_vm14, %v15752_v26 }
0x2391   : > { %13006 = vmatpush3.msra.mxu0 %v15684_v59  ;;  %v15772_v59 = vpop.trf.xlu0 }
0x2392   : > { %13025 = vmatprep.subr.mxu0 %v15715_v14 }
0x2393   : > { %v15760_v57 = vpop.trf.xlu1 }
0x2394   : > { %13002 = vmatprep.mubr.msk.f32.mxu0 %vm2592_vm14, %v15760_v57 }
0x2395   : > { %v15780_v42 = vpop.trf.xlu0 }
0x2397   : > { %v15766_v35 = vpop.trf.xlu1 }
0x2398   : > { %13003 = vmatmul.mubr.msk.f32.gmra.mrb[64].mxu0 %vm2592_vm14, %v15766_v35 }
0x2399   : > { %13007 = vmatprep.mubr.msk.f32.mxu0 %vm2592_vm14, %v15754_v40 }
0x239c   : > { %13008 = vmatmul.mubr.msk.f32.vlgmr.msra.gmra.mrb[62].mxu0 %vm2592_vm14, %v15764_v13 }
0x239d   : > { %13026 = vmatpush3.msra.mxu0 %v15715_v14  ;;  %13010 = vmatprep.mubr.msk.f32.mxu0 %vm2592_vm14, %v15772_v59  ;;  %v8185_v14 = vld [vmem:[%s16880_s3 + $0x10] sm:$0xff] }
0x239e   : > { %13510 = vmatprep.subr.bf16.mxu0 %v16791_v8 }
0x23a0   : > { %13011 = vmatmul.mubr.msk.f32.gmra.mrb[64].mxu0 %vm2592_vm14, %v15780_v42 }
0x23ac   : > { %7698 = vxpose.xlu1.b32.start.end [1/1] (short) (narrow) %v7697_v30, 32 }
0x23b4   : > { %v15799_v15 = vpop.permute.xlu1 %6650 }
0x23b5   : > { %16884 = vst [vmem:[#allocation43_spill] sm:$0xff] %v15799_v15 }
0x23b9   : > { %8050 = vxpose.xlu1.b32.start.end [1/1] (short) (narrow) %v8049_v58, 32 }
0x23e3   : > { %8194 = vperm.xlu1 %13771, %v8184_v33  }
0x23e7   : > { %8199 = vperm.xlu1 %13771, %v8185_v14  }
0x23eb   : > { %8495 = vperm.xlu1 %13771, %v8485_v31  }
0x23ef   : > { %8505 = vperm.xlu1 %13771, %v8487_v48  }
0x23f3   : > { %8515 = vperm.xlu1 %13771, %v8489_v55  }
0x23f7   : > { %8525 = vperm.xlu1 %13771, %v8491_v17  }
0x23fb   : > { %8636 = vperm.xlu1 %13771, %v8541_v7  }
0x23ff   : > { %8684 = vperm.xlu1 %13771, %v8549_v4  }
0x2402   : > { %v7965_v12 = vpop.xlane.xlu1 %7964 }
0x2403   : > { %8646 = vperm.xlu1 %13771, %v8543_v21  }
0x2406   : > { %v7962_v30 = vpop.xlane.xlu1 %7961 }
0x2407   : > { %8694 = vperm.xlu1 %13771, %v8551_v23   ;;  %13888 = vrcp.f32 %v7962_v30 }
0x2408   : > { %13890 = vrcp.f32 %v7965_v12 }
0x240b   : > { %8656 = vperm.xlu1 %13771, %v8545_v9  }
0x240f   : > { %8704 = vperm.xlu1 %13771, %v8553_v61   ;;  %v15844_v61 = vld [vmem:[%s16888_s1] sm:$0xff] }
0x2410   : > { %16893 = vst [vmem:[#allocation51_spill] sm:$0xff] %v15844_v61  ;;  %13061 = vmatprep.mubr.msk.f32.mxu1 %vm1785_vm6, %v15844_v61 }
0x2411   : > { %v13889_v58 = vpop.eup %13888 }
0x2412   : > { %v13891_v33 = vpop.eup %13890  ;;  %v7968_v14 = vmul.f32 %v13889_v58, %v15744_v45 }
0x2413   : > { %8666 = vperm.xlu1 %13771, %v8547_v3   ;;  %v7969_v48 = vmul.f32 %v13891_v33, %v15740_v51  ;;  %v6779_v51 = vadd.f32 %v15630_v2, %v15799_v15  ;;  %v15848_v3 = vpop.permute.xlu0 %8189 }
0x2414   : > { %16894 = vst [vmem:[#allocation52_spill] sm:$0xff] %v15848_v3 }
0x2415   : > { %v13511_v17 = vpack.c.bf16 %v7969_v48, %v7968_v14 }
0x2417   : > { %8714 = vperm.xlu1 %13771, %v8555_v41   ;;  %v15854_v14 = vpop.permute.xlu0 %8204 }
0x2418   : > { %16896 = vst [vmem:[#allocation56_spill] sm:$0xff] %v15854_v14 }
0x242c   : > { %v15803_v31 = vpop.trf.xlu1 }
0x242d   : > { %13027 = vmatprep.mubr.msk.f32.mxu0 %vm2592_vm14, %v15803_v31 }
0x2430   : > { %v15808_v55 = vpop.trf.xlu1 }
0x2431   : > { %16885 = vst [vmem:[#allocation44_spill] sm:$0xff] %v15808_v55  ;;  %13028 = vmatmul.mubr.msk.f32.vlgmr.msra.gmra.mrb[62].mxu0 %vm2592_vm14, %v15808_v55 }
0x2432   : > { %13513 = vmatpush3.bf16.xpose.msk.msra.mxu0 %vm15293_vm11, %v13511_v17 }
0x2434   : > { %v15814_v7 = vpop.trf.xlu1 }
0x2435   : > { %16886 = vst [vmem:[#allocation45_spill] sm:$0xff] %v15814_v7  ;;  %13030 = vmatprep.mubr.msk.f32.mxu0 %vm2592_vm14, %v15814_v7 }
0x2438   : > { %v15818_v45 = vpop.trf.xlu1 }
0x2439   : > { %16887 = vst [vmem:[#allocation70_spill] sm:$0xff] %v15818_v45  ;;  %13031 = vmatmul.mubr.msk.f32.gmra.mrb[64].mxu0 %vm2592_vm14, %v15818_v45 }
0x243a   : > { %13042 = vmatprep.mubr.msk.f32.mxu0 %vm14134_vm1, %v16793_v56 }
0x243c   : > { %v15827_v43 = vpop.trf.xlu1 }
0x243d   : > { %13043 = vmatmul.mubr.msk.f32.vlgmr.msra.gmra.mrb[66].mxu0 %vm1970_vm7, %v6779_v51  ;;  %16889 = vst [vmem:[#allocation47_spill] sm:$0xff] %v15827_v43 }
0x243e   : > { %13047 = vmatprep.mubr.msk.f32.mxu0 %vm2592_vm14, %v15827_v43 }
0x2440   : > { %v15831_v4 = vpop.trf.xlu1 }
0x2441   : > { %16890 = vst [vmem:[#allocation49_spill] sm:$0xff] %v15831_v4 }
0x2444   : > { %v15833_v21 = vpop.trf.xlu1 }
0x2445   : > { %16891 = vst [vmem:[#allocation50_spill] sm:$0xff] %v15833_v21 }
0x2448   : > { %v15839_v2 = vpop.trf.xlu1 }
0x2449   : > { %16892 = vst [vmem:[#allocation48_spill] sm:$0xff] %v15839_v2 }
0x2462   : > { %v15850_v41 = vpop.permute.xlu1 %8194 }
0x2463   : > { %16895 = vst [vmem:[#allocation55_spill] sm:$0xff] %v15850_v41 }
0x2466   : > { %v15856_v51 = vpop.permute.xlu1 %8199 }
0x2467   : > { %16897 = vst [vmem:[#allocation57_spill] sm:$0xff] %v15856_v51 }
0x2510   : > { %v8045_v23 = vpop.f32.mrb[66].mxu0 }
0x2511   : > { %v13044_v9 = vpop.f32.mrb[67].mxu0  ;;  %13045 = vmatprep.subr.mxu0 %v8045_v23 }
0x2512   : > { %13046 = vmatpush3.msra.mxu0 %v8045_v23 }
0x2513   : > { %13048 = vmatmul.mubr.msk.f32.vlgmr.msra.gmra.mrb[62].mxu0 %vm2592_vm14, %v15831_v4 }
0x2514   : > { %13050 = vmatprep.mubr.msk.f32.mxu0 %vm2592_vm14, %v15833_v21 }
0x2517   : > { %13051 = vmatmul.mubr.msk.f32.gmra.mrb[64].mxu0 %vm2592_vm14, %v15839_v2 }
0x25e6   : > { %v13049_v12 = vpop.f32.mrb[62].mxu0 }
0x25e7   : > { %v8208_v30 = vadd.f32 %v13049_v12, %v15850_v41  ;;  %v8160_v58 = vpop.f32.mrb[63].mxu0 }
0x25e8   : > { %v8207_v33 = vadd.f32 %v15848_v3, %v8160_v58  ;;  %v15861_v58 = vld [vmem:[%s16888_s1 + $0x8] sm:$0xff] }
0x25e9   : > { %16898 = vst [vmem:[#allocation58_spill] sm:$0xff] %v15861_v58 }
0x25ea   : > { %v13514_v48 = vpack.c.bf16 %v8208_v30, %v8207_v33  ;;  %v13052_v17 = vpop.f32.mrb[64].mxu0  ;;  %v15865_v30 = vld [vmem:[%s16888_s1 + $0x10] sm:$0xff]  ;;  %v15877_v33 = vld [vmem:[%s16888_s1 + $0x20] sm:$0xff] }
0x25eb   : > { %v8210_v23 = vadd.f32 %v13052_v17, %v15854_v14  ;;  %v8170_v9 = vpop.f32.mrb[65].mxu0  ;;  %16899 = vst [vmem:[#allocation59_spill] sm:$0xff] %v15865_v30  ;;  %16902 = vst [vmem:[#allocation63_spill] sm:$0xff] %v15877_v33  ;;  %v15889_v17 = vld [vmem:[%s16888_s1 + $0x30] sm:$0xff] }
0x25ec   : > { %v8209_v18 = vadd.f32 %v15856_v51, %v8170_v9  ;;  %13515 = vmatprep.subr.bf16.mxu1 %v13514_v48  ;;  %16904 = vst [vmem:[#allocation65_spill] sm:$0xff] %v15889_v17  ;;  %v15899_v9 = vld [vmem:[%s16900_s2] sm:$0xff] }
0x25ed   : > { %13517 = vmatpush3.bf16.msra.mxu1 %v13514_v48  ;;  %v15885_v48 = vld [vmem:[%s16888_s1 + $0x28] sm:$0xff]  ;;  %16906 = vst [vmem:[#allocation67_spill] sm:$0xff] %v15899_v9 }
0x25ee   : > { %v13518_v12 = vpack.c.bf16 %v8210_v23, %v8209_v18  ;;  %v15873_v18 = vld [vmem:[%s16888_s1 + $0x18] sm:$0xff]  ;;  %16903 = vst [vmem:[#allocation64_spill] sm:$0xff] %v15885_v48 }
0x25ef   : > { %16901 = vst [vmem:[#allocation60_spill] sm:$0xff] %v15873_v18  ;;  %v15896_v23 = vld [vmem:[%s16888_s1 + $0x38] sm:$0xff]  ;;  %s16912_s1 = sld [smem:[#allocation26_spill]] }
0x25f0   : > { %13519 = vmatprep.subr.bf16.mxu1 %v13518_v12  ;;  %16905 = vst [vmem:[#allocation66_spill] sm:$0xff] %v15896_v23 }
0x25f1   : > { %13521 = vmatpush3.bf16.msra.mxu1 %v13518_v12  ;;  %v15906_v12 = vld [vmem:[%s16900_s2 + $0x8] sm:$0xff] }
0x25f2   : > { %13523 = vmatprep.subr.bf16.mxu1 %v15503_v52  ;;  %16907 = vst [vmem:[#allocation68_spill] sm:$0xff] %v15906_v12 }
0x25f4   : > { %13062 = vmatmul.mubr.msk.f32.vlgmr.msra.gmra.mrb[72].mxu1 %vm1785_vm6, %v15861_v58 }
0x25f5   : > { %13525 = vmatpush3.bf16.msra.mxu1 %v15503_v52  ;;  %13064 = vmatprep.mubr.msk.f32.mxu1 %vm1785_vm6, %v15865_v30 }
0x25f6   : > { %13527 = vmatprep.subr.bf16.mxu1 %v15514_v10 }
0x25f8   : > { %13065 = vmatmul.mubr.msk.f32.gmra.mrb[74].mxu1 %vm1785_vm6, %v15873_v18 }
0x25f9   : > { %13529 = vmatpush3.bf16.msra.mxu1 %v15514_v10  ;;  %13067 = vmatprep.mubr.msk.f32.mxu1 %vm1785_vm6, %v15877_v33 }
0x25fa   : > { %13555 = vmatprep.subr.bf16.mxu1 %v15503_v52 }
0x25fc   : > { %13068 = vmatmul.mubr.msk.f32.gmra.mrb[76].mxu1 %vm1785_vm6, %v15885_v48 }
0x25fd   : > { %13070 = vmatprep.mubr.msk.f32.mxu1 %vm1785_vm6, %v15889_v17 }
0x2600   : > { %13071 = vmatmul.mubr.msk.f32.gmra.mrb[78].mxu1 %vm1785_vm6, %v15896_v23 }
0x2601   : > { %13081 = vmatprep.mubr.msk.f32.mxu1 %vm1785_vm6, %v15899_v9 }
0x2604   : > { %13082 = vmatmul.mubr.msk.f32.vlgmr.msra.gmra.mrb[72].mxu1 %vm1785_vm6, %v15906_v12  ;;  %v15929_v12 = vld [vmem:[%s16900_s2 + $0x28] sm:$0xff] }
0x2605   : > { %13557 = vmatpush3.bf16.msra.mxu1 %v15503_v52  ;;  %13084 = vmatprep.mubr.msk.f32.mxu1 %vm1785_vm6, %v15909_v6  ;;  %16911 = vst [vmem:[#allocation74_spill] sm:$0xff] %v15929_v12  ;;  %v15932_v52 = vld [vmem:[%s16900_s2 + $0x30] sm:$0xff]  ;;  %v15940_v6 = vld [vmem:[%s16900_s2 + $0x38] sm:$0xff] }
0x2606   : > { %13559 = vmatprep.subr.bf16.mxu1 %v15514_v10  ;;  %16913 = vst [vmem:[#allocation73_spill] sm:$0xff] %v15932_v52  ;;  %16914 = vst [vmem:[#allocation76_spill] sm:$0xff] %v15940_v6 }
0x2608   : > { %13085 = vmatmul.mubr.msk.f32.gmra.mrb[74].mxu1 %vm1785_vm6, %v15917_v22 }
0x2609   : > { %13561 = vmatpush3.bf16.msra.mxu1 %v15514_v10  ;;  %13087 = vmatprep.mubr.msk.f32.mxu1 %vm1785_vm6, %v15921_v24  ;;  %v15963_v10 = vld [vmem:[%s16912_s1] sm:$0xff] }
0x260a   : > { %13566 = vmatprep.subr.bf16.mxu1 %v16791_v8  ;;  %16915 = vst [vmem:[#allocation75_spill] sm:$0xff] %v15963_v10  ;;  %13109 = vmatprep.mubr.msk.f32.mxu0 %vm4546_vm4, %v15963_v10 }
0x260c   : > { %13088 = vmatmul.mubr.msk.f32.gmra.mrb[76].mxu1 %vm1785_vm6, %v15929_v12 }
0x260d   : > { %13090 = vmatprep.mubr.msk.f32.mxu1 %vm1785_vm6, %v15932_v52 }
0x2610   : > { %13091 = vmatmul.mubr.msk.f32.gmra.mrb[78].mxu1 %vm1785_vm6, %v15940_v6 }
0x2611   : > { %13137 = vmatprep.mubr.msk.f32.mxu1 %vm1785_vm6, %v15534_v34  ;;  %v15967_v34 = vpop.permute.xlu0 %8500 }
0x2612   : > { %16916 = vst [vmem:[#allocation78_spill] sm:$0xff] %v15967_v34 }
0x2614   : > { %13138 = vmatmul.mubr.msk.f32.vlgmr.msra.gmra.mrb[80].mxu1 %vm1785_vm6, %v15571_v62  ;;  %v15969_v62 = vpop.permute.xlu1 %8495 }
0x2615   : > { %13140 = vmatprep.mubr.msk.f32.mxu1 %vm1785_vm6, %v15574_v54  ;;  %16917 = vst [vmem:[#allocation77_spill] sm:$0xff] %v15969_v62  ;;  %v15971_v54 = vpop.permute.xlu0 %8510 }
0x2616   : > { %16918 = vst [vmem:[#allocation82_spill] sm:$0xff] %v15971_v54 }
0x2618   : > { %13141 = vmatmul.mubr.msk.f32.gmra.mrb[82].mxu1 %vm1785_vm6, %v15581_v39 }
0x2619   : > { %13143 = vmatprep.mubr.msk.f32.mxu1 %vm1785_vm6, %v15590_v27  ;;  %v15973_v27 = vpop.permute.xlu1 %8505  ;;  %v15979_v9 = vpop.permute.xlu0 %8520 }
0x261a   : > { %16919 = vst [vmem:[#allocation83_spill] sm:$0xff] %v15973_v27  ;;  %16920 = vst [vmem:[#allocation84_spill] sm:$0xff] %v15979_v9 }
0x261c   : > { %13144 = vmatmul.mubr.msk.f32.gmra.mrb[84].mxu1 %vm1785_vm6, %v15595_v47 }
0x261d   : > { %13146 = vmatprep.mubr.msk.f32.mxu1 %vm1785_vm6, %v15600_v49  ;;  %v15983_v48 = vpop.permute.xlu1 %8515  ;;  %v15989_v30 = vpop.permute.xlu0 %8530 }
0x261e   : > { %16921 = vst [vmem:[#allocation81_spill] sm:$0xff] %v15983_v48  ;;  %16922 = vst [vmem:[#allocation85_spill] sm:$0xff] %v15989_v30 }
0x2620   : > { %13147 = vmatmul.mubr.msk.f32.gmra.mrb[86].mxu1 %vm1785_vm6, %v15605_v46 }
0x2621   : > { %13170 = vmatprep.mubr.msk.f32.mxu1 %vm14134_vm1, %v16793_v56 }
0x26d7   : > { %v13083_v39 = vpop.f32.mrb[72].mxu1 }
0x26d8   : > { %v8534_v47 = vadd.f32 %v13083_v39, %v15967_v34  ;;  %v8446_v49 = vpop.f32.mrb[73].mxu1 }
0x26d9   : > { %v8533_v46 = vadd.f32 %v15969_v62, %v8446_v49 }
0x26da   : > { %v8558_v6 = vsel %vm1458_vm3, %v8534_v47, 0.0 }
0x26db   : > { %v8557_v52 = vsel %vm1458_vm3, %v8533_v46, 0.0  ;;  %v13086_v12 = vpop.f32.mrb[74].mxu1 }
0x26dc   : > { %v8559_v24 = vadd.f32 %v8558_v6, %v8557_v52  ;;  %v8456_v22 = vpop.f32.mrb[75].mxu1  ;;  %v8536_v23 = vadd.f32 %v13086_v12, %v15971_v54 }
0x26dd   : > { %v8535_v17 = vadd.f32 %v15973_v27, %v8456_v22  ;;  %v15992_v22 = vpop.permute.xlu1 %8525 }
0x26de   : > { %v8562_v62 = vsel %vm1458_vm3, %v8536_v23, 0.0  ;;  %16923 = vst [vmem:[#allocation32_spill] sm:$0xff] %v15992_v22 }
0x26df   : > { %v8560_v39 = vsel %vm1458_vm3, %v8535_v17, 0.0  ;;  %v13089_v34 = vpop.f32.mrb[76].mxu1 }
0x26e0   : > { %v8561_v33 = vadd.f32 %v8560_v39, %v8559_v24  ;;  %v8466_v49 = vpop.f32.mrb[77].mxu1  ;;  %v8538_v18 = vadd.f32 %v13089_v34, %v15979_v9 }
0x26e1   : > { %v8537_v6 = vadd.f32 %v15983_v48, %v8466_v49 }
0x26e2   : > { %v8563_v52 = vadd.f32 %v8562_v62, %v8561_v33  ;;  %v8566_v51 = vsel %vm1458_vm3, %v8538_v18, 0.0 }
0x26e3   : > { %v8564_v12 = vsel %vm1458_vm3, %v8537_v6, 0.0  ;;  %v13092_v54 = vpop.f32.mrb[78].mxu1 }
0x26e4   : > { %v8565_v27 = vadd.f32 %v8564_v12, %v8563_v52  ;;  %v8476_v58 = vpop.f32.mrb[79].mxu1  ;;  %v8540_v24 = vadd.f32 %v13092_v54, %v15989_v30 }
0x26e5   : > { %v8539_v39 = vadd.f32 %v15992_v22, %v8476_v58 }
0x26e6   : > { %v8567_v14 = vadd.f32 %v8566_v51, %v8565_v27  ;;  %v8570_v48 = vsel %vm1458_vm3, %v8540_v24, 0.0 }
0x26e7   : > { %v8568_v34 = vsel %vm1458_vm3, %v8539_v39, 0.0  ;;  %v15998_v49 = vpop.f32.mrb[80].mxu1 }
0x26e8   : > { %v8569_v33 = vadd.f32 %v8568_v34, %v8567_v14  ;;  %v16000_v62 = vpop.f32.mrb[81].mxu1 }
0x26ea   : > { %v8571_v9 = vadd.f32 %v8570_v48, %v8569_v33 }
0x26eb   : > { %v16003_v3 = vpop.f32.mrb[82].mxu1 }
0x26ec   : > { %v8572_v52 = vrot.slane %v8571_v9, 4  ;;  %v16005_v12 = vpop.f32.mrb[83].mxu1 }
0x26ee   : > { %v8573_v41 = vadd.f32 %v8572_v52, %v8571_v9 }
0x26ef   : > { %v16007_v54 = vpop.f32.mrb[84].mxu1 }
0x26f0   : > { %v8574_v58 = vrot.slane %v8573_v41, 2  ;;  %v16009_v51 = vpop.f32.mrb[85].mxu1 }
0x26f2   : > { %v8575_v27 = vadd.f32 %v8574_v58, %v8573_v41 }
0x26f3   : > { %v16011_v22 = vpop.f32.mrb[86].mxu1 }
0x26f4   : > { %16924 = vst [vmem:[#allocation33_spill] sm:$0xff] %v16011_v22  ;;  %v8576_v14 = vrot.slane %v8575_v27, 1  ;;  %v16013_v34 = vpop.f32.mrb[87].mxu1 }
0x26f5   : > { %16925 = vst [vmem:[#allocation34_spill] sm:$0xff] %v16013_v34 }
0x26f6   : > { %v8577_v30 = vadd.f32 %v8576_v14, %v8575_v27 }
0x26f8   : > { %v8578_v10 = vmul.f32 0.015625, %v8577_v30 }
0x26fa   : > { %v16015_v48 = vsub.f32 %v8533_v46, %v8578_v10  ;;  %v16017_v33 = vsub.f32 %v8534_v47, %v8578_v10  ;;  %v16019_v2 = vsub.f32 %v8535_v17, %v8578_v10  ;;  %v16021_v9 = vsub.f32 %v8536_v23, %v8578_v10 }
0x26fb   : > { %v16023_v52 = vsub.f32 %v8537_v6, %v8578_v10  ;;  %v16025_v21 = vsub.f32 %v8538_v18, %v8578_v10  ;;  %v8585_v41 = vsub.f32 %v8539_v39, %v8578_v10  ;;  %v16027_v58 = vsub.f32 %v8540_v24, %v8578_v10 }
0x26fc   : > { %v8587_v4 = vmul.f32 %v16015_v48, %v16015_v48  ;;  %v8588_v30 = vmul.f32 %v16017_v33, %v16017_v33  ;;  %v8589_v47 = vmul.f32 %v16019_v2, %v16019_v2  ;;  %v8590_v17 = vmul.f32 %v16021_v9, %v16021_v9 }
0x26fd   : > { %v8591_v10 = vmul.f32 %v16023_v52, %v16023_v52  ;;  %v8592_v39 = vmul.f32 %v16025_v21, %v16025_v21  ;;  %v8593_v61 = vmul.f32 %v8585_v41, %v8585_v41 }
0x26fe   : > { %v8595_v23 = vsel %vm1458_vm3, %v8587_v4, 0.0  ;;  %v8596_v18 = vsel %vm1458_vm3, %v8588_v30, 0.0  ;;  %v8598_v6 = vsel %vm1458_vm3, %v8589_v47, 0.0  ;;  %v8600_v27 = vsel %vm1458_vm3, %v8590_v17, 0.0  ;;  %v16051_v17 = vpop.permute.xlu1 %8636 }
0x26ff   : > { %v8597_v46 = vadd.f32 %v8596_v18, %v8595_v23  ;;  %v8602_v22 = vsel %vm1458_vm3, %v8591_v10, 0.0  ;;  %v8594_v4 = vmul.f32 %v16027_v58, %v16027_v58  ;;  %v8604_v30 = vsel %vm1458_vm3, %v8592_v39, 0.0 }
0x2700   : > { %v8606_v18 = vsel %vm1458_vm3, %v8593_v61, 0.0 }
0x2701   : > { %v8599_v24 = vadd.f32 %v8598_v6, %v8597_v46  ;;  %v8608_v46 = vsel %vm1458_vm3, %v8594_v4, 0.0 }
0x2703   : > { %v8601_v14 = vadd.f32 %v8600_v27, %v8599_v24  ;;  %v16053_v24 = vpop.permute.xlu0 %8641 }
0x2705   : > { %v8603_v15 = vadd.f32 %v8602_v22, %v8601_v14  ;;  %v16055_v14 = vpop.permute.xlu1 %8684 }
0x2707   : > { %v8605_v23 = vadd.f32 %v8604_v30, %v8603_v15  ;;  %v16057_v0 = vpop.permute.xlu0 %8689 }
0x2709   : > { %v8607_v47 = vadd.f32 %v8606_v18, %v8605_v23  ;;  %v16059_v61 = vpop.permute.xlu1 %8646 }
0x270b   : > { %v8609_v6 = vadd.f32 %v8608_v46, %v8607_v47  ;;  %v16061_v4 = vpop.permute.xlu0 %8651 }
0x270d   : > { %v8610_v32 = vrot.slane %v8609_v6, 4  ;;  %v16063_v30 = vpop.permute.xlu1 %8694 }
0x270e   : > { %16926 = vst [vmem:[#allocation35_spill] sm:$0xff] %v16063_v30 }
0x270f   : > { %v8611_v1 = vadd.f32 %v8610_v32, %v8609_v6  ;;  %v16065_v32 = vpop.permute.xlu0 %8699 }
0x2711   : > { %v8612_v10 = vrot.slane %v8611_v1, 2  ;;  %v16067_v47 = vpop.permute.xlu1 %8656 }
0x2712   : > { %16927 = vst [vmem:[#allocation53_spill] sm:$0xff] %v16067_v47 }
0x2713   : > { %v8613_v22 = vadd.f32 %v8612_v10, %v8611_v1  ;;  %v16069_v6 = vpop.permute.xlu0 %8661 }
0x2714   : > { %16928 = vst [vmem:[#allocation54_spill] sm:$0xff] %v16069_v6 }
0x2715   : > { %v8614_v27 = vrot.slane %v8613_v22, 1 }
0x2717   : > { %v8615_v15 = vadd.f32 %v8614_v27, %v8613_v22  ;;  %v16071_v27 = vpop.permute.xlu1 %8704 }
0x2719   : > { %v8616_v39 = vmul.f32 0.015873017, %v8615_v15  ;;  %v16073_v15 = vpop.permute.xlu0 %8709 }
0x271b   : > { %13892 = vrsqrt.f32 %v8616_v39  ;;  %vm8619_vm5 = vcmp.eq.f32.partialorder %v8616_v39, inf  ;;  %v8622_v1 = vand.u32 2147483648, %v8616_v39  ;;  %vm8621_vm8 = vcmp.eq.f32.partialorder %v8616_v39, 0.0  ;;  %v16075_v5 = vpop.permute.xlu1 %8666 }
0x271d   : > { %v16077_v43 = vpop.permute.xlu0 %8671 }
0x271e   : > { %16929 = vst [vmem:[#allocation61_spill] sm:$0xff] %v16077_v43 }
0x271f   : > { %v16090_v28 = vpop.permute.xlu1 %8714 }
0x2720   : > { %16930 = vst [vmem:[#allocation62_spill] sm:$0xff] %v16090_v28 }
0x2725   : > { %v13893_v23 = vpop.eup %13892 }
0x2726   : > { %v8618_v18 = vmul.f32 %v13893_v23, %v8616_v39 }
0x2728   : > { %v8620_v46 = vsel %vm8619_vm5, %v8616_v39, %v8618_v18 }
0x2729   : > { %v8623_v10 = vsel %vm8621_vm8, %v8622_v1, %v8620_v46 }
0x272a   : > { %v8624_v22 = vadd.f32 1e-06, %v8623_v10 }
0x272c   : > { %13894 = vrcp.f32 %v8624_v22 }
0x2736   : > { %v13895_v23 = vpop.eup %13894 }
0x2737   : > { %v8632_v45 = vmul.f32 %v13895_v23, %v8585_v41  ;;  %v8626_v7 = vmul.f32 %v13895_v23, %v16015_v48  ;;  %v8627_v18 = vmul.f32 %v13895_v23, %v16017_v33  ;;  %v8628_v39 = vmul.f32 %v13895_v23, %v16019_v2 }
0x2738   : > { %v8629_v1 = vmul.f32 %v13895_v23, %v16021_v9  ;;  %v8630_v46 = vmul.f32 %v13895_v23, %v16023_v52  ;;  %v8631_v10 = vmul.f32 %v13895_v23, %v16025_v21  ;;  %v8633_v22 = vmul.f32 %v13895_v23, %v16027_v58  ;;  %v16096_v52 = vpop.permute.xlu0 %8719 }
0x2739   : > { %v8680_v55 = vmul.f32 %v16075_v5, %v8632_v45  ;;  %v8674_v34 = vmul.f32 %v16051_v17, %v8626_v7  ;;  %v8675_v41 = vmul.f32 %v16053_v24, %v8627_v18  ;;  %v8676_v48 = vmul.f32 %v16059_v61, %v8628_v39 }
0x273a   : > { %v8677_v2 = vmul.f32 %v16061_v4, %v8629_v1  ;;  %v8678_v33 = vmul.f32 %v16067_v47, %v8630_v46  ;;  %v8679_v9 = vmul.f32 %v16069_v6, %v8631_v10  ;;  %v8681_v21 = vmul.f32 %v16077_v43, %v8633_v22 }
0x273b   : > { %v8722_v45 = vadd.f32 %v16055_v14, %v8674_v34  ;;  %v8723_v7 = vadd.f32 %v16057_v0, %v8675_v41  ;;  %v8724_v58 = vadd.f32 %v16063_v30, %v8676_v48  ;;  %v8728_v23 = vadd.f32 %v16090_v28, %v8680_v55 }
0x273c   : > { %v8725_v18 = vadd.f32 %v16065_v32, %v8677_v2  ;;  %v8726_v39 = vadd.f32 %v16071_v27, %v8678_v33  ;;  %v8727_v1 = vadd.f32 %v16073_v15, %v8679_v9  ;;  %v8729_v46 = vadd.f32 %v16096_v52, %v8681_v21  ;;  %v16107_v33 = vld [vmem:[%s16912_s1 + $0x8] sm:$0xff]  ;;  %v16111_v9 = vld [vmem:[%s16912_s1 + $0x10] sm:$0xff]  ;;  %v14079_v21 = vld [vmem:[%s16862_s0 + $0x18] sm:$0xff] }
0x273d   : > { %v8730_v10 = vmax.f32 %v8722_v45, 0.0  ;;  %v8731_v22 = vmax.f32 %v8723_v7, 0.0  ;;  %v8732_v43 = vmax.f32 %v8724_v58, 0.0  ;;  %v8736_v6 = vmax.f32 %v8728_v23, 0.0 }
0x273e   : > { %v8733_v47 = vmax.f32 %v8725_v18, 0.0  ;;  %v8734_v34 = vmax.f32 %v8726_v39, 0.0  ;;  %v8735_v41 = vmax.f32 %v8727_v1, 0.0  ;;  %v8737_v48 = vmax.f32 %v8729_v46, 0.0 }
0x273f   : > { %v13530_v30 = vpack.c.bf16 %v8731_v22, %v8730_v10 }
0x2740   : > { %v13534_v55 = vpack.c.bf16 %v8733_v47, %v8732_v43  ;;  %v13538_v28 = vpack.c.bf16 %v8735_v41, %v8734_v34  ;;  %v13542_v2 = vpack.c.bf16 %v8737_v48, %v8736_v6  ;;  %v9015_v43 = vadd.f32 %v16000_v62, %v15611_v44  ;;  %v14077_v47 = vld [vmem:[%s16862_s0 + $0x8] sm:$0xff]  ;;  %v14078_v6 = vld [vmem:[%s16862_s0 + $0x10] sm:$0xff] }
0x2741   : > { %13531 = vmatprep.subr.bf16.mxu0 %v13530_v30 }
0x2742   : > { %13533 = vmatpush3.bf16.msra.mxu0 %v13530_v30  ;;  %v14076_v30 = vld [vmem:[%s16862_s0] sm:$0xff]  ;;  %s16934_s0 = sld [smem:[#allocation5_spill]] }
0x2743   : > { %13535 = vmatprep.subr.bf16.mxu0 %v13534_v55 }
0x2746   : > { %13537 = vmatpush3.bf16.msra.mxu0 %v13534_v55 }
0x2747   : > { %13539 = vmatprep.subr.bf16.mxu0 %v13538_v28 }
0x274a   : > { %13541 = vmatpush3.bf16.msra.mxu0 %v13538_v28  ;;  %v16119_v28 = vld [vmem:[%s16912_s1 + $0x18] sm:$0xff]  ;;  %s16939_s1 = sld [smem:[#allocation18_spill]] }
0x274b   : > { %13543 = vmatprep.subr.bf16.mxu0 %v13542_v2 }
0x274e   : > { %13545 = vmatpush3.bf16.msra.mxu0 %v13542_v2 }
0x274f   : > { %13547 = vmatprep.subr.bf16.mxu0 %v15550_v25 }
0x2751   : > { %13110 = vmatmul.mubr.msk.f32.vlgmr.msra.gmra.mrb[68].mxu0 %vm4546_vm4, %v16107_v33 }
0x2752   : > { %13549 = vmatpush3.bf16.msra.mxu0 %v15550_v25  ;;  %13112 = vmatprep.mubr.msk.f32.mxu0 %vm4546_vm4, %v16111_v9 }
0x2753   : > { %13551 = vmatprep.subr.bf16.mxu0 %v15565_v63 }
0x2755   : > { %13113 = vmatmul.mubr.msk.f32.gmra.mrb[70].mxu0 %vm4546_vm4, %v16119_v28 }
0x2756   : > { %13553 = vmatpush3.bf16.msra.mxu0 %v15565_v63  ;;  %13123 = vmatprep.mubr.msk.f32.mxu0 %vm1785_vm6, %v14076_v30 }
0x2757   : > { %13149 = vmatprep.subr.mxu0 %v9015_v43 }
0x2759   : > { %13124 = vmatmul.mubr.msk.f32.vlgmr.msra.gmra.mrb[72].mxu0 %vm1785_vm6, %v14077_v47 }
0x275a   : > { %13150 = vmatpush3.msra.mxu0 %v9015_v43  ;;  %13126 = vmatprep.mubr.msk.f32.mxu0 %vm1785_vm6, %v14078_v6 }
0x275b   : > { %13562 = vmatprep.subr.bf16.mxu0 %v16791_v8 }
0x275d   : > { %13127 = vmatmul.mubr.msk.f32.gmra.mrb[74].mxu0 %vm1785_vm6, %v14079_v21 }
0x2824   : > { %v16136_v44 = vpop.f32.mrb[68].mxu0 }
0x2825   : > { %v16138_v62 = vpop.f32.mrb[69].mxu0 }
0x2828   : > { %v16140_v45 = vpop.f32.mrb[70].mxu0 }
0x2829   : > { %v16142_v7 = vpop.f32.mrb[71].mxu0 }
0x282c   : > { %v13125_v58 = vpop.f32.mrb[72].mxu0 }
0x282d   : > { %v8929_v23 = vpop.f32.mrb[73].mxu0 }
0x282e   : > { %v8930_v18 = vadd.f32 %v8929_v23, %v15539_v20 }
0x2830   : > { %v16145_v39 = vpop.f32.mrb[74].mxu0  ;;  %9053 = vxpose.xlu1.b32.start.end [1/1] (short) (narrow) %v8930_v18, 16 }
0x2831   : > { %v16147_v1 = vpop.f32.mrb[75].mxu0 }
0x28b0   : > { %v9069_v46 = vpop.trf.xlu1 }
0x28b1   : > { %13151 = vmatprep.mubr.msk.f32.mxu0 %vm2592_vm14, %v9069_v46 }
0x28b4   : > { %v9070_v10 = vpop.trf.xlu1 }
0x28b5   : > { %13152 = vmatmul.mubr.msk.f32.vlgmr.msra.gmra.mrb[76].mxu0 %vm2592_vm14, %v9070_v10 }
0x28b6   : > { %13158 = vmatprep.mubr.msk.f32.mxu0 %vm14134_vm1, %v16793_v56 }
0x2988   : > { %v13153_v22 = vpop.f32.mrb[76].mxu0 }
0x2989   : > { %v9157_v34 = vpop.f32.mrb[77].mxu0  ;;  %v9167_v41 = vmul.f32 0.35355338, %v13153_v22 }
0x298a   : > { %v9166_v48 = vmul.f32 0.35355338, %v9157_v34 }
0x298b   : > { %v9169_v2 = vsel %vm2559_vm15, %v9167_v41, -1e+30  ;;  %v8935_v41 = vadd.f32 %v13125_v58, %v15555_v16  ;;  %v9035_v16 = vadd.f32 %v16009_v51, %v15658_v60 }
0x298c   : > { %v9168_v20 = vsel %vm2559_vm15, %v9166_v48, -1e+30  ;;  %v9174_v43 = vsel %vm9173_vm10, %v9169_v2, -inf }
0x298d   : > { %v9170_v55 = vsel %vm1458_vm3, %v9168_v20, -inf }
0x298e   : > { %9171 = vmax.xlane.f32.xlu0 %v9170_v55 }
0x2992   : > { %9175 = vmax.xlane.f32.xlu0 %v9174_v43 }
0x2a1b   : > { %v9172_v30 = vpop.xlane.xlu0 %9171 }
0x2a1c   : > { %v9177_v47 = vsub.f32 %v9168_v20, %v9172_v30 }
0x2a1e   : > { %v9179_v6 = vmul.f32 1.442695, %v9177_v47 }
0x2a1f   : > { %v9176_v21 = vpop.xlane.xlu0 %9175 }
0x2a20   : > { %13896 = vpow2.f32 %v9179_v6  ;;  %v9178_v23 = vsub.f32 %v9169_v2, %v9176_v21  ;;  %v9020_v6 = vadd.f32 %v15998_v49, %v15609_v37 }
0x2a22   : > { %v9181_v18 = vmul.f32 1.442695, %v9178_v23 }
0x2a24   : > { %13898 = vpow2.f32 %v9181_v18 }
0x2a2a   : > { %v13897_v46 = vpop.eup %13896 }
0x2a2b   : > { %v9183_v10 = vsel %vm1458_vm3, %v13897_v46, 0.0 }
0x2a2c   : > { %9184 = vadd.xlane.f32.xlu0 %v9183_v10 }
0x2a2e   : > { %v13899_v22 = vpop.eup %13898 }
0x2a2f   : > { %v9186_v34 = vsel %vm9173_vm10, %v13899_v22, 0.0 }
0x2a30   : > { %9187 = vadd.xlane.f32.xlu1 %v9186_v34 }
0x2a59   : > { %9272 = vxpose.xlu0.b32.start.end [1/1] (short) (narrow) %v8935_v41, 16 }
0x2ab9   : > { %v9185_v48 = vpop.xlane.xlu0 %9184 }
0x2aba   : > { %13900 = vrcp.f32 %v9185_v48 }
0x2abd   : > { %v9188_v20 = vpop.xlane.xlu1 %9187 }
0x2abe   : > { %13902 = vrcp.f32 %v9188_v20 }
0x2ac4   : > { %v13901_v55 = vpop.eup %13900 }
0x2ac5   : > { %v9191_v2 = vmul.f32 %v13901_v55, %v13897_v46 }
0x2ac8   : > { %v13903_v43 = vpop.eup %13902 }
0x2ac9   : > { %v9192_v30 = vmul.f32 %v13903_v43, %v13899_v22 }
0x2acb   : > { %v13563_v47 = vpack.c.bf16 %v9192_v30, %v9191_v2 }
0x2acd   : > { %13565 = vmatpush3.bf16.xpose.msk.msra.mxu0 %vm14758_vm2, %v13563_v47 }
0x2ace   : > { %13161 = vmatprep.subr.mxu0 %v9020_v6 }
0x2ad4   : > { %13159 = vmatmul.mubr.msk.f32.vlgmr.msra.gmra.mrb[78].mxu0 %vm1458_vm3, %v9035_v16 }
0x2ad5   : > { %13162 = vmatpush3.msra.mxu0 %v9020_v6 }
0x2ad9   : > { %v9288_v58 = vpop.trf.xlu0 }
0x2ada   : > { %13163 = vmatprep.mubr.msk.f32.mxu0 %vm2592_vm14, %v9288_v58  ;;  %v8940_v58 = vadd.f32 %v16147_v1, %v15648_v36  ;;  %v9040_v36 = vadd.f32 %v16007_v54, %v15667_v53 }
0x2add   : > { %v9289_v23 = vpop.trf.xlu0 }
0x2ade   : > { %13164 = vmatmul.mubr.msk.f32.vlgmr.msra.gmra.mrb[80].mxu0 %vm2592_vm14, %v9289_v23 }
0x2adf   : > { %13175 = vmatprep.mubr.msk.f32.mxu0 %vm2592_vm14, %v15748_v29 }
0x2ba7   : > { %v9268_v37 = vpop.f32.mrb[78].mxu0 }
0x2ba8   : > { %v13160_v49 = vpop.f32.mrb[79].mxu0 }
0x2bb1   : > { %v13165_v18 = vpop.f32.mrb[80].mxu0 }
0x2bb2   : > { %v9386_v46 = vmul.f32 0.35355338, %v13165_v18  ;;  %v9376_v10 = vpop.f32.mrb[81].mxu0 }
0x2bb3   : > { %v9385_v22 = vmul.f32 0.35355338, %v9376_v10 }
0x2bb4   : > { %v9388_v60 = vsel %vm2559_vm15, %v9386_v46, -1e+30 }
0x2bb5   : > { %v9387_v51 = vsel %vm2559_vm15, %v9385_v22, -1e+30  ;;  %v9392_v34 = vsel %vm9173_vm10, %v9388_v60, -inf }
0x2bb6   : > { %9393 = vmax.xlane.f32.xlu0 %v9392_v34  ;;  %v9389_v41 = vsel %vm1458_vm3, %v9387_v51, -inf }
0x2bb7   : > { %9390 = vmax.xlane.f32.xlu1 %v9389_v41 }
0x2c43   : > { %v9394_v48 = vpop.xlane.xlu0 %9393 }
0x2c44   : > { %v9396_v29 = vsub.f32 %v9388_v60, %v9394_v48  ;;  %v9391_v20 = vpop.xlane.xlu1 %9390 }
0x2c45   : > { %v9395_v55 = vsub.f32 %v9387_v51, %v9391_v20  ;;  %v9025_v51 = vadd.f32 %v16005_v12, %v15663_v38 }
0x2c46   : > { %v9399_v43 = vmul.f32 1.442695, %v9396_v29 }
0x2c47   : > { %v9397_v2 = vmul.f32 1.442695, %v9395_v55 }
0x2c49   : > { %13904 = vpow2.f32 %v9397_v2 }
0x2c4a   : > { %13906 = vpow2.f32 %v9399_v43 }
0x2c53   : > { %v13905_v30 = vpop.eup %13904 }
0x2c54   : > { %v9401_v47 = vsel %vm1458_vm3, %v13905_v30, 0.0  ;;  %v13907_v6 = vpop.eup %13906 }
0x2c55   : > { %9402 = vadd.xlane.f32.xlu1 %v9401_v47  ;;  %v9404_v16 = vsel %vm9173_vm10, %v13907_v6, 0.0 }
0x2c59   : > { %9405 = vadd.xlane.f32.xlu1 %v9404_v16 }
0x2c8c   : > { %9660 = vxpose.xlu1.b32.start.end [1/1] (short) (narrow) %v8940_v58, 16 }
0x2ce2   : > { %v9403_v23 = vpop.xlane.xlu1 %9402 }
0x2ce3   : > { %13908 = vrcp.f32 %v9403_v23 }
0x2ce6   : > { %v9406_v49 = vpop.xlane.xlu1 %9405 }
0x2ce7   : > { %13910 = vrcp.f32 %v9406_v49 }
0x2ced   : > { %v13909_v18 = vpop.eup %13908 }
0x2cee   : > { %v9409_v10 = vmul.f32 %v13909_v18, %v13905_v30  ;;  %v8945_v30 = vadd.f32 %v16145_v39, %v15698_v11 }
0x2cf1   : > { %v13911_v46 = vpop.eup %13910 }
0x2cf2   : > { %v9410_v22 = vmul.f32 %v13911_v46, %v13907_v6  ;;  %v9030_v46 = vadd.f32 %v16003_v3, %v15702_v50 }
0x2cf4   : > { %v13567_v60 = vpack.c.bf16 %v9410_v22, %v9409_v10  ;;  %v16932_v10 = vld [vmem:[#allocation46_spill] sm:$0xff] }
0x2cf5   : > { %v16933_v22 = vld [vmem:[#allocation34_spill] sm:$0xff] }
0x2cf6   : > { %13569 = vmatpush3.bf16.xpose.msk.msra.mxu1 %vm14758_vm2, %v13567_v60  ;;  %v9045_v11 = vadd.f32 %v16933_v22, %v16932_v10 }
0x2cf7   : > { %13189 = vmatprep.subr.mxu1 %v9025_v51 }
0x2cfd   : > { %13171 = vmatmul.mubr.msk.f32.vlgmr.msra.gmra.mrb[88].mxu1 %vm1458_vm3, %v9040_v36  ;;  %v16936_v36 = vld [vmem:[#allocation45_spill] sm:$0xff] }
0x2cfe   : > { %13190 = vmatpush3.msra.mxu1 %v9025_v51  ;;  %v16935_v51 = vld [vmem:[#allocation44_spill] sm:$0xff] }
0x2cff   : > { %13570 = vmatprep.subr.bf16.mxu1 %v16791_v8 }
0x2d0c   : > { %v9676_v1 = vpop.trf.xlu1 }
0x2d0d   : > { %13191 = vmatprep.mubr.msk.f32.mxu1 %vm2592_vm14, %v9676_v1  ;;  %v16938_v1 = vld [vmem:[#allocation47_spill] sm:$0xff] }
0x2d10   : > { %v9677_v34 = vpop.trf.xlu1 }
0x2d11   : > { %13192 = vmatmul.mubr.msk.f32.vlgmr.msra.gmra.mrb[90].mxu1 %vm2592_vm14, %v9677_v34 }
0x2d12   : > { %13198 = vmatprep.mubr.msk.f32.mxu1 %vm14134_vm1, %v16793_v56 }
0x2dd0   : > { %v9486_v38 = vpop.f32.mrb[88].mxu1 }
0x2dd1   : > { %v13172_v12 = vpop.f32.mrb[89].mxu1  ;;  %13173 = vmatprep.subr.mxu0 %v9486_v38 }
0x2dd2   : > { %13174 = vmatpush3.msra.mxu0 %v9486_v38 }
0x2dd3   : > { %13176 = vmatmul.mubr.msk.f32.vlgmr.msra.gmra.mrb[82].mxu0 %vm2592_vm14, %v15752_v26  ;;  %13181 = vmatprep.subr.mxu0 %v9268_v37 }
0x2dd4   : > { %13178 = vmatprep.mubr.msk.f32.mxu0 %vm2592_vm14, %v15760_v57  ;;  %13182 = vmatpush3.msra.mxu0 %v9268_v37 }
0x2dd7   : > { %13179 = vmatmul.mubr.msk.f32.gmra.mrb[84].mxu0 %vm2592_vm14, %v15766_v35 }
0x2dd8   : > { %13183 = vmatprep.mubr.msk.f32.mxu0 %vm2592_vm14, %v15754_v40 }
0x2ddb   : > { %13184 = vmatmul.mubr.msk.f32.vlgmr.msra.gmra.mrb[82].mxu0 %vm2592_vm14, %v15764_v13 }
0x2ddc   : > { %13186 = vmatprep.mubr.msk.f32.mxu0 %vm2592_vm14, %v15772_v59 }
0x2ddf   : > { %13187 = vmatmul.mubr.msk.f32.gmra.mrb[84].mxu0 %vm2592_vm14, %v15780_v42 }
0x2de0   : > { %13203 = vmatprep.mubr.msk.f32.mxu0 %vm2592_vm14, %v15803_v31 }
0x2de4   : > { %v13193_v53 = vpop.f32.mrb[90].mxu1 }
0x2de5   : > { %v9764_v26 = vpop.f32.mrb[91].mxu1  ;;  %v9774_v57 = vmul.f32 0.35355338, %v13193_v53 }
0x2de6   : > { %v9773_v54 = vmul.f32 0.35355338, %v9764_v26 }
0x2de7   : > { %v9776_v13 = vsel %vm2559_vm15, %v9774_v57, -1e+30 }
0x2de8   : > { %v9775_v35 = vsel %vm2559_vm15, %v9773_v54, -1e+30  ;;  %v9780_v59 = vsel %vm9173_vm10, %v9776_v13, -inf }
0x2de9   : > { %v9777_v40 = vsel %vm1458_vm3, %v9775_v35, -inf }
0x2dea   : > { %9778 = vmax.xlane.f32.xlu0 %v9777_v40 }
0x2dee   : > { %9781 = vmax.xlane.f32.xlu0 %v9780_v59 }
0x2e77   : > { %v9779_v42 = vpop.xlane.xlu0 %9778 }
0x2e78   : > { %v9783_v37 = vsub.f32 %v9775_v35, %v9779_v42  ;;  %v10697_v35 = vld [vmem:[%s16934_s0 + $0x18] sm:$0xff] }
0x2e7a   : > { %v9785_v41 = vmul.f32 1.442695, %v9783_v37 }
0x2e7b   : > { %v9782_v31 = vpop.xlane.xlu0 %9781 }
0x2e7c   : > { %13912 = vpow2.f32 %v9785_v41  ;;  %v9784_v48 = vsub.f32 %v9776_v13, %v9782_v31 }
0x2e7e   : > { %v9787_v29 = vmul.f32 1.442695, %v9784_v48 }
0x2e80   : > { %13914 = vpow2.f32 %v9787_v29 }
0x2e86   : > { %v13913_v20 = vpop.eup %13912 }
0x2e87   : > { %v9789_v55 = vsel %vm1458_vm3, %v13913_v20, 0.0 }
0x2e88   : > { %9790 = vadd.xlane.f32.xlu0 %v9789_v55  ;;  %v8742_v55 = vld [vmem:[%s16939_s1] sm:$0xff] }
0x2e8a   : > { %v13915_v43 = vpop.eup %13914 }
0x2e8b   : > { %v9792_v2 = vsel %vm9173_vm10, %v13915_v43, 0.0 }
0x2e8c   : > { %9793 = vadd.xlane.f32.xlu1 %v9792_v2  ;;  %v8744_v2 = vld [vmem:[%s16939_s1 + $0x10] sm:$0xff] }
0x2eb5   : > { %9967 = vxpose.xlu0.b32.start.end [1/1] (short) (narrow) %v8945_v30, 16  ;;  %v8745_v30 = vld [vmem:[%s16939_s1 + $0x18] sm:$0xff] }
0x2f15   : > { %v9791_v47 = vpop.xlane.xlu0 %9790 }
0x2f16   : > { %13916 = vrcp.f32 %v9791_v47  ;;  %v10694_v47 = vld [vmem:[%s16934_s0] sm:$0xff] }
0x2f19   : > { %v9794_v6 = vpop.xlane.xlu1 %9793 }
0x2f1a   : > { %13918 = vrcp.f32 %v9794_v6  ;;  %v10695_v6 = vld [vmem:[%s16934_s0 + $0x8] sm:$0xff] }
0x2f20   : > { %v13917_v16 = vpop.eup %13916 }
0x2f21   : > { %v9797_v23 = vmul.f32 %v13917_v16, %v13913_v20  ;;  %v10696_v16 = vld [vmem:[%s16934_s0 + $0x10] sm:$0xff]  ;;  %s16983_s0 = sld [smem:[#allocation6_spill]] }
0x2f24   : > { %v13919_v58 = vpop.eup %13918 }
0x2f25   : > { %v9798_v49 = vmul.f32 %v13919_v58, %v13915_v43  ;;  %v8743_v43 = vld [vmem:[%s16939_s1 + $0x8] sm:$0xff] }
0x2f27   : > { %v13571_v18 = vpack.c.bf16 %v9798_v49, %v9797_v23 }
0x2f29   : > { %13573 = vmatpush3.bf16.xpose.msk.msra.mxu1 %vm14758_vm2, %v13571_v18 }
0x2f2a   : > { %13209 = vmatprep.subr.mxu1 %v9030_v46 }
0x2f30   : > { %13199 = vmatmul.mubr.msk.f32.vlgmr.msra.gmra.mrb[92].mxu1 %vm1458_vm3, %v9045_v11 }
0x2f31   : > { %13210 = vmatpush3.msra.mxu1 %v9030_v46 }
0x2f32   : > { %13574 = vmatprep.subr.bf16.mxu1 %v16791_v8  ;;  %v16937_v8 = vld [vmem:[#allocation70_spill] sm:$0xff] }
0x2f35   : > { %v9983_v39 = vpop.trf.xlu0 }
0x2f36   : > { %13211 = vmatprep.mubr.msk.f32.mxu1 %vm2592_vm14, %v9983_v39  ;;  %v16940_v39 = vld [vmem:[#allocation80_spill] sm:$0xff] }
0x2f39   : > { %v9984_v60 = vpop.trf.xlu0 }
0x2f3a   : > { %13212 = vmatmul.mubr.msk.f32.vlgmr.msra.gmra.mrb[94].mxu1 %vm2592_vm14, %v9984_v60 }
0x2f3b   : > { %13218 = vmatprep.mubr.msk.f32.mxu1 %vm14134_vm1, %v16793_v56 }
0x3003   : > { %v9874_v50 = vpop.f32.mrb[92].mxu1 }
0x3004   : > { %v13200_v3 = vpop.f32.mrb[93].mxu1  ;;  %13201 = vmatprep.subr.mxu0 %v9874_v50 }
0x3005   : > { %13202 = vmatpush3.msra.mxu0 %v9874_v50  ;;  %v16941_v50 = vld [vmem:[#allocation37_spill] sm:$0xff] }
0x3006   : > { %13204 = vmatmul.mubr.msk.f32.vlgmr.msra.gmra.mrb[82].mxu0 %vm2592_vm14, %v16935_v51 }
0x3007   : > { %13206 = vmatprep.mubr.msk.f32.mxu0 %vm2592_vm14, %v16936_v36 }
0x300a   : > { %13207 = vmatmul.mubr.msk.f32.gmra.mrb[84].mxu0 %vm2592_vm14, %v16937_v8 }
0x300b   : > { %13223 = vmatprep.mubr.msk.f32.mxu0 %vm2592_vm14, %v16938_v1 }
0x300d   : > { %v13213_v34 = vpop.f32.mrb[94].mxu1 }
0x300e   : > { %v10081_v38 = vmul.f32 0.35355338, %v13213_v34  ;;  %v10071_v56 = vpop.f32.mrb[95].mxu1 }
0x300f   : > { %v10080_v12 = vmul.f32 0.35355338, %v10071_v56  ;;  %v16942_v56 = vld [vmem:[#allocation40_spill] sm:$0xff] }
0x3010   : > { %v10083_v53 = vsel %vm2559_vm15, %v10081_v38, -1e+30 }
0x3011   : > { %v10082_v26 = vsel %vm2559_vm15, %v10080_v12, -1e+30  ;;  %v10087_v57 = vsel %vm9173_vm10, %v10083_v53, -inf }
0x3012   : > { %10088 = vmax.xlane.f32.xlu0 %v10087_v57  ;;  %v10084_v54 = vsel %vm1458_vm3, %v10082_v26, -inf  ;;  %v16944_v57 = vld [vmem:[#allocation43_spill] sm:$0xff] }
0x3013   : > { %10085 = vmax.xlane.f32.xlu1 %v10084_v54  ;;  %v16945_v54 = vld [vmem:[#allocation33_spill] sm:$0xff] }
0x3028   : > { %10715 = vperm.xlu0 %13770, %v10697_v35   ;;  %v9050_v35 = vadd.f32 %v16945_v54, %v16944_v57  ;;  %v16971_v57 = vld [vmem:[#allocation77_spill] sm:$0xff] }
0x309f   : > { %v10089_v40 = vpop.xlane.xlu0 %10088 }
0x30a0   : > { %v10091_v13 = vsub.f32 %v10083_v53, %v10089_v40  ;;  %v10086_v59 = vpop.xlane.xlu1 %10085  ;;  %v16943_v53 = vld [vmem:[#allocation39_spill] sm:$0xff] }
0x30a1   : > { %v10090_v42 = vsub.f32 %v10082_v26, %v10086_v59  ;;  %v16947_v59 = vld [vmem:[#allocation49_spill] sm:$0xff] }
0x30a2   : > { %v10094_v37 = vmul.f32 1.442695, %v10091_v13 }
0x30a3   : > { %v10092_v41 = vmul.f32 1.442695, %v10090_v42  ;;  %v16949_v42 = vld [vmem:[#allocation48_spill] sm:$0xff] }
0x30a5   : > { %13920 = vpow2.f32 %v10092_v41 }
0x30a6   : > { %13922 = vpow2.f32 %v10094_v37  ;;  %v16950_v37 = vld [vmem:[#allocation75_spill] sm:$0xff] }
0x30af   : > { %v13921_v31 = vpop.eup %13920 }
0x30b0   : > { %v10096_v48 = vsel %vm1458_vm3, %v13921_v31, 0.0  ;;  %v13923_v29 = vpop.eup %13922 }
0x30b1   : > { %10097 = vadd.xlane.f32.xlu1 %v10096_v48  ;;  %v10099_v20 = vsel %vm9173_vm10, %v13923_v29, 0.0 }
0x30b5   : > { %10100 = vadd.xlane.f32.xlu1 %v10099_v20  ;;  %v16952_v20 = vld [vmem:[#allocation52_spill] sm:$0xff] }
0x30c6   : > { %8748 = vperm.xlu1 %13771, %v8742_v55  }
0x30ca   : > { %8753 = vperm.xlu1 %13771, %v8743_v43  }
0x30ce   : > { %8758 = vperm.xlu1 %13771, %v8744_v2  }
0x30d2   : > { %8763 = vperm.xlu1 %13771, %v8745_v30   ;;  %v16953_v30 = vld [vmem:[#allocation56_spill] sm:$0xff] }
0x30d6   : > { %10700 = vperm.xlu1 %13771, %v10694_v47  }
0x30da   : > { %10705 = vperm.xlu1 %13771, %v10695_v6  }
0x30de   : > { %10710 = vperm.xlu1 %13771, %v10696_v16   ;;  %v16954_v16 = vld [vmem:[#allocation57_spill] sm:$0xff] }
0x313e   : > { %v10098_v58 = vpop.xlane.xlu1 %10097 }
0x313f   : > { %13924 = vrcp.f32 %v10098_v58 }
0x3142   : > { %v10101_v23 = vpop.xlane.xlu1 %10100 }
0x3143   : > { %13926 = vrcp.f32 %v10101_v23 }
0x3146   : > { %v16257_v49 = vpop.permute.xlu1 %8748 }
0x3147   : > { %v8845_v18 = vadd.f32 %v16138_v62, %v16257_v49 }
0x3149   : > { %v13925_v10 = vpop.eup %13924  ;;  %v10682_v60 = vadd.f32 %v8845_v18, %v16940_v39  ;;  %v16955_v18 = vld [vmem:[#allocation58_spill] sm:$0xff]  ;;  %v16959_v39 = vld [vmem:[#allocation64_spill] sm:$0xff] }
0x314a   : > { %v16261_v46 = vpop.permute.xlu1 %8753  ;;  %v10104_v51 = vmul.f32 %v13925_v10, %v13921_v31  ;;  %v16951_v31 = vld [vmem:[#allocation55_spill] sm:$0xff] }
0x314b   : > { %v8850_v22 = vadd.f32 %v16136_v44, %v16261_v46  ;;  %v16956_v10 = vld [vmem:[#allocation59_spill] sm:$0xff] }
0x314d   : > { %v13927_v11 = vpop.eup %13926  ;;  %v10683_v3 = vadd.f32 %v8850_v22, %v16941_v50  ;;  %v16957_v22 = vld [vmem:[#allocation60_spill] sm:$0xff]  ;;  %v16962_v50 = vld [vmem:[#allocation67_spill] sm:$0xff] }
0x314e   : > { %v10105_v36 = vmul.f32 %v13927_v11, %v13923_v29  ;;  %v16267_v8 = vpop.permute.xlu1 %8758  ;;  %v16958_v11 = vld [vmem:[#allocation63_spill] sm:$0xff] }
0x314f   : > { %v16269_v1 = vpack.c.bf16 %v10683_v3, %v10682_v60  ;;  %v8855_v62 = vadd.f32 %v16142_v7, %v16267_v8  ;;  %v16946_v7 = vld [vmem:[#allocation51_spill] sm:$0xff]  ;;  %v16960_v60 = vld [vmem:[#allocation65_spill] sm:$0xff]  ;;  %v16963_v3 = vld [vmem:[#allocation68_spill] sm:$0xff] }
0x3150   : > { %v13575_v34 = vpack.c.bf16 %v10105_v36, %v10104_v51  ;;  %v16964_v51 = vld [vmem:[#allocation69_spill] sm:$0xff]  ;;  %v16966_v36 = vld [vmem:[#allocation71_spill] sm:$0xff] }
0x3151   : > { %v10684_v12 = vadd.f32 %v8855_v62, %v16942_v56  ;;  %v16968_v62 = vld [vmem:[#allocation73_spill] sm:$0xff] }
0x3152   : > { %13577 = vmatpush3.bf16.xpose.msk.msra.mxu1 %vm14758_vm2, %v13575_v34  ;;  %v16275_v38 = vpop.permute.xlu1 %8763  ;;  %v16967_v34 = vld [vmem:[#allocation74_spill] sm:$0xff] }
0x3153   : > { %v8860_v44 = vadd.f32 %v16140_v45, %v16275_v38  ;;  %v16948_v45 = vld [vmem:[#allocation50_spill] sm:$0xff] }
0x3155   : > { %v10685_v26 = vadd.f32 %v8860_v44, %v16943_v53  ;;  %v16969_v44 = vld [vmem:[#allocation76_spill] sm:$0xff] }
0x3157   : > { %v16283_v40 = vpack.c.bf16 %v10685_v26, %v10684_v12  ;;  %v16970_v12 = vld [vmem:[#allocation78_spill] sm:$0xff] }
0x3159   : > { %13219 = vmatmul.mubr.msk.f32.vlgmr.msra.gmra.mrb[96].mxu1 %vm1458_vm3, %v9050_v35 }
0x315a   : > { %13237 = vmatprep.mubr.msk.f32.mxu1 %vm1785_vm6, %v16946_v7 }
0x322c   : > { %v10181_v21 = vpop.f32.mrb[96].mxu1 }
0x322d   : > { %v13220_v13 = vpop.f32.mrb[97].mxu1  ;;  %13221 = vmatprep.subr.mxu0 %v10181_v21 }
0x322e   : > { %13222 = vmatpush3.msra.mxu0 %v10181_v21 }
0x322f   : > { %13224 = vmatmul.mubr.msk.f32.vlgmr.msra.gmra.mrb[82].mxu0 %vm2592_vm14, %v16947_v59 }
0x3230   : > { %13226 = vmatprep.mubr.msk.f32.mxu0 %vm2592_vm14, %v16948_v45  ;;  %v16972_v45 = vld [vmem:[#allocation82_spill] sm:$0xff] }
0x3233   : > { %13227 = vmatmul.mubr.msk.f32.gmra.mrb[84].mxu0 %vm2592_vm14, %v16949_v42 }
0x3234   : > { %13285 = vmatprep.mubr.msk.f32.mxu0 %vm4546_vm4, %v16950_v37  ;;  %v16973_v37 = vld [vmem:[#allocation83_spill] sm:$0xff] }
0x3302   : > { %v13225_v41 = vpop.f32.mrb[82].mxu0 }
0x3303   : > { %v10275_v48 = vadd.f32 %v13225_v41, %v16951_v31  ;;  %v10251_v29 = vpop.f32.mrb[83].mxu0 }
0x3304   : > { %v10274_v55 = vadd.f32 %v10251_v29, %v16952_v20 }
0x3306   : > { %v13578_v43 = vpack.c.bf16 %v10275_v48, %v10274_v55  ;;  %v13228_v2 = vpop.f32.mrb[84].mxu0 }
0x3307   : > { %v10277_v47 = vadd.f32 %v13228_v2, %v16953_v30  ;;  %v10261_v6 = vpop.f32.mrb[85].mxu0  ;;  %v16975_v30 = vld [vmem:[#allocation81_spill] sm:$0xff] }
0x3308   : > { %v10276_v58 = vadd.f32 %v10261_v6, %v16954_v16  ;;  %13579 = vmatprep.subr.bf16.mxu1 %v13578_v43 }
0x3309   : > { %13581 = vmatpush3.bf16.msra.mxu1 %v13578_v43  ;;  %v16974_v43 = vld [vmem:[#allocation84_spill] sm:$0xff] }
0x330a   : > { %v13582_v23 = vpack.c.bf16 %v10277_v47, %v10276_v58 }
0x330c   : > { %13583 = vmatprep.subr.bf16.mxu1 %v13582_v23 }
0x330d   : > { %13585 = vmatpush3.bf16.msra.mxu1 %v13582_v23 }
0x330e   : > { %13587 = vmatprep.subr.bf16.mxu1 %v15550_v25 }
0x3310   : > { %13238 = vmatmul.mubr.msk.f32.vlgmr.msra.gmra.mrb[98].mxu1 %vm1785_vm6, %v16955_v18 }
0x3311   : > { %13589 = vmatpush3.bf16.msra.mxu1 %v15550_v25  ;;  %13240 = vmatprep.mubr.msk.f32.mxu1 %vm1785_vm6, %v16956_v10  ;;  %v16961_v25 = vld [vmem:[#allocation66_spill] sm:$0xff] }
0x3312   : > { %13591 = vmatprep.subr.bf16.mxu1 %v15565_v63 }
0x3314   : > { %13241 = vmatmul.mubr.msk.f32.gmra.mrb[100].mxu1 %vm1785_vm6, %v16957_v22  ;;  %v16976_v22 = vld [vmem:[#allocation85_spill] sm:$0xff] }
0x3315   : > { %13593 = vmatpush3.bf16.msra.mxu1 %v15565_v63  ;;  %13243 = vmatprep.mubr.msk.f32.mxu1 %vm1785_vm6, %v16958_v11  ;;  %v16965_v63 = vld [vmem:[#allocation72_spill] sm:$0xff] }
0x3318   : > { %13244 = vmatmul.mubr.msk.f32.gmra.mrb[102].mxu1 %vm1785_vm6, %v16959_v39  ;;  %v16977_v39 = vld [vmem:[#allocation32_spill] sm:$0xff] }
0x3319   : > { %13246 = vmatprep.mubr.msk.f32.mxu1 %vm1785_vm6, %v16960_v60 }
0x331c   : > { %13247 = vmatmul.mubr.msk.f32.gmra.mrb[104].mxu1 %vm1785_vm6, %v16961_v25 }
0x331d   : > { %13257 = vmatprep.mubr.msk.f32.mxu1 %vm1785_vm6, %v16962_v50 }
0x3320   : > { %13258 = vmatmul.mubr.msk.f32.vlgmr.msra.gmra.mrb[98].mxu1 %vm1785_vm6, %v16963_v3 }
0x3321   : > { %13260 = vmatprep.mubr.msk.f32.mxu1 %vm1785_vm6, %v16964_v51 }
0x3324   : > { %13261 = vmatmul.mubr.msk.f32.gmra.mrb[100].mxu1 %vm1785_vm6, %v16965_v63 }
0x3325   : > { %13263 = vmatprep.mubr.msk.f32.mxu1 %vm1785_vm6, %v16966_v36 }
0x3328   : > { %13264 = vmatmul.mubr.msk.f32.gmra.mrb[102].mxu1 %vm1785_vm6, %v16967_v34 }
0x3329   : > { %13266 = vmatprep.mubr.msk.f32.mxu1 %vm1785_vm6, %v16968_v62 }
0x332c   : > { %13267 = vmatmul.mubr.msk.f32.gmra.mrb[104].mxu1 %vm1785_vm6, %v16969_v44 }
0x33f3   : > { %v13259_v56 = vpop.f32.mrb[98].mxu1 }
0x33f4   : > { %v10489_v53 = vadd.f32 %v13259_v56, %v16970_v12  ;;  %v10449_v26 = vpop.f32.mrb[99].mxu1 }
0x33f5   : > { %v10488_v54 = vadd.f32 %v10449_v26, %v16971_v57 }
0x33f6   : > { %v10497_v35 = vsel %vm1970_vm7, %v10489_v53, 0.0 }
0x33f7   : > { %v10496_v7 = vsel %vm1970_vm7, %v10488_v54, 0.0  ;;  %v13262_v21 = vpop.f32.mrb[100].mxu1 }
0x33f8   : > { %v10498_v13 = vadd.f32 %v10497_v35, %v10496_v7  ;;  %v10459_v59 = vpop.f32.mrb[101].mxu1  ;;  %v10491_v42 = vadd.f32 %v13262_v21, %v16972_v45 }
0x33f9   : > { %v10490_v41 = vadd.f32 %v10459_v59, %v16973_v37 }
0x33fa   : > { %v10501_v55 = vsel %vm1970_vm7, %v10491_v42, 0.0 }
0x33fb   : > { %v10499_v31 = vsel %vm1970_vm7, %v10490_v41, 0.0  ;;  %v13265_v48 = vpop.f32.mrb[102].mxu1 }
0x33fc   : > { %v10500_v29 = vadd.f32 %v10499_v31, %v10498_v13  ;;  %v10469_v20 = vpop.f32.mrb[103].mxu1  ;;  %v10493_v2 = vadd.f32 %v13265_v48, %v16974_v43 }
0x33fd   : > { %v10492_v47 = vadd.f32 %v10469_v20, %v16975_v30 }
0x33fe   : > { %v10502_v6 = vadd.f32 %v10501_v55, %v10500_v29  ;;  %v10505_v10 = vsel %vm1970_vm7, %v10493_v2, 0.0 }
0x33ff   : > { %v10503_v16 = vsel %vm1970_vm7, %v10492_v47, 0.0  ;;  %v13268_v58 = vpop.f32.mrb[104].mxu1 }
0x3400   : > { %v10504_v23 = vadd.f32 %v10503_v16, %v10502_v6  ;;  %v10479_v18 = vpop.f32.mrb[105].mxu1  ;;  %v10495_v11 = vadd.f32 %v13268_v58, %v16976_v22 }
0x3401   : > { %v10494_v60 = vadd.f32 %v10479_v18, %v16977_v39 }
0x3402   : > { %v10506_v25 = vadd.f32 %v10505_v10, %v10504_v23  ;;  %v10509_v51 = vsel %vm1970_vm7, %v10495_v11, 0.0 }
0x3403   : > { %v10507_v50 = vsel %vm1970_vm7, %v10494_v60, 0.0 }
0x3404   : > { %v10508_v3 = vadd.f32 %v10507_v50, %v10506_v25 }
0x3406   : > { %v10510_v63 = vadd.f32 %v10509_v51, %v10508_v3 }
0x3408   : > { %v10511_v36 = vrot.slane %v10510_v63, 4 }
0x340a   : > { %v10512_v34 = vadd.f32 %v10511_v36, %v10510_v63 }
0x340c   : > { %v10513_v62 = vrot.slane %v10512_v34, 2 }
0x340e   : > { %v10514_v44 = vadd.f32 %v10513_v62, %v10512_v34 }
0x3410   : > { %v10515_v56 = vrot.slane %v10514_v44, 1 }
0x3412   : > { %v10516_v12 = vadd.f32 %v10515_v56, %v10514_v44 }
0x3414   : > { %v10517_v26 = vmul.f32 0.015625, %v10516_v12 }
0x3416   : > { %v10518_v57 = vsub.f32 %v10488_v54, %v10517_v26  ;;  %v10519_v35 = vsub.f32 %v10489_v53, %v10517_v26  ;;  %v10520_v7 = vsub.f32 %v10490_v41, %v10517_v26  ;;  %v10521_v21 = vsub.f32 %v10491_v42, %v10517_v26 }
0x3417   : > { %v10522_v13 = vsub.f32 %v10492_v47, %v10517_v26  ;;  %v10523_v59 = vsub.f32 %v10493_v2, %v10517_v26  ;;  %v10524_v45 = vsub.f32 %v10494_v60, %v10517_v26  ;;  %v10525_v37 = vsub.f32 %v10495_v11, %v10517_v26 }
0x3418   : > { %v10526_v31 = vmul.f32 %v10518_v57, %v10518_v57  ;;  %v10527_v48 = vmul.f32 %v10519_v35, %v10519_v35  ;;  %v10528_v29 = vmul.f32 %v10520_v7, %v10520_v7  ;;  %v10529_v20 = vmul.f32 %v10521_v21, %v10521_v21 }
0x3419   : > { %v10530_v6 = vmul.f32 %v10522_v13, %v10522_v13  ;;  %v10531_v53 = vmul.f32 %v10523_v59, %v10523_v59  ;;  %v10532_v2 = vmul.f32 %v10524_v45, %v10524_v45  ;;  %v10533_v23 = vmul.f32 %v10525_v37, %v10525_v37 }
0x341a   : > { %v10534_v55 = vsel %vm1970_vm7, %v10526_v31, 0.0  ;;  %v10535_v43 = vsel %vm1970_vm7, %v10527_v48, 0.0  ;;  %v10537_v16 = vsel %vm1970_vm7, %v10528_v29, 0.0  ;;  %v10539_v42 = vsel %vm1970_vm7, %v10529_v20, 0.0 }
0x341b   : > { %v10536_v30 = vadd.f32 %v10535_v43, %v10534_v55  ;;  %v10541_v47 = vsel %vm1970_vm7, %v10530_v6, 0.0  ;;  %v10543_v18 = vsel %vm1970_vm7, %v10531_v53, 0.0  ;;  %v10545_v22 = vsel %vm1970_vm7, %v10532_v2, 0.0 }
0x341c   : > { %v10547_v39 = vsel %vm1970_vm7, %v10533_v23, 0.0 }
0x341d   : > { %v10538_v54 = vadd.f32 %v10537_v16, %v10536_v30 }
0x341f   : > { %v10540_v41 = vadd.f32 %v10539_v42, %v10538_v54 }
0x3421   : > { %v10542_v58 = vadd.f32 %v10541_v47, %v10540_v41 }
0x3423   : > { %v10544_v10 = vadd.f32 %v10543_v18, %v10542_v58  ;;  %v16978_v58 = vld [vmem:[#allocation53_spill] sm:$0xff] }
0x3425   : > { %v10546_v11 = vadd.f32 %v10545_v22, %v10544_v10 }
0x3427   : > { %v10548_v60 = vadd.f32 %v10547_v39, %v10546_v11 }
0x3429   : > { %v10549_v25 = vrot.slane %v10548_v60, 4 }
0x342b   : > { %v10550_v50 = vadd.f32 %v10549_v25, %v10548_v60 }
0x342d   : > { %v10551_v3 = vrot.slane %v10550_v50, 2 }
0x342f   : > { %v10552_v51 = vadd.f32 %v10551_v3, %v10550_v50 }
0x3431   : > { %v10553_v63 = vrot.slane %v10552_v51, 1 }
0x3433   : > { %v10554_v36 = vadd.f32 %v10553_v63, %v10552_v51 }
0x3435   : > { %v10555_v34 = vmul.f32 0.015873017, %v10554_v36 }
0x3437   : > { %13928 = vrsqrt.f32 %v10555_v34  ;;  %vm10558_vm3 = vcmp.eq.f32.partialorder %v10555_v34, inf  ;;  %v10561_v56 = vand.u32 2147483648, %v10555_v34  ;;  %vm10560_vm14 = vcmp.eq.f32.partialorder %v10555_v34, 0.0 }
0x3441   : > { %v13929_v62 = vpop.eup %13928 }
0x3442   : > { %v10557_v44 = vmul.f32 %v13929_v62, %v10555_v34 }
0x3444   : > { %v10559_v12 = vsel %vm10558_vm3, %v10555_v34, %v10557_v44  ;;  %v16985_v34 = vld [vmem:[#allocation42_spill] sm:$0xff] }
0x3445   : > { %v10562_v26 = vsel %vm10560_vm14, %v10561_v56, %v10559_v12  ;;  %v10701_v56 = vpop.permute.xlu1 %10700 }
0x3446   : > { %v10563_v31 = vadd.f32 1e-06, %v10562_v26 }
0x3448   : > { %13930 = vrcp.f32 %v10563_v31 }
0x3452   : > { %v13931_v48 = vpop.eup %13930 }
0x3453   : > { %v10571_v29 = vmul.f32 %v13931_v48, %v10524_v45  ;;  %v10565_v20 = vmul.f32 %v13931_v48, %v10518_v57  ;;  %v10566_v55 = vmul.f32 %v13931_v48, %v10519_v35  ;;  %v10567_v43 = vmul.f32 %v13931_v48, %v10520_v7  ;;  %v16979_v45 = vld [vmem:[#allocation54_spill] sm:$0xff]  ;;  %v16980_v35 = vld [vmem:[#allocation61_spill] sm:$0xff] }
0x3454   : > { %v10568_v30 = vmul.f32 %v13931_v48, %v10521_v21  ;;  %v10569_v6 = vmul.f32 %v13931_v48, %v10522_v13  ;;  %v10570_v16 = vmul.f32 %v13931_v48, %v10523_v59  ;;  %v10572_v54 = vmul.f32 %v13931_v48, %v10525_v37  ;;  %v16981_v59 = vld [vmem:[#allocation35_spill] sm:$0xff]  ;;  %v16982_v37 = vld [vmem:[#allocation62_spill] sm:$0xff] }
0x3455   : > { %v10579_v53 = vmul.f32 %v10571_v29, %v16075_v5  ;;  %v10573_v42 = vmul.f32 %v10565_v20, %v16051_v17  ;;  %v10574_v41 = vmul.f32 %v10566_v55, %v16053_v24  ;;  %v10575_v2 = vmul.f32 %v10567_v43, %v16059_v61  ;;  %v16986_v29 = vld [vmem:[#allocation38_spill] sm:$0xff]  ;;  %v16987_v55 = vld [vmem:[#allocation79_spill] sm:$0xff] }
0x3456   : > { %v10576_v47 = vmul.f32 %v10568_v30, %v16061_v4  ;;  %v10577_v23 = vmul.f32 %v10569_v6, %v16978_v58  ;;  %v10578_v57 = vmul.f32 %v10570_v16, %v16979_v45  ;;  %v10580_v7 = vmul.f32 %v10572_v54, %v16980_v35  ;;  %v10706_v16 = vpop.permute.xlu1 %10705 }
0x3457   : > { %v10581_v21 = vadd.f32 %v10573_v42, %v16055_v14  ;;  %v10582_v13 = vadd.f32 %v10574_v41, %v16057_v0  ;;  %v10583_v5 = vadd.f32 %v10575_v2, %v16981_v59  ;;  %v10587_v17 = vadd.f32 %v10579_v53, %v16982_v37  ;;  %v10716_v41 = vpop.permute.xlu0 %10715 }
0x3458   : > { %v10584_v24 = vadd.f32 %v10576_v47, %v16065_v32  ;;  %v10585_v61 = vadd.f32 %v10577_v23, %v16071_v27  ;;  %v10586_v4 = vadd.f32 %v10578_v57, %v16073_v15  ;;  %v10588_v18 = vadd.f32 %v10580_v7, %v16096_v52  ;;  %v10690_v32 = vld [vmem:[%s16983_s0] sm:$0xff]  ;;  %v10691_v27 = vld [vmem:[%s16983_s0 + $0x8] sm:$0xff]  ;;  %v10692_v15 = vld [vmem:[%s16983_s0 + $0x10] sm:$0xff] }
0x3459   : > { %v10589_v10 = vmax.f32 %v10581_v21, 0.0  ;;  %v10590_v22 = vmax.f32 %v10582_v13, 0.0  ;;  %v10591_v11 = vmax.f32 %v10583_v5, 0.0  ;;  %v10595_v39 = vmax.f32 %v10587_v17, 0.0  ;;  %v10693_v52 = vld [vmem:[%s16983_s0 + $0x18] sm:$0xff]  ;;  %s16988_s0 = sld [smem:[#allocation4_spill]] }
0x345a   : > { %v10592_v60 = vmax.f32 %v10584_v24, 0.0  ;;  %v10593_v14 = vmax.f32 %v10585_v61, 0.0  ;;  %v10594_v25 = vmax.f32 %v10586_v4, 0.0  ;;  %v10596_v0 = vmax.f32 %v10588_v18, 0.0 }
0x345b   : > { %v13594_v50 = vpack.c.bf16 %v10590_v22, %v10589_v10 }
0x345c   : > { %v13598_v3 = vpack.c.bf16 %v10592_v60, %v10591_v11  ;;  %v13602_v51 = vpack.c.bf16 %v10594_v25, %v10593_v14  ;;  %v13606_v63 = vpack.c.bf16 %v10596_v0, %v10595_v39 }
0x345d   : > { %13595 = vmatprep.subr.bf16.mxu0 %v13594_v50 }
0x345e   : > { %13597 = vmatpush3.bf16.msra.mxu0 %v13594_v50 }
0x345f   : > { %13599 = vmatprep.subr.bf16.mxu0 %v13598_v3  ;;  %v11022_v61 = vld [vmem:[%s16988_s0] sm:$0xff]  ;;  %v16412_v10 = vld [vmem:[%s16988_s0 + $0x8] sm:$0x1] }
0x3460   : > { %v11034_v11 = vsel %vm6902_vm0, %v16412_v10, -inf }
0x3462   : > { %13601 = vmatpush3.bf16.msra.mxu0 %v13598_v3 }
0x3463   : > { %13603 = vmatprep.subr.bf16.mxu0 %v13602_v51 }
0x3466   : > { %13605 = vmatpush3.bf16.msra.mxu0 %v13602_v51 }
0x3467   : > { %13607 = vmatprep.subr.bf16.mxu0 %v13606_v63 }
0x346a   : > { %13609 = vmatpush3.bf16.msra.mxu0 %v13606_v63 }
0x346b   : > { %13611 = vmatprep.subr.bf16.mxu0 %v16269_v1 }
0x346d   : > { %13286 = vmatmul.mubr.msk.f32.vlgmr.msra.gmra.mrb[86].mxu0 %vm4546_vm4, %v16107_v33 }
0x346e   : > { %13613 = vmatpush3.bf16.msra.mxu0 %v16269_v1  ;;  %13288 = vmatprep.mubr.msk.f32.mxu0 %vm4546_vm4, %v16111_v9 }
0x346f   : > { %13615 = vmatprep.subr.bf16.mxu0 %v16283_v40 }
0x3471   : > { %13289 = vmatmul.mubr.msk.f32.gmra.mrb[88].mxu0 %vm4546_vm4, %v16119_v28 }
0x3472   : > { %13617 = vmatpush3.bf16.msra.mxu0 %v16283_v40  ;;  %13299 = vmatprep.mubr.msk.f32.mxu0 %vm1785_vm6, %v10690_v32  ;;  %v16984_v40 = vld [vmem:[#allocation41_spill] sm:$0xff] }
0x3475   : > { %13300 = vmatmul.mubr.msk.f32.vlgmr.msra.gmra.mrb[90].mxu0 %vm1785_vm6, %v10691_v27 }
0x3476   : > { %13302 = vmatprep.mubr.msk.f32.mxu0 %vm1785_vm6, %v10692_v15 }
0x3479   : > { %13303 = vmatmul.mubr.msk.f32.gmra.mrb[92].mxu0 %vm1785_vm6, %v10693_v52 }
0x347a   : > { %13313 = vmatprep.mubr.msk.f32.mxu0 %vm1785_vm6, %v10690_v32 }
0x3540   : > { %v13287_v33 = vpop.f32.mrb[86].mxu0 }
0x3541   : > { %v10669_v9 = vadd.f32 %v13287_v33, %v16261_v46  ;;  %v10663_v1 = vpop.f32.mrb[87].mxu0 }
0x3542   : > { %v10664_v28 = vadd.f32 %v10663_v1, %v16257_v49 }
0x3543   : > { %v10687_v36 = vadd.f32 %v10669_v9, %v16984_v40 }
0x3544   : > { %v10686_v62 = vadd.f32 %v10664_v28, %v16985_v34  ;;  %v13290_v44 = vpop.f32.mrb[88].mxu0 }
0x3545   : > { %v10679_v12 = vadd.f32 %v13290_v44, %v16275_v38  ;;  %v10673_v26 = vpop.f32.mrb[89].mxu0 }
0x3546   : > { %v10674_v31 = vadd.f32 %v10673_v26, %v16267_v8  ;;  %v13618_v48 = vpack.c.bf16 %v10687_v36, %v10686_v62  ;;  %v10711_v8 = vpop.permute.xlu1 %10710 }
0x3547   : > { %v10689_v20 = vadd.f32 %v10679_v12, %v16986_v29 }
0x3548   : > { %v10688_v43 = vadd.f32 %v10674_v31, %v16987_v55  ;;  %v13301_v46 = vpop.f32.mrb[90].mxu0  ;;  %13619 = vmatprep.subr.bf16.mxu0 %v13618_v48 }
0x3549   : > { %v10796_v30 = vpop.f32.mrb[91].mxu0  ;;  %13621 = vmatpush3.bf16.msra.mxu0 %v13618_v48  ;;  %v10802_v38 = vadd.f32 %v13301_v46, %v10706_v16 }
0x354a   : > { %v10797_v49 = vadd.f32 %v10796_v30, %v10701_v56  ;;  %v13622_v6 = vpack.c.bf16 %v10689_v20, %v10688_v43 }
0x354c   : > { %v13304_v54 = vpop.f32.mrb[92].mxu0  ;;  %13623 = vmatprep.subr.bf16.mxu0 %v13622_v6  ;;  %10900 = vxpose.xlu1.b32.start [1/4] (short) (narrow) %v10797_v49, 16 }
0x354d   : > { %v10806_v53 = vpop.f32.mrb[93].mxu0  ;;  %13625 = vmatpush3.bf16.msra.mxu0 %v13622_v6  ;;  %v10812_v2 = vadd.f32 %v13304_v54, %v10716_v41 }
0x354e   : > { %v10807_v42 = vadd.f32 %v10806_v53, %v10711_v8 }
0x3550   : > { %13314 = vmatmul.mubr.msk.f32.vlgmr.msra.gmra.mrb[94].mxu0 %vm1785_vm6, %v10691_v27  ;;  %10901 = vxpose.xlu1.b32.cont [2/4] (short) (narrow) %v10802_v38, 16 }
0x3551   : > { %13316 = vmatprep.mubr.msk.f32.mxu0 %vm1785_vm6, %v10692_v15 }
0x3554   : > { %13317 = vmatmul.mubr.msk.f32.gmra.mrb[96].mxu0 %vm1785_vm6, %v10693_v52  ;;  %10902 = vxpose.xlu1.b32.cont [3/4] (short) (narrow) %v10807_v42, 16 }
0x3558   : > { %10903 = vxpose.xlu1.b32.end [4/4] (short) (narrow) %v10812_v2, 16 }
0x35cc   : > { %v10916_v47 = vpop.trf.xlu1 }
0x35cd   : > { %13327 = vmatprep.mubr.msk.f32.mxu1 %vm1785_vm6, %v10916_v47 }
0x35d0   : > { %v10917_v37 = vpop.trf.xlu1 }
0x3623   : > { %v13315_v58 = vpop.f32.mrb[94].mxu0 }
0x3624   : > { %v10887_v23 = vadd.f32 %v13315_v58, %v10706_v16  ;;  %v10881_v45 = vpop.f32.mrb[95].mxu0 }
0x3625   : > { %v10882_v57 = vadd.f32 %v10881_v45, %v10701_v56 }
0x3627   : > { %v13626_v35 = vpack.c.bf16 %v10887_v23, %v10882_v57  ;;  %v13318_v7 = vpop.f32.mrb[96].mxu0 }
0x3628   : > { %v10897_v21 = vadd.f32 %v13318_v7, %v10716_v41  ;;  %v10891_v13 = vpop.f32.mrb[97].mxu0 }
0x3629   : > { %v10892_v59 = vadd.f32 %v10891_v13, %v10711_v8  ;;  %13627 = vmatprep.subr.bf16.mxu1 %v13626_v35 }
0x362a   : > { %13629 = vmatpush3.bf16.msra.mxu1 %v13626_v35  ;;  %v14136_v35 = vmov -0.8109302  }
0x362b   : > { %v13630_v5 = vpack.c.bf16 %v10897_v21, %v10892_v59  ;;  %v16430_v7 = vsel %vm4834_vm9, -2.8903718, %v14136_v35 }
0x362d   : > { %13631 = vmatprep.subr.bf16.mxu1 %v13630_v5 }
0x362e   : > { %13633 = vmatpush3.bf16.msra.mxu1 %v13630_v5 }
0x3631   : > { %13328 = vmatmul.mubr.msk.f32.vlgmr.msra.gmra.mrb[106].mxu1 %vm1785_vm6, %v10917_v37 }
0x3704   : > { %v13329_v17 = vpop.f32.mrb[106].mxu1 }
0x3705   : > { %v11004_v24 = vpop.f32.mrb[107].mxu1 }
0x3706   : > { %v11013_v4 = vmul.f32 0.17677669, %v11004_v24 }
0x3708   : > { %v16409_v18 = vsel %vm4834_vm9, %v11013_v4, %v11022_v61 }
0x3709   : > { %v11031_v22 = vsel %vm1970_vm7, %v16409_v18, -inf }
0x370a   : > { %11032 = vmax.xlane.f32.xlu0 %v11031_v22 }
0x370e   : > { %11035 = vmax.xlane.f32.xlu0 %v11034_v11 }
0x3797   : > { %v11033_v39 = vpop.xlane.xlu0 %11032 }
0x3798   : > { %v11037_v60 = vsub.f32 %v16409_v18, %v11033_v39 }
0x379a   : > { %v11039_v14 = vmul.f32 1.442695, %v11037_v60 }
0x379b   : > { %v11036_v25 = vpop.xlane.xlu0 %11035 }
0x379c   : > { %13932 = vpow2.f32 %v11039_v14  ;;  %v11038_v0 = vsub.f32 %v16412_v10, %v11036_v25 }
0x379e   : > { %v11041_v50 = vmul.f32 1.442695, %v11038_v0 }
0x37a0   : > { %13934 = vpow2.f32 %v11041_v50 }
0x37a6   : > { %v13933_v3 = vpop.eup %13932 }
0x37a7   : > { %v11043_v51 = vsel %vm1970_vm7, %v13933_v3, 0.0 }
0x37a8   : > { %11044 = vadd.xlane.f32.xlu1 %v11043_v51 }
0x37aa   : > { %v13935_v63 = vpop.eup %13934 }
0x37ab   : > { %v11046_v32 = vsel %vm6902_vm0, %v13935_v63, 0.0 }
0x37ac   : > { %11047 = vadd.xlane.f32.xlu0 %v11046_v32 }
0x3835   : > { %v11045_v27 = vpop.xlane.xlu1 %11044 }
0x3836   : > { %13936 = vlog2.f32 %v11045_v27 }
0x3839   : > { %v11048_v15 = vpop.xlane.xlu0 %11047 }
0x383a   : > { %13938 = vlog2.f32 %v11048_v15 }
0x3840   : > { %v13937_v52 = vpop.eup %13936 }
0x3841   : > { %v11050_v33 = vmul.f32 0.6931472, %v13937_v52 }
0x3843   : > { %v11053_v9 = vadd.f32 %v11050_v33, %v11033_v39 }
0x3844   : > { %v13939_v1 = vpop.eup %13938 }
0x3845   : > { %v11055_v28 = vsub.f32 -2.8903718, %v11053_v9  ;;  %v11052_v40 = vmul.f32 0.6931472, %v13939_v1 }
0x3847   : > { %v11054_v36 = vadd.f32 %v11052_v40, %v11036_v25  ;;  %v11057_v34 = vadd.f32 %v11055_v28, %v16409_v18 }
0x3849   : > { %v11056_v62 = vsub.f32 -0.5877867, %v11054_v36  ;;  %v11059_v56 = vsel %vm1970_vm7, %v11057_v34, -inf }
0x384b   : > { %v11058_v44 = vadd.f32 %v11056_v62, %v16412_v10 }
0x384d   : > { %v11060_v12 = vsel %vm6902_vm0, %v11058_v44, -inf }
0x384e   : > { %v11061_v26 = vmax.f32 %v11059_v56, %v11060_v12 }
0x3850   : > { %v11062_v31 = vrot.slane %v11061_v26, 4 }
0x3852   : > { %v11063_v48 = vmax.f32 %v11061_v26, %v11062_v31 }
0x3854   : > { %v11064_v29 = vrot.slane %v11063_v48, 2 }
0x3856   : > { %v11065_v20 = vmax.f32 %v11063_v48, %v11064_v29 }
0x3858   : > { %v11066_v55 = vrot.slane %v11065_v20, 1 }
0x385a   : > { %v11067_v43 = vmax.f32 %v11065_v20, %v11066_v55 }
0x385c   : > { %v11068_v46 = vsub.f32 %v11057_v34, %v11067_v43  ;;  %v11069_v30 = vsub.f32 %v11058_v44, %v11067_v43 }
0x385e   : > { %v11070_v49 = vmul.f32 1.442695, %v11068_v46  ;;  %v11072_v6 = vmul.f32 1.442695, %v11069_v30 }
0x3860   : > { %13940 = vpow2.f32 %v11070_v49 }
0x3861   : > { %13942 = vpow2.f32 %v11072_v6 }
0x386a   : > { %v13941_v16 = vpop.eup %13940 }
0x386b   : > { %v13943_v54 = vpop.eup %13942  ;;  %v11074_v53 = vsel %vm1970_vm7, %v13941_v16, 0.0 }
0x386c   : > { %v11075_v38 = vsel %vm6902_vm0, %v13943_v54, 0.0 }
0x386d   : > { %v11076_v8 = vadd.f32 %v11075_v38, %v11074_v53 }
0x386f   : > { %v11077_v42 = vrot.slane %v11076_v8, 4 }
0x3871   : > { %v11078_v41 = vadd.f32 %v11077_v42, %v11076_v8 }
0x3873   : > { %v11079_v2 = vrot.slane %v11078_v41, 2 }
0x3875   : > { %v11080_v47 = vadd.f32 %v11079_v2, %v11078_v41 }
0x3877   : > { %v11081_v58 = vrot.slane %v11080_v47, 1 }
0x3879   : > { %v11082_v23 = vadd.f32 %v11081_v58, %v11080_v47 }
0x387b   : > { %13944 = vlog2.f32 %v11082_v23 }
0x3885   : > { %v13945_v45 = vpop.eup %13944 }
0x3886   : > { %v11084_v57 = vmul.f32 0.6931472, %v13945_v45 }
0x3888   : > { %v11085_v21 = vadd.f32 %v11084_v57, %v11067_v43 }
0x388a   : > { %v11086_v13 = vsub.f32 %v16430_v7, %v11085_v21 }
0x388c   : > { %v11087_v59 = vadd.f32 %v11086_v13, %v16409_v18  ;;  %v11088_v37 = vadd.f32 %v11086_v13, %v16412_v10 }
0x388e   : > { %v11089_v5 = vsel %vm1970_vm7, %v11087_v59, -inf  ;;  %v11092_v17 = vsel %vm6902_vm0, %v11088_v37, -inf }
0x388f   : > { %11090 = vmax.xlane.f32.xlu0 %v11089_v5 }
0x3893   : > { %11093 = vmax.xlane.f32.xlu0 %v11092_v17 }
0x391c   : > { %v11091_v24 = vpop.xlane.xlu0 %11090 }
0x391d   : > { %v11095_v61 = vsub.f32 %v11087_v59, %v11091_v24 }
0x391f   : > { %v11097_v4 = vmul.f32 1.442695, %v11095_v61 }
0x3920   : > { %v11094_v22 = vpop.xlane.xlu0 %11093 }
0x3921   : > { %13946 = vpow2.f32 %v11097_v4  ;;  %v11096_v19 = vsub.f32 %v11088_v37, %v11094_v22 }
0x3923   : > { %v11099_v11 = vmul.f32 1.442695, %v11096_v19 }
0x3925   : > { %13948 = vpow2.f32 %v11099_v11 }
0x392b   : > { %v13947_v39 = vpop.eup %13946 }
0x392c   : > { %v11101_v60 = vsel %vm1970_vm7, %v13947_v39, 0.0 }
0x392d   : > { %11102 = vadd.xlane.f32.xlu0 %v11101_v60 }
0x392f   : > { %v13949_v14 = vpop.eup %13948 }
0x3930   : > { %v11104_v25 = vsel %vm6902_vm0, %v13949_v14, 0.0 }
0x3931   : > { %11105 = vadd.xlane.f32.xlu0 %v11104_v25 }
0x39ba   : > { %v11103_v0 = vpop.xlane.xlu0 %11102 }
0x39bb   : > { %13950 = vlog2.f32 %v11103_v0 }
0x39be   : > { %v11106_v50 = vpop.xlane.xlu0 %11105 }
0x39bf   : > { %13952 = vlog2.f32 %v11106_v50 }
0x39c5   : > { %v13951_v3 = vpop.eup %13950 }
0x39c6   : > { %v11108_v51 = vmul.f32 0.6931472, %v13951_v3 }
0x39c8   : > { %v11111_v63 = vadd.f32 %v11108_v51, %v11091_v24 }
0x39c9   : > { %v13953_v32 = vpop.eup %13952 }
0x39ca   : > { %v11113_v27 = vsub.f32 -2.8903718, %v11111_v63  ;;  %v11110_v15 = vmul.f32 0.6931472, %v13953_v32 }
0x39cc   : > { %v11112_v52 = vadd.f32 %v11110_v15, %v11094_v22  ;;  %v11115_v33 = vadd.f32 %v11113_v27, %v16409_v18 }
0x39ce   : > { %v11114_v9 = vsub.f32 -0.5877867, %v11112_v52  ;;  %v11117_v28 = vsel %vm1970_vm7, %v11115_v33, -inf }
0x39d0   : > { %v11116_v1 = vadd.f32 %v11114_v9, %v16412_v10 }
0x39d2   : > { %v11118_v40 = vsel %vm6902_vm0, %v11116_v1, -inf }
0x39d3   : > { %v11119_v36 = vmax.f32 %v11117_v28, %v11118_v40 }
0x39d5   : > { %v11120_v34 = vrot.slane %v11119_v36, 4 }
0x39d7   : > { %v11121_v62 = vmax.f32 %v11119_v36, %v11120_v34 }
0x39d9   : > { %v11122_v44 = vrot.slane %v11121_v62, 2 }
0x39db   : > { %v11123_v56 = vmax.f32 %v11121_v62, %v11122_v44 }
0x39dd   : > { %v11124_v12 = vrot.slane %v11123_v56, 1 }
0x39df   : > { %v11125_v26 = vmax.f32 %v11123_v56, %v11124_v12 }
0x39e1   : > { %v11126_v31 = vsub.f32 %v11115_v33, %v11125_v26  ;;  %v11127_v48 = vsub.f32 %v11116_v1, %v11125_v26 }
0x39e3   : > { %v11128_v29 = vmul.f32 1.442695, %v11126_v31  ;;  %v11130_v20 = vmul.f32 1.442695, %v11127_v48 }
0x39e5   : > { %13954 = vpow2.f32 %v11128_v29 }
0x39e6   : > { %13956 = vpow2.f32 %v11130_v20 }
0x39ef   : > { %v13955_v55 = vpop.eup %13954 }
0x39f0   : > { %v13957_v43 = vpop.eup %13956  ;;  %v11132_v46 = vsel %vm1970_vm7, %v13955_v55, 0.0 }
0x39f1   : > { %v11133_v30 = vsel %vm6902_vm0, %v13957_v43, 0.0 }
0x39f2   : > { %v11134_v49 = vadd.f32 %v11133_v30, %v11132_v46 }
0x39f4   : > { %v11135_v6 = vrot.slane %v11134_v49, 4 }
0x39f6   : > { %v11136_v16 = vadd.f32 %v11135_v6, %v11134_v49 }
0x39f8   : > { %v11137_v54 = vrot.slane %v11136_v16, 2 }
0x39fa   : > { %v11138_v53 = vadd.f32 %v11137_v54, %v11136_v16 }
0x39fc   : > { %v11139_v38 = vrot.slane %v11138_v53, 1 }
0x39fe   : > { %v11140_v8 = vadd.f32 %v11139_v38, %v11138_v53 }
0x3a00   : > { %13958 = vlog2.f32 %v11140_v8 }
0x3a0a   : > { %v13959_v42 = vpop.eup %13958 }
0x3a0b   : > { %v11142_v41 = vmul.f32 0.6931472, %v13959_v42 }
0x3a0d   : > { %v11143_v2 = vadd.f32 %v11142_v41, %v11125_v26 }
0x3a0f   : > { %v11144_v47 = vsub.f32 %v16430_v7, %v11143_v2 }
0x3a11   : > { %v11145_v58 = vadd.f32 %v11144_v47, %v16409_v18  ;;  %v11146_v45 = vadd.f32 %v11144_v47, %v16412_v10 }
0x3a13   : > { %v11147_v23 = vsel %vm1970_vm7, %v11145_v58, -inf  ;;  %v11150_v57 = vsel %vm6902_vm0, %v11146_v45, -inf }
0x3a14   : > { %11148 = vmax.xlane.f32.xlu0 %v11147_v23 }
0x3a18   : > { %11151 = vmax.xlane.f32.xlu0 %v11150_v57 }
0x3aa1   : > { %v11149_v35 = vpop.xlane.xlu0 %11148 }
0x3aa2   : > { %v11153_v21 = vsub.f32 %v11145_v58, %v11149_v35 }
0x3aa4   : > { %v11155_v13 = vmul.f32 1.442695, %v11153_v21 }
0x3aa5   : > { %v11152_v59 = vpop.xlane.xlu0 %11151 }
0x3aa6   : > { %13960 = vpow2.f32 %v11155_v13  ;;  %v11154_v5 = vsub.f32 %v11146_v45, %v11152_v59 }
0x3aa8   : > { %v11157_v37 = vmul.f32 1.442695, %v11154_v5 }
0x3aaa   : > { %13962 = vpow2.f32 %v11157_v37 }
0x3ab0   : > { %v13961_v17 = vpop.eup %13960 }
0x3ab1   : > { %v11159_v24 = vsel %vm1970_vm7, %v13961_v17, 0.0 }
0x3ab2   : > { %11160 = vadd.xlane.f32.xlu0 %v11159_v24 }
0x3ab4   : > { %v13963_v61 = vpop.eup %13962 }
0x3ab5   : > { %v11162_v4 = vsel %vm6902_vm0, %v13963_v61, 0.0 }
0x3ab6   : > { %11163 = vadd.xlane.f32.xlu0 %v11162_v4 }
0x3b3f   : > { %v11161_v22 = vpop.xlane.xlu0 %11160 }
0x3b40   : > { %13964 = vlog2.f32 %v11161_v22 }
0x3b43   : > { %v11164_v19 = vpop.xlane.xlu0 %11163 }
0x3b44   : > { %13966 = vlog2.f32 %v11164_v19 }
0x3b4a   : > { %v13965_v11 = vpop.eup %13964 }
0x3b4b   : > { %v11166_v39 = vmul.f32 0.6931472, %v13965_v11 }
0x3b4d   : > { %v11169_v60 = vadd.f32 %v11166_v39, %v11149_v35 }
0x3b4e   : > { %v13967_v14 = vpop.eup %13966 }
0x3b4f   : > { %v11171_v25 = vsub.f32 -2.8903718, %v11169_v60  ;;  %v11168_v0 = vmul.f32 0.6931472, %v13967_v14 }
0x3b51   : > { %v11170_v50 = vadd.f32 %v11168_v0, %v11152_v59  ;;  %v11173_v3 = vadd.f32 %v11171_v25, %v16409_v18 }
0x3b53   : > { %v11172_v51 = vsub.f32 -0.5877867, %v11170_v50  ;;  %v11175_v32 = vsel %vm1970_vm7, %v11173_v3, -inf }
0x3b55   : > { %v11174_v63 = vadd.f32 %v11172_v51, %v16412_v10 }
0x3b57   : > { %v11176_v27 = vsel %vm6902_vm0, %v11174_v63, -inf }
0x3b58   : > { %v11177_v15 = vmax.f32 %v11175_v32, %v11176_v27 }
0x3b5a   : > { %v11178_v52 = vrot.slane %v11177_v15, 4 }
0x3b5c   : > { %v11179_v33 = vmax.f32 %v11177_v15, %v11178_v52 }
0x3b5e   : > { %v11180_v9 = vrot.slane %v11179_v33, 2 }
0x3b60   : > { %v11181_v1 = vmax.f32 %v11179_v33, %v11180_v9 }
0x3b62   : > { %v11182_v28 = vrot.slane %v11181_v1, 1 }
0x3b64   : > { %v11183_v40 = vmax.f32 %v11181_v1, %v11182_v28 }
0x3b66   : > { %v11184_v36 = vsub.f32 %v11173_v3, %v11183_v40  ;;  %v11185_v34 = vsub.f32 %v11174_v63, %v11183_v40 }
0x3b68   : > { %v11186_v62 = vmul.f32 1.442695, %v11184_v36  ;;  %v11188_v44 = vmul.f32 1.442695, %v11185_v34 }
0x3b6a   : > { %13968 = vpow2.f32 %v11186_v62 }
0x3b6b   : > { %13970 = vpow2.f32 %v11188_v44 }
0x3b74   : > { %v13969_v56 = vpop.eup %13968 }
0x3b75   : > { %v13971_v12 = vpop.eup %13970  ;;  %v11190_v26 = vsel %vm1970_vm7, %v13969_v56, 0.0 }
0x3b76   : > { %v11191_v31 = vsel %vm6902_vm0, %v13971_v12, 0.0 }
0x3b77   : > { %v11192_v48 = vadd.f32 %v11191_v31, %v11190_v26 }
0x3b79   : > { %v11193_v29 = vrot.slane %v11192_v48, 4 }
0x3b7b   : > { %v11194_v20 = vadd.f32 %v11193_v29, %v11192_v48 }
0x3b7d   : > { %v11195_v55 = vrot.slane %v11194_v20, 2 }
0x3b7f   : > { %v11196_v43 = vadd.f32 %v11195_v55, %v11194_v20 }
0x3b81   : > { %v11197_v46 = vrot.slane %v11196_v43, 1 }
0x3b83   : > { %v11198_v30 = vadd.f32 %v11197_v46, %v11196_v43 }
0x3b85   : > { %13972 = vlog2.f32 %v11198_v30 }
0x3b8f   : > { %v13973_v49 = vpop.eup %13972 }
0x3b90   : > { %v11200_v6 = vmul.f32 0.6931472, %v13973_v49 }
0x3b92   : > { %v11201_v16 = vadd.f32 %v11200_v6, %v11183_v40 }
0x3b94   : > { %v11202_v54 = vsub.f32 %v16430_v7, %v11201_v16 }
0x3b96   : > { %v11204_v53 = vadd.f32 %v11202_v54, %v16412_v10  ;;  %v11203_v38 = vadd.f32 %v11202_v54, %v16409_v18 }
0x3b98   : > { %v11208_v8 = vsel %vm6902_vm0, %v11204_v53, -inf  ;;  %v11205_v42 = vsel %vm1970_vm7, %v11203_v38, -inf }
0x3b99   : > { %11209 = vmax.xlane.f32.xlu1 %v11208_v8  ;;  %11206 = vmax.xlane.f32.xlu0 %v11205_v42 }
0x3c26   : > { %v11210_v41 = vpop.xlane.xlu1 %11209  ;;  %v11207_v2 = vpop.xlane.xlu0 %11206 }
0x3c27   : > { %v11212_v47 = vsub.f32 %v11204_v53, %v11210_v41  ;;  %v11211_v58 = vsub.f32 %v11203_v38, %v11207_v2 }
0x3c29   : > { %v11215_v23 = vmul.f32 1.442695, %v11212_v47  ;;  %v11213_v45 = vmul.f32 1.442695, %v11211_v58 }
0x3c2b   : > { %13974 = vpow2.f32 %v11215_v23 }
0x3c2c   : > { %13976 = vpow2.f32 %v11213_v45 }
0x3c35   : > { %v13975_v57 = vpop.eup %13974 }
0x3c36   : > { %v13977_v35 = vpop.eup %13976  ;;  %v11220_v21 = vsel %vm6902_vm0, %v13975_v57, 0.0 }
0x3c37   : > { %11221 = vadd.xlane.f32.xlu1 %v11220_v21  ;;  %v11217_v13 = vsel %vm1970_vm7, %v13977_v35, 0.0 }
0x3c38   : > { %11218 = vadd.xlane.f32.xlu0 %v11217_v13 }
0x3cc4   : > { %v11222_v59 = vpop.xlane.xlu1 %11221 }
0x3cc5   : > { %13978 = vlog2.f32 %v11222_v59  ;;  %v11219_v5 = vpop.xlane.xlu0 %11218 }
0x3cc6   : > { %13980 = vlog2.f32 %v11219_v5 }
0x3ccf   : > { %v13979_v37 = vpop.eup %13978 }
0x3cd0   : > { %v13981_v17 = vpop.eup %13980  ;;  %v11226_v24 = vmul.f32 0.6931472, %v13979_v37 }
0x3cd1   : > { %v11224_v61 = vmul.f32 0.6931472, %v13981_v17 }
0x3cd2   : > { %v11228_v4 = vadd.f32 %v11226_v24, %v11210_v41 }
0x3cd3   : > { %v11227_v22 = vadd.f32 %v11224_v61, %v11207_v2 }
0x3cd4   : > { %v11230_v19 = vsub.f32 -0.5877867, %v11228_v4 }
0x3cd5   : > { %v11229_v11 = vsub.f32 -2.8903718, %v11227_v22 }
0x3cd6   : > { %v11232_v39 = vadd.f32 %v11230_v19, %v16412_v10 }
0x3cd7   : > { %v11231_v60 = vadd.f32 %v11229_v11, %v16409_v18 }
0x3cd8   : > { %v11234_v14 = vsel %vm6902_vm0, %v11232_v39, -inf }
0x3cd9   : > { %v11233_v25 = vsel %vm1970_vm7, %v11231_v60, -inf }
0x3cda   : > { %v11235_v0 = vmax.f32 %v11233_v25, %v11234_v14 }
0x3cdc   : > { %v11236_v50 = vrot.slane %v11235_v0, 4 }
0x3cde   : > { %v11237_v3 = vmax.f32 %v11235_v0, %v11236_v50 }
0x3ce0   : > { %v11238_v51 = vrot.slane %v11237_v3, 2 }
0x3ce2   : > { %v11239_v63 = vmax.f32 %v11237_v3, %v11238_v51 }
0x3ce4   : > { %v11240_v32 = vrot.slane %v11239_v63, 1 }
0x3ce6   : > { %v11241_v27 = vmax.f32 %v11239_v63, %v11240_v32 }
0x3ce8   : > { %v11242_v15 = vsub.f32 %v11231_v60, %v11241_v27  ;;  %v11243_v52 = vsub.f32 %v11232_v39, %v11241_v27 }
0x3cea   : > { %v11244_v33 = vmul.f32 1.442695, %v11242_v15  ;;  %v11246_v9 = vmul.f32 1.442695, %v11243_v52 }
0x3cec   : > { %13982 = vpow2.f32 %v11244_v33 }
0x3ced   : > { %13984 = vpow2.f32 %v11246_v9 }
0x3cf6   : > { %v13983_v1 = vpop.eup %13982 }
0x3cf7   : > { %v13985_v28 = vpop.eup %13984  ;;  %v11248_v40 = vsel %vm1970_vm7, %v13983_v1, 0.0 }
0x3cf8   : > { %v11249_v36 = vsel %vm6902_vm0, %v13985_v28, 0.0 }
0x3cf9   : > { %v11250_v34 = vadd.f32 %v11249_v36, %v11248_v40 }
0x3cfb   : > { %v11251_v62 = vrot.slane %v11250_v34, 4 }
0x3cfd   : > { %v11252_v44 = vadd.f32 %v11251_v62, %v11250_v34 }
0x3cff   : > { %v11253_v56 = vrot.slane %v11252_v44, 2 }
0x3d01   : > { %v11254_v12 = vadd.f32 %v11253_v56, %v11252_v44 }
0x3d03   : > { %v11255_v26 = vrot.slane %v11254_v12, 1 }
0x3d05   : > { %v11256_v31 = vadd.f32 %v11255_v26, %v11254_v12 }
0x3d07   : > { %13986 = vlog2.f32 %v11256_v31 }
0x3d11   : > { %v13987_v48 = vpop.eup %13986 }
0x3d12   : > { %v11258_v29 = vmul.f32 0.6931472, %v13987_v48 }
0x3d14   : > { %v11259_v20 = vadd.f32 %v11258_v29, %v11241_v27 }
0x3d16   : > { %v11260_v55 = vsub.f32 %v16430_v7, %v11259_v20 }
0x3d18   : > { %v11262_v43 = vadd.f32 %v11260_v55, %v16412_v10  ;;  %v11261_v46 = vadd.f32 %v11260_v55, %v16409_v18 }
0x3d1a   : > { %v11266_v30 = vsel %vm6902_vm0, %v11262_v43, -inf  ;;  %v11263_v49 = vsel %vm1970_vm7, %v11261_v46, -inf }
0x3d1b   : > { %11267 = vmax.xlane.f32.xlu1 %v11266_v30  ;;  %11264 = vmax.xlane.f32.xlu0 %v11263_v49 }
0x3da8   : > { %v11268_v6 = vpop.xlane.xlu1 %11267  ;;  %v11265_v16 = vpop.xlane.xlu0 %11264 }
0x3da9   : > { %v11270_v54 = vsub.f32 %v11262_v43, %v11268_v6  ;;  %v11269_v53 = vsub.f32 %v11261_v46, %v11265_v16 }
0x3dab   : > { %v11273_v38 = vmul.f32 1.442695, %v11270_v54  ;;  %v11271_v8 = vmul.f32 1.442695, %v11269_v53 }
0x3dad   : > { %13988 = vpow2.f32 %v11273_v38 }
0x3dae   : > { %13990 = vpow2.f32 %v11271_v8 }
0x3db7   : > { %v13989_v42 = vpop.eup %13988 }
0x3db8   : > { %v13991_v41 = vpop.eup %13990  ;;  %v11278_v2 = vsel %vm6902_vm0, %v13989_v42, 0.0 }
0x3db9   : > { %11279 = vadd.xlane.f32.xlu1 %v11278_v2  ;;  %v11275_v47 = vsel %vm1970_vm7, %v13991_v41, 0.0 }
0x3dba   : > { %11276 = vadd.xlane.f32.xlu0 %v11275_v47 }
0x3e46   : > { %v11280_v58 = vpop.xlane.xlu1 %11279 }
0x3e47   : > { %13992 = vlog2.f32 %v11280_v58  ;;  %v11277_v23 = vpop.xlane.xlu0 %11276 }
0x3e48   : > { %13994 = vlog2.f32 %v11277_v23 }
0x3e51   : > { %v13993_v45 = vpop.eup %13992 }
0x3e52   : > { %v13995_v57 = vpop.eup %13994  ;;  %v11284_v35 = vmul.f32 0.6931472, %v13993_v45 }
0x3e53   : > { %v11282_v21 = vmul.f32 0.6931472, %v13995_v57 }
0x3e54   : > { %v11286_v13 = vadd.f32 %v11284_v35, %v11268_v6 }
0x3e55   : > { %v11285_v59 = vadd.f32 %v11282_v21, %v11265_v16 }
0x3e56   : > { %v11288_v5 = vsub.f32 -0.5877867, %v11286_v13 }
0x3e57   : > { %v11287_v37 = vsub.f32 -2.8903718, %v11285_v59 }
0x3e58   : > { %v11290_v17 = vadd.f32 %v11288_v5, %v16412_v10 }
0x3e59   : > { %v11289_v24 = vadd.f32 %v11287_v37, %v16409_v18 }
0x3e5a   : > { %v11292_v61 = vsel %vm6902_vm0, %v11290_v17, -inf }
0x3e5b   : > { %v11291_v4 = vsel %vm1970_vm7, %v11289_v24, -inf }
0x3e5c   : > { %v11293_v22 = vmax.f32 %v11291_v4, %v11292_v61 }
0x3e5e   : > { %v11294_v19 = vrot.slane %v11293_v22, 4 }
0x3e60   : > { %v11295_v11 = vmax.f32 %v11293_v22, %v11294_v19 }
0x3e62   : > { %v11296_v39 = vrot.slane %v11295_v11, 2 }
0x3e64   : > { %v11297_v60 = vmax.f32 %v11295_v11, %v11296_v39 }
0x3e66   : > { %v11298_v14 = vrot.slane %v11297_v60, 1 }
0x3e68   : > { %v11299_v25 = vmax.f32 %v11297_v60, %v11298_v14 }
0x3e6a   : > { %v11300_v0 = vsub.f32 %v11289_v24, %v11299_v25  ;;  %v11301_v50 = vsub.f32 %v11290_v17, %v11299_v25 }
0x3e6c   : > { %v11302_v3 = vmul.f32 1.442695, %v11300_v0  ;;  %v11304_v51 = vmul.f32 1.442695, %v11301_v50 }
0x3e6e   : > { %13996 = vpow2.f32 %v11302_v3 }
0x3e6f   : > { %13998 = vpow2.f32 %v11304_v51 }
0x3e78   : > { %v13997_v63 = vpop.eup %13996 }
0x3e79   : > { %v13999_v32 = vpop.eup %13998  ;;  %v11306_v27 = vsel %vm1970_vm7, %v13997_v63, 0.0 }
0x3e7a   : > { %v11307_v15 = vsel %vm6902_vm0, %v13999_v32, 0.0 }
0x3e7b   : > { %v11308_v52 = vadd.f32 %v11307_v15, %v11306_v27 }
0x3e7d   : > { %v11309_v33 = vrot.slane %v11308_v52, 4 }
0x3e7f   : > { %v11310_v9 = vadd.f32 %v11309_v33, %v11308_v52 }
0x3e81   : > { %v11311_v1 = vrot.slane %v11310_v9, 2 }
0x3e83   : > { %v11312_v28 = vadd.f32 %v11311_v1, %v11310_v9 }
0x3e85   : > { %v11313_v40 = vrot.slane %v11312_v28, 1 }
0x3e87   : > { %v11314_v36 = vadd.f32 %v11313_v40, %v11312_v28 }
0x3e89   : > { %14000 = vlog2.f32 %v11314_v36 }
0x3e93   : > { %v14001_v34 = vpop.eup %14000 }
0x3e94   : > { %v11316_v62 = vmul.f32 0.6931472, %v14001_v34 }
0x3e96   : > { %v11317_v44 = vadd.f32 %v11316_v62, %v11299_v25 }
0x3e98   : > { %v11318_v56 = vsub.f32 %v16430_v7, %v11317_v44 }
0x3e9a   : > { %v11320_v12 = vadd.f32 %v11318_v56, %v16412_v10  ;;  %v11319_v26 = vadd.f32 %v11318_v56, %v16409_v18 }
0x3e9c   : > { %v11324_v31 = vsel %vm6902_vm0, %v11320_v12, -inf  ;;  %v11321_v48 = vsel %vm1970_vm7, %v11319_v26, -inf }
0x3e9d   : > { %11325 = vmax.xlane.f32.xlu1 %v11324_v31  ;;  %11322 = vmax.xlane.f32.xlu0 %v11321_v48 }
0x3f2a   : > { %v11326_v29 = vpop.xlane.xlu1 %11325  ;;  %v11323_v20 = vpop.xlane.xlu0 %11322 }
0x3f2b   : > { %v11328_v55 = vsub.f32 %v11320_v12, %v11326_v29  ;;  %v11327_v43 = vsub.f32 %v11319_v26, %v11323_v20 }
0x3f2d   : > { %v11331_v46 = vmul.f32 1.442695, %v11328_v55  ;;  %v11329_v30 = vmul.f32 1.442695, %v11327_v43 }
0x3f2f   : > { %14002 = vpow2.f32 %v11331_v46 }
0x3f30   : > { %14004 = vpow2.f32 %v11329_v30 }
0x3f39   : > { %v14003_v49 = vpop.eup %14002 }
0x3f3a   : > { %v14005_v6 = vpop.eup %14004  ;;  %v11336_v16 = vsel %vm6902_vm0, %v14003_v49, 0.0 }
0x3f3b   : > { %11337 = vadd.xlane.f32.xlu1 %v11336_v16  ;;  %v11333_v54 = vsel %vm1970_vm7, %v14005_v6, 0.0 }
0x3f3c   : > { %11334 = vadd.xlane.f32.xlu0 %v11333_v54 }
0x3fc8   : > { %v11338_v53 = vpop.xlane.xlu1 %11337 }
0x3fc9   : > { %14006 = vlog2.f32 %v11338_v53  ;;  %v11335_v38 = vpop.xlane.xlu0 %11334 }
0x3fca   : > { %14008 = vlog2.f32 %v11335_v38 }
0x3fd3   : > { %v14007_v8 = vpop.eup %14006 }
0x3fd4   : > { %v14009_v42 = vpop.eup %14008  ;;  %v11342_v41 = vmul.f32 0.6931472, %v14007_v8 }
0x3fd5   : > { %v11340_v2 = vmul.f32 0.6931472, %v14009_v42 }
0x3fd6   : > { %v11344_v47 = vadd.f32 %v11342_v41, %v11326_v29 }
0x3fd7   : > { %v11343_v58 = vadd.f32 %v11340_v2, %v11323_v20 }
0x3fd8   : > { %v11346_v23 = vsub.f32 -0.5877867, %v11344_v47 }
0x3fd9   : > { %v11345_v45 = vsub.f32 -2.8903718, %v11343_v58 }
0x3fda   : > { %v11348_v57 = vadd.f32 %v11346_v23, %v16412_v10 }
0x3fdb   : > { %v11347_v35 = vadd.f32 %v11345_v45, %v16409_v18 }
0x3fdc   : > { %v11350_v21 = vsel %vm6902_vm0, %v11348_v57, -inf }
0x3fdd   : > { %v11349_v13 = vsel %vm1970_vm7, %v11347_v35, -inf }
0x3fde   : > { %v11351_v59 = vmax.f32 %v11349_v13, %v11350_v21 }
0x3fe0   : > { %v11352_v5 = vrot.slane %v11351_v59, 4 }
0x3fe2   : > { %v11353_v37 = vmax.f32 %v11351_v59, %v11352_v5 }
0x3fe4   : > { %v11354_v17 = vrot.slane %v11353_v37, 2 }
0x3fe6   : > { %v11355_v24 = vmax.f32 %v11353_v37, %v11354_v17 }
0x3fe8   : > { %v11356_v61 = vrot.slane %v11355_v24, 1 }
0x3fea   : > { %v11357_v4 = vmax.f32 %v11355_v24, %v11356_v61 }
0x3fec   : > { %v11358_v22 = vsub.f32 %v11347_v35, %v11357_v4  ;;  %v11359_v19 = vsub.f32 %v11348_v57, %v11357_v4 }
0x3fee   : > { %v11360_v11 = vmul.f32 1.442695, %v11358_v22  ;;  %v11362_v39 = vmul.f32 1.442695, %v11359_v19 }
0x3ff0   : > { %14010 = vpow2.f32 %v11360_v11 }
0x3ff1   : > { %14012 = vpow2.f32 %v11362_v39 }
0x3ffa   : > { %v14011_v60 = vpop.eup %14010 }
0x3ffb   : > { %v14013_v14 = vpop.eup %14012  ;;  %v11364_v25 = vsel %vm1970_vm7, %v14011_v60, 0.0 }
0x3ffc   : > { %v11365_v0 = vsel %vm6902_vm0, %v14013_v14, 0.0 }
0x3ffd   : > { %v11366_v50 = vadd.f32 %v11365_v0, %v11364_v25 }
0x3fff   : > { %v11367_v3 = vrot.slane %v11366_v50, 4 }
0x4001   : > { %v11368_v51 = vadd.f32 %v11367_v3, %v11366_v50 }
0x4003   : > { %v11369_v63 = vrot.slane %v11368_v51, 2 }
0x4005   : > { %v11370_v32 = vadd.f32 %v11369_v63, %v11368_v51 }
0x4007   : > { %v11371_v27 = vrot.slane %v11370_v32, 1 }
0x4009   : > { %v11372_v15 = vadd.f32 %v11371_v27, %v11370_v32 }
0x400b   : > { %14014 = vlog2.f32 %v11372_v15 }
0x4015   : > { %v14015_v52 = vpop.eup %14014 }
0x4016   : > { %v11374_v33 = vmul.f32 0.6931472, %v14015_v52 }
0x4018   : > { %v11375_v9 = vadd.f32 %v11374_v33, %v11357_v4 }
0x401a   : > { %v11376_v1 = vsub.f32 %v16430_v7, %v11375_v9 }
0x401c   : > { %v11378_v28 = vadd.f32 %v11376_v1, %v16412_v10  ;;  %v11377_v40 = vadd.f32 %v11376_v1, %v16409_v18 }
0x401e   : > { %v11382_v36 = vsel %vm6902_vm0, %v11378_v28, -inf  ;;  %v11379_v34 = vsel %vm1970_vm7, %v11377_v40, -inf }
0x401f   : > { %11383 = vmax.xlane.f32.xlu1 %v11382_v36  ;;  %11380 = vmax.xlane.f32.xlu0 %v11379_v34 }
0x40ac   : > { %v11384_v62 = vpop.xlane.xlu1 %11383  ;;  %v11381_v44 = vpop.xlane.xlu0 %11380 }
0x40ad   : > { %v11386_v56 = vsub.f32 %v11378_v28, %v11384_v62  ;;  %v11385_v12 = vsub.f32 %v11377_v40, %v11381_v44 }
0x40af   : > { %v11389_v26 = vmul.f32 1.442695, %v11386_v56  ;;  %v11387_v31 = vmul.f32 1.442695, %v11385_v12 }
0x40b1   : > { %14016 = vpow2.f32 %v11389_v26 }
0x40b2   : > { %14018 = vpow2.f32 %v11387_v31 }
0x40bb   : > { %v14017_v48 = vpop.eup %14016 }
0x40bc   : > { %v14019_v29 = vpop.eup %14018  ;;  %v11394_v20 = vsel %vm6902_vm0, %v14017_v48, 0.0 }
0x40bd   : > { %11395 = vadd.xlane.f32.xlu1 %v11394_v20  ;;  %v11391_v55 = vsel %vm1970_vm7, %v14019_v29, 0.0 }
0x40be   : > { %11392 = vadd.xlane.f32.xlu0 %v11391_v55 }
0x414a   : > { %v11396_v43 = vpop.xlane.xlu1 %11395 }
0x414b   : > { %14020 = vlog2.f32 %v11396_v43  ;;  %v11393_v46 = vpop.xlane.xlu0 %11392 }
0x414c   : > { %14022 = vlog2.f32 %v11393_v46 }
0x4155   : > { %v14021_v30 = vpop.eup %14020 }
0x4156   : > { %v14023_v49 = vpop.eup %14022  ;;  %v11400_v6 = vmul.f32 0.6931472, %v14021_v30 }
0x4157   : > { %v11398_v16 = vmul.f32 0.6931472, %v14023_v49 }
0x4158   : > { %v11402_v54 = vadd.f32 %v11400_v6, %v11384_v62 }
0x4159   : > { %v11401_v53 = vadd.f32 %v11398_v16, %v11381_v44 }
0x415a   : > { %v11404_v38 = vsub.f32 -0.5877867, %v11402_v54 }
0x415b   : > { %v11403_v8 = vsub.f32 -2.8903718, %v11401_v53 }
0x415c   : > { %v11406_v42 = vadd.f32 %v11404_v38, %v16412_v10 }
0x415d   : > { %v11405_v41 = vadd.f32 %v11403_v8, %v16409_v18 }
0x415e   : > { %v11408_v2 = vsel %vm6902_vm0, %v11406_v42, -inf }
0x415f   : > { %v11407_v47 = vsel %vm1970_vm7, %v11405_v41, -inf }
0x4160   : > { %v11409_v58 = vmax.f32 %v11407_v47, %v11408_v2 }
0x4162   : > { %v11410_v23 = vrot.slane %v11409_v58, 4 }
0x4164   : > { %v11411_v45 = vmax.f32 %v11409_v58, %v11410_v23 }
0x4166   : > { %v11412_v57 = vrot.slane %v11411_v45, 2 }
0x4168   : > { %v11413_v35 = vmax.f32 %v11411_v45, %v11412_v57 }
0x416a   : > { %v11414_v21 = vrot.slane %v11413_v35, 1 }
0x416c   : > { %v11415_v13 = vmax.f32 %v11413_v35, %v11414_v21 }
0x416e   : > { %v11416_v59 = vsub.f32 %v11405_v41, %v11415_v13  ;;  %v11417_v5 = vsub.f32 %v11406_v42, %v11415_v13 }
0x4170   : > { %v11418_v37 = vmul.f32 1.442695, %v11416_v59  ;;  %v11420_v17 = vmul.f32 1.442695, %v11417_v5 }
0x4172   : > { %14024 = vpow2.f32 %v11418_v37 }
0x4173   : > { %14026 = vpow2.f32 %v11420_v17 }
0x417c   : > { %v14025_v24 = vpop.eup %14024 }
0x417d   : > { %v14027_v61 = vpop.eup %14026  ;;  %v11422_v4 = vsel %vm1970_vm7, %v14025_v24, 0.0 }
0x417e   : > { %v11423_v22 = vsel %vm6902_vm0, %v14027_v61, 0.0 }
0x417f   : > { %v11424_v19 = vadd.f32 %v11423_v22, %v11422_v4 }
0x4181   : > { %v11425_v11 = vrot.slane %v11424_v19, 4 }
0x4183   : > { %v11426_v39 = vadd.f32 %v11425_v11, %v11424_v19 }
0x4185   : > { %v11427_v60 = vrot.slane %v11426_v39, 2 }
0x4187   : > { %v11428_v14 = vadd.f32 %v11427_v60, %v11426_v39  ;;  %v16525_v60 = vld [vmem:[%s16988_s0 + $0x8] sm:$0x1]  ;;  %s12072_s0 = sshll.u32 %s16990_s23, 4 }
0x4188   : > { %s1348_s1 = scalar_lea.vmem %s14360_s21, %s12072_s0 }
0x4189   : > { %v11429_v25 = vrot.slane %v11428_v14, 1 }
0x418b   : > { %v11430_v0 = vadd.f32 %v11429_v25, %v11428_v14 }
0x418d   : > { %14028 = vlog2.f32 %v11430_v0 }
0x4197   : > { %v14029_v50 = vpop.eup %14028 }
0x4198   : > { %v11432_v3 = vmul.f32 0.6931472, %v14029_v50 }
0x419a   : > { %v11433_v51 = vadd.f32 %v11432_v3, %v11415_v13 }
0x419c   : > { %v11434_v63 = vsub.f32 %v16430_v7, %v11433_v51 }
0x419e   : > { %v11436_v32 = vadd.f32 %v11434_v63, %v16412_v10  ;;  %v11435_v27 = vadd.f32 %v11434_v63, %v16409_v18 }
0x41a0   : > { %v11440_v15 = vsel %vm6902_vm0, %v11436_v32, -inf  ;;  %v11437_v52 = vsel %vm1970_vm7, %v11435_v27, -inf }
0x41a1   : > { %11441 = vmax.xlane.f32.xlu1 %v11440_v15  ;;  %11438 = vmax.xlane.f32.xlu0 %v11437_v52 }
0x422e   : > { %v11442_v33 = vpop.xlane.xlu1 %11441  ;;  %v11439_v9 = vpop.xlane.xlu0 %11438 }
0x422f   : > { %v11444_v1 = vsub.f32 %v11436_v32, %v11442_v33  ;;  %v11443_v28 = vsub.f32 %v11435_v27, %v11439_v9 }
0x4231   : > { %v11447_v40 = vmul.f32 1.442695, %v11444_v1  ;;  %v11445_v36 = vmul.f32 1.442695, %v11443_v28 }
0x4233   : > { %14030 = vpow2.f32 %v11447_v40 }
0x4234   : > { %14032 = vpow2.f32 %v11445_v36 }
0x423d   : > { %v14031_v34 = vpop.eup %14030 }
0x423e   : > { %v14033_v62 = vpop.eup %14032  ;;  %v11452_v44 = vsel %vm6902_vm0, %v14031_v34, 0.0 }
0x423f   : > { %11453 = vadd.xlane.f32.xlu1 %v11452_v44  ;;  %v11449_v56 = vsel %vm1970_vm7, %v14033_v62, 0.0 }
0x4240   : > { %11450 = vadd.xlane.f32.xlu0 %v11449_v56 }
0x42cc   : > { %v11454_v12 = vpop.xlane.xlu1 %11453 }
0x42cd   : > { %14034 = vlog2.f32 %v11454_v12  ;;  %v11451_v26 = vpop.xlane.xlu0 %11450 }
0x42ce   : > { %14036 = vlog2.f32 %v11451_v26 }
0x42d7   : > { %v14035_v31 = vpop.eup %14034 }
0x42d8   : > { %v14037_v48 = vpop.eup %14036  ;;  %v11458_v29 = vmul.f32 0.6931472, %v14035_v31 }
0x42d9   : > { %v11456_v20 = vmul.f32 0.6931472, %v14037_v48 }
0x42da   : > { %v11460_v55 = vadd.f32 %v11458_v29, %v11442_v33 }
0x42db   : > { %v11459_v43 = vadd.f32 %v11456_v20, %v11439_v9 }
0x42dc   : > { %v11462_v46 = vsub.f32 -0.5877867, %v11460_v55 }
0x42dd   : > { %v11461_v30 = vsub.f32 -2.8903718, %v11459_v43 }
0x42de   : > { %v11464_v49 = vadd.f32 %v11462_v46, %v16412_v10 }
0x42df   : > { %v11463_v6 = vadd.f32 %v11461_v30, %v16409_v18 }
0x42e0   : > { %v11466_v16 = vsel %vm6902_vm0, %v11464_v49, -inf }
0x42e1   : > { %v11465_v54 = vsel %vm1970_vm7, %v11463_v6, -inf }
0x42e2   : > { %v11467_v53 = vmax.f32 %v11465_v54, %v11466_v16 }
0x42e4   : > { %v11468_v38 = vrot.slane %v11467_v53, 4 }
0x42e6   : > { %v11469_v8 = vmax.f32 %v11467_v53, %v11468_v38 }
0x42e8   : > { %v11470_v42 = vrot.slane %v11469_v8, 2 }
0x42ea   : > { %v11471_v41 = vmax.f32 %v11469_v8, %v11470_v42 }
0x42ec   : > { %v11472_v2 = vrot.slane %v11471_v41, 1 }
0x42ee   : > { %v11473_v47 = vmax.f32 %v11471_v41, %v11472_v2 }
0x42f0   : > { %v11474_v58 = vsub.f32 %v11463_v6, %v11473_v47  ;;  %v11475_v23 = vsub.f32 %v11464_v49, %v11473_v47 }
0x42f2   : > { %v11476_v45 = vmul.f32 1.442695, %v11474_v58  ;;  %v11478_v57 = vmul.f32 1.442695, %v11475_v23 }
0x42f4   : > { %14038 = vpow2.f32 %v11476_v45 }
0x42f5   : > { %14040 = vpow2.f32 %v11478_v57 }
0x42fe   : > { %v14039_v10 = vpop.eup %14038 }
0x42ff   : > { %v14041_v35 = vpop.eup %14040  ;;  %v11480_v21 = vsel %vm1970_vm7, %v14039_v10, 0.0 }
0x4300   : > { %v11481_v13 = vsel %vm6902_vm0, %v14041_v35, 0.0 }
0x4301   : > { %v11482_v59 = vadd.f32 %v11481_v13, %v11480_v21 }
0x4303   : > { %v11483_v5 = vrot.slane %v11482_v59, 4 }
0x4305   : > { %v11484_v37 = vadd.f32 %v11483_v5, %v11482_v59 }
0x4307   : > { %v11485_v17 = vrot.slane %v11484_v37, 2 }
0x4309   : > { %v11486_v24 = vadd.f32 %v11485_v17, %v11484_v37 }
0x430b   : > { %v11487_v61 = vrot.slane %v11486_v24, 1 }
0x430d   : > { %v11488_v4 = vadd.f32 %v11487_v61, %v11486_v24 }
0x430f   : > { %14042 = vlog2.f32 %v11488_v4 }
0x4319   : > { %v14043_v22 = vpop.eup %14042 }
0x431a   : > { %v11490_v19 = vmul.f32 0.6931472, %v14043_v22 }
0x431c   : > { %v11491_v11 = vadd.f32 %v11490_v19, %v11473_v47 }
0x431e   : > { %v11492_v39 = vsub.f32 %v16430_v7, %v11491_v11 }
0x4320   : > { %v11494_v14 = vadd.f32 %v16525_v60, %v11492_v39  ;;  %v11493_v25 = vadd.f32 %v11492_v39, %v16409_v18 }
0x4322   : > { %v11498_v0 = vsel %vm6902_vm0, %v11494_v14, -inf  ;;  %v11495_v50 = vsel %vm1970_vm7, %v11493_v25, -inf }
0x4323   : > { %11499 = vmax.xlane.f32.xlu1 %v11498_v0  ;;  %11496 = vmax.xlane.f32.xlu0 %v11495_v50 }
0x43b0   : > { %v11500_v3 = vpop.xlane.xlu1 %11499  ;;  %v11497_v51 = vpop.xlane.xlu0 %11496 }
0x43b1   : > { %v11502_v63 = vsub.f32 %v11494_v14, %v11500_v3  ;;  %v11501_v32 = vsub.f32 %v11493_v25, %v11497_v51 }
0x43b3   : > { %v11505_v27 = vmul.f32 1.442695, %v11502_v63  ;;  %v11503_v15 = vmul.f32 1.442695, %v11501_v32 }
0x43b5   : > { %14044 = vpow2.f32 %v11505_v27 }
0x43b6   : > { %14046 = vpow2.f32 %v11503_v15 }
0x43bf   : > { %v14045_v52 = vpop.eup %14044 }
0x43c0   : > { %v14047_v33 = vpop.eup %14046  ;;  %v11510_v9 = vsel %vm6902_vm0, %v14045_v52, 0.0 }
0x43c1   : > { %11511 = vadd.xlane.f32.xlu1 %v11510_v9  ;;  %v11507_v1 = vsel %vm1970_vm7, %v14047_v33, 0.0 }
0x43c2   : > { %11508 = vadd.xlane.f32.xlu0 %v11507_v1 }
0x444e   : > { %v11512_v28 = vpop.xlane.xlu1 %11511 }
0x444f   : > { %14048 = vlog2.f32 %v11512_v28  ;;  %v11509_v40 = vpop.xlane.xlu0 %11508 }
0x4450   : > { %14050 = vlog2.f32 %v11509_v40 }
0x4459   : > { %v14049_v36 = vpop.eup %14048 }
0x445a   : > { %v14051_v34 = vpop.eup %14050  ;;  %v11516_v62 = vmul.f32 0.6931472, %v14049_v36 }
0x445b   : > { %v11514_v44 = vmul.f32 0.6931472, %v14051_v34 }
0x445c   : > { %v11518_v56 = vadd.f32 %v11516_v62, %v11500_v3 }
0x445d   : > { %v11517_v12 = vadd.f32 %v11514_v44, %v11497_v51 }
0x445e   : > { %v11520_v26 = vsub.f32 -0.5877867, %v11518_v56 }
0x445f   : > { %v11519_v31 = vsub.f32 -2.8903718, %v11517_v12 }
0x4460   : > { %v11522_v48 = vadd.f32 %v16525_v60, %v11520_v26 }
0x4461   : > { %v11521_v29 = vadd.f32 %v11519_v31, %v16409_v18 }
0x4462   : > { %v11524_v20 = vsel %vm6902_vm0, %v11522_v48, -inf }
0x4463   : > { %v11523_v55 = vsel %vm1970_vm7, %v11521_v29, -inf }
0x4464   : > { %v11525_v43 = vmax.f32 %v11523_v55, %v11524_v20 }
0x4466   : > { %v11526_v46 = vrot.slane %v11525_v43, 4 }
0x4468   : > { %v11527_v30 = vmax.f32 %v11525_v43, %v11526_v46 }
0x446a   : > { %v11528_v49 = vrot.slane %v11527_v30, 2 }
0x446c   : > { %v11529_v6 = vmax.f32 %v11527_v30, %v11528_v49 }
0x446e   : > { %v11530_v16 = vrot.slane %v11529_v6, 1 }
0x4470   : > { %v11531_v54 = vmax.f32 %v11529_v6, %v11530_v16 }
0x4472   : > { %v11532_v53 = vsub.f32 %v11521_v29, %v11531_v54  ;;  %v11533_v38 = vsub.f32 %v11522_v48, %v11531_v54 }
0x4474   : > { %v11534_v8 = vmul.f32 1.442695, %v11532_v53  ;;  %v11536_v42 = vmul.f32 1.442695, %v11533_v38 }
0x4476   : > { %14052 = vpow2.f32 %v11534_v8 }
0x4477   : > { %14054 = vpow2.f32 %v11536_v42 }
0x4480   : > { %v14053_v41 = vpop.eup %14052 }
0x4481   : > { %v14055_v2 = vpop.eup %14054  ;;  %v11538_v47 = vsel %vm1970_vm7, %v14053_v41, 0.0 }
0x4482   : > { %v11539_v58 = vsel %vm6902_vm0, %v14055_v2, 0.0 }
0x4483   : > { %v11540_v23 = vadd.f32 %v11539_v58, %v11538_v47 }
0x4485   : > { %v11541_v45 = vrot.slane %v11540_v23, 4 }
0x4487   : > { %v11542_v57 = vadd.f32 %v11541_v45, %v11540_v23 }
0x4489   : > { %v11543_v10 = vrot.slane %v11542_v57, 2 }
0x448b   : > { %v11544_v35 = vadd.f32 %v11543_v10, %v11542_v57 }
0x448d   : > { %v11545_v21 = vrot.slane %v11544_v35, 1 }
0x448f   : > { %v11546_v13 = vadd.f32 %v11545_v21, %v11544_v35 }
0x4491   : > { %14056 = vlog2.f32 %v11546_v13 }
0x449b   : > { %v14057_v59 = vpop.eup %14056 }
0x449c   : > { %v11548_v5 = vmul.f32 0.6931472, %v14057_v59 }
0x449e   : > { %v11549_v37 = vadd.f32 %v11548_v5, %v11531_v54 }
0x44a0   : > { %v11550_v17 = vsub.f32 %v16430_v7, %v11549_v37 }
0x44a2   : > { %v11552_v24 = vadd.f32 %v16525_v60, %v11550_v17  ;;  %v11551_v61 = vadd.f32 %v11550_v17, %v16409_v18 }
0x44a4   : > { %v11556_v4 = vsel %vm6902_vm0, %v11552_v24, -inf  ;;  %v11553_v22 = vsel %vm1970_vm7, %v11551_v61, -inf }
0x44a5   : > { %11557 = vmax.xlane.f32.xlu1 %v11556_v4  ;;  %11554 = vmax.xlane.f32.xlu0 %v11553_v22 }
0x4532   : > { %v11558_v19 = vpop.xlane.xlu1 %11557  ;;  %v11555_v11 = vpop.xlane.xlu0 %11554 }
0x4533   : > { %v11560_v39 = vsub.f32 %v11552_v24, %v11558_v19  ;;  %v11559_v14 = vsub.f32 %v11551_v61, %v11555_v11 }
0x4535   : > { %v11563_v25 = vmul.f32 1.442695, %v11560_v39  ;;  %v11561_v0 = vmul.f32 1.442695, %v11559_v14 }
0x4537   : > { %14058 = vpow2.f32 %v11563_v25 }
0x4538   : > { %14060 = vpow2.f32 %v11561_v0 }
0x4541   : > { %v14059_v50 = vpop.eup %14058 }
0x4542   : > { %v14061_v3 = vpop.eup %14060  ;;  %v11568_v51 = vsel %vm6902_vm0, %v14059_v50, 0.0 }
0x4543   : > { %11569 = vadd.xlane.f32.xlu1 %v11568_v51  ;;  %v11565_v63 = vsel %vm1970_vm7, %v14061_v3, 0.0 }
0x4544   : > { %11566 = vadd.xlane.f32.xlu0 %v11565_v63 }
0x45d0   : > { %v11570_v32 = vpop.xlane.xlu1 %11569 }
0x45d1   : > { %14062 = vlog2.f32 %v11570_v32  ;;  %v11567_v27 = vpop.xlane.xlu0 %11566 }
0x45d2   : > { %14064 = vlog2.f32 %v11567_v27 }
0x45db   : > { %v14063_v15 = vpop.eup %14062 }
0x45dc   : > { %v14065_v52 = vpop.eup %14064  ;;  %v11574_v33 = vmul.f32 0.6931472, %v14063_v15 }
0x45dd   : > { %v11572_v9 = vmul.f32 0.6931472, %v14065_v52 }
0x45de   : > { %v11576_v1 = vadd.f32 %v11574_v33, %v11558_v19 }
0x45df   : > { %v11575_v28 = vadd.f32 %v11572_v9, %v11555_v11 }
0x45e0   : > { %v11578_v40 = vsub.f32 -0.5877867, %v11576_v1 }
0x45e1   : > { %v11577_v36 = vsub.f32 -2.8903718, %v11575_v28 }
0x45e2   : > { %v11580_v34 = vadd.f32 %v16525_v60, %v11578_v40 }
0x45e3   : > { %v11579_v62 = vadd.f32 %v11577_v36, %v16409_v18 }
0x45e4   : > { %v11582_v44 = vsel %vm6902_vm0, %v11580_v34, -inf }
0x45e5   : > { %v11581_v56 = vsel %vm1970_vm7, %v11579_v62, -inf }
0x45e6   : > { %v11583_v12 = vmax.f32 %v11581_v56, %v11582_v44 }
0x45e8   : > { %v11584_v26 = vrot.slane %v11583_v12, 4 }
0x45ea   : > { %v11585_v31 = vmax.f32 %v11583_v12, %v11584_v26 }
0x45ec   : > { %v11586_v48 = vrot.slane %v11585_v31, 2 }
0x45ee   : > { %v11587_v29 = vmax.f32 %v11585_v31, %v11586_v48 }
0x45f0   : > { %v11588_v20 = vrot.slane %v11587_v29, 1 }
0x45f2   : > { %v11589_v55 = vmax.f32 %v11587_v29, %v11588_v20 }
0x45f4   : > { %v11590_v43 = vsub.f32 %v11579_v62, %v11589_v55  ;;  %v11591_v46 = vsub.f32 %v11580_v34, %v11589_v55 }
0x45f6   : > { %v11592_v30 = vmul.f32 1.442695, %v11590_v43  ;;  %v11594_v49 = vmul.f32 1.442695, %v11591_v46 }
0x45f8   : > { %14066 = vpow2.f32 %v11592_v30 }
0x45f9   : > { %14068 = vpow2.f32 %v11594_v49 }
0x4602   : > { %v14067_v60 = vpop.eup %14066 }
0x4603   : > { %v14069_v18 = vpop.eup %14068  ;;  %v11596_v6 = vsel %vm1970_vm7, %v14067_v60, 0.0 }
0x4604   : > { %v11597_v16 = vsel %vm6902_vm0, %v14069_v18, 0.0 }
0x4605   : > { %v11598_v54 = vadd.f32 %v11597_v16, %v11596_v6 }
0x4607   : > { %v11599_v53 = vrot.slane %v11598_v54, 4 }
0x4609   : > { %v11600_v38 = vadd.f32 %v11599_v53, %v11598_v54 }
0x460b   : > { %v11601_v8 = vrot.slane %v11600_v38, 2 }
0x460d   : > { %v11602_v42 = vadd.f32 %v11601_v8, %v11600_v38 }
0x460f   : > { %v11603_v41 = vrot.slane %v11602_v42, 1 }
0x4611   : > { %v11604_v2 = vadd.f32 %v11603_v41, %v11602_v42 }
0x4613   : > { %14070 = vlog2.f32 %v11604_v2 }
0x461d   : > { %v14071_v47 = vpop.eup %14070 }
0x461e   : > { %v11606_v58 = vmul.f32 0.6931472, %v14071_v47 }
0x4620   : > { %v11607_v23 = vadd.f32 %v11606_v58, %v11589_v55 }
0x4622   : > { %v11608_v45 = vsub.f32 %v16430_v7, %v11607_v23 }
0x4624   : > { %v11609_v57 = vadd.f32 %v11608_v45, %v11579_v62  ;;  %v11610_v10 = vadd.f32 %v11608_v45, %v11580_v34 }
0x4626   : > { %v12066_v35 = vadd.f32 2.8903718, %v11609_v57  ;;  %v12067_v21 = vadd.f32 2.8903718, %v11610_v10 }
0x4628   : > { %11613 = vst.msk [vmem:[%s1348_s1] sm:$0xff] %vm1970_vm7, %v12066_v35 }
0x4629   : > { %11614 = vst.msk [vmem:[%s1348_s1 + $0x8] sm:$0x1] %vm6902_vm0, %v12067_v21 }
0x462a PF: > { %s97_s22 = sadd.s32 1, %s14087_s22  }
0x462b   : > { %p94_p4 = scmp.ge.s32.totalorder %s97_s22, 4  }
0x462d   :  { %96 = sbr.rel (!%p94_p4) target bundleno = 77 (0x4d), region = 274 }

</bundles_post_ra>
